<compile_context>
chip_gen: v6e
topology: v6e:2x2x1
jax: 0.10.0
libtpu: 0.0.40
codegen_flags: <defaults>
</compile_context>

<pallas_src>
import math
import jax
import jax.numpy as jnp
from jax import lax
from jax.experimental import pallas as pl
from jax.experimental.pallas import tpu as pltpu

NUM_BLOCKS = (2, 2, 2, 2)   # ResNet-18; only conv2_x ([0]) feeds the output
_EPS = 1e-5


# --------------------------- fused Pallas kernels ----------------------------

def _stem_kernel(p_ref, w_ref, g_ref, b_ref, opad_ref, ypad_ref, rmax_ref):
    """conv1 (im2col matmul) + BN + ReLU + MaxPool2d(3, s2, p1), fused.

    p_ref:    (M1, Kp)  im2col patches of the 7x7/s2 conv (K zero-padded)
    w_ref:    (Kp, C)   conv1 weight, rows = (kh, kw, cin), K zero-padded
    g_ref/b_ref: (1, C) BN gamma / beta
    opad_ref: (N, H2+2, W2+2, C) output; zero border = next conv's padding
    ypad_ref: (N, H1+2, W1+2, C) scratch: -inf-padded conv output for the pool
    rmax_ref: (N, H2, W1+2, C)   scratch: H-direction 3-window max
    """
    N, Hp1, Wp1, C = ypad_ref.shape
    H1, W1 = Hp1 - 2, Wp1 - 2
    H2, W2 = opad_ref.shape[1] - 2, opad_ref.shape[2] - 2
    M1 = N * H1 * W1

    # conv1 matmul (MXU) + single-pass batch statistics + affine + ReLU.
    acc = jnp.dot(p_ref[...], w_ref[...], preferred_element_type=jnp.float32)
    s = jnp.sum(acc, axis=0, keepdims=True)
    sq = jnp.sum(acc * acc, axis=0, keepdims=True)
    mean = s * (1.0 / M1)
    var = sq * (1.0 / M1) - mean * mean              # biased variance
    scale = g_ref[...] * lax.rsqrt(var + _EPS)
    shift = b_ref[...] - mean * scale
    y = jnp.maximum(acc * scale + shift, 0.0)

    # MaxPool2d(3, stride=2, padding=1), VMEM-resident, two separable stages
    # built from static shifted-window reads + elementwise maxima only.
    ypad_ref[...] = jnp.full(ypad_ref.shape, -jnp.inf, jnp.float32)
    ypad_ref[:, 1:1 + H1, 1:1 + W1, :] = y.reshape(N, H1, W1, C)
    for i in range(H2):                              # H-direction 3-window max
        a = ypad_ref[:, 2 * i:2 * i + 1, :, :]
        b = ypad_ref[:, 2 * i + 1:2 * i + 2, :, :]
        c = ypad_ref[:, 2 * i + 2:2 * i + 3, :, :]
        rmax_ref[:, i:i + 1, :, :] = jnp.maximum(jnp.maximum(a, b), c)
    opad_ref[...] = jnp.zeros(opad_ref.shape, jnp.float32)
    for j in range(W2):                              # W-direction 3-window max
        a = rmax_ref[:, :, 2 * j:2 * j + 1, :]
        b = rmax_ref[:, :, 2 * j + 1:2 * j + 2, :]
        c = rmax_ref[:, :, 2 * j + 2:2 * j + 3, :]
        opad_ref[:, 1:1 + H2, 1 + j:2 + j, :] = jnp.maximum(jnp.maximum(a, b), c)


def _block_kernel(xpad_ref, wa_ref, ga_ref, ba_ref, wb_ref, gb_ref, bb_ref,
                  opad_ref, ypad_ref):
    """Fused BasicBlock: conv3x3-BN-ReLU-conv3x3-BN (+identity) -> ReLU.

    xpad_ref: (N, H+2, W+2, C) zero-padded input activation
    wa_ref/wb_ref: (9, C, C)   3x3 weights per tap, index = kh*3 + kw
    g*/b*_ref: (1, C)          BN gamma / beta
    opad_ref: (N, H+2, W+2, C) zero-padded output (border = next conv padding)
    ypad_ref: (N, H+2, W+2, C) scratch for the padded intermediate activation
    """
    N, Hp, Wp, C = xpad_ref.shape
    H, W = Hp - 2, Wp - 2
    M = N * H * W
    inv_m = 1.0 / M

    def conv3x3(src_ref, w_ref):
        # In-kernel im2col: 9 shifted-window taps accumulated on the MXU.
        acc = None
        for kh in range(3):
            for kw in range(3):
                patch = src_ref[:, kh:kh + H, kw:kw + W, :].reshape(M, C)
                d = jnp.dot(patch, w_ref[kh * 3 + kw],
                            preferred_element_type=jnp.float32)
                acc = d if acc is None else acc + d
        return acc

    def bn(acc, g_ref, b_ref):
        # Training-mode BN, single-pass sums, scale/shift computed in-kernel.
        s = jnp.sum(acc, axis=0, keepdims=True)
        sq = jnp.sum(acc * acc, axis=0, keepdims=True)
        mean = s * inv_m
        var = sq * inv_m - mean * mean               # biased variance
        scale = g_ref[...] * lax.rsqrt(var + _EPS)
        shift = b_ref[...] - mean * scale
        return acc * scale + shift

    # conv_a -> BN -> ReLU, staged into a zero-padded VMEM scratch for conv_b.
    y = jnp.maximum(bn(conv3x3(xpad_ref, wa_ref), ga_ref, ba_ref), 0.0)
    ypad_ref[...] = jnp.zeros(ypad_ref.shape, jnp.float32)
    ypad_ref[:, 1:1 + H, 1:1 + W, :] = y.reshape(N, H, W, C)

    # conv_b -> BN -> + identity shortcut -> ReLU.
    res = xpad_ref[:, 1:1 + H, 1:1 + W, :].reshape(M, C)
    z = jnp.maximum(bn(conv3x3(ypad_ref, wb_ref), gb_ref, bb_ref) + res, 0.0)
    opad_ref[...] = jnp.zeros(opad_ref.shape, jnp.float32)
    opad_ref[:, 1:1 + H, 1:1 + W, :] = z.reshape(N, H, W, C)


# --------------------------- Pallas wrappers ----------------------------------

def pallas_stem(patches, w, gamma, beta, N, H1, W1):
    C = w.shape[1]
    H2 = (H1 + 2 - 3) // 2 + 1
    W2 = (W1 + 2 - 3) // 2 + 1
    return pl.pallas_call(
        _stem_kernel,
        out_shape=jax.ShapeDtypeStruct((N, H2 + 2, W2 + 2, C), jnp.float32),
        scratch_shapes=[pltpu.VMEM((N, H1 + 2, W1 + 2, C), jnp.float32),
                        pltpu.VMEM((N, H2, W1 + 2, C), jnp.float32)],
    )(patches, w, gamma, beta)


def pallas_basic_block(xpad, wa, ga, ba, wb, gb, bb):
    N, Hp, Wp, C = xpad.shape
    return pl.pallas_call(
        _block_kernel,
        out_shape=jax.ShapeDtypeStruct((N, Hp, Wp, C), jnp.float32),
        scratch_shapes=[pltpu.VMEM((N, Hp, Wp, C), jnp.float32)],
    )(xpad, wa, ga, ba, wb, gb, bb)


# --------------------------- host-side glue -----------------------------------

def _im2col(x, ksize, stride, pad):
    # Only used for the one-shot 7x7/s2 stem conv (stride-2 taps do not map to
    # cheap in-kernel shifted reads); the hot-path 3x3 convs im2col in-kernel.
    N, H, W, C = x.shape
    xp = jnp.pad(x, ((0, 0), (pad, pad), (pad, pad), (0, 0)))
    Ho = (H + 2 * pad - ksize) // stride + 1
    Wo = (W + 2 * pad - ksize) // stride + 1
    cols = []
    for kh in range(ksize):
        for kw in range(ksize):
            cols.append(xp[:, kh:kh + stride * Ho:stride,
                           kw:kw + stride * Wo:stride, :])
    patches = jnp.concatenate(cols, axis=-1)          # (kh, kw, cin) ordering
    return patches.reshape(N * Ho * Wo, ksize * ksize * C), Ho, Wo


def _pad_dim(a, axis, mult):
    size = a.shape[axis]
    target = pl.cdiv(size, mult) * mult
    if target == size:
        return a
    pad = [(0, 0)] * a.ndim
    pad[axis] = (0, target - size)
    return jnp.pad(a, pad)


def _tap_weights(w):
    # (Cout, Cin, 3, 3) PyTorch layout -> (9, Cin, Cout), tap index = kh*3+kw.
    cout, cin = w.shape[0], w.shape[1]
    return jnp.transpose(w, (2, 3, 1, 0)).reshape(9, cin, cout)


# --------------------------- model --------------------------------------------

def init_params(key):
    def conv_w(k, cout, cin, ksz):
        fan_out = cout * ksz * ksz                    # kaiming_normal_, fan_out, relu
        std = math.sqrt(2.0 / fan_out)
        return std * jax.random.normal(k, (cout, cin, ksz, ksz), jnp.float32)

    keys = jax.random.split(key, 1 + 2 * NUM_BLOCKS[0])
    params = {
        'conv1_w': conv_w(keys[0], 64, 3, 7),
        'bn1_g': jnp.ones((64,), jnp.float32),
        'bn1_b': jnp.zeros((64,), jnp.float32),
        'conv2_x': [],
    }
    ki = 1
    for _ in range(NUM_BLOCKS[0]):
        params['conv2_x'].append({
            'conv_a_w': conv_w(keys[ki], 64, 64, 3),
            'bn_a_g': jnp.ones((64,), jnp.float32),
            'bn_a_b': jnp.zeros((64,), jnp.float32),
            'conv_b_w': conv_w(keys[ki + 1], 64, 64, 3),
            'bn_b_g': jnp.ones((64,), jnp.float32),
            'bn_b_b': jnp.zeros((64,), jnp.float32),
        })
        ki += 2
    return params


def resnet_forward(params, x_nchw):
    # The PyTorch forward returns `output` == conv2_x(conv1(x)).
    # TODO(synk): conv3_x..conv5_x / avg_pool / fc are dead code in the
    # reference forward (their results are discarded), so they are skipped.
    x = jnp.transpose(x_nchw, (0, 2, 3, 1)).astype(jnp.float32)   # NCHW -> NHWC
    N = x.shape[0]

    # Stem: one fused pallas_call (conv1 + BN + ReLU + maxpool).  K of the
    # im2col matmul is zero-padded to a multiple of 128 for lane alignment.
    patches, H1, W1 = _im2col(x, 7, 2, 3)
    w1 = jnp.transpose(params['conv1_w'], (2, 3, 1, 0)).reshape(7 * 7 * 3, 64)
    patches = _pad_dim(patches, 1, 128)
    w1 = _pad_dim(w1, 0, 128)
    act = pallas_stem(patches, w1,
                      params['bn1_g'].reshape(1, -1),
                      params['bn1_b'].reshape(1, -1), N, H1, W1)

    # conv2_x: fully fused BasicBlocks; activations stay in zero-padded NHWC
    # form so each block is exactly one HBM read + one HBM write.
    for blk in params['conv2_x']:
        act = pallas_basic_block(
            act,
            _tap_weights(blk['conv_a_w']),
            blk['bn_a_g'].reshape(1, -1), blk['bn_a_b'].reshape(1, -1),
            _tap_weights(blk['conv_b_w']),
            blk['bn_b_g'].reshape(1, -1), blk['bn_b_b'].reshape(1, -1))

    out = act[:, 1:act.shape[1] - 1, 1:act.shape[2] - 1, :]       # drop padding
    return jnp.transpose(out, (0, 3, 1, 2))                       # NHWC -> NCHW


# --------------------------- main ----------------------------------------------

if __name__ == "__main__":
    key = jax.random.PRNGKey(0)
    pkey, xkey = jax.random.split(key)
    params = init_params(pkey)
    x = jax.random.normal(xkey, (2, 3, 32, 32), jnp.float32)      # NCHW like PyTorch
    out = jax.jit(resnet_forward)(params, x)
    jax.block_until_ready(out)
    assert out.shape == (2, 64, 8, 8), out.shape
    assert out.dtype == jnp.float32
    print("KERNEL_OK")
</pallas_src>

<mosaic_0001>
module attributes {stable_mosaic.version = 11 : i64} {
  func.func @_stem_kernel(%arg0: memref<512x256xf32, #tpu.memory_space<vmem>>, %arg1: memref<256x64xf32, #tpu.memory_space<vmem>>, %arg2: memref<1x64xf32, #tpu.memory_space<vmem>>, %arg3: memref<1x64xf32, #tpu.memory_space<vmem>>, %arg4: memref<2x10x10x64xf32, #tpu.memory_space<vmem>>, %arg5: memref<2x18x18x64xf32, #tpu.memory_space<vmem>>, %arg6: memref<2x8x18x64xf32, #tpu.memory_space<vmem>>) attributes {dimension_semantics = [], scalar_prefetch = 0 : i64, scratch_operands = 2 : i64, tpu.core_type = #tpu.core_type<tc>} {
    %c0 = arith.constant 0 : index
    %c0_0 = arith.constant 0 : index
    %0 = vector.load %arg0[%c0, %c0_0] : memref<512x256xf32, #tpu.memory_space<vmem>>, vector<512x256xf32>
    %c0_1 = arith.constant 0 : index
    %c0_2 = arith.constant 0 : index
    %1 = vector.load %arg1[%c0_1, %c0_2] : memref<256x64xf32, #tpu.memory_space<vmem>>, vector<256x64xf32>
    %cst = arith.constant dense<0.000000e+00> : vector<512x64xf32>
    %2 = tpu.matmul %0, %1, %cst {dimension_numbers = #tpu.dot_dimension_numbers<[1], [0], [0], [1], [0, 0, 1, 1], [], []>} : vector<512x256xf32>, vector<256x64xf32>, vector<512x64xf32> -> vector<512x64xf32>
    %cst_3 = arith.constant dense<0.000000e+00> : vector<64xf32>
    %3 = vector.multi_reduction <add>, %2, %cst_3 [0] : vector<512x64xf32> to vector<64xf32>
    %4 = vector.shape_cast %3 : vector<64xf32> to vector<1x64xf32>
    %5 = arith.mulf %2, %2 : vector<512x64xf32>
    %cst_4 = arith.constant dense<0.000000e+00> : vector<64xf32>
    %6 = vector.multi_reduction <add>, %5, %cst_4 [0] : vector<512x64xf32> to vector<64xf32>
    %7 = vector.shape_cast %6 : vector<64xf32> to vector<1x64xf32>
    %cst_5 = arith.constant 0.001953125 : f32
    %8 = vector.broadcast %cst_5 : f32 to vector<1x64xf32>
    %9 = arith.mulf %4, %8 : vector<1x64xf32>
    %cst_6 = arith.constant 0.001953125 : f32
    %10 = vector.broadcast %cst_6 : f32 to vector<1x64xf32>
    %11 = arith.mulf %7, %10 : vector<1x64xf32>
    %12 = arith.mulf %9, %9 : vector<1x64xf32>
    %13 = arith.subf %11, %12 : vector<1x64xf32>
    %c0_7 = arith.constant 0 : index
    %c0_8 = arith.constant 0 : index
    %14 = vector.load %arg2[%c0_7, %c0_8] : memref<1x64xf32, #tpu.memory_space<vmem>>, vector<1x64xf32>
    %cst_9 = arith.constant 9.99999974E-6 : f32
    %15 = vector.broadcast %cst_9 : f32 to vector<1x64xf32>
    %16 = arith.addf %13, %15 : vector<1x64xf32>
    %17 = math.rsqrt %16 : vector<1x64xf32>
    %18 = arith.mulf %14, %17 : vector<1x64xf32>
    %c0_10 = arith.constant 0 : index
    %c0_11 = arith.constant 0 : index
    %19 = vector.load %arg3[%c0_10, %c0_11] : memref<1x64xf32, #tpu.memory_space<vmem>>, vector<1x64xf32>
    %20 = arith.mulf %9, %18 : vector<1x64xf32>
    %21 = arith.subf %19, %20 : vector<1x64xf32>
    %22 = vector.broadcast %18 : vector<1x64xf32> to vector<512x64xf32>
    %23 = arith.mulf %2, %22 : vector<512x64xf32>
    %24 = vector.broadcast %21 : vector<1x64xf32> to vector<512x64xf32>
    %25 = arith.addf %23, %24 : vector<512x64xf32>
    %cst_12 = arith.constant 0.000000e+00 : f32
    %26 = vector.broadcast %cst_12 : f32 to vector<512x64xf32>
    %27 = arith.maximumf %25, %26 : vector<512x64xf32>
    %cst_13 = arith.constant 0xFF800000 : f32
    %28 = vector.broadcast %cst_13 : f32 to vector<2x18x18x64xf32>
    %c0_14 = arith.constant 0 : index
    %c0_15 = arith.constant 0 : index
    %c0_16 = arith.constant 0 : index
    %c0_17 = arith.constant 0 : index
    %29 = vector.load %arg5[%c0_14, %c0_15, %c0_16, %c0_17] : memref<2x18x18x64xf32, #tpu.memory_space<vmem>>, vector<2x18x18x64xf32>
    tpu.vector_store %arg5[%c0_14, %c0_15, %c0_16, %c0_17], %28 {strides = array<i32>} : memref<2x18x18x64xf32, #tpu.memory_space<vmem>>, vector<2x18x18x64xf32>,
    %30 = vector.shape_cast %27 : vector<512x64xf32> to vector<2x16x16x64xf32>
    %c0_18 = arith.constant 0 : index
    %c1 = arith.constant 1 : index
    %c1_19 = arith.constant 1 : index
    %c0_20 = arith.constant 0 : index
    %31 = vector.load %arg5[%c0_18, %c1, %c1_19, %c0_20] : memref<2x18x18x64xf32, #tpu.memory_space<vmem>>, vector<2x16x16x64xf32>
    tpu.vector_store %arg5[%c0_18, %c1, %c1_19, %c0_20], %30 {strides = array<i32>} : memref<2x18x18x64xf32, #tpu.memory_space<vmem>>, vector<2x16x16x64xf32>,
    %c0_21 = arith.constant 0 : index
    %c0_22 = arith.constant 0 : index
    %c0_23 = arith.constant 0 : index
    %c0_24 = arith.constant 0 : index
    %32 = vector.load %arg5[%c0_21, %c0_22, %c0_23, %c0_24] : memref<2x18x18x64xf32, #tpu.memory_space<vmem>>, vector<2x1x18x64xf32>
    %c0_25 = arith.constant 0 : index
    %c1_26 = arith.constant 1 : index
    %c0_27 = arith.constant 0 : index
    %c0_28 = arith.constant 0 : index
    %33 = vector.load %arg5[%c0_25, %c1_26, %c0_27, %c0_28] : memref<2x18x18x64xf32, #tpu.memory_space<vmem>>, vector<2x1x18x64xf32>
    %c0_29 = arith.constant 0 : index
    %c2 = arith.constant 2 : index
    %c0_30 = arith.constant 0 : index
    %c0_31 = arith.constant 0 : index
    %34 = vector.load %arg5[%c0_29, %c2, %c0_30, %c0_31] : memref<2x18x18x64xf32, #tpu.memory_space<vmem>>, vector<2x1x18x64xf32>
    %35 = arith.maximumf %32, %33 : vector<2x1x18x64xf32>
    %36 = arith.maximumf %35, %34 : vector<2x1x18x64xf32>
    %c0_32 = arith.constant 0 : index
    %c0_33 = arith.constant 0 : index
    %c0_34 = arith.constant 0 : index
    %c0_35 = arith.constant 0 : index
    %37 = vector.load %arg6[%c0_32, %c0_33, %c0_34, %c0_35] : memref<2x8x18x64xf32, #tpu.memory_space<vmem>>, vector<2x1x18x64xf32>
    tpu.vector_store %arg6[%c0_32, %c0_33, %c0_34, %c0_35], %36 {strides = array<i32>} : memref<2x8x18x64xf32, #tpu.memory_space<vmem>>, vector<2x1x18x64xf32>,
    %c0_36 = arith.constant 0 : index
    %c2_37 = arith.constant 2 : index
    %c0_38 = arith.constant 0 : index
    %c0_39 = arith.constant 0 : index
    %38 = vector.load %arg5[%c0_36, %c2_37, %c0_38, %c0_39] : memref<2x18x18x64xf32, #tpu.memory_space<vmem>>, vector<2x1x18x64xf32>
    %c0_40 = arith.constant 0 : index
    %c3 = arith.constant 3 : index
    %c0_41 = arith.constant 0 : index
    %c0_42 = arith.constant 0 : index
    %39 = vector.load %arg5[%c0_40, %c3, %c0_41, %c0_42] : memref<2x18x18x64xf32, #tpu.memory_space<vmem>>, vector<2x1x18x64xf32>
    %c0_43 = arith.constant 0 : index
    %c4 = arith.constant 4 : index
    %c0_44 = arith.constant 0 : index
    %c0_45 = arith.constant 0 : index
    %40 = vector.load %arg5[%c0_43, %c4, %c0_44, %c0_45] : memref<2x18x18x64xf32, #tpu.memory_space<vmem>>, vector<2x1x18x64xf32>
    %41 = arith.maximumf %38, %39 : vector<2x1x18x64xf32>
    %42 = arith.maximumf %41, %40 : vector<2x1x18x64xf32>
    %c0_46 = arith.constant 0 : index
    %c1_47 = arith.constant 1 : index
    %c0_48 = arith.constant 0 : index
    %c0_49 = arith.constant 0 : index
    %43 = vector.load %arg6[%c0_46, %c1_47, %c0_48, %c0_49] : memref<2x8x18x64xf32, #tpu.memory_space<vmem>>, vector<2x1x18x64xf32>
    tpu.vector_store %arg6[%c0_46, %c1_47, %c0_48, %c0_49], %42 {strides = array<i32>} : memref<2x8x18x64xf32, #tpu.memory_space<vmem>>, vector<2x1x18x64xf32>,
    %c0_50 = arith.constant 0 : index
    %c4_51 = arith.constant 4 : index
    %c0_52 = arith.constant 0 : index
    %c0_53 = arith.constant 0 : index
    %44 = vector.load %arg5[%c0_50, %c4_51, %c0_52, %c0_53] : memref<2x18x18x64xf32, #tpu.memory_space<vmem>>, vector<2x1x18x64xf32>
    %c0_54 = arith.constant 0 : index
    %c5 = arith.constant 5 : index
    %c0_55 = arith.constant 0 : index
    %c0_56 = arith.constant 0 : index
    %45 = vector.load %arg5[%c0_54, %c5, %c0_55, %c0_56] : memref<2x18x18x64xf32, #tpu.memory_space<vmem>>, vector<2x1x18x64xf32>
    %c0_57 = arith.constant 0 : index
    %c6 = arith.constant 6 : index
    %c0_58 = arith.constant 0 : index
    %c0_59 = arith.constant 0 : index
    %46 = vector.load %arg5[%c0_57, %c6, %c0_58, %c0_59] : memref<2x18x18x64xf32, #tpu.memory_space<vmem>>, vector<2x1x18x64xf32>
    %47 = arith.maximumf %44, %45 : vector<2x1x18x64xf32>
    %48 = arith.maximumf %47, %46 : vector<2x1x18x64xf32>
    %c0_60 = arith.constant 0 : index
    %c2_61 = arith.constant 2 : index
    %c0_62 = arith.constant 0 : index
    %c0_63 = arith.constant 0 : index
    %49 = vector.load %arg6[%c0_60, %c2_61, %c0_62, %c0_63] : memref<2x8x18x64xf32, #tpu.memory_space<vmem>>, vector<2x1x18x64xf32>
    tpu.vector_store %arg6[%c0_60, %c2_61, %c0_62, %c0_63], %48 {strides = array<i32>} : memref<2x8x18x64xf32, #tpu.memory_space<vmem>>, vector<2x1x18x64xf32>,
    %c0_64 = arith.constant 0 : index
    %c6_65 = arith.constant 6 : index
    %c0_66 = arith.constant 0 : index
    %c0_67 = arith.constant 0 : index
    %50 = vector.load %arg5[%c0_64, %c6_65, %c0_66, %c0_67] : memref<2x18x18x64xf32, #tpu.memory_space<vmem>>, vector<2x1x18x64xf32>
    %c0_68 = arith.constant 0 : index
    %c7 = arith.constant 7 : index
    %c0_69 = arith.constant 0 : index
    %c0_70 = arith.constant 0 : index
    %51 = vector.load %arg5[%c0_68, %c7, %c0_69, %c0_70] : memref<2x18x18x64xf32, #tpu.memory_space<vmem>>, vector<2x1x18x64xf32>
    %c0_71 = arith.constant 0 : index
    %c8 = arith.constant 8 : index
    %c0_72 = arith.constant 0 : index
    %c0_73 = arith.constant 0 : index
    %52 = vector.load %arg5[%c0_71, %c8, %c0_72, %c0_73] : memref<2x18x18x64xf32, #tpu.memory_space<vmem>>, vector<2x1x18x64xf32>
    %53 = arith.maximumf %50, %51 : vector<2x1x18x64xf32>
    %54 = arith.maximumf %53, %52 : vector<2x1x18x64xf32>
    %c0_74 = arith.constant 0 : index
    %c3_75 = arith.constant 3 : index
    %c0_76 = arith.constant 0 : index
    %c0_77 = arith.constant 0 : index
    %55 = vector.load %arg6[%c0_74, %c3_75, %c0_76, %c0_77] : memref<2x8x18x64xf32, #tpu.memory_space<vmem>>, vector<2x1x18x64xf32>
    tpu.vector_store %arg6[%c0_74, %c3_75, %c0_76, %c0_77], %54 {strides = array<i32>} : memref<2x8x18x64xf32, #tpu.memory_space<vmem>>, vector<2x1x18x64xf32>,
    %c0_78 = arith.constant 0 : index
    %c8_79 = arith.constant 8 : index
    %c0_80 = arith.constant 0 : index
    %c0_81 = arith.constant 0 : index
    %56 = vector.load %arg5[%c0_78, %c8_79, %c0_80, %c0_81] : memref<2x18x18x64xf32, #tpu.memory_space<vmem>>, vector<2x1x18x64xf32>
    %c0_82 = arith.constant 0 : index
    %c9 = arith.constant 9 : index
    %c0_83 = arith.constant 0 : index
    %c0_84 = arith.constant 0 : index
    %57 = vector.load %arg5[%c0_82, %c9, %c0_83, %c0_84] : memref<2x18x18x64xf32, #tpu.memory_space<vmem>>, vector<2x1x18x64xf32>
    %c0_85 = arith.constant 0 : index
    %c10 = arith.constant 10 : index
    %c0_86 = arith.constant 0 : index
    %c0_87 = arith.constant 0 : index
    %58 = vector.load %arg5[%c0_85, %c10, %c0_86, %c0_87] : memref<2x18x18x64xf32, #tpu.memory_space<vmem>>, vector<2x1x18x64xf32>
    %59 = arith.maximumf %56, %57 : vector<2x1x18x64xf32>
    %60 = arith.maximumf %59, %58 : vector<2x1x18x64xf32>
    %c0_88 = arith.constant 0 : index
    %c4_89 = arith.constant 4 : index
    %c0_90 = arith.constant 0 : index
    %c0_91 = arith.constant 0 : index
    %61 = vector.load %arg6[%c0_88, %c4_89, %c0_90, %c0_91] : memref<2x8x18x64xf32, #tpu.memory_space<vmem>>, vector<2x1x18x64xf32>
    tpu.vector_store %arg6[%c0_88, %c4_89, %c0_90, %c0_91], %60 {strides = array<i32>} : memref<2x8x18x64xf32, #tpu.memory_space<vmem>>, vector<2x1x18x64xf32>,
    %c0_92 = arith.constant 0 : index
    %c10_93 = arith.constant 10 : index
    %c0_94 = arith.constant 0 : index
    %c0_95 = arith.constant 0 : index
    %62 = vector.load %arg5[%c0_92, %c10_93, %c0_94, %c0_95] : memref<2x18x18x64xf32, #tpu.memory_space<vmem>>, vector<2x1x18x64xf32>
    %c0_96 = arith.constant 0 : index
    %c11 = arith.constant 11 : index
    %c0_97 = arith.constant 0 : index
    %c0_98 = arith.constant 0 : index
    %63 = vector.load %arg5[%c0_96, %c11, %c0_97, %c0_98] : memref<2x18x18x64xf32, #tpu.memory_space<vmem>>, vector<2x1x18x64xf32>
    %c0_99 = arith.constant 0 : index
    %c12 = arith.constant 12 : index
    %c0_100 = arith.constant 0 : index
    %c0_101 = arith.constant 0 : index
    %64 = vector.load %arg5[%c0_99, %c12, %c0_100, %c0_101] : memref<2x18x18x64xf32, #tpu.memory_space<vmem>>, vector<2x1x18x64xf32>
    %65 = arith.maximumf %62, %63 : vector<2x1x18x64xf32>
    %66 = arith.maximumf %65, %64 : vector<2x1x18x64xf32>
    %c0_102 = arith.constant 0 : index
    %c5_103 = arith.constant 5 : index
    %c0_104 = arith.constant 0 : index
    %c0_105 = arith.constant 0 : index
    %67 = vector.load %arg6[%c0_102, %c5_103, %c0_104, %c0_105] : memref<2x8x18x64xf32, #tpu.memory_space<vmem>>, vector<2x1x18x64xf32>
    tpu.vector_store %arg6[%c0_102, %c5_103, %c0_104, %c0_105], %66 {strides = array<i32>} : memref<2x8x18x64xf32, #tpu.memory_space<vmem>>, vector<2x1x18x64xf32>,
    %c0_106 = arith.constant 0 : index
    %c12_107 = arith.constant 12 : index
    %c0_108 = arith.constant 0 : index
    %c0_109 = arith.constant 0 : index
    %68 = vector.load %arg5[%c0_106, %c12_107, %c0_108, %c0_109] : memref<2x18x18x64xf32, #tpu.memory_space<vmem>>, vector<2x1x18x64xf32>
    %c0_110 = arith.constant 0 : index
    %c13 = arith.constant 13 : index
    %c0_111 = arith.constant 0 : index
    %c0_112 = arith.constant 0 : index
    %69 = vector.load %arg5[%c0_110, %c13, %c0_111, %c0_112] : memref<2x18x18x64xf32, #tpu.memory_space<vmem>>, vector<2x1x18x64xf32>
    %c0_113 = arith.constant 0 : index
    %c14 = arith.constant 14 : index
    %c0_114 = arith.constant 0 : index
    %c0_115 = arith.constant 0 : index
    %70 = vector.load %arg5[%c0_113, %c14, %c0_114, %c0_115] : memref<2x18x18x64xf32, #tpu.memory_space<vmem>>, vector<2x1x18x64xf32>
    %71 = arith.maximumf %68, %69 : vector<2x1x18x64xf32>
    %72 = arith.maximumf %71, %70 : vector<2x1x18x64xf32>
    %c0_116 = arith.constant 0 : index
    %c6_117 = arith.constant 6 : index
    %c0_118 = arith.constant 0 : index
    %c0_119 = arith.constant 0 : index
    %73 = vector.load %arg6[%c0_116, %c6_117, %c0_118, %c0_119] : memref<2x8x18x64xf32, #tpu.memory_space<vmem>>, vector<2x1x18x64xf32>
    tpu.vector_store %arg6[%c0_116, %c6_117, %c0_118, %c0_119], %72 {strides = array<i32>} : memref<2x8x18x64xf32, #tpu.memory_space<vmem>>, vector<2x1x18x64xf32>,
    %c0_120 = arith.constant 0 : index
    %c14_121 = arith.constant 14 : index
    %c0_122 = arith.constant 0 : index
    %c0_123 = arith.constant 0 : index
    %74 = vector.load %arg5[%c0_120, %c14_121, %c0_122, %c0_123] : memref<2x18x18x64xf32, #tpu.memory_space<vmem>>, vector<2x1x18x64xf32>
    %c0_124 = arith.constant 0 : index
    %c15 = arith.constant 15 : index
    %c0_125 = arith.constant 0 : index
    %c0_126 = arith.constant 0 : index
    %75 = vector.load %arg5[%c0_124, %c15, %c0_125, %c0_126] : memref<2x18x18x64xf32, #tpu.memory_space<vmem>>, vector<2x1x18x64xf32>
    %c0_127 = arith.constant 0 : index
    %c16 = arith.constant 16 : index
    %c0_128 = arith.constant 0 : index
    %c0_129 = arith.constant 0 : index
    %76 = vector.load %arg5[%c0_127, %c16, %c0_128, %c0_129] : memref<2x18x18x64xf32, #tpu.memory_space<vmem>>, vector<2x1x18x64xf32>
    %77 = arith.maximumf %74, %75 : vector<2x1x18x64xf32>
    %78 = arith.maximumf %77, %76 : vector<2x1x18x64xf32>
    %c0_130 = arith.constant 0 : index
    %c7_131 = arith.constant 7 : index
    %c0_132 = arith.constant 0 : index
    %c0_133 = arith.constant 0 : index
    %79 = vector.load %arg6[%c0_130, %c7_131, %c0_132, %c0_133] : memref<2x8x18x64xf32, #tpu.memory_space<vmem>>, vector<2x1x18x64xf32>
    tpu.vector_store %arg6[%c0_130, %c7_131, %c0_132, %c0_133], %78 {strides = array<i32>} : memref<2x8x18x64xf32, #tpu.memory_space<vmem>>, vector<2x1x18x64xf32>,
    %cst_134 = arith.constant 0.000000e+00 : f32
    %80 = vector.broadcast %cst_134 : f32 to vector<2x10x10x64xf32>
    %c0_135 = arith.constant 0 : index
    %c0_136 = arith.constant 0 : index
    %c0_137 = arith.constant 0 : index
    %c0_138 = arith.constant 0 : index
    %81 = vector.load %arg4[%c0_135, %c0_136, %c0_137, %c0_138] : memref<2x10x10x64xf32, #tpu.memory_space<vmem>>, vector<2x10x10x64xf32>
    tpu.vector_store %arg4[%c0_135, %c0_136, %c0_137, %c0_138], %80 {strides = array<i32>} : memref<2x10x10x64xf32, #tpu.memory_space<vmem>>, vector<2x10x10x64xf32>,
    %c0_139 = arith.constant 0 : index
    %c0_140 = arith.constant 0 : index
    %c0_141 = arith.constant 0 : index
    %c0_142 = arith.constant 0 : index
    %82 = vector.load %arg6[%c0_139, %c0_140, %c0_141, %c0_142] : memref<2x8x18x64xf32, #tpu.memory_space<vmem>>, vector<2x8x1x64xf32>
    %c0_143 = arith.constant 0 : index
    %c0_144 = arith.constant 0 : index
    %c1_145 = arith.constant 1 : index
    %c0_146 = arith.constant 0 : index
    %83 = vector.load %arg6[%c0_143, %c0_144, %c1_145, %c0_146] : memref<2x8x18x64xf32, #tpu.memory_space<vmem>>, vector<2x8x1x64xf32>
    %c0_147 = arith.constant 0 : index
    %c0_148 = arith.constant 0 : index
    %c2_149 = arith.constant 2 : index
    %c0_150 = arith.constant 0 : index
    %84 = vector.load %arg6[%c0_147, %c0_148, %c2_149, %c0_150] : memref<2x8x18x64xf32, #tpu.memory_space<vmem>>, vector<2x8x1x64xf32>
    %85 = arith.maximumf %82, %83 : vector<2x8x1x64xf32>
    %86 = arith.maximumf %85, %84 : vector<2x8x1x64xf32>
    %c0_151 = arith.constant 0 : index
    %c1_152 = arith.constant 1 : index
    %c1_153 = arith.constant 1 : index
    %c0_154 = arith.constant 0 : index
    %87 = vector.load %arg4[%c0_151, %c1_152, %c1_153, %c0_154] : memref<2x10x10x64xf32, #tpu.memory_space<vmem>>, vector<2x8x1x64xf32>
    tpu.vector_store %arg4[%c0_151, %c1_152, %c1_153, %c0_154], %86 {strides = array<i32>} : memref<2x10x10x64xf32, #tpu.memory_space<vmem>>, vector<2x8x1x64xf32>,
    %c0_155 = arith.constant 0 : index
    %c0_156 = arith.constant 0 : index
    %c2_157 = arith.constant 2 : index
    %c0_158 = arith.constant 0 : index
    %88 = vector.load %arg6[%c0_155, %c0_156, %c2_157, %c0_158] : memref<2x8x18x64xf32, #tpu.memory_space<vmem>>, vector<2x8x1x64xf32>
    %c0_159 = arith.constant 0 : index
    %c0_160 = arith.constant 0 : index
    %c3_161 = arith.constant 3 : index
    %c0_162 = arith.constant 0 : index
    %89 = vector.load %arg6[%c0_159, %c0_160, %c3_161, %c0_162] : memref<2x8x18x64xf32, #tpu.memory_space<vmem>>, vector<2x8x1x64xf32>
    %c0_163 = arith.constant 0 : index
    %c0_164 = arith.constant 0 : index
    %c4_165 = arith.constant 4 : index
    %c0_166 = arith.constant 0 : index
    %90 = vector.load %arg6[%c0_163, %c0_164, %c4_165, %c0_166] : memref<2x8x18x64xf32, #tpu.memory_space<vmem>>, vector<2x8x1x64xf32>
    %91 = arith.maximumf %88, %89 : vector<2x8x1x64xf32>
    %92 = arith.maximumf %91, %90 : vector<2x8x1x64xf32>
    %c0_167 = arith.constant 0 : index
    %c1_168 = arith.constant 1 : index
    %c2_169 = arith.constant 2 : index
    %c0_170 = arith.constant 0 : index
    %93 = vector.load %arg4[%c0_167, %c1_168, %c2_169, %c0_170] : memref<2x10x10x64xf32, #tpu.memory_space<vmem>>, vector<2x8x1x64xf32>
    tpu.vector_store %arg4[%c0_167, %c1_168, %c2_169, %c0_170], %92 {strides = array<i32>} : memref<2x10x10x64xf32, #tpu.memory_space<vmem>>, vector<2x8x1x64xf32>,
    %c0_171 = arith.constant 0 : index
    %c0_172 = arith.constant 0 : index
    %c4_173 = arith.constant 4 : index
    %c0_174 = arith.constant 0 : index
    %94 = vector.load %arg6[%c0_171, %c0_172, %c4_173, %c0_174] : memref<2x8x18x64xf32, #tpu.memory_space<vmem>>, vector<2x8x1x64xf32>
    %c0_175 = arith.constant 0 : index
    %c0_176 = arith.constant 0 : index
    %c5_177 = arith.constant 5 : index
    %c0_178 = arith.constant 0 : index
    %95 = vector.load %arg6[%c0_175, %c0_176, %c5_177, %c0_178] : memref<2x8x18x64xf32, #tpu.memory_space<vmem>>, vector<2x8x1x64xf32>
    %c0_179 = arith.constant 0 : index
    %c0_180 = arith.constant 0 : index
    %c6_181 = arith.constant 6 : index
    %c0_182 = arith.constant 0 : index
    %96 = vector.load %arg6[%c0_179, %c0_180, %c6_181, %c0_182] : memref<2x8x18x64xf32, #tpu.memory_space<vmem>>, vector<2x8x1x64xf32>
    %97 = arith.maximumf %94, %95 : vector<2x8x1x64xf32>
    %98 = arith.maximumf %97, %96 : vector<2x8x1x64xf32>
    %c0_183 = arith.constant 0 : index
    %c1_184 = arith.constant 1 : index
    %c3_185 = arith.constant 3 : index
    %c0_186 = arith.constant 0 : index
    %99 = vector.load %arg4[%c0_183, %c1_184, %c3_185, %c0_186] : memref<2x10x10x64xf32, #tpu.memory_space<vmem>>, vector<2x8x1x64xf32>
    tpu.vector_store %arg4[%c0_183, %c1_184, %c3_185, %c0_186], %98 {strides = array<i32>} : memref<2x10x10x64xf32, #tpu.memory_space<vmem>>, vector<2x8x1x64xf32>,
    %c0_187 = arith.constant 0 : index
    %c0_188 = arith.constant 0 : index
    %c6_189 = arith.constant 6 : index
    %c0_190 = arith.constant 0 : index
    %100 = vector.load %arg6[%c0_187, %c0_188, %c6_189, %c0_190] : memref<2x8x18x64xf32, #tpu.memory_space<vmem>>, vector<2x8x1x64xf32>
    %c0_191 = arith.constant 0 : index
    %c0_192 = arith.constant 0 : index
    %c7_193 = arith.constant 7 : index
    %c0_194 = arith.constant 0 : index
    %101 = vector.load %arg6[%c0_191, %c0_192, %c7_193, %c0_194] : memref<2x8x18x64xf32, #tpu.memory_space<vmem>>, vector<2x8x1x64xf32>
    %c0_195 = arith.constant 0 : index
    %c0_196 = arith.constant 0 : index
    %c8_197 = arith.constant 8 : index
    %c0_198 = arith.constant 0 : index
    %102 = vector.load %arg6[%c0_195, %c0_196, %c8_197, %c0_198] : memref<2x8x18x64xf32, #tpu.memory_space<vmem>>, vector<2x8x1x64xf32>
    %103 = arith.maximumf %100, %101 : vector<2x8x1x64xf32>
    %104 = arith.maximumf %103, %102 : vector<2x8x1x64xf32>
    %c0_199 = arith.constant 0 : index
    %c1_200 = arith.constant 1 : index
    %c4_201 = arith.constant 4 : index
    %c0_202 = arith.constant 0 : index
    %105 = vector.load %arg4[%c0_199, %c1_200, %c4_201, %c0_202] : memref<2x10x10x64xf32, #tpu.memory_space<vmem>>, vector<2x8x1x64xf32>
    tpu.vector_store %arg4[%c0_199, %c1_200, %c4_201, %c0_202], %104 {strides = array<i32>} : memref<2x10x10x64xf32, #tpu.memory_space<vmem>>, vector<2x8x1x64xf32>,
    %c0_203 = arith.constant 0 : index
    %c0_204 = arith.constant 0 : index
    %c8_205 = arith.constant 8 : index
    %c0_206 = arith.constant 0 : index
    %106 = vector.load %arg6[%c0_203, %c0_204, %c8_205, %c0_206] : memref<2x8x18x64xf32, #tpu.memory_space<vmem>>, vector<2x8x1x64xf32>
    %c0_207 = arith.constant 0 : index
    %c0_208 = arith.constant 0 : index
    %c9_209 = arith.constant 9 : index
    %c0_210 = arith.constant 0 : index
    %107 = vector.load %arg6[%c0_207, %c0_208, %c9_209, %c0_210] : memref<2x8x18x64xf32, #tpu.memory_space<vmem>>, vector<2x8x1x64xf32>
    %c0_211 = arith.constant 0 : index
    %c0_212 = arith.constant 0 : index
    %c10_213 = arith.constant 10 : index
    %c0_214 = arith.constant 0 : index
    %108 = vector.load %arg6[%c0_211, %c0_212, %c10_213, %c0_214] : memref<2x8x18x64xf32, #tpu.memory_space<vmem>>, vector<2x8x1x64xf32>
    %109 = arith.maximumf %106, %107 : vector<2x8x1x64xf32>
    %110 = arith.maximumf %109, %108 : vector<2x8x1x64xf32>
    %c0_215 = arith.constant 0 : index
    %c1_216 = arith.constant 1 : index
    %c5_217 = arith.constant 5 : index
    %c0_218 = arith.constant 0 : index
    %111 = vector.load %arg4[%c0_215, %c1_216, %c5_217, %c0_218] : memref<2x10x10x64xf32, #tpu.memory_space<vmem>>, vector<2x8x1x64xf32>
    tpu.vector_store %arg4[%c0_215, %c1_216, %c5_217, %c0_218], %110 {strides = array<i32>} : memref<2x10x10x64xf32, #tpu.memory_space<vmem>>, vector<2x8x1x64xf32>,
    %c0_219 = arith.constant 0 : index
    %c0_220 = arith.constant 0 : index
    %c10_221 = arith.constant 10 : index
    %c0_222 = arith.constant 0 : index
    %112 = vector.load %arg6[%c0_219, %c0_220, %c10_221, %c0_222] : memref<2x8x18x64xf32, #tpu.memory_space<vmem>>, vector<2x8x1x64xf32>
    %c0_223 = arith.constant 0 : index
    %c0_224 = arith.constant 0 : index
    %c11_225 = arith.constant 11 : index
    %c0_226 = arith.constant 0 : index
    %113 = vector.load %arg6[%c0_223, %c0_224, %c11_225, %c0_226] : memref<2x8x18x64xf32, #tpu.memory_space<vmem>>, vector<2x8x1x64xf32>
    %c0_227 = arith.constant 0 : index
    %c0_228 = arith.constant 0 : index
    %c12_229 = arith.constant 12 : index
    %c0_230 = arith.constant 0 : index
    %114 = vector.load %arg6[%c0_227, %c0_228, %c12_229, %c0_230] : memref<2x8x18x64xf32, #tpu.memory_space<vmem>>, vector<2x8x1x64xf32>
    %115 = arith.maximumf %112, %113 : vector<2x8x1x64xf32>
    %116 = arith.maximumf %115, %114 : vector<2x8x1x64xf32>
    %c0_231 = arith.constant 0 : index
    %c1_232 = arith.constant 1 : index
    %c6_233 = arith.constant 6 : index
    %c0_234 = arith.constant 0 : index
    %117 = vector.load %arg4[%c0_231, %c1_232, %c6_233, %c0_234] : memref<2x10x10x64xf32, #tpu.memory_space<vmem>>, vector<2x8x1x64xf32>
    tpu.vector_store %arg4[%c0_231, %c1_232, %c6_233, %c0_234], %116 {strides = array<i32>} : memref<2x10x10x64xf32, #tpu.memory_space<vmem>>, vector<2x8x1x64xf32>,
    %c0_235 = arith.constant 0 : index
    %c0_236 = arith.constant 0 : index
    %c12_237 = arith.constant 12 : index
    %c0_238 = arith.constant 0 : index
    %118 = vector.load %arg6[%c0_235, %c0_236, %c12_237, %c0_238] : memref<2x8x18x64xf32, #tpu.memory_space<vmem>>, vector<2x8x1x64xf32>
    %c0_239 = arith.constant 0 : index
    %c0_240 = arith.constant 0 : index
    %c13_241 = arith.constant 13 : index
    %c0_242 = arith.constant 0 : index
    %119 = vector.load %arg6[%c0_239, %c0_240, %c13_241, %c0_242] : memref<2x8x18x64xf32, #tpu.memory_space<vmem>>, vector<2x8x1x64xf32>
    %c0_243 = arith.constant 0 : index
    %c0_244 = arith.constant 0 : index
    %c14_245 = arith.constant 14 : index
    %c0_246 = arith.constant 0 : index
    %120 = vector.load %arg6[%c0_243, %c0_244, %c14_245, %c0_246] : memref<2x8x18x64xf32, #tpu.memory_space<vmem>>, vector<2x8x1x64xf32>
    %121 = arith.maximumf %118, %119 : vector<2x8x1x64xf32>
    %122 = arith.maximumf %121, %120 : vector<2x8x1x64xf32>
    %c0_247 = arith.constant 0 : index
    %c1_248 = arith.constant 1 : index
    %c7_249 = arith.constant 7 : index
    %c0_250 = arith.constant 0 : index
    %123 = vector.load %arg4[%c0_247, %c1_248, %c7_249, %c0_250] : memref<2x10x10x64xf32, #tpu.memory_space<vmem>>, vector<2x8x1x64xf32>
    tpu.vector_store %arg4[%c0_247, %c1_248, %c7_249, %c0_250], %122 {strides = array<i32>} : memref<2x10x10x64xf32, #tpu.memory_space<vmem>>, vector<2x8x1x64xf32>,
    %c0_251 = arith.constant 0 : index
    %c0_252 = arith.constant 0 : index
    %c14_253 = arith.constant 14 : index
    %c0_254 = arith.constant 0 : index
    %124 = vector.load %arg6[%c0_251, %c0_252, %c14_253, %c0_254] : memref<2x8x18x64xf32, #tpu.memory_space<vmem>>, vector<2x8x1x64xf32>
    %c0_255 = arith.constant 0 : index
    %c0_256 = arith.constant 0 : index
    %c15_257 = arith.constant 15 : index
    %c0_258 = arith.constant 0 : index
    %125 = vector.load %arg6[%c0_255, %c0_256, %c15_257, %c0_258] : memref<2x8x18x64xf32, #tpu.memory_space<vmem>>, vector<2x8x1x64xf32>
    %c0_259 = arith.constant 0 : index
    %c0_260 = arith.constant 0 : index
    %c16_261 = arith.constant 16 : index
    %c0_262 = arith.constant 0 : index
    %126 = vector.load %arg6[%c0_259, %c0_260, %c16_261, %c0_262] : memref<2x8x18x64xf32, #tpu.memory_space<vmem>>, vector<2x8x1x64xf32>
    %127 = arith.maximumf %124, %125 : vector<2x8x1x64xf32>
    %128 = arith.maximumf %127, %126 : vector<2x8x1x64xf32>
    %c0_263 = arith.constant 0 : index
    %c1_264 = arith.constant 1 : index
    %c8_265 = arith.constant 8 : index
    %c0_266 = arith.constant 0 : index
    %129 = vector.load %arg4[%c0_263, %c1_264, %c8_265, %c0_266] : memref<2x10x10x64xf32, #tpu.memory_space<vmem>>, vector<2x8x1x64xf32>
    tpu.vector_store %arg4[%c0_263, %c1_264, %c8_265, %c0_266], %128 {strides = array<i32>} : memref<2x10x10x64xf32, #tpu.memory_space<vmem>>, vector<2x8x1x64xf32>,
    return
  }
}

module attributes {stable_mosaic.version = 11 : i64} {
  func.func @_block_kernel(%arg0: memref<2x10x10x64xf32, #tpu.memory_space<vmem>>, %arg1: memref<9x64x64xf32, #tpu.memory_space<vmem>>, %arg2: memref<1x64xf32, #tpu.memory_space<vmem>>, %arg3: memref<1x64xf32, #tpu.memory_space<vmem>>, %arg4: memref<9x64x64xf32, #tpu.memory_space<vmem>>, %arg5: memref<1x64xf32, #tpu.memory_space<vmem>>, %arg6: memref<1x64xf32, #tpu.memory_space<vmem>>, %arg7: memref<2x10x10x64xf32, #tpu.memory_space<vmem>>, %arg8: memref<2x10x10x64xf32, #tpu.memory_space<vmem>>) attributes {dimension_semantics = [], scalar_prefetch = 0 : i64, scratch_operands = 1 : i64, tpu.core_type = #tpu.core_type<tc>} {
    %c0 = arith.constant 0 : index
    %c0_0 = arith.constant 0 : index
    %c0_1 = arith.constant 0 : index
    %c0_2 = arith.constant 0 : index
    %0 = vector.load %arg0[%c0, %c0_0, %c0_1, %c0_2] : memref<2x10x10x64xf32, #tpu.memory_space<vmem>>, vector<2x8x8x64xf32>
    %1 = vector.shape_cast %0 : vector<2x8x8x64xf32> to vector<128x64xf32>
    %c0_3 = arith.constant 0 : index
    %c0_4 = arith.constant 0 : index
    %c0_5 = arith.constant 0 : index
    %2 = vector.load %arg1[%c0_3, %c0_4, %c0_5] : memref<9x64x64xf32, #tpu.memory_space<vmem>>, vector<1x64x64xf32>
    %3 = vector.shape_cast %2 : vector<1x64x64xf32> to vector<64x64xf32>
    %cst = arith.constant dense<0.000000e+00> : vector<128x64xf32>
    %4 = tpu.matmul %1, %3, %cst {dimension_numbers = #tpu.dot_dimension_numbers<[1], [0], [0], [1], [0, 0, 1, 1], [], []>} : vector<128x64xf32>, vector<64x64xf32>, vector<128x64xf32> -> vector<128x64xf32>
    %c0_6 = arith.constant 0 : index
    %c0_7 = arith.constant 0 : index
    %c1 = arith.constant 1 : index
    %c0_8 = arith.constant 0 : index
    %5 = vector.load %arg0[%c0_6, %c0_7, %c1, %c0_8] : memref<2x10x10x64xf32, #tpu.memory_space<vmem>>, vector<2x8x8x64xf32>
    %6 = vector.shape_cast %5 : vector<2x8x8x64xf32> to vector<128x64xf32>
    %c1_9 = arith.constant 1 : index
    %c0_10 = arith.constant 0 : index
    %c0_11 = arith.constant 0 : index
    %7 = vector.load %arg1[%c1_9, %c0_10, %c0_11] : memref<9x64x64xf32, #tpu.memory_space<vmem>>, vector<1x64x64xf32>
    %8 = vector.shape_cast %7 : vector<1x64x64xf32> to vector<64x64xf32>
    %cst_12 = arith.constant dense<0.000000e+00> : vector<128x64xf32>
    %9 = tpu.matmul %6, %8, %cst_12 {dimension_numbers = #tpu.dot_dimension_numbers<[1], [0], [0], [1], [0, 0, 1, 1], [], []>} : vector<128x64xf32>, vector<64x64xf32>, vector<128x64xf32> -> vector<128x64xf32>
    %10 = arith.addf %4, %9 : vector<128x64xf32>
    %c0_13 = arith.constant 0 : index
    %c0_14 = arith.constant 0 : index
    %c2 = arith.constant 2 : index
    %c0_15 = arith.constant 0 : index
    %11 = vector.load %arg0[%c0_13, %c0_14, %c2, %c0_15] : memref<2x10x10x64xf32, #tpu.memory_space<vmem>>, vector<2x8x8x64xf32>
    %12 = vector.shape_cast %11 : vector<2x8x8x64xf32> to vector<128x64xf32>
    %c2_16 = arith.constant 2 : index
    %c0_17 = arith.constant 0 : index
    %c0_18 = arith.constant 0 : index
    %13 = vector.load %arg1[%c2_16, %c0_17, %c0_18] : memref<9x64x64xf32, #tpu.memory_space<vmem>>, vector<1x64x64xf32>
    %14 = vector.shape_cast %13 : vector<1x64x64xf32> to vector<64x64xf32>
    %cst_19 = arith.constant dense<0.000000e+00> : vector<128x64xf32>
    %15 = tpu.matmul %12, %14, %cst_19 {dimension_numbers = #tpu.dot_dimension_numbers<[1], [0], [0], [1], [0, 0, 1, 1], [], []>} : vector<128x64xf32>, vector<64x64xf32>, vector<128x64xf32> -> vector<128x64xf32>
    %16 = arith.addf %10, %15 : vector<128x64xf32>
    %c0_20 = arith.constant 0 : index
    %c1_21 = arith.constant 1 : index
    %c0_22 = arith.constant 0 : index
    %c0_23 = arith.constant 0 : index
    %17 = vector.load %arg0[%c0_20, %c1_21, %c0_22, %c0_23] : memref<2x10x10x64xf32, #tpu.memory_space<vmem>>, vector<2x8x8x64xf32>
    %18 = vector.shape_cast %17 : vector<2x8x8x64xf32> to vector<128x64xf32>
    %c3 = arith.constant 3 : index
    %c0_24 = arith.constant 0 : index
    %c0_25 = arith.constant 0 : index
    %19 = vector.load %arg1[%c3, %c0_24, %c0_25] : memref<9x64x64xf32, #tpu.memory_space<vmem>>, vector<1x64x64xf32>
    %20 = vector.shape_cast %19 : vector<1x64x64xf32> to vector<64x64xf32>
    %cst_26 = arith.constant dense<0.000000e+00> : vector<128x64xf32>
    %21 = tpu.matmul %18, %20, %cst_26 {dimension_numbers = #tpu.dot_dimension_numbers<[1], [0], [0], [1], [0, 0, 1, 1], [], []>} : vector<128x64xf32>, vector<64x64xf32>, vector<128x64xf32> -> vector<128x64xf32>
    %22 = arith.addf %16, %21 : vector<128x64xf32>
    %c0_27 = arith.constant 0 : index
    %c1_28 = arith.constant 1 : index
    %c1_29 = arith.constant 1 : index
    %c0_30 = arith.constant 0 : index
    %23 = vector.load %arg0[%c0_27, %c1_28, %c1_29, %c0_30] : memref<2x10x10x64xf32, #tpu.memory_space<vmem>>, vector<2x8x8x64xf32>
    %24 = vector.shape_cast %23 : vector<2x8x8x64xf32> to vector<128x64xf32>
    %c4 = arith.constant 4 : index
    %c0_31 = arith.constant 0 : index
    %c0_32 = arith.constant 0 : index
    %25 = vector.load %arg1[%c4, %c0_31, %c0_32] : memref<9x64x64xf32, #tpu.memory_space<vmem>>, vector<1x64x64xf32>
    %26 = vector.shape_cast %25 : vector<1x64x64xf32> to vector<64x64xf32>
    %cst_33 = arith.constant dense<0.000000e+00> : vector<128x64xf32>
    %27 = tpu.matmul %24, %26, %cst_33 {dimension_numbers = #tpu.dot_dimension_numbers<[1], [0], [0], [1], [0, 0, 1, 1], [], []>} : vector<128x64xf32>, vector<64x64xf32>, vector<128x64xf32> -> vector<128x64xf32>
    %28 = arith.addf %22, %27 : vector<128x64xf32>
    %c0_34 = arith.constant 0 : index
    %c1_35 = arith.constant 1 : index
    %c2_36 = arith.constant 2 : index
    %c0_37 = arith.constant 0 : index
    %29 = vector.load %arg0[%c0_34, %c1_35, %c2_36, %c0_37] : memref<2x10x10x64xf32, #tpu.memory_space<vmem>>, vector<2x8x8x64xf32>
    %30 = vector.shape_cast %29 : vector<2x8x8x64xf32> to vector<128x64xf32>
    %c5 = arith.constant 5 : index
    %c0_38 = arith.constant 0 : index
    %c0_39 = arith.constant 0 : index
    %31 = vector.load %arg1[%c5, %c0_38, %c0_39] : memref<9x64x64xf32, #tpu.memory_space<vmem>>, vector<1x64x64xf32>
    %32 = vector.shape_cast %31 : vector<1x64x64xf32> to vector<64x64xf32>
    %cst_40 = arith.constant dense<0.000000e+00> : vector<128x64xf32>
    %33 = tpu.matmul %30, %32, %cst_40 {dimension_numbers = #tpu.dot_dimension_numbers<[1], [0], [0], [1], [0, 0, 1, 1], [], []>} : vector<128x64xf32>, vector<64x64xf32>, vector<128x64xf32> -> vector<128x64xf32>
    %34 = arith.addf %28, %33 : vector<128x64xf32>
    %c0_41 = arith.constant 0 : index
    %c2_42 = arith.constant 2 : index
    %c0_43 = arith.constant 0 : index
    %c0_44 = arith.constant 0 : index
    %35 = vector.load %arg0[%c0_41, %c2_42, %c0_43, %c0_44] : memref<2x10x10x64xf32, #tpu.memory_space<vmem>>, vector<2x8x8x64xf32>
    %36 = vector.shape_cast %35 : vector<2x8x8x64xf32> to vector<128x64xf32>
    %c6 = arith.constant 6 : index
    %c0_45 = arith.constant 0 : index
    %c0_46 = arith.constant 0 : index
    %37 = vector.load %arg1[%c6, %c0_45, %c0_46] : memref<9x64x64xf32, #tpu.memory_space<vmem>>, vector<1x64x64xf32>
    %38 = vector.shape_cast %37 : vector<1x64x64xf32> to vector<64x64xf32>
    %cst_47 = arith.constant dense<0.000000e+00> : vector<128x64xf32>
    %39 = tpu.matmul %36, %38, %cst_47 {dimension_numbers = #tpu.dot_dimension_numbers<[1], [0], [0], [1], [0, 0, 1, 1], [], []>} : vector<128x64xf32>, vector<64x64xf32>, vector<128x64xf32> -> vector<128x64xf32>
    %40 = arith.addf %34, %39 : vector<128x64xf32>
    %c0_48 = arith.constant 0 : index
    %c2_49 = arith.constant 2 : index
    %c1_50 = arith.constant 1 : index
    %c0_51 = arith.constant 0 : index
    %41 = vector.load %arg0[%c0_48, %c2_49, %c1_50, %c0_51] : memref<2x10x10x64xf32, #tpu.memory_space<vmem>>, vector<2x8x8x64xf32>
    %42 = vector.shape_cast %41 : vector<2x8x8x64xf32> to vector<128x64xf32>
    %c7 = arith.constant 7 : index
    %c0_52 = arith.constant 0 : index
    %c0_53 = arith.constant 0 : index
    %43 = vector.load %arg1[%c7, %c0_52, %c0_53] : memref<9x64x64xf32, #tpu.memory_space<vmem>>, vector<1x64x64xf32>
    %44 = vector.shape_cast %43 : vector<1x64x64xf32> to vector<64x64xf32>
    %cst_54 = arith.constant dense<0.000000e+00> : vector<128x64xf32>
    %45 = tpu.matmul %42, %44, %cst_54 {dimension_numbers = #tpu.dot_dimension_numbers<[1], [0], [0], [1], [0, 0, 1, 1], [], []>} : vector<128x64xf32>, vector<64x64xf32>, vector<128x64xf32> -> vector<128x64xf32>
    %46 = arith.addf %40, %45 : vector<128x64xf32>
    %c0_55 = arith.constant 0 : index
    %c2_56 = arith.constant 2 : index
    %c2_57 = arith.constant 2 : index
    %c0_58 = arith.constant 0 : index
    %47 = vector.load %arg0[%c0_55, %c2_56, %c2_57, %c0_58] : memref<2x10x10x64xf32, #tpu.memory_space<vmem>>, vector<2x8x8x64xf32>
    %48 = vector.shape_cast %47 : vector<2x8x8x64xf32> to vector<128x64xf32>
    %c8 = arith.constant 8 : index
    %c0_59 = arith.constant 0 : index
    %c0_60 = arith.constant 0 : index
    %49 = vector.load %arg1[%c8, %c0_59, %c0_60] : memref<9x64x64xf32, #tpu.memory_space<vmem>>, vector<1x64x64xf32>
    %50 = vector.shape_cast %49 : vector<1x64x64xf32> to vector<64x64xf32>
    %cst_61 = arith.constant dense<0.000000e+00> : vector<128x64xf32>
    %51 = tpu.matmul %48, %50, %cst_61 {dimension_numbers = #tpu.dot_dimension_numbers<[1], [0], [0], [1], [0, 0, 1, 1], [], []>} : vector<128x64xf32>, vector<64x64xf32>, vector<128x64xf32> -> vector<128x64xf32>
    %52 = arith.addf %46, %51 : vector<128x64xf32>
    %cst_62 = arith.constant dense<0.000000e+00> : vector<64xf32>
    %53 = vector.multi_reduction <add>, %52, %cst_62 [0] : vector<128x64xf32> to vector<64xf32>
    %54 = vector.shape_cast %53 : vector<64xf32> to vector<1x64xf32>
    %55 = arith.mulf %52, %52 : vector<128x64xf32>
    %cst_63 = arith.constant dense<0.000000e+00> : vector<64xf32>
    %56 = vector.multi_reduction <add>, %55, %cst_63 [0] : vector<128x64xf32> to vector<64xf32>
    %57 = vector.shape_cast %56 : vector<64xf32> to vector<1x64xf32>
    %cst_64 = arith.constant 7.812500e-03 : f32
    %58 = vector.broadcast %cst_64 : f32 to vector<1x64xf32>
    %59 = arith.mulf %54, %58 : vector<1x64xf32>
    %cst_65 = arith.constant 7.812500e-03 : f32
    %60 = vector.broadcast %cst_65 : f32 to vector<1x64xf32>
    %61 = arith.mulf %57, %60 : vector<1x64xf32>
    %62 = arith.mulf %59, %59 : vector<1x64xf32>
    %63 = arith.subf %61, %62 : vector<1x64xf32>
    %c0_66 = arith.constant 0 : index
    %c0_67 = arith.constant 0 : index
    %64 = vector.load %arg2[%c0_66, %c0_67] : memref<1x64xf32, #tpu.memory_space<vmem>>, vector<1x64xf32>
    %cst_68 = arith.constant 9.99999974E-6 : f32
    %65 = vector.broadcast %cst_68 : f32 to vector<1x64xf32>
    %66 = arith.addf %63, %65 : vector<1x64xf32>
    %67 = math.rsqrt %66 : vector<1x64xf32>
    %68 = arith.mulf %64, %67 : vector<1x64xf32>
    %c0_69 = arith.constant 0 : index
    %c0_70 = arith.constant 0 : index
    %69 = vector.load %arg3[%c0_69, %c0_70] : memref<1x64xf32, #tpu.memory_space<vmem>>, vector<1x64xf32>
    %70 = arith.mulf %59, %68 : vector<1x64xf32>
    %71 = arith.subf %69, %70 : vector<1x64xf32>
    %72 = vector.broadcast %68 : vector<1x64xf32> to vector<128x64xf32>
    %73 = arith.mulf %52, %72 : vector<128x64xf32>
    %74 = vector.broadcast %71 : vector<1x64xf32> to vector<128x64xf32>
    %75 = arith.addf %73, %74 : vector<128x64xf32>
    %cst_71 = arith.constant 0.000000e+00 : f32
    %76 = vector.broadcast %cst_71 : f32 to vector<128x64xf32>
    %77 = arith.maximumf %75, %76 : vector<128x64xf32>
    %cst_72 = arith.constant 0.000000e+00 : f32
    %78 = vector.broadcast %cst_72 : f32 to vector<2x10x10x64xf32>
    %c0_73 = arith.constant 0 : index
    %c0_74 = arith.constant 0 : index
    %c0_75 = arith.constant 0 : index
    %c0_76 = arith.constant 0 : index
    %79 = vector.load %arg8[%c0_73, %c0_74, %c0_75, %c0_76] : memref<2x10x10x64xf32, #tpu.memory_space<vmem>>, vector<2x10x10x64xf32>
    tpu.vector_store %arg8[%c0_73, %c0_74, %c0_75, %c0_76], %78 {strides = array<i32>} : memref<2x10x10x64xf32, #tpu.memory_space<vmem>>, vector<2x10x10x64xf32>,
    %80 = vector.shape_cast %77 : vector<128x64xf32> to vector<2x8x8x64xf32>
    %c0_77 = arith.constant 0 : index
    %c1_78 = arith.constant 1 : index
    %c1_79 = arith.constant 1 : index
    %c0_80 = arith.constant 0 : index
    %81 = vector.load %arg8[%c0_77, %c1_78, %c1_79, %c0_80] : memref<2x10x10x64xf32, #tpu.memory_space<vmem>>, vector<2x8x8x64xf32>
    tpu.vector_store %arg8[%c0_77, %c1_78, %c1_79, %c0_80], %80 {strides = array<i32>} : memref<2x10x10x64xf32, #tpu.memory_space<vmem>>, vector<2x8x8x64xf32>,
    %c0_81 = arith.constant 0 : index
    %c1_82 = arith.constant 1 : index
    %c1_83 = arith.constant 1 : index
    %c0_84 = arith.constant 0 : index
    %82 = vector.load %arg0[%c0_81, %c1_82, %c1_83, %c0_84] : memref<2x10x10x64xf32, #tpu.memory_space<vmem>>, vector<2x8x8x64xf32>
    %83 = vector.shape_cast %82 : vector<2x8x8x64xf32> to vector<128x64xf32>
    %c0_85 = arith.constant 0 : index
    %c0_86 = arith.constant 0 : index
    %c0_87 = arith.constant 0 : index
    %c0_88 = arith.constant 0 : index
    %84 = vector.load %arg8[%c0_85, %c0_86, %c0_87, %c0_88] : memref<2x10x10x64xf32, #tpu.memory_space<vmem>>, vector<2x8x8x64xf32>
    %85 = vector.shape_cast %84 : vector<2x8x8x64xf32> to vector<128x64xf32>
    %c0_89 = arith.constant 0 : index
    %c0_90 = arith.constant 0 : index
    %c0_91 = arith.constant 0 : index
    %86 = vector.load %arg4[%c0_89, %c0_90, %c0_91] : memref<9x64x64xf32, #tpu.memory_space<vmem>>, vector<1x64x64xf32>
    %87 = vector.shape_cast %86 : vector<1x64x64xf32> to vector<64x64xf32>
    %cst_92 = arith.constant dense<0.000000e+00> : vector<128x64xf32>
    %88 = tpu.matmul %85, %87, %cst_92 {dimension_numbers = #tpu.dot_dimension_numbers<[1], [0], [0], [1], [0, 0, 1, 1], [], []>} : vector<128x64xf32>, vector<64x64xf32>, vector<128x64xf32> -> vector<128x64xf32>
    %c0_93 = arith.constant 0 : index
    %c0_94 = arith.constant 0 : index
    %c1_95 = arith.constant 1 : index
    %c0_96 = arith.constant 0 : index
    %89 = vector.load %arg8[%c0_93, %c0_94, %c1_95, %c0_96] : memref<2x10x10x64xf32, #tpu.memory_space<vmem>>, vector<2x8x8x64xf32>
    %90 = vector.shape_cast %89 : vector<2x8x8x64xf32> to vector<128x64xf32>
    %c1_97 = arith.constant 1 : index
    %c0_98 = arith.constant 0 : index
    %c0_99 = arith.constant 0 : index
    %91 = vector.load %arg4[%c1_97, %c0_98, %c0_99] : memref<9x64x64xf32, #tpu.memory_space<vmem>>, vector<1x64x64xf32>
    %92 = vector.shape_cast %91 : vector<1x64x64xf32> to vector<64x64xf32>
    %cst_100 = arith.constant dense<0.000000e+00> : vector<128x64xf32>
    %93 = tpu.matmul %90, %92, %cst_100 {dimension_numbers = #tpu.dot_dimension_numbers<[1], [0], [0], [1], [0, 0, 1, 1], [], []>} : vector<128x64xf32>, vector<64x64xf32>, vector<128x64xf32> -> vector<128x64xf32>
    %94 = arith.addf %88, %93 : vector<128x64xf32>
    %c0_101 = arith.constant 0 : index
    %c0_102 = arith.constant 0 : index
    %c2_103 = arith.constant 2 : index
    %c0_104 = arith.constant 0 : index
    %95 = vector.load %arg8[%c0_101, %c0_102, %c2_103, %c0_104] : memref<2x10x10x64xf32, #tpu.memory_space<vmem>>, vector<2x8x8x64xf32>
    %96 = vector.shape_cast %95 : vector<2x8x8x64xf32> to vector<128x64xf32>
    %c2_105 = arith.constant 2 : index
    %c0_106 = arith.constant 0 : index
    %c0_107 = arith.constant 0 : index
    %97 = vector.load %arg4[%c2_105, %c0_106, %c0_107] : memref<9x64x64xf32, #tpu.memory_space<vmem>>, vector<1x64x64xf32>
    %98 = vector.shape_cast %97 : vector<1x64x64xf32> to vector<64x64xf32>
    %cst_108 = arith.constant dense<0.000000e+00> : vector<128x64xf32>
    %99 = tpu.matmul %96, %98, %cst_108 {dimension_numbers = #tpu.dot_dimension_numbers<[1], [0], [0], [1], [0, 0, 1, 1], [], []>} : vector<128x64xf32>, vector<64x64xf32>, vector<128x64xf32> -> vector<128x64xf32>
    %100 = arith.addf %94, %99 : vector<128x64xf32>
    %c0_109 = arith.constant 0 : index
    %c1_110 = arith.constant 1 : index
    %c0_111 = arith.constant 0 : index
    %c0_112 = arith.constant 0 : index
    %101 = vector.load %arg8[%c0_109, %c1_110, %c0_111, %c0_112] : memref<2x10x10x64xf32, #tpu.memory_space<vmem>>, vector<2x8x8x64xf32>
    %102 = vector.shape_cast %101 : vector<2x8x8x64xf32> to vector<128x64xf32>
    %c3_113 = arith.constant 3 : index
    %c0_114 = arith.constant 0 : index
    %c0_115 = arith.constant 0 : index
    %103 = vector.load %arg4[%c3_113, %c0_114, %c0_115] : memref<9x64x64xf32, #tpu.memory_space<vmem>>, vector<1x64x64xf32>
    %104 = vector.shape_cast %103 : vector<1x64x64xf32> to vector<64x64xf32>
    %cst_116 = arith.constant dense<0.000000e+00> : vector<128x64xf32>
    %105 = tpu.matmul %102, %104, %cst_116 {dimension_numbers = #tpu.dot_dimension_numbers<[1], [0], [0], [1], [0, 0, 1, 1], [], []>} : vector<128x64xf32>, vector<64x64xf32>, vector<128x64xf32> -> vector<128x64xf32>
    %106 = arith.addf %100, %105 : vector<128x64xf32>
    %c0_117 = arith.constant 0 : index
    %c1_118 = arith.constant 1 : index
    %c1_119 = arith.constant 1 : index
    %c0_120 = arith.constant 0 : index
    %107 = vector.load %arg8[%c0_117, %c1_118, %c1_119, %c0_120] : memref<2x10x10x64xf32, #tpu.memory_space<vmem>>, vector<2x8x8x64xf32>
    %108 = vector.shape_cast %107 : vector<2x8x8x64xf32> to vector<128x64xf32>
    %c4_121 = arith.constant 4 : index
    %c0_122 = arith.constant 0 : index
    %c0_123 = arith.constant 0 : index
    %109 = vector.load %arg4[%c4_121, %c0_122, %c0_123] : memref<9x64x64xf32, #tpu.memory_space<vmem>>, vector<1x64x64xf32>
    %110 = vector.shape_cast %109 : vector<1x64x64xf32> to vector<64x64xf32>
    %cst_124 = arith.constant dense<0.000000e+00> : vector<128x64xf32>
    %111 = tpu.matmul %108, %110, %cst_124 {dimension_numbers = #tpu.dot_dimension_numbers<[1], [0], [0], [1], [0, 0, 1, 1], [], []>} : vector<128x64xf32>, vector<64x64xf32>, vector<128x64xf32> -> vector<128x64xf32>
    %112 = arith.addf %106, %111 : vector<128x64xf32>
    %c0_125 = arith.constant 0 : index
    %c1_126 = arith.constant 1 : index
    %c2_127 = arith.constant 2 : index
    %c0_128 = arith.constant 0 : index
    %113 = vector.load %arg8[%c0_125, %c1_126, %c2_127, %c0_128] : memref<2x10x10x64xf32, #tpu.memory_space<vmem>>, vector<2x8x8x64xf32>
    %114 = vector.shape_cast %113 : vector<2x8x8x64xf32> to vector<128x64xf32>
    %c5_129 = arith.constant 5 : index
    %c0_130 = arith.constant 0 : index
    %c0_131 = arith.constant 0 : index
    %115 = vector.load %arg4[%c5_129, %c0_130, %c0_131] : memref<9x64x64xf32, #tpu.memory_space<vmem>>, vector<1x64x64xf32>
    %116 = vector.shape_cast %115 : vector<1x64x64xf32> to vector<64x64xf32>
    %cst_132 = arith.constant dense<0.000000e+00> : vector<128x64xf32>
    %117 = tpu.matmul %114, %116, %cst_132 {dimension_numbers = #tpu.dot_dimension_numbers<[1], [0], [0], [1], [0, 0, 1, 1], [], []>} : vector<128x64xf32>, vector<64x64xf32>, vector<128x64xf32> -> vector<128x64xf32>
    %118 = arith.addf %112, %117 : vector<128x64xf32>
    %c0_133 = arith.constant 0 : index
    %c2_134 = arith.constant 2 : index
    %c0_135 = arith.constant 0 : index
    %c0_136 = arith.constant 0 : index
    %119 = vector.load %arg8[%c0_133, %c2_134, %c0_135, %c0_136] : memref<2x10x10x64xf32, #tpu.memory_space<vmem>>, vector<2x8x8x64xf32>
    %120 = vector.shape_cast %119 : vector<2x8x8x64xf32> to vector<128x64xf32>
    %c6_137 = arith.constant 6 : index
    %c0_138 = arith.constant 0 : index
    %c0_139 = arith.constant 0 : index
    %121 = vector.load %arg4[%c6_137, %c0_138, %c0_139] : memref<9x64x64xf32, #tpu.memory_space<vmem>>, vector<1x64x64xf32>
    %122 = vector.shape_cast %121 : vector<1x64x64xf32> to vector<64x64xf32>
    %cst_140 = arith.constant dense<0.000000e+00> : vector<128x64xf32>
    %123 = tpu.matmul %120, %122, %cst_140 {dimension_numbers = #tpu.dot_dimension_numbers<[1], [0], [0], [1], [0, 0, 1, 1], [], []>} : vector<128x64xf32>, vector<64x64xf32>, vector<128x64xf32> -> vector<128x64xf32>
    %124 = arith.addf %118, %123 : vector<128x64xf32>
    %c0_141 = arith.constant 0 : index
    %c2_142 = arith.constant 2 : index
    %c1_143 = arith.constant 1 : index
    %c0_144 = arith.constant 0 : index
    %125 = vector.load %arg8[%c0_141, %c2_142, %c1_143, %c0_144] : memref<2x10x10x64xf32, #tpu.memory_space<vmem>>, vector<2x8x8x64xf32>
    %126 = vector.shape_cast %125 : vector<2x8x8x64xf32> to vector<128x64xf32>
    %c7_145 = arith.constant 7 : index
    %c0_146 = arith.constant 0 : index
    %c0_147 = arith.constant 0 : index
    %127 = vector.load %arg4[%c7_145, %c0_146, %c0_147] : memref<9x64x64xf32, #tpu.memory_space<vmem>>, vector<1x64x64xf32>
    %128 = vector.shape_cast %127 : vector<1x64x64xf32> to vector<64x64xf32>
    %cst_148 = arith.constant dense<0.000000e+00> : vector<128x64xf32>
    %129 = tpu.matmul %126, %128, %cst_148 {dimension_numbers = #tpu.dot_dimension_numbers<[1], [0], [0], [1], [0, 0, 1, 1], [], []>} : vector<128x64xf32>, vector<64x64xf32>, vector<128x64xf32> -> vector<128x64xf32>
    %130 = arith.addf %124, %129 : vector<128x64xf32>
    %c0_149 = arith.constant 0 : index
    %c2_150 = arith.constant 2 : index
    %c2_151 = arith.constant 2 : index
    %c0_152 = arith.constant 0 : index
    %131 = vector.load %arg8[%c0_149, %c2_150, %c2_151, %c0_152] : memref<2x10x10x64xf32, #tpu.memory_space<vmem>>, vector<2x8x8x64xf32>
    %132 = vector.shape_cast %131 : vector<2x8x8x64xf32> to vector<128x64xf32>
    %c8_153 = arith.constant 8 : index
    %c0_154 = arith.constant 0 : index
    %c0_155 = arith.constant 0 : index
    %133 = vector.load %arg4[%c8_153, %c0_154, %c0_155] : memref<9x64x64xf32, #tpu.memory_space<vmem>>, vector<1x64x64xf32>
    %134 = vector.shape_cast %133 : vector<1x64x64xf32> to vector<64x64xf32>
    %cst_156 = arith.constant dense<0.000000e+00> : vector<128x64xf32>
    %135 = tpu.matmul %132, %134, %cst_156 {dimension_numbers = #tpu.dot_dimension_numbers<[1], [0], [0], [1], [0, 0, 1, 1], [], []>} : vector<128x64xf32>, vector<64x64xf32>, vector<128x64xf32> -> vector<128x64xf32>
    %136 = arith.addf %130, %135 : vector<128x64xf32>
    %cst_157 = arith.constant dense<0.000000e+00> : vector<64xf32>
    %137 = vector.multi_reduction <add>, %136, %cst_157 [0] : vector<128x64xf32> to vector<64xf32>
    %138 = vector.shape_cast %137 : vector<64xf32> to vector<1x64xf32>
    %139 = arith.mulf %136, %136 : vector<128x64xf32>
    %cst_158 = arith.constant dense<0.000000e+00> : vector<64xf32>
    %140 = vector.multi_reduction <add>, %139, %cst_158 [0] : vector<128x64xf32> to vector<64xf32>
    %141 = vector.shape_cast %140 : vector<64xf32> to vector<1x64xf32>
    %cst_159 = arith.constant 7.812500e-03 : f32
    %142 = vector.broadcast %cst_159 : f32 to vector<1x64xf32>
    %143 = arith.mulf %138, %142 : vector<1x64xf32>
    %cst_160 = arith.constant 7.812500e-03 : f32
    %144 = vector.broadcast %cst_160 : f32 to vector<1x64xf32>
    %145 = arith.mulf %141, %144 : vector<1x64xf32>
    %146 = arith.mulf %143, %143 : vector<1x64xf32>
    %147 = arith.subf %145, %146 : vector<1x64xf32>
    %c0_161 = arith.constant 0 : index
    %c0_162 = arith.constant 0 : index
    %148 = vector.load %arg5[%c0_161, %c0_162] : memref<1x64xf32, #tpu.memory_space<vmem>>, vector<1x64xf32>
    %cst_163 = arith.constant 9.99999974E-6 : f32
    %149 = vector.broadcast %cst_163 : f32 to vector<1x64xf32>
    %150 = arith.addf %147, %149 : vector<1x64xf32>
    %151 = math.rsqrt %150 : vector<1x64xf32>
    %152 = arith.mulf %148, %151 : vector<1x64xf32>
    %c0_164 = arith.constant 0 : index
    %c0_165 = arith.constant 0 : index
    %153 = vector.load %arg6[%c0_164, %c0_165] : memref<1x64xf32, #tpu.memory_space<vmem>>, vector<1x64xf32>
    %154 = arith.mulf %143, %152 : vector<1x64xf32>
    %155 = arith.subf %153, %154 : vector<1x64xf32>
    %156 = vector.broadcast %152 : vector<1x64xf32> to vector<128x64xf32>
    %157 = arith.mulf %136, %156 : vector<128x64xf32>
    %158 = vector.broadcast %155 : vector<1x64xf32> to vector<128x64xf32>
    %159 = arith.addf %157, %158 : vector<128x64xf32>
    %160 = arith.addf %159, %83 : vector<128x64xf32>
    %cst_166 = arith.constant 0.000000e+00 : f32
    %161 = vector.broadcast %cst_166 : f32 to vector<128x64xf32>
    %162 = arith.maximumf %160, %161 : vector<128x64xf32>
    %cst_167 = arith.constant 0.000000e+00 : f32
    %163 = vector.broadcast %cst_167 : f32 to vector<2x10x10x64xf32>
    %c0_168 = arith.constant 0 : index
    %c0_169 = arith.constant 0 : index
    %c0_170 = arith.constant 0 : index
    %c0_171 = arith.constant 0 : index
    %164 = vector.load %arg7[%c0_168, %c0_169, %c0_170, %c0_171] : memref<2x10x10x64xf32, #tpu.memory_space<vmem>>, vector<2x10x10x64xf32>
    tpu.vector_store %arg7[%c0_168, %c0_169, %c0_170, %c0_171], %163 {strides = array<i32>} : memref<2x10x10x64xf32, #tpu.memory_space<vmem>>, vector<2x10x10x64xf32>,
    %165 = vector.shape_cast %162 : vector<128x64xf32> to vector<2x8x8x64xf32>
    %c0_172 = arith.constant 0 : index
    %c1_173 = arith.constant 1 : index
    %c1_174 = arith.constant 1 : index
    %c0_175 = arith.constant 0 : index
    %166 = vector.load %arg7[%c0_172, %c1_173, %c1_174, %c0_175] : memref<2x10x10x64xf32, #tpu.memory_space<vmem>>, vector<2x8x8x64xf32>
    tpu.vector_store %arg7[%c0_172, %c1_173, %c1_174, %c0_175], %165 {strides = array<i32>} : memref<2x10x10x64xf32, #tpu.memory_space<vmem>>, vector<2x8x8x64xf32>,
    return
  }
}

</mosaic_0001>

<bundles_post_ra>
// kernel: resnet_forward.4
= control target key start
LH: loop header
LB: loop body
LE: loop exit
PB: predicated region body
PF: predicated region fallthrough
CT: control target
= control target key end

     0   :  { %vm75_vm0 = vcmask 523264   ;;  %vm2264_vm1 = vcmask 517120   ;;  %s9030_s1 = inlined_call_operand.vmem [shape: f32[9,64,64], index: 1, kind: input, shape index: {}]   ;;  %s9031_s0 = inlined_call_operand.vmem [shape: f32[2,10,10,64], index: 0, kind: input, shape index: {}]   ;;  %s9032_s4 = inlined_call_operand.vmem [shape: f32[9,64,64], index: 4, kind: input, shape index: {}]   ;;  %s9033_s2 = inlined_call_operand.vmem [shape: f32[1,64], index: 2, kind: input, shape index: {}]   ;;  %s9034_s3 = inlined_call_operand.vmem [shape: f32[1,64], index: 3, kind: input, shape index: {}]   ;;  %s9035_s7 = inlined_call_operand.vmem [shape: f32[2,10,10,64], index: 7, kind: output, shape index: {}]   ;;  %s9036_s5 = inlined_call_operand.vmem [shape: f32[1,64], index: 5, kind: input, shape index: {}]   ;;  %s9037_s6 = inlined_call_operand.vmem [shape: f32[1,64], index: 6, kind: input, shape index: {}]  }
   0x1   :  { %v4656_v0 = vld [vmem:[%s9030_s1 + $0x78] sm:$0xff]  ;;  %v4655_v2 = vld [vmem:[%s9030_s1 + $0x70] sm:$0xff]  ;;  %v4654_v4 = vld [vmem:[%s9030_s1 + $0x68] sm:$0xff] }
   0x2   :  { %v49_v1 = vld [vmem:[%s9030_s1 + $0x38] sm:$0xff]  ;;  %5625 = vmatprep.subr.mxu0 %v4656_v0  ;;  %v48_v3 = vld [vmem:[%s9030_s1 + $0x30] sm:$0xff]  ;;  %v47_v5 = vld [vmem:[%s9030_s1 + $0x28] sm:$0xff] }
   0x3   :  { %5665 = vmatprep.subr.mxu1 %v49_v1  ;;  %5626 = vmatpush3.msra.mxu0 %v4656_v0  ;;  %v4653_v6 = vld [vmem:[%s9030_s1 + $0x60] sm:$0xff]  ;;  %v4652_v8 = vld [vmem:[%s9030_s1 + $0x58] sm:$0xff]  ;;  %v4651_v10 = vld [vmem:[%s9030_s1 + $0x50] sm:$0xff] }
   0x4   :  { %5666 = vmatpush3.msra.mxu1 %v49_v1  ;;  %5627 = vmatprep.subr.mxu0 %v4655_v2  ;;  %v46_v7 = vld [vmem:[%s9030_s1 + $0x20] sm:$0xff]  ;;  %v45_v9 = vld [vmem:[%s9030_s1 + $0x18] sm:$0xff]  ;;  %v44_v11 = vld [vmem:[%s9030_s1 + $0x10] sm:$0xff] }
   0x5   :  { %5667 = vmatprep.subr.mxu1 %v48_v3  ;;  %5628 = vmatpush3.msra.mxu0 %v4655_v2  ;;  %v4650_v12 = vld [vmem:[%s9030_s1 + $0x48] sm:$0xff]  ;;  %v4649_v14 = vld [vmem:[%s9030_s1 + $0x40] sm:$0xff]  ;;  %v6448_v18 = vld [vmem:[%s9031_s0 + $0x11] sm:$0xff] }
   0x6   :  { %5668 = vmatpush3.msra.mxu1 %v48_v3  ;;  %5629 = vmatprep.subr.mxu0 %v4654_v4  ;;  %v43_v13 = vld [vmem:[%s9030_s1 + $0x8] sm:$0xff]  ;;  %v42_v15 = vld [vmem:[%s9030_s1] sm:$0xff]  ;;  %v6453_v19 = vld [vmem:[%s9031_s0 + $0x10] sm:$0xff] }
   0x7   :  { %5669 = vmatprep.subr.mxu1 %v47_v5  ;;  %5630 = vmatpush3.msra.mxu0 %v4654_v4  ;;  %v50_v16 = vld [vmem:[%s9031_s0 + $0x1] sm:$0xff]  ;;  %v4696_v20 = vld [vmem:[%s9030_s1 + $0xb8] sm:$0xff]  ;;  %v4695_v23 = vld [vmem:[%s9030_s1 + $0xb0] sm:$0xff] }
   0x8   :  { %5670 = vmatpush3.msra.mxu1 %v47_v5  ;;  %5631 = vmatprep.subr.mxu0 %v4653_v6  ;;  %v26_v17 = vld [vmem:[%s9031_s0] sm:$0xff]  ;;  %v4736_v24 = vld [vmem:[%s9030_s1 + $0xf8] sm:$0xff]  ;;  %v6490_v26 = vld [vmem:[%s9031_s0 + $0x30] sm:$0xff] }
   0x9   :  { %5671 = vmatprep.subr.mxu1 %v46_v7  ;;  %5632 = vmatpush3.msra.mxu0 %v4653_v6  ;;  %v6462_v21 = vld [vmem:[%s9031_s0 + $0x21] sm:$0xff]  ;;  %v6485_v25 = vld [vmem:[%s9031_s0 + $0x31] sm:$0xff] }
   0xa   :  { %5672 = vmatpush3.msra.mxu1 %v46_v7  ;;  %5633 = vmatprep.subr.mxu0 %v4652_v8  ;;  %v6468_v22 = vld [vmem:[%s9031_s0 + $0x20] sm:$0xff]  ;;  %v4694_v29 = vld [vmem:[%s9030_s1 + $0xa8] sm:$0xff]  ;;  %v6516_v30 = vld [vmem:[%s9031_s0 + $0x51] sm:$0xff] }
   0xb   :  { %5673 = vmatprep.subr.mxu1 %v45_v9  ;;  %5634 = vmatpush3.msra.mxu0 %v4652_v8  ;;  %v6497_v27 = vld [vmem:[%s9031_s0 + $0x41] sm:$0xff]  ;;  %v6521_v31 = vld [vmem:[%s9031_s0 + $0x50] sm:$0xff]  ;;  %v4692_v40 = vld [vmem:[%s9030_s1 + $0x98] sm:$0xff] }
   0xc   :  { %5674 = vmatpush3.msra.mxu1 %v45_v9  ;;  %5635 = vmatprep.subr.mxu0 %v4651_v10  ;;  %v6502_v28 = vld [vmem:[%s9031_s0 + $0x40] sm:$0xff]  ;;  %v4735_v35 = vld [vmem:[%s9030_s1 + $0xf0] sm:$0xff]  ;;  %v4734_v41 = vld [vmem:[%s9030_s1 + $0xe8] sm:$0xff] }
   0xd   :  { %5675 = vmatprep.subr.mxu1 %v44_v11  ;;  %5636 = vmatpush3.msra.mxu0 %v4651_v10  ;;  %v6528_v32 = vld [vmem:[%s9031_s0 + $0x61] sm:$0xff]  ;;  %v6552_v36 = vld [vmem:[%s9031_s0 + $0x71] sm:$0xff] }
   0xe   :  { %5676 = vmatpush3.msra.mxu1 %v44_v11  ;;  %5637 = vmatprep.subr.mxu0 %v4650_v12  ;;  %v6533_v33 = vld [vmem:[%s9031_s0 + $0x60] sm:$0xff]  ;;  %v6557_v37 = vld [vmem:[%s9031_s0 + $0x70] sm:$0xff]  ;;  %v4690_v52 = vld [vmem:[%s9030_s1 + $0x88] sm:$0xff] }
   0xf   :  { %5677 = vmatprep.subr.mxu1 %v43_v13  ;;  %5638 = vmatpush3.msra.mxu0 %v4650_v12  ;;  %v4693_v34 = vld [vmem:[%s9030_s1 + $0xa0] sm:$0xff]  ;;  %v6580_v42 = vld [vmem:[%s9031_s0 + $0xb1] sm:$0xff]  ;;  %v4730_v62 = vld [vmem:[%s9030_s1 + $0xc8] sm:$0xff] }
  0x10   :  { %5678 = vmatpush3.msra.mxu1 %v43_v13  ;;  %5639 = vmatprep.subr.mxu0 %v4649_v14  ;;  %v58_v38 = vld [vmem:[%s9031_s0 + $0xa1] sm:$0xff]  ;;  %v6585_v43 = vld [vmem:[%s9031_s0 + $0xb0] sm:$0xff]  ;;  %v4732_v53 = vld [vmem:[%s9030_s1 + $0xd8] sm:$0xff] }
  0x11   :  { %5679 = vmatprep.subr.mxu1 %v42_v15  ;;  %5640 = vmatpush3.msra.mxu0 %v4649_v14  ;;  %v34_v39 = vld [vmem:[%s9031_s0 + $0xa0] sm:$0xff]  ;;  %v4691_v46 = vld [vmem:[%s9030_s1 + $0x90] sm:$0xff]  ;;  %v4776_v0 = vld [vmem:[%s9030_s1 + $0x138] sm:$0xff] }
  0x12   :  { %5641 = vmatprep.mubr.msk.f32.mxu0 %vm75_vm0, %v50_v16  ;;  %5680 = vmatpush3.msra.mxu1 %v42_v15  ;;  %v6590_v44 = vld [vmem:[%s9031_s0 + $0xc1] sm:$0xff]  ;;  %v6614_v48 = vld [vmem:[%s9031_s0 + $0xd1] sm:$0xff] }
  0x13   :  { %5681 = vmatprep.mubr.msk.f32.mxu1 %vm75_vm0, %v26_v17  ;;  %5642 = vmatmul.mubr.msk.f32.vlgmr.msra.gmra.mxu0 %vm75_vm0, %v6448_v18  ;;  %v6595_v45 = vld [vmem:[%s9031_s0 + $0xc0] sm:$0xff]  ;;  %v6619_v49 = vld [vmem:[%s9031_s0 + $0xd0] sm:$0xff]  ;;  %v4774_v6 = vld [vmem:[%s9030_s1 + $0x128] sm:$0xff] }
  0x14   :  { %5682 = vmatmul.mubr.msk.f32.vlgmr.msra.gmra.mxu1 %vm75_vm0, %v6453_v19  ;;  %5705 = vmatprep.subr.mxu0 %v4696_v20  ;;  %v4733_v47 = vld [vmem:[%s9030_s1 + $0xe0] sm:$0xff]  ;;  %v6648_v54 = vld [vmem:[%s9031_s0 + $0xf1] sm:$0xff] }
  0x15   :  { %5644 = vmatprep.mubr.msk.f32.mxu0 %vm75_vm0, %v6462_v21  ;;  %5706 = vmatpush3.msra.mxu0 %v4696_v20  ;;  %v6624_v50 = vld [vmem:[%s9031_s0 + $0xe1] sm:$0xff]  ;;  %v6653_v55 = vld [vmem:[%s9031_s0 + $0xf0] sm:$0xff]  ;;  %v4816_v9 = vld [vmem:[%s9030_s1 + $0x178] sm:$0xff] }
  0x16   :  { %5684 = vmatprep.mubr.msk.f32.mxu1 %vm75_vm0, %v6468_v22  ;;  %5707 = vmatprep.subr.mxu0 %v4695_v23  ;;  %v6629_v51 = vld [vmem:[%s9031_s0 + $0xe0] sm:$0xff]  ;;  %v4731_v59 = vld [vmem:[%s9030_s1 + $0xd0] sm:$0xff]  ;;  %v4772_v12 = vld [vmem:[%s9030_s1 + $0x118] sm:$0xff] }
  0x17   :  { %5745 = vmatprep.subr.mxu1 %v4736_v24  ;;  %5645 = vmatmul.mubr.msk.f32.gmra.mxu0 %vm75_vm0, %v6485_v25  ;;  %v6658_v56 = vld [vmem:[%s9031_s0 + $0x101] sm:$0xff]  ;;  %v6682_v60 = vld [vmem:[%s9031_s0 + $0x111] sm:$0xff] }
  0x18   :  { %5685 = vmatmul.mubr.msk.f32.gmra.mxu1 %vm75_vm0, %v6490_v26  ;;  %5708 = vmatpush3.msra.mxu0 %v4695_v23  ;;  %v6663_v57 = vld [vmem:[%s9031_s0 + $0x100] sm:$0xff]  ;;  %v6687_v61 = vld [vmem:[%s9031_s0 + $0x110] sm:$0xff] }
  0x19   :  { %5647 = vmatprep.mubr.msk.f32.mxu0 %vm75_vm0, %v6497_v27  ;;  %5687 = vmatprep.mubr.msk.f32.mxu1 %vm75_vm0, %v6502_v28  ;;  %v4689_v58 = vld [vmem:[%s9030_s1 + $0x80] sm:$0xff]  ;;  %v6709_v2 = vld [vmem:[%s9031_s0 + $0x12] sm:$0xff] }
  0x1a   :  { %5709 = vmatprep.subr.mxu0 %v4694_v29  ;;  %5746 = vmatpush3.msra.mxu1 %v4736_v24  ;;  %v462_v63 = vld [vmem:[%s9031_s0 + $0x2] sm:$0xff]  ;;  %v4775_v4 = vld [vmem:[%s9030_s1 + $0x130] sm:$0xff] }
  0x1b   :  { %5710 = vmatpush3.msra.mxu0 %v4694_v29  ;;  %5747 = vmatprep.subr.mxu1 %v4735_v35  ;;  %v4729_v1 = vld [vmem:[%s9030_s1 + $0xc0] sm:$0xff]  ;;  %v6728_v5 = vld [vmem:[%s9031_s0 + $0x32] sm:$0xff]  ;;  %v4770_v24 = vld [vmem:[%s9030_s1 + $0x108] sm:$0xff] }
  0x1c   :  { %5648 = vmatmul.mubr.msk.f32.gmra.mxu0 %vm75_vm0, %v6516_v30  ;;  %5688 = vmatmul.mubr.msk.f32.gmra.mxu1 %vm75_vm0, %v6521_v31  ;;  %v6716_v3 = vld [vmem:[%s9031_s0 + $0x22] sm:$0xff]  ;;  %v6757_v10 = vld [vmem:[%s9031_s0 + $0x52] sm:$0xff] }
  0x1d   :  { %5650 = vmatprep.mubr.msk.f32.mxu0 %vm75_vm0, %v6528_v32  ;;  %5690 = vmatprep.mubr.msk.f32.mxu1 %vm75_vm0, %v6533_v33  ;;  %v6738_v7 = vld [vmem:[%s9031_s0 + $0x42] sm:$0xff]  ;;  %v4815_v13 = vld [vmem:[%s9030_s1 + $0x170] sm:$0xff] }
  0x1e   :  { %5711 = vmatprep.subr.mxu0 %v4693_v34  ;;  %5748 = vmatpush3.msra.mxu1 %v4735_v35  ;;  %v4773_v8 = vld [vmem:[%s9030_s1 + $0x120] sm:$0xff]  ;;  %v6781_v14 = vld [vmem:[%s9031_s0 + $0x72] sm:$0xff] }
  0x1f   :  { %5712 = vmatpush3.msra.mxu0 %v4693_v34  ;;  %5749 = vmatprep.subr.mxu1 %v4734_v41  ;;  %v6764_v11 = vld [vmem:[%s9031_s0 + $0x62] sm:$0xff]  ;;  %v4771_v17 = vld [vmem:[%s9030_s1 + $0x110] sm:$0xff] }
  0x20   :  { %5651 = vmatmul.mubr.msk.f32.gmra.mxu0 %vm75_vm0, %v6552_v36  ;;  %5691 = vmatmul.mubr.msk.f32.gmra.mxu1 %vm75_vm0, %v6557_v37  ;;  %v6788_v15 = vld [vmem:[%s9031_s0 + $0x80] sm:$0xff]  ;;  %v6807_v20 = vld [vmem:[%s9031_s0 + $0xb2] sm:$0xff] }
  0x21   :  { %5653 = vmatprep.mubr.msk.f32.mxu0 %vm75_vm0, %v58_v38  ;;  %5693 = vmatprep.mubr.msk.f32.mxu1 %vm75_vm0, %v34_v39  ;;  %v470_v16 = vld [vmem:[%s9031_s0 + $0xa2] sm:$0xff]  ;;  %v6831_v34 = vld [vmem:[%s9031_s0 + $0xd2] sm:$0xff] }
  0x22   :  { %5713 = vmatprep.subr.mxu0 %v4692_v40  ;;  %5750 = vmatpush3.msra.mxu1 %v4734_v41  ;;  %v6814_v23 = vld [vmem:[%s9031_s0 + $0xc2] sm:$0xff]  ;;  %v4812_v38 = vld [vmem:[%s9030_s1 + $0x158] sm:$0xff] }
  0x23   :  { %5714 = vmatpush3.msra.mxu0 %v4692_v40  ;;  %5751 = vmatprep.subr.mxu1 %v4733_v47  ;;  %v4813_v29 = vld [vmem:[%s9030_s1 + $0x160] sm:$0xff]  ;;  %v6855_v40 = vld [vmem:[%s9031_s0 + $0xf2] sm:$0xff] }
  0x24   :  { %5654 = vmatmul.mubr.msk.f32.gmra.mxu0 %vm75_vm0, %v6580_v42  ;;  %5694 = vmatmul.mubr.msk.f32.gmra.mxu1 %vm75_vm0, %v6585_v43  ;;  %v6838_v35 = vld [vmem:[%s9031_s0 + $0xe2] sm:$0xff] }
  0x25   :  { %5656 = vmatprep.mubr.msk.f32.mxu0 %vm75_vm0, %v6590_v44  ;;  %5696 = vmatprep.mubr.msk.f32.mxu1 %vm75_vm0, %v6595_v45  ;;  %v4769_v39 = vld [vmem:[%s9030_s1 + $0x100] sm:$0xff] }
  0x26   :  { %5715 = vmatprep.subr.mxu0 %v4691_v46  ;;  %5752 = vmatpush3.msra.mxu1 %v4733_v47  ;;  %v6862_v41 = vld [vmem:[%s9031_s0 + $0x102] sm:$0xff] }
  0x27   :  { %5716 = vmatpush3.msra.mxu0 %v4691_v46  ;;  %5753 = vmatprep.subr.mxu1 %v4732_v53  ;;  %v6876_v46 = vld [vmem:[%s9031_s0 + $0x112] sm:$0xff]  ;;  %v4810_v47 = vld [vmem:[%s9030_s1 + $0x148] sm:$0xff] }
  0x28   :  { %5657 = vmatmul.mubr.msk.f32.gmra.mxu0 %vm75_vm0, %v6614_v48  ;;  %5697 = vmatmul.mubr.msk.f32.gmra.mxu1 %vm75_vm0, %v6619_v49 }
  0x29   :  { %5659 = vmatprep.mubr.msk.f32.mxu0 %vm75_vm0, %v6624_v50  ;;  %5699 = vmatprep.mubr.msk.f32.mxu1 %vm75_vm0, %v6629_v51 }
  0x2a   :  { %5717 = vmatprep.subr.mxu0 %v4690_v52  ;;  %5754 = vmatpush3.msra.mxu1 %v4732_v53  ;;  %v4856_v53 = vld [vmem:[%s9030_s1 + $0x1b8] sm:$0xff] }
  0x2b   :  { %5718 = vmatpush3.msra.mxu0 %v4690_v52  ;;  %5755 = vmatprep.subr.mxu1 %v4731_v59  ;;  %v6886_v52 = vld [vmem:[%s9031_s0 + $0x120] sm:$0xff] }
  0x2c   :  { %5660 = vmatmul.mubr.msk.f32.gmra.mxu0 %vm75_vm0, %v6648_v54  ;;  %5700 = vmatmul.mubr.msk.f32.gmra.mxu1 %vm75_vm0, %v6653_v55 }
  0x2d   :  { %5662 = vmatprep.mubr.msk.f32.mxu0 %vm75_vm0, %v6658_v56  ;;  %5702 = vmatprep.mubr.msk.f32.mxu1 %vm75_vm0, %v6663_v57 }
  0x2e   :  { %5719 = vmatprep.subr.mxu0 %v4689_v58  ;;  %5756 = vmatpush3.msra.mxu1 %v4731_v59  ;;  %v4855_v59 = vld [vmem:[%s9030_s1 + $0x1b0] sm:$0xff] }
  0x2f   :  { %5720 = vmatpush3.msra.mxu0 %v4689_v58  ;;  %5757 = vmatprep.subr.mxu1 %v4730_v62  ;;  %v4809_v58 = vld [vmem:[%s9030_s1 + $0x140] sm:$0xff] }
  0x30   :  { %5663 = vmatmul.mubr.msk.f32.gmra.mxu0 %vm75_vm0, %v6682_v60  ;;  %5703 = vmatmul.mubr.msk.f32.gmra.mxu1 %vm75_vm0, %v6687_v61 }
  0x31   :  { %5721 = vmatprep.mubr.msk.f32.mxu0 %vm75_vm0, %v462_v63  ;;  %5758 = vmatpush3.msra.mxu1 %v4730_v62  ;;  %v4853_v62 = vld [vmem:[%s9030_s1 + $0x1a0] sm:$0xff]  ;;  %v4896_v63 = vld [vmem:[%s9030_s1 + $0x1f8] sm:$0xff] }
  0x32   :  { %5785 = vmatprep.subr.mxu0 %v4776_v0  ;;  %5759 = vmatprep.subr.mxu1 %v4729_v1 }
  0x33   :  { %5761 = vmatprep.mubr.msk.f32.mxu1 %vm75_vm0, %v6453_v19  ;;  %5760 = vmatpush3.msra.mxu1 %v4729_v1  ;;  %v4814_v19 = vld [vmem:[%s9030_s1 + $0x168] sm:$0xff]  ;;  %v4895_v1 = vld [vmem:[%s9030_s1 + $0x1f0] sm:$0xff] }
  0x34   :  { %5722 = vmatmul.mubr.msk.f32.vlgmr.msra.gmra.mxu0 %vm75_vm0, %v6709_v2  ;;  %5762 = vmatmul.mubr.msk.f32.vlgmr.msra.gmra.mxu1 %vm75_vm0, %v6468_v22 }
  0x35   :  { %5786 = vmatpush3.msra.mxu0 %v4776_v0  ;;  %5724 = vmatprep.mubr.msk.f32.mxu0 %vm75_vm0, %v6716_v3  ;;  %v4852_v0 = vld [vmem:[%s9030_s1 + $0x198] sm:$0xff] }
  0x36   :  { %5787 = vmatprep.subr.mxu0 %v4775_v4  ;;  %5764 = vmatprep.mubr.msk.f32.mxu1 %vm75_vm0, %v6490_v26 }
  0x37   :  { %5788 = vmatpush3.msra.mxu0 %v4775_v4  ;;  %5825 = vmatprep.subr.mxu1 %v4816_v9  ;;  %v6952_v4 = vld [vmem:[%s9031_s0 + $0x82] sm:$0xff] }
  0x38   :  { %5725 = vmatmul.mubr.msk.f32.gmra.mxu0 %vm75_vm0, %v6728_v5  ;;  %5789 = vmatprep.subr.mxu0 %v4774_v6 }
  0x39   :  { %5765 = vmatmul.mubr.msk.f32.gmra.mxu1 %vm75_vm0, %v6502_v28  ;;  %5727 = vmatprep.mubr.msk.f32.mxu0 %vm75_vm0, %v6738_v7 }
  0x3a   :  { %5767 = vmatprep.mubr.msk.f32.mxu1 %vm75_vm0, %v6521_v31  ;;  %5790 = vmatpush3.msra.mxu0 %v4774_v6  ;;  %v4851_v6 = vld [vmem:[%s9030_s1 + $0x190] sm:$0xff] }
  0x3b   :  { %5791 = vmatprep.subr.mxu0 %v4773_v8  ;;  %5826 = vmatpush3.msra.mxu1 %v4816_v9  ;;  %v4850_v9 = vld [vmem:[%s9030_s1 + $0x188] sm:$0xff] }
  0x3c   :  { %5728 = vmatmul.mubr.msk.f32.gmra.mxu0 %vm75_vm0, %v6757_v10  ;;  %5827 = vmatprep.subr.mxu1 %v4815_v13 }
  0x3d   :  { %5768 = vmatmul.mubr.msk.f32.gmra.mxu1 %vm75_vm0, %v6533_v33  ;;  %5730 = vmatprep.mubr.msk.f32.mxu0 %vm75_vm0, %v6764_v11 }
  0x3e   :  { %5770 = vmatprep.mubr.msk.f32.mxu1 %vm75_vm0, %v6557_v37  ;;  %5792 = vmatpush3.msra.mxu0 %v4773_v8  ;;  %v4894_v8 = vld [vmem:[%s9030_s1 + $0x1e8] sm:$0xff] }
  0x3f   :  { %5793 = vmatprep.subr.mxu0 %v4772_v12  ;;  %5828 = vmatpush3.msra.mxu1 %v4815_v13  ;;  %v4849_v13 = vld [vmem:[%s9030_s1 + $0x180] sm:$0xff] }
  0x40   :  { %5731 = vmatmul.mubr.msk.f32.gmra.mxu0 %vm75_vm0, %v6781_v14  ;;  %5829 = vmatprep.subr.mxu1 %v4814_v19 }
  0x41   :  { %5771 = vmatmul.mubr.msk.f32.gmra.mxu1 %vm75_vm0, %v6788_v15  ;;  %5733 = vmatprep.mubr.msk.f32.mxu0 %vm75_vm0, %v470_v16  ;;  %v4891_v16 = vld [vmem:[%s9030_s1 + $0x1d0] sm:$0xff] }
  0x42   :  { %5773 = vmatprep.mubr.msk.f32.mxu1 %vm75_vm0, %v6585_v43  ;;  %5794 = vmatpush3.msra.mxu0 %v4772_v12  ;;  %v4811_v43 = vld [vmem:[%s9030_s1 + $0x150] sm:$0xff]  ;;  %v4893_v12 = vld [vmem:[%s9030_s1 + $0x1e0] sm:$0xff] }
  0x43   :  { %5795 = vmatprep.subr.mxu0 %v4771_v17  ;;  %5830 = vmatpush3.msra.mxu1 %v4814_v19  ;;  %v4890_v19 = vld [vmem:[%s9030_s1 + $0x1c8] sm:$0xff] }
  0x44   :  { %5734 = vmatmul.mubr.msk.f32.gmra.mxu0 %vm75_vm0, %v6807_v20  ;;  %5831 = vmatprep.subr.mxu1 %v4813_v29 }
  0x45   :  { %5774 = vmatmul.mubr.msk.f32.gmra.mxu1 %vm75_vm0, %v6595_v45  ;;  %5736 = vmatprep.mubr.msk.f32.mxu0 %vm75_vm0, %v6814_v23 }
  0x46   :  { %5776 = vmatprep.mubr.msk.f32.mxu1 %vm75_vm0, %v6619_v49  ;;  %5796 = vmatpush3.msra.mxu0 %v4771_v17  ;;  %v7008_v17 = vld [vmem:[%s9031_s0 + $0x121] sm:$0xff] }
  0x47   :  { %5797 = vmatprep.subr.mxu0 %v4770_v24  ;;  %5832 = vmatpush3.msra.mxu1 %v4813_v29  ;;  %v4889_v29 = vld [vmem:[%s9030_s1 + $0x1c0] sm:$0xff] }
  0x48   :  { %5737 = vmatmul.mubr.msk.f32.gmra.mxu0 %vm75_vm0, %v6831_v34  ;;  %5833 = vmatprep.subr.mxu1 %v4812_v38 }
  0x49   :  { %5777 = vmatmul.mubr.msk.f32.gmra.mxu1 %vm75_vm0, %v6629_v51  ;;  %5739 = vmatprep.mubr.msk.f32.mxu0 %vm75_vm0, %v6838_v35 }
  0x4a   :  { %5779 = vmatprep.mubr.msk.f32.mxu1 %vm75_vm0, %v6653_v55  ;;  %5798 = vmatpush3.msra.mxu0 %v4770_v24  ;;  %v4936_v24 = vld [vmem:[%s9030_s1 + $0x238] sm:$0xff] }
  0x4b   :  { %5799 = vmatprep.subr.mxu0 %v4769_v39  ;;  %5834 = vmatpush3.msra.mxu1 %v4812_v38  ;;  %v4935_v38 = vld [vmem:[%s9030_s1 + $0x230] sm:$0xff] }
  0x4c   :  { %5740 = vmatmul.mubr.msk.f32.gmra.mxu0 %vm75_vm0, %v6855_v40  ;;  %5835 = vmatprep.subr.mxu1 %v4811_v43 }
  0x4d   :  { %5780 = vmatmul.mubr.msk.f32.gmra.mxu1 %vm75_vm0, %v6663_v57  ;;  %5742 = vmatprep.mubr.msk.f32.mxu0 %vm75_vm0, %v6862_v41 }
  0x4e   :  { %5782 = vmatprep.mubr.msk.f32.mxu1 %vm75_vm0, %v6687_v61  ;;  %5800 = vmatpush3.msra.mxu0 %v4769_v39 }
  0x4f   :  { %5836 = vmatpush3.msra.mxu1 %v4811_v43  ;;  %5865 = vmatprep.subr.mxu0 %v4856_v53 }
  0x50   :  { %5743 = vmatmul.mubr.msk.f32.gmra.mxu0 %vm75_vm0, %v6876_v46  ;;  %5837 = vmatprep.subr.mxu1 %v4810_v47 }
  0x51   :  { %5783 = vmatmul.mubr.msk.f32.gmra.mxu1 %vm75_vm0, %v6886_v52  ;;  %5801 = vmatprep.mubr.msk.f32.mxu0 %vm75_vm0, %v6448_v18  ;;  %v4854_v18 = vld [vmem:[%s9030_s1 + $0x1a8] sm:$0xff] }
  0x52   :  { %5838 = vmatpush3.msra.mxu1 %v4810_v47  ;;  %5841 = vmatprep.mubr.msk.f32.mxu1 %vm75_vm0, %v6709_v2  ;;  %v6945_v2 = vld [vmem:[%s9031_s0 + $0x81] sm:$0xff] }
  0x53   :  { %5839 = vmatprep.subr.mxu1 %v4809_v58 }
  0x54   :  { %5802 = vmatmul.mubr.msk.f32.vlgmr.msra.gmra.mxu0 %vm75_vm0, %v6462_v21  ;;  %5840 = vmatpush3.msra.mxu1 %v4809_v58 }
  0x55   :  { %5866 = vmatpush3.msra.mxu0 %v4856_v53  ;;  %5842 = vmatmul.mubr.msk.f32.vlgmr.msra.gmra.mxu1 %vm75_vm0, %v6716_v3 }
  0x56   :  { %5804 = vmatprep.mubr.msk.f32.mxu0 %vm75_vm0, %v6485_v25  ;;  %5867 = vmatprep.subr.mxu0 %v4855_v59 }
  0x57   :  { %5844 = vmatprep.mubr.msk.f32.mxu1 %vm75_vm0, %v6728_v5  ;;  %5868 = vmatpush3.msra.mxu0 %v4855_v59 }
  0x58   :  { %5805 = vmatmul.mubr.msk.f32.gmra.mxu0 %vm75_vm0, %v6497_v27  ;;  %5869 = vmatprep.subr.mxu0 %v4854_v18 }
  0x59   :  { %5845 = vmatmul.mubr.msk.f32.gmra.mxu1 %vm75_vm0, %v6738_v7  ;;  %5807 = vmatprep.mubr.msk.f32.mxu0 %vm75_vm0, %v6516_v30 }
  0x5a   :  { %5847 = vmatprep.mubr.msk.f32.mxu1 %vm75_vm0, %v6757_v10  ;;  %5870 = vmatpush3.msra.mxu0 %v4854_v18 }
  0x5b   :  { %5871 = vmatprep.subr.mxu0 %v4853_v62  ;;  %5905 = vmatprep.subr.mxu1 %v4896_v63 }
  0x5c   :  { %5808 = vmatmul.mubr.msk.f32.gmra.mxu0 %vm75_vm0, %v6528_v32  ;;  %5906 = vmatpush3.msra.mxu1 %v4896_v63 }
  0x5d   :  { %5848 = vmatmul.mubr.msk.f32.gmra.mxu1 %vm75_vm0, %v6764_v11  ;;  %5810 = vmatprep.mubr.msk.f32.mxu0 %vm75_vm0, %v6552_v36 }
  0x5e   :  { %5850 = vmatprep.mubr.msk.f32.mxu1 %vm75_vm0, %v6781_v14  ;;  %5872 = vmatpush3.msra.mxu0 %v4853_v62 }
  0x5f   :  { %5873 = vmatprep.subr.mxu0 %v4852_v0  ;;  %5907 = vmatprep.subr.mxu1 %v4895_v1 }
  0x60   :  { %5811 = vmatmul.mubr.msk.f32.gmra.mxu0 %vm75_vm0, %v6945_v2  ;;  %5908 = vmatpush3.msra.mxu1 %v4895_v1 }
  0x61   :  { %5851 = vmatmul.mubr.msk.f32.gmra.mxu1 %vm75_vm0, %v6952_v4  ;;  %5813 = vmatprep.mubr.msk.f32.mxu0 %vm75_vm0, %v6580_v42  ;;  %v4892_v42 = vld [vmem:[%s9030_s1 + $0x1d8] sm:$0xff] }
  0x62   :  { %5853 = vmatprep.mubr.msk.f32.mxu1 %vm75_vm0, %v6807_v20  ;;  %5874 = vmatpush3.msra.mxu0 %v4852_v0  ;;  %v7018_v20 = vld [vmem:[%s9031_s0 + $0x122] sm:$0xff] }
  0x63   :  { %5875 = vmatprep.subr.mxu0 %v4851_v6  ;;  %5909 = vmatprep.subr.mxu1 %v4894_v8 }
  0x64   :  { %5814 = vmatmul.mubr.msk.f32.gmra.mxu0 %vm75_vm0, %v6590_v44  ;;  %5910 = vmatpush3.msra.mxu1 %v4894_v8 }
  0x65   :  { %5854 = vmatmul.mubr.msk.f32.gmra.mxu1 %vm75_vm0, %v6814_v23  ;;  %5816 = vmatprep.mubr.msk.f32.mxu0 %vm75_vm0, %v6614_v48 }
  0x66   :  { %5856 = vmatprep.mubr.msk.f32.mxu1 %vm75_vm0, %v6831_v34  ;;  %5876 = vmatpush3.msra.mxu0 %v4851_v6 }
  0x67   :  { %5877 = vmatprep.subr.mxu0 %v4850_v9  ;;  %5911 = vmatprep.subr.mxu1 %v4893_v12 }
  0x68   :  { %5817 = vmatmul.mubr.msk.f32.gmra.mxu0 %vm75_vm0, %v6624_v50  ;;  %5912 = vmatpush3.msra.mxu1 %v4893_v12 }
  0x69   :  { %5857 = vmatmul.mubr.msk.f32.gmra.mxu1 %vm75_vm0, %v6838_v35  ;;  %5819 = vmatprep.mubr.msk.f32.mxu0 %vm75_vm0, %v6648_v54 }
  0x6a   :  { %5859 = vmatprep.mubr.msk.f32.mxu1 %vm75_vm0, %v6855_v40  ;;  %5878 = vmatpush3.msra.mxu0 %v4850_v9 }
  0x6b   :  { %5913 = vmatprep.subr.mxu1 %v4892_v42  ;;  %5879 = vmatprep.subr.mxu0 %v4849_v13 }
  0x6c   :  { %5820 = vmatmul.mubr.msk.f32.gmra.mxu0 %vm75_vm0, %v6658_v56  ;;  %5914 = vmatpush3.msra.mxu1 %v4892_v42 }
  0x6d   :  { %5860 = vmatmul.mubr.msk.f32.gmra.mxu1 %vm75_vm0, %v6862_v41  ;;  %5822 = vmatprep.mubr.msk.f32.mxu0 %vm75_vm0, %v6682_v60 }
  0x6e   :  { %5915 = vmatprep.subr.mxu1 %v4891_v16  ;;  %5862 = vmatprep.mubr.msk.f32.mxu1 %vm75_vm0, %v6876_v46 }
  0x6f   :  { %5880 = vmatpush3.msra.mxu0 %v4849_v13  ;;  %5916 = vmatpush3.msra.mxu1 %v4891_v16 }
  0x70   :  { %5823 = vmatmul.mubr.msk.f32.gmra.mxu0 %vm75_vm0, %v7008_v17  ;;  %5917 = vmatprep.subr.mxu1 %v4890_v19 }
  0x71   :  { %5863 = vmatmul.mubr.msk.f32.gmra.mxu1 %vm75_vm0, %v7018_v20  ;;  %5881 = vmatprep.mubr.msk.f32.mxu0 %vm75_vm0, %v6468_v22  ;;  %v4934_v22 = vld [vmem:[%s9030_s1 + $0x228] sm:$0xff] }
  0x72   :  { %5918 = vmatpush3.msra.mxu1 %v4890_v19  ;;  %5945 = vmatprep.subr.mxu0 %v4936_v24 }
  0x73   :  { %5919 = vmatprep.subr.mxu1 %v4889_v29  ;;  %5921 = vmatprep.mubr.msk.f32.mxu1 %vm75_vm0, %v6462_v21  ;;  %v4933_v21 = vld [vmem:[%s9030_s1 + $0x220] sm:$0xff] }
  0x74   :  { %5882 = vmatmul.mubr.msk.f32.vlgmr.msra.gmra.mxu0 %vm75_vm0, %v6490_v26  ;;  %5920 = vmatpush3.msra.mxu1 %v4889_v29  ;;  %v4840_v26 = vld [vmem:[%s9031_s0 + $0x90] sm:$0xff] }
  0x75   :  { %5946 = vmatpush3.msra.mxu0 %v4936_v24  ;;  %5922 = vmatmul.mubr.msk.f32.vlgmr.msra.gmra.mxu1 %vm75_vm0, %v6485_v25  ;;  %v4932_v25 = vld [vmem:[%s9030_s1 + $0x218] sm:$0xff] }
  0x76   :  { %5884 = vmatprep.mubr.msk.f32.mxu0 %vm75_vm0, %v6502_v28  ;;  %5947 = vmatprep.subr.mxu0 %v4935_v38  ;;  %v4931_v28 = vld [vmem:[%s9030_s1 + $0x210] sm:$0xff] }
  0x77   :  { %5924 = vmatprep.mubr.msk.f32.mxu1 %vm75_vm0, %v6497_v27  ;;  %5948 = vmatpush3.msra.mxu0 %v4935_v38  ;;  %v4880_v27 = vld [vmem:[%s9031_s0 + $0x91] sm:$0xff] }
  0x78   :  { %5885 = vmatmul.mubr.msk.f32.gmra.mxu0 %vm75_vm0, %v6521_v31  ;;  %5949 = vmatprep.subr.mxu0 %v4934_v22  ;;  %v4929_v31 = vld [vmem:[%s9030_s1 + $0x200] sm:$0xff] }
  0x79   :  { %5925 = vmatmul.mubr.msk.f32.gmra.mxu1 %vm75_vm0, %v6516_v30  ;;  %5887 = vmatprep.mubr.msk.f32.mxu0 %vm75_vm0, %v6533_v33  ;;  %v4930_v30 = vld [vmem:[%s9030_s1 + $0x208] sm:$0xff]  ;;  %v4888_v33 = vld [vmem:[%s9031_s0 + $0x131] sm:$0xff] }
  0x7a   :  { %5927 = vmatprep.mubr.msk.f32.mxu1 %vm75_vm0, %v6528_v32  ;;  %5950 = vmatpush3.msra.mxu0 %v4934_v22  ;;  %v4848_v32 = vld [vmem:[%s9031_s0 + $0x130] sm:$0xff] }
  0x7b   :  { %5951 = vmatprep.subr.mxu0 %v4933_v21 }
  0x7c   :  { %5888 = vmatmul.mubr.msk.f32.gmra.mxu0 %vm75_vm0, %v6557_v37  ;;  %v4928_v37 = vld [vmem:[%s9031_s0 + $0x132] sm:$0xff] }
  0x7d   :  { %5928 = vmatmul.mubr.msk.f32.gmra.mxu1 %vm75_vm0, %v6552_v36  ;;  %5890 = vmatprep.mubr.msk.f32.mxu0 %vm75_vm0, %v6788_v15  ;;  %v4920_v36 = vld [vmem:[%s9031_s0 + $0x92] sm:$0xff] }
  0x7e   :  { %5930 = vmatprep.mubr.msk.f32.mxu1 %vm75_vm0, %v6945_v2  ;;  %5952 = vmatpush3.msra.mxu0 %v4933_v21 }
  0x7f   :  { %5953 = vmatprep.subr.mxu0 %v4932_v25 }
  0x80   :  { %5891 = vmatmul.mubr.msk.f32.gmra.mxu0 %vm75_vm0, %v4840_v26 }
  0x81   :  { %5931 = vmatmul.mubr.msk.f32.gmra.mxu1 %vm75_vm0, %v4880_v27  ;;  %5893 = vmatprep.mubr.msk.f32.mxu0 %vm75_vm0, %v6595_v45 }
  0x82   :  { %5933 = vmatprep.mubr.msk.f32.mxu1 %vm75_vm0, %v6590_v44  ;;  %5954 = vmatpush3.msra.mxu0 %v4932_v25 }
  0x83   :  { %5955 = vmatprep.subr.mxu0 %v4931_v28 }
  0x84   :  { %5894 = vmatmul.mubr.msk.f32.gmra.mxu0 %vm75_vm0, %v6619_v49 }
  0x85   :  { %5934 = vmatmul.mubr.msk.f32.gmra.mxu1 %vm75_vm0, %v6614_v48  ;;  %5896 = vmatprep.mubr.msk.f32.mxu0 %vm75_vm0, %v6629_v51 }
  0x86   :  { %5936 = vmatprep.mubr.msk.f32.mxu1 %vm75_vm0, %v6624_v50  ;;  %5956 = vmatpush3.msra.mxu0 %v4931_v28 }
  0x87   :  { %5957 = vmatprep.subr.mxu0 %v4930_v30 }
  0x88   :  { %5897 = vmatmul.mubr.msk.f32.gmra.mxu0 %vm75_vm0, %v6653_v55 }
  0x89   :  { %5937 = vmatmul.mubr.msk.f32.gmra.mxu1 %vm75_vm0, %v6648_v54  ;;  %5899 = vmatprep.mubr.msk.f32.mxu0 %vm75_vm0, %v6663_v57 }
  0x8a   :  { %5939 = vmatprep.mubr.msk.f32.mxu1 %vm75_vm0, %v6658_v56  ;;  %5958 = vmatpush3.msra.mxu0 %v4930_v30 }
  0x8b   :  { %5959 = vmatprep.subr.mxu0 %v4929_v31 }
  0x8c   :  { %5900 = vmatmul.mubr.msk.f32.gmra.mxu0 %vm75_vm0, %v6687_v61 }
  0x8d   :  { %5940 = vmatmul.mubr.msk.f32.gmra.mxu1 %vm75_vm0, %v6682_v60  ;;  %5902 = vmatprep.mubr.msk.f32.mxu0 %vm75_vm0, %v6886_v52 }
  0x8e   :  { %5942 = vmatprep.mubr.msk.f32.mxu1 %vm75_vm0, %v7008_v17  ;;  %5960 = vmatpush3.msra.mxu0 %v4929_v31 }
  0x90   :  { %5903 = vmatmul.mubr.msk.f32.gmra.mxu0 %vm75_vm0, %v4848_v32 }
  0x91   :  { %5943 = vmatmul.mubr.msk.f32.gmra.mxu1 %vm75_vm0, %v4888_v33  ;;  %5961 = vmatprep.mubr.msk.f32.mxu0 %vm75_vm0, %v6716_v3 }
  0x94   :  { %5962 = vmatmul.mubr.msk.f32.vlgmr.msra.gmra.mxu0 %vm75_vm0, %v6728_v5 }
  0x95   :  { %5964 = vmatprep.mubr.msk.f32.mxu0 %vm75_vm0, %v6738_v7 }
  0x98   :  { %5965 = vmatmul.mubr.msk.f32.gmra.mxu0 %vm75_vm0, %v6757_v10 }
  0x99   :  { %5967 = vmatprep.mubr.msk.f32.mxu0 %vm75_vm0, %v6764_v11 }
  0x9c   :  { %5968 = vmatmul.mubr.msk.f32.gmra.mxu0 %vm75_vm0, %v6781_v14 }
  0x9d   :  { %5970 = vmatprep.mubr.msk.f32.mxu0 %vm75_vm0, %v6952_v4 }
  0xa0   :  { %5971 = vmatmul.mubr.msk.f32.gmra.mxu0 %vm75_vm0, %v4920_v36 }
  0xa1   :  { %5973 = vmatprep.mubr.msk.f32.mxu0 %vm75_vm0, %v6814_v23 }
  0xa4   :  { %5974 = vmatmul.mubr.msk.f32.gmra.mxu0 %vm75_vm0, %v6831_v34 }
  0xa5   :  { %5976 = vmatprep.mubr.msk.f32.mxu0 %vm75_vm0, %v6838_v35 }
  0xa8   :  { %5977 = vmatmul.mubr.msk.f32.gmra.mxu0 %vm75_vm0, %v6855_v40 }
  0xa9   :  { %5979 = vmatprep.mubr.msk.f32.mxu0 %vm75_vm0, %v6862_v41 }
  0xac   :  { %5980 = vmatmul.mubr.msk.f32.gmra.mxu0 %vm75_vm0, %v6876_v46 }
  0xad   :  { %5982 = vmatprep.mubr.msk.f32.mxu0 %vm75_vm0, %v7018_v20 }
  0xb0   :  { %5983 = vmatmul.mubr.msk.f32.gmra.mxu0 %vm75_vm0, %v4928_v37 }
  0xd3   :  { %v5643_v44 = vpop.f32.mrf.mxu0 }
  0xd4   :  { %v5683_v45 = vpop.f32.mrf.mxu1 }
  0xd5   :  { %v389_v48 = vadd.f32 %v5683_v45, %v5643_v44  ;;  %v7159_v49 = vpop.f32.mrf.mxu0 }
  0xd6   :  { %v7161_v50 = vpop.f32.mrf.mxu1 }
  0xd7   :  { %v5646_v51 = vpop.f32.mrf.mxu0 }
  0xd8   :  { %v5686_v54 = vpop.f32.mrf.mxu1 }
  0xd9   :  { %v399_v55 = vadd.f32 %v5686_v54, %v5646_v51  ;;  %v7163_v56 = vpop.f32.mrf.mxu0 }
  0xda   :  { %v7165_v57 = vpop.f32.mrf.mxu1 }
  0xdc   :  { %v5649_v60 = vpop.f32.mrf.mxu0  ;;  %v5689_v61 = vpop.f32.mrf.mxu1 }
  0xdd   :  { %v409_v3 = vadd.f32 %v5689_v61, %v5649_v60 }
  0xde   :  { %v7167_v5 = vpop.f32.mrf.mxu0  ;;  %v7169_v7 = vpop.f32.mrf.mxu1 }
  0xe0   :  { %v5652_v10 = vpop.f32.mrf.mxu0  ;;  %v5692_v11 = vpop.f32.mrf.mxu1 }
  0xe1   :  { %v419_v14 = vadd.f32 %v5692_v11, %v5652_v10 }
  0xe2   :  { %v7171_v15 = vpop.f32.mrf.mxu0  ;;  %v7173_v23 = vpop.f32.mrf.mxu1 }
  0xe4   :  { %v5655_v34 = vpop.f32.mrf.mxu0  ;;  %v5695_v35 = vpop.f32.mrf.mxu1 }
  0xe5   :  { %v429_v39 = vadd.f32 %v5695_v35, %v5655_v34 }
  0xe6   :  { %v7175_v40 = vpop.f32.mrf.mxu0  ;;  %v7177_v41 = vpop.f32.mrf.mxu1 }
  0xe8   :  { %v5658_v43 = vpop.f32.mrf.mxu0  ;;  %v5698_v46 = vpop.f32.mrf.mxu1 }
  0xe9   :  { %v439_v47 = vadd.f32 %v5698_v46, %v5658_v43 }
  0xea   :  { %v7179_v52 = vpop.f32.mrf.mxu0  ;;  %v7181_v53 = vpop.f32.mrf.mxu1 }
  0xec   :  { %v5661_v58 = vpop.f32.mrf.mxu0  ;;  %v5701_v59 = vpop.f32.mrf.mxu1 }
  0xed   :  { %v449_v18 = vadd.f32 %v5701_v59, %v5661_v58 }
  0xee   :  { %v7183_v62 = vpop.f32.mrf.mxu0  ;;  %v7185_v63 = vpop.f32.mrf.mxu1 }
  0xf0   :  { %v5664_v0 = vpop.f32.mrf.mxu0  ;;  %v5704_v1 = vpop.f32.mrf.mxu1 }
  0xf1   :  { %v459_v2 = vadd.f32 %v5704_v1, %v5664_v0 }
  0xf2   :  { %v7187_v4 = vpop.f32.mrf.mxu0  ;;  %v7189_v6 = vpop.f32.mrf.mxu1 }
  0xf4   :  { %v5723_v8 = vpop.f32.mrf.mxu0  ;;  %v7193_v12 = vpop.f32.mrf.mxu1 }
  0xf5   :  { %v7191_v9 = vadd.f32 %v5723_v8, %v389_v48 }
  0xf6   :  { %v7195_v42 = vpop.f32.mrf.mxu0  ;;  %v7197_v13 = vpop.f32.mrf.mxu1 }
  0xf8   :  { %v5726_v16 = vpop.f32.mrf.mxu0 }
  0xf9   :  { %v7199_v17 = vadd.f32 %v5726_v16, %v399_v55  ;;  %v7201_v19 = vpop.f32.mrf.mxu1 }
  0xfa   :  { %v7203_v20 = vpop.f32.mrf.mxu0 }
  0xfb   :  { %v7205_v24 = vpop.f32.mrf.mxu1 }
  0xfc   :  { %v5729_v29 = vpop.f32.mrf.mxu0 }
  0xfd   :  { %v7207_v38 = vadd.f32 %v5729_v29, %v409_v3  ;;  %v7209_v22 = vpop.f32.mrf.mxu1 }
  0xfe   :  { %v7211_v21 = vpop.f32.mrf.mxu0 }
  0xff   :  { %v7213_v25 = vpop.f32.mrf.mxu1 }
 0x100   :  { %v5732_v26 = vpop.f32.mrf.mxu0 }
 0x101   :  { %v7215_v27 = vadd.f32 %v5732_v26, %v419_v14  ;;  %v7217_v28 = vpop.f32.mrf.mxu1 }
 0x102   :  { %v7219_v30 = vpop.f32.mrf.mxu0 }
 0x103   :  { %v7221_v31 = vpop.f32.mrf.mxu1 }
 0x104   :  { %v5735_v32 = vpop.f32.mrf.mxu0 }
 0x105   :  { %v7223_v33 = vadd.f32 %v5735_v32, %v429_v39  ;;  %v7225_v36 = vpop.f32.mrf.mxu1  ;;  %v4976_v32 = vld [vmem:[%s9032_s4 + $0x78] sm:$0xff] }
 0x106   :  { %v7227_v37 = vpop.f32.mrf.mxu0  ;;  %5985 = vmatprep.subr.mxu1 %v4976_v32 }
 0x107   :  { %v7229_v44 = vpop.f32.mrf.mxu1  ;;  %5986 = vmatpush3.msra.mxu1 %v4976_v32  ;;  %v4974_v32 = vld [vmem:[%s9032_s4 + $0x68] sm:$0xff] }
 0x108   :  { %v5738_v45 = vpop.f32.mrf.mxu0 }
 0x109   :  { %v7231_v48 = vadd.f32 %v5738_v45, %v439_v47  ;;  %v7233_v51 = vpop.f32.mrf.mxu1  ;;  %v2360_v45 = vld [vmem:[%s9032_s4 + $0x38] sm:$0xff] }
 0x10a   :  { %v7235_v54 = vpop.f32.mrf.mxu0  ;;  %6025 = vmatprep.subr.mxu0 %v2360_v45 }
 0x10b   :  { %v7237_v55 = vpop.f32.mrf.mxu1  ;;  %6026 = vmatpush3.msra.mxu0 %v2360_v45  ;;  %v2358_v45 = vld [vmem:[%s9032_s4 + $0x28] sm:$0xff] }
 0x10c   :  { %v5741_v60 = vpop.f32.mrf.mxu0 }
 0x10d   :  { %v7239_v61 = vadd.f32 %v5741_v60, %v449_v18  ;;  %v7241_v3 = vpop.f32.mrf.mxu1 }
 0x10e   :  { %v7243_v10 = vpop.f32.mrf.mxu0 }
 0x10f   :  { %v7245_v11 = vpop.f32.mrf.mxu1 }
 0x110   :  { %v5744_v14 = vpop.f32.mrf.mxu0 }
 0x111   :  { %v7247_v34 = vadd.f32 %v5744_v14, %v459_v2  ;;  %v7249_v35 = vpop.f32.mrf.mxu1 }
 0x112   :  { %9045 = vst [vmem:[#allocation4_spill] sm:$0xff] %v7249_v35  ;;  %v7251_v39 = vpop.f32.mrf.mxu0 }
 0x113   :  { %9044 = vst [vmem:[#allocation3_spill] sm:$0xff] %v7247_v34  ;;  %v7253_v43 = vpop.f32.mrf.mxu1 }
 0x114   :  { %9046 = vst [vmem:[#allocation5_spill] sm:$0xff] %v7253_v43  ;;  %v7255_v46 = vpop.f32.mrf.mxu0 }
 0x115   :  { %v7257_v47 = vpop.f32.mrf.mxu1 }
 0x116   :  { %v7259_v58 = vpop.f32.mrf.mxu0 }
 0x117   :  { %v7261_v59 = vpop.f32.mrf.mxu1 }
 0x118   :  { %v7263_v18 = vpop.f32.mrf.mxu0 }
 0x119   :  { %v7265_v0 = vpop.f32.mrf.mxu1 }
 0x11a   :  { %9047 = vst [vmem:[#allocation6_spill] sm:$0xff] %v7265_v0  ;;  %v7267_v1 = vpop.f32.mrf.mxu0 }
 0x11b   :  { %v7269_v2 = vpop.f32.mrf.mxu1 }
 0x11c   :  { %9048 = vst [vmem:[#allocation7_spill] sm:$0xff] %v7269_v2  ;;  %v7271_v8 = vpop.f32.mrf.mxu0 }
 0x11d   :  { %v7273_v16 = vpop.f32.mrf.mxu1 }
 0x11e   :  { %9049 = vst [vmem:[#allocation8_spill] sm:$0xff] %v7273_v16  ;;  %v7275_v29 = vpop.f32.mrf.mxu0  ;;  %v4975_v16 = vld [vmem:[%s9032_s4 + $0x70] sm:$0xff] }
 0x11f   :  { %v7277_v26 = vpop.f32.mrf.mxu1  ;;  %5987 = vmatprep.subr.mxu1 %v4975_v16 }
 0x120   :  { %9050 = vst [vmem:[#allocation9_spill] sm:$0xff] %v7277_v26  ;;  %v7285_v60 = vpop.f32.mrf.mxu0  ;;  %v2359_v26 = vld [vmem:[%s9032_s4 + $0x30] sm:$0xff]  ;;  %5988 = vmatpush3.msra.mxu1 %v4975_v16  ;;  %v4973_v16 = vld [vmem:[%s9032_s4 + $0x60] sm:$0xff] }
 0x121   :  { %9051 = vst [vmem:[#allocation10_spill] sm:$0xff] %v7285_v60  ;;  %v7287_v14 = vpop.f32.mrf.mxu1  ;;  %6027 = vmatprep.subr.mxu0 %v2359_v26  ;;  %5989 = vmatprep.subr.mxu1 %v4974_v32 }
 0x122   :  { %9052 = vst [vmem:[#allocation11_spill] sm:$0xff] %v7287_v14  ;;  %v7295_v2 = vpop.f32.mrf.mxu0  ;;  %6028 = vmatpush3.msra.mxu0 %v2359_v26  ;;  %5990 = vmatpush3.msra.mxu1 %v4974_v32  ;;  %v2357_v26 = vld [vmem:[%s9032_s4 + $0x20] sm:$0xff]  ;;  %v4972_v32 = vld [vmem:[%s9032_s4 + $0x58] sm:$0xff] }
 0x123   :  { %9053 = vst [vmem:[#allocation12_spill] sm:$0xff] %v7295_v2  ;;  %v7297_v43 = vpop.f32.mrf.mxu1  ;;  %6029 = vmatprep.subr.mxu0 %v2358_v45  ;;  %5991 = vmatprep.subr.mxu1 %v4973_v16  ;;  %v9038_v2 = vmov 0.0  }
 0x124   :  { %9054 = vst [vmem:[#allocation13_spill] sm:$0xff] %v7297_v43  ;;  %v7305_v14 = vpop.f32.mrf.mxu0  ;;  %6030 = vmatpush3.msra.mxu0 %v2358_v45  ;;  %2298 = vst.msk [vmem:[#allocation2 + $0x110] sm:$0xff] %vm75_vm0, %v9038_v2  ;;  %5992 = vmatpush3.msra.mxu1 %v4973_v16  ;;  %v2356_v45 = vld [vmem:[%s9032_s4 + $0x18] sm:$0xff]  ;;  %v2355_v16 = vld [vmem:[%s9032_s4 + $0x10] sm:$0xff] }
 0x125   :  { %9055 = vst [vmem:[#allocation14_spill] sm:$0xff] %v7305_v14  ;;  %v7307_v0 = vpop.f32.mrf.mxu1  ;;  %6031 = vmatprep.subr.mxu0 %v2357_v26  ;;  %2299 = vst.msk [vmem:[#allocation2 + $0x118] sm:$0x3] %vm2264_vm1, %v9038_v2  ;;  %5993 = vmatprep.subr.mxu1 %v4972_v32 }
 0x126   :  { %9056 = vst [vmem:[#allocation15_spill] sm:$0xff] %v7307_v0  ;;  %v7315_v43 = vpop.f32.mrf.mxu0  ;;  %2263 = vst.msk [vmem:[#allocation2] sm:$0xff] %vm75_vm0, %v9038_v2  ;;  %6032 = vmatpush3.msra.mxu0 %v2357_v26  ;;  %v4971_v0 = vld [vmem:[%s9032_s4 + $0x50] sm:$0xff]  ;;  %5994 = vmatpush3.msra.mxu1 %v4972_v32  ;;  %v4970_v26 = vld [vmem:[%s9032_s4 + $0x48] sm:$0xff] }
 0x127   :  { %9057 = vst [vmem:[#allocation16_spill] sm:$0xff] %v7315_v43  ;;  %v7317_v14 = vpop.f32.mrf.mxu1  ;;  %2265 = vst.msk [vmem:[#allocation2 + $0x8] sm:$0x3] %vm2264_vm1, %v9038_v2  ;;  %6033 = vmatprep.subr.mxu0 %v2356_v45  ;;  %5995 = vmatprep.subr.mxu1 %v4971_v0  ;;  %v4969_v32 = vld [vmem:[%s9032_s4 + $0x40] sm:$0xff] }
 0x128   :  { %9058 = vst [vmem:[#allocation17_spill] sm:$0xff] %v7317_v14  ;;  %2266 = vst.msk [vmem:[#allocation2 + $0x10] sm:$0xff] %vm75_vm0, %v9038_v2  ;;  %v7405_v14 = vpop.f32.mrf.mxu0  ;;  %6034 = vmatpush3.msra.mxu0 %v2356_v45  ;;  %5996 = vmatpush3.msra.mxu1 %v4971_v0  ;;  %v2353_v45 = vld [vmem:[%s9032_s4] sm:$0xff] }
 0x129   :  { %2267 = vst.msk [vmem:[#allocation2 + $0x18] sm:$0x3] %vm2264_vm1, %v9038_v2  ;;  %2269 = vst.msk [vmem:[#allocation2 + $0x28] sm:$0x3] %vm2264_vm1, %v9038_v2  ;;  %6035 = vmatprep.subr.mxu0 %v2355_v16  ;;  %5997 = vmatprep.subr.mxu1 %v4970_v26 }
 0x12a   :  { %2268 = vst.msk [vmem:[#allocation2 + $0x20] sm:$0xff] %vm75_vm0, %v9038_v2  ;;  %2270 = vst.msk [vmem:[#allocation2 + $0x30] sm:$0xff] %vm75_vm0, %v9038_v2  ;;  %v7421_v43 = vpop.f32.mrf.mxu0  ;;  %6036 = vmatpush3.msra.mxu0 %v2355_v16  ;;  %5998 = vmatpush3.msra.mxu1 %v4970_v26 }
 0x12b   :  { %2271 = vst.msk [vmem:[#allocation2 + $0x38] sm:$0x3] %vm2264_vm1, %v9038_v2  ;;  %2273 = vst.msk [vmem:[#allocation2 + $0x48] sm:$0x3] %vm2264_vm1, %v9038_v2  ;;  %5999 = vmatprep.subr.mxu1 %v4969_v32 }
 0x12c   :  { %2272 = vst.msk [vmem:[#allocation2 + $0x40] sm:$0xff] %vm75_vm0, %v9038_v2  ;;  %2274 = vst.msk [vmem:[#allocation2 + $0x50] sm:$0xff] %vm75_vm0, %v9038_v2  ;;  %6000 = vmatpush3.msra.mxu1 %v4969_v32 }
 0x12d   :  { %2275 = vst.msk [vmem:[#allocation2 + $0x58] sm:$0x3] %vm2264_vm1, %v9038_v2  ;;  %2277 = vst.msk [vmem:[#allocation2 + $0x68] sm:$0x3] %vm2264_vm1, %v9038_v2  ;;  %v2337_v16 = vld [vmem:[#allocation2] sm:$0xff] }
 0x12e   :  { %2276 = vst.msk [vmem:[#allocation2 + $0x60] sm:$0xff] %vm75_vm0, %v9038_v2  ;;  %2278 = vst.msk [vmem:[#allocation2 + $0x70] sm:$0xff] %vm75_vm0, %v9038_v2  ;;  %v2361_v0 = vld [vmem:[#allocation2 + $0x1] sm:$0xff]  ;;  %6041 = vmatprep.mubr.msk.f32.mxu0 %vm75_vm0, %v2337_v16 }
 0x12f   :  { %2279 = vst.msk [vmem:[#allocation2 + $0x78] sm:$0x3] %vm2264_vm1, %v9038_v2  ;;  %2281 = vst.msk [vmem:[#allocation2 + $0x88] sm:$0x3] %vm2264_vm1, %v9038_v2  ;;  %6001 = vmatprep.mubr.msk.f32.mxu1 %vm75_vm0, %v2361_v0 }
 0x130   :  { %2280 = vst.msk [vmem:[#allocation2 + $0x80] sm:$0xff] %vm75_vm0, %v9038_v2  ;;  %2282 = vst.msk [vmem:[#allocation2 + $0x90] sm:$0xff] %vm75_vm0, %v9038_v2 }
 0x131   :  { %2283 = vst.msk [vmem:[#allocation2 + $0x98] sm:$0x3] %vm2264_vm1, %v9038_v2  ;;  %2285 = vst.msk [vmem:[#allocation2 + $0xa8] sm:$0x3] %vm2264_vm1, %v9038_v2 }
 0x132   :  { %2284 = vst.msk [vmem:[#allocation2 + $0xa0] sm:$0xff] %vm75_vm0, %v9038_v2  ;;  %2286 = vst.msk [vmem:[#allocation2 + $0xb0] sm:$0xff] %vm75_vm0, %v9038_v2 }
 0x133   :  { %2287 = vst.msk [vmem:[#allocation2 + $0xb8] sm:$0x3] %vm2264_vm1, %v9038_v2  ;;  %2289 = vst.msk [vmem:[#allocation2 + $0xc8] sm:$0x3] %vm2264_vm1, %v9038_v2 }
 0x134   :  { %2288 = vst.msk [vmem:[#allocation2 + $0xc0] sm:$0xff] %vm75_vm0, %v9038_v2  ;;  %2290 = vst.msk [vmem:[#allocation2 + $0xd0] sm:$0xff] %vm75_vm0, %v9038_v2 }
 0x135   :  { %2291 = vst.msk [vmem:[#allocation2 + $0xd8] sm:$0x3] %vm2264_vm1, %v9038_v2  ;;  %2293 = vst.msk [vmem:[#allocation2 + $0xe8] sm:$0x3] %vm2264_vm1, %v9038_v2 }
 0x136   :  { %2292 = vst.msk [vmem:[#allocation2 + $0xe0] sm:$0xff] %vm75_vm0, %v9038_v2  ;;  %2294 = vst.msk [vmem:[#allocation2 + $0xf0] sm:$0xff] %vm75_vm0, %v9038_v2 }
 0x137   :  { %2295 = vst.msk [vmem:[#allocation2 + $0xf8] sm:$0x3] %vm2264_vm1, %v9038_v2  ;;  %2297 = vst.msk [vmem:[#allocation2 + $0x108] sm:$0x3] %vm2264_vm1, %v9038_v2 }
 0x138   :  { %2296 = vst.msk [vmem:[#allocation2 + $0x100] sm:$0xff] %vm75_vm0, %v9038_v2  ;;  %2300 = vst.msk [vmem:[#allocation2 + $0x120] sm:$0xff] %vm75_vm0, %v9038_v2 }
 0x139   :  { %2301 = vst.msk [vmem:[#allocation2 + $0x128] sm:$0x3] %vm2264_vm1, %v9038_v2  ;;  %2303 = vst.msk [vmem:[#allocation2 + $0x138] sm:$0x3] %vm2264_vm1, %v9038_v2 }
 0x13a   :  { %2302 = vst.msk [vmem:[#allocation2 + $0x130] sm:$0xff] %vm75_vm0, %v9038_v2  ;;  %9059 = vst [vmem:[#allocation18_spill] sm:$0xff] %v7405_v14  ;;  %v7413_v2 = vpop.f32.mrf.mxu1  ;;  %v2354_v14 = vld [vmem:[%s9032_s4 + $0x8] sm:$0xff] }
 0x13b   :  { %9060 = vst [vmem:[#allocation19_spill] sm:$0xff] %v7413_v2  ;;  %9061 = vst [vmem:[#allocation20_spill] sm:$0xff] %v7421_v43  ;;  %v7431_v2 = vpop.f32.mrf.mxu0  ;;  %6037 = vmatprep.subr.mxu0 %v2354_v14 }
 0x13c   :  { %v7423_v60 = vpop.f32.mrf.mxu1  ;;  %9063 = vst [vmem:[#allocation22_spill] sm:$0xff] %v7431_v2  ;;  %6038 = vmatpush3.msra.mxu0 %v2354_v14  ;;  %v7446_v14 = vld [vmem:[%s9032_s4 + $0xb8] sm:$0xff] }
 0x13d   :  { %9062 = vst [vmem:[#allocation21_spill] sm:$0xff] %v7423_v60  ;;  %v7435_v43 = vpop.f32.mrf.mxu0  ;;  %6039 = vmatprep.subr.mxu0 %v2353_v45  ;;  %9068 = vst [vmem:[#allocation27_spill] sm:$0xff] %v7446_v14  ;;  %6065 = vmatprep.subr.mxu1 %v7446_v14 }
 0x13e   :  { %v7433_v35 = vpop.f32.mrf.mxu1  ;;  %9065 = vst [vmem:[#allocation24_spill] sm:$0xff] %v7435_v43  ;;  %6040 = vmatpush3.msra.mxu0 %v2353_v45 }
 0x13f   :  { %9064 = vst [vmem:[#allocation23_spill] sm:$0xff] %v7433_v35  ;;  %v7440_v34 = vpop.f32.mrf.mxu0 }
 0x140   :  { %v7437_v60 = vpop.f32.mrf.mxu1  ;;  %9067 = vst [vmem:[#allocation26_spill] sm:$0xff] %v7440_v34 }
 0x141   :  { %9066 = vst [vmem:[#allocation25_spill] sm:$0xff] %v7437_v60  ;;  %v7451_v35 = vpop.f32.mrf.mxu0 }
 0x142   :  { %v7448_v26 = vpop.f32.mrf.mxu1  ;;  %9070 = vst [vmem:[#allocation29_spill] sm:$0xff] %v7451_v35 }
 0x143   :  { %9069 = vst [vmem:[#allocation28_spill] sm:$0xff] %v7448_v26  ;;  %v5883_v32 = vpop.f32.mrf.mxu0 }
 0x144   :  { %v7453_v60 = vpop.f32.mrf.mxu1 }
 0x145   :  { %9071 = vst [vmem:[#allocation30_spill] sm:$0xff] %v7453_v60  ;;  %v7457_v34 = vpop.f32.mrf.mxu0 }
 0x146   :  { %v7455_v0 = vpop.f32.mrf.mxu1 }
 0x147   :  { %9072 = vst [vmem:[#allocation31_spill] sm:$0xff] %v7455_v0  ;;  %v7461_v16 = vpop.f32.mrf.mxu0  ;;  %v7478_v0 = vld [vmem:[%s9032_s4 + $0xf8] sm:$0xff] }
 0x148   :  { %v7459_v45 = vpop.f32.mrf.mxu1  ;;  %9074 = vst [vmem:[#allocation33_spill] sm:$0xff] %v7461_v16  ;;  %9081 = vst [vmem:[#allocation40_spill] sm:$0xff] %v7478_v0  ;;  %6105 = vmatprep.subr.mxu0 %v7478_v0  ;;  %v404_v16 = vadd.f32 %v7169_v7, %v7167_v5  ;;  %v414_v0 = vadd.f32 %v7173_v23, %v7171_v15  ;;  %v434_v5 = vadd.f32 %v7181_v53, %v7179_v52 }
 0x149   :  { %9073 = vst [vmem:[#allocation32_spill] sm:$0xff] %v7459_v45  ;;  %v7465_v2 = vpop.f32.mrf.mxu0  ;;  %v920_v53 = vadd.f32 %v7209_v22, %v7207_v38 }
 0x14a   :  { %v7463_v43 = vpop.f32.mrf.mxu1  ;;  %9076 = vst [vmem:[#allocation35_spill] sm:$0xff] %v7465_v2 }
 0x14b   :  { %9075 = vst [vmem:[#allocation34_spill] sm:$0xff] %v7463_v43  ;;  %v7467_v26 = vpop.f32.mrf.mxu0 }
 0x14c   :  { %9077 = vst [vmem:[#allocation36_spill] sm:$0xff] %v7467_v26  ;;  %v7469_v14 = vpop.f32.mrf.mxu1  ;;  %v384_v26 = vadd.f32 %v7161_v50, %v7159_v49  ;;  %v424_v49 = vadd.f32 %v7177_v41, %v7175_v40  ;;  %v916_v50 = vadd.f32 %v7193_v12, %v7191_v9  ;;  %v444_v41 = vadd.f32 %v7185_v63, %v7183_v62 }
 0x14d   :  { %9078 = vst [vmem:[#allocation37_spill] sm:$0xff] %v7469_v14  ;;  %v7471_v35 = vpop.f32.mrf.mxu0  ;;  %v454_v9 = vadd.f32 %v7189_v6, %v7187_v4  ;;  %v918_v12 = vadd.f32 %v7201_v19, %v7199_v17  ;;  %v922_v62 = vadd.f32 %v7217_v28, %v7215_v27  ;;  %v924_v17 = vadd.f32 %v7225_v36, %v7223_v33 }
 0x14e   :  { %9079 = vst [vmem:[#allocation38_spill] sm:$0xff] %v7471_v35  ;;  %v7480_v45 = vpop.f32.mrf.mxu1  ;;  %v394_v35 = vadd.f32 %v7165_v57, %v7163_v56  ;;  %v684_v57 = vadd.f32 %v7211_v21, %v404_v16  ;;  %v688_v15 = vadd.f32 %v7227_v37, %v424_v49  ;;  %v1150_v23 = vadd.f32 %v7255_v46, %v916_v50  ;;  %v9085_v46 = vld [vmem:[#allocation10_spill] sm:$0xff]  ;;  %v9091_v16 = vld [vmem:[#allocation8_spill] sm:$0xff] }
 0x14f   :  { %v7473_v60 = vpop.f32.mrf.mxu0  ;;  %9082 = vst [vmem:[#allocation41_spill] sm:$0xff] %v7480_v45  ;;  %v692_v4 = vadd.f32 %v7243_v10, %v444_v41  ;;  %v1152_v38 = vadd.f32 %v7263_v18, %v918_v12  ;;  %v694_v27 = vadd.f32 %v7251_v39, %v454_v9  ;;  %v928_v10 = vadd.f32 %v7241_v3, %v7239_v61  ;;  %v9086_v18 = vld [vmem:[#allocation6_spill] sm:$0xff]  ;;  %v9089_v61 = vld [vmem:[#allocation5_spill] sm:$0xff]  ;;  %v9092_v50 = vld [vmem:[#allocation16_spill] sm:$0xff] }
 0x150   :  { %9080 = vst [vmem:[#allocation39_spill] sm:$0xff] %v7473_v60  ;;  %v680_v60 = vadd.f32 %v7195_v42, %v384_v26  ;;  %v7492_v14 = vpop.f32.mrf.mxu1  ;;  %v682_v56 = vadd.f32 %v7203_v20, %v394_v35  ;;  %v686_v42 = vadd.f32 %v7219_v30, %v414_v0  ;;  %v919_v30 = vadd.f32 %v7213_v25, %v684_v57  ;;  %v9084_v35 = vld [vmem:[#allocation4_spill] sm:$0xff]  ;;  %v9096_v9 = vld [vmem:[#allocation33_spill] sm:$0xff]  ;;  %v9097_v12 = vld [vmem:[#allocation11_spill] sm:$0xff] }
 0x151   :  { %v7483_v43 = vpop.f32.mrf.mxu0  ;;  %v923_v19 = vadd.f32 %v7229_v44, %v688_v15  ;;  %v926_v25 = vadd.f32 %v7233_v51, %v7231_v48  ;;  %v927_v48 = vadd.f32 %v7245_v11, %v692_v4  ;;  %v9083_v51 = vld [vmem:[#allocation3_spill] sm:$0xff]  ;;  %v929_v3 = vadd.f32 %v9089_v61, %v694_v27  ;;  %v9103_v27 = vld [vmem:[#allocation32_spill] sm:$0xff]  ;;  %v9111_v61 = vld [vmem:[#allocation21_spill] sm:$0xff] }
 0x152   :  { %v915_v7 = vadd.f32 %v7197_v13, %v680_v60  ;;  %v7514_v40 = vpop.f32.mrf.mxu1  ;;  %v917_v52 = vadd.f32 %v7205_v24, %v682_v56  ;;  %v690_v13 = vadd.f32 %v7235_v54, %v434_v5  ;;  %v921_v63 = vadd.f32 %v7221_v31, %v686_v42  ;;  %v9090_v11 = vld [vmem:[#allocation7_spill] sm:$0xff]  ;;  %v9093_v42 = vld [vmem:[#allocation9_spill] sm:$0xff] }
 0x153   :  { %v7487_v2 = vpop.f32.mrf.mxu0  ;;  %v1384_v24 = vadd.f32 %v7257_v47, %v1150_v23  ;;  %v1154_v31 = vadd.f32 %v7271_v8, %v920_v53  ;;  %v1153_v44 = vadd.f32 %v7275_v29, %v919_v30  ;;  %v930_v39 = vadd.f32 %v9084_v35, %v9083_v51  ;;  %v9095_v23 = vld [vmem:[#allocation31_spill] sm:$0xff]  ;;  %v9098_v53 = vld [vmem:[#allocation20_spill] sm:$0xff] }
 0x154   :  { %v1149_v21 = vadd.f32 %v7259_v58, %v915_v7  ;;  %v7541_v22 = vpop.f32.mrf.mxu1  ;;  %v1151_v28 = vadd.f32 %v7267_v1, %v917_v52  ;;  %v925_v33 = vadd.f32 %v7237_v55, %v690_v13  ;;  %v1156_v47 = vadd.f32 %v9085_v46, %v922_v62  ;;  %v9087_v55 = vld [vmem:[#allocation12_spill] sm:$0xff]  ;;  %v9094_v7 = vld [vmem:[#allocation18_spill] sm:$0xff]  ;;  %v9100_v62 = vld [vmem:[#allocation35_spill] sm:$0xff] }
 0x155   :  { %v7498_v45 = vpop.f32.mrf.mxu0  ;;  %v1619_v54 = vadd.f32 %v5883_v32, %v1384_v24  ;;  %v1386_v1 = vadd.f32 %v9086_v18, %v1152_v38  ;;  %v1155_v8 = vadd.f32 %v9087_v55, %v921_v63  ;;  %v1388_v49 = vadd.f32 %v9091_v16, %v1154_v31  ;;  %v9102_v24 = vld [vmem:[#allocation15_spill] sm:$0xff]  ;;  %v9109_v55 = vld [vmem:[#allocation34_spill] sm:$0xff] }
 0x156   :  { %v1383_v36 = vadd.f32 %v7261_v59, %v1149_v21  ;;  %v9088_v59 = vld [vmem:[#allocation14_spill] sm:$0xff]  ;;  %v7565_v32 = vpop.f32.mrf.mxu1  ;;  %v1385_v0 = vadd.f32 %v9090_v11, %v1151_v28  ;;  %v1157_v56 = vadd.f32 %v9092_v50, %v923_v19  ;;  %v1387_v5 = vadd.f32 %v9093_v42, %v1153_v44  ;;  %v9108_v18 = vld [vmem:[#allocation19_spill] sm:$0xff]  ;;  %v9113_v50 = vld [vmem:[#allocation37_spill] sm:$0xff] }
 0x157   :  { %v7507_v26 = vpop.f32.mrf.mxu0  ;;  %v1158_v60 = vadd.f32 %v9088_v59, %v924_v17  ;;  %v1160_v15 = vadd.f32 %v9094_v7, %v926_v25  ;;  %v1853_v41 = vadd.f32 %v9095_v23, %v1619_v54  ;;  %v1390_v52 = vadd.f32 %v9097_v12, %v1156_v47  ;;  %v9099_v21 = vld [vmem:[#allocation22_spill] sm:$0xff]  ;;  %v9101_v17 = vld [vmem:[#allocation13_spill] sm:$0xff]  ;;  %v9105_v54 = vld [vmem:[#allocation24_spill] sm:$0xff] }
 0x158   :  { %v1618_v29 = vadd.f32 %v7457_v34, %v1383_v36  ;;  %v1621_v34 = vadd.f32 %v9096_v9, %v1386_v1  ;;  %v1159_v13 = vadd.f32 %v9098_v53, %v925_v33  ;;  %v1162_v30 = vadd.f32 %v9099_v21, %v928_v10  ;;  %v7584_v25 = vpop.f32.mrf.mxu1  ;;  %v9104_v36 = vld [vmem:[#allocation17_spill] sm:$0xff]  ;;  %v9106_v33 = vld [vmem:[#allocation26_spill] sm:$0xff]  ;;  %v9110_v59 = vld [vmem:[#allocation36_spill] sm:$0xff] }
 0x159   :  { %v7522_v20 = vpop.f32.mrf.mxu0  ;;  %v1620_v63 = vadd.f32 %v9100_v62, %v1385_v0  ;;  %v1389_v19 = vadd.f32 %v9101_v17, %v1155_v8  ;;  %v1392_v38 = vadd.f32 %v9102_v24, %v1158_v60  ;;  %v1391_v44 = vadd.f32 %v9104_v36, %v1157_v56  ;;  %v9107_v10 = vld [vmem:[#allocation29_spill] sm:$0xff]  ;;  %v9112_v0 = vld [vmem:[#allocation23_spill] sm:$0xff]  ;;  %v9114_v56 = vld [vmem:[#allocation38_spill] sm:$0xff] }
 0x15a   :  { %v1852_v28 = vadd.f32 %v9103_v27, %v1618_v29  ;;  %v1161_v51 = vadd.f32 %v9105_v54, %v927_v48  ;;  %v1164_v35 = vadd.f32 %v9106_v33, %v930_v39  ;;  %v1163_v46 = vadd.f32 %v9107_v10, %v929_v3  ;;  %v5938_v3 = vpop.f32.mrf.mxu1  ;;  %v9117_v53 = vld [vmem:[#allocation30_spill] sm:$0xff]  ;;  %v9119_v62 = vld [vmem:[#allocation41_spill] sm:$0xff] }
 0x15b   :  { %v7534_v6 = vpop.f32.mrf.mxu0  ;;  %v1394_v1 = vadd.f32 %v9108_v18, %v1160_v15  ;;  %v1855_v8 = vadd.f32 %v9109_v55, %v1621_v34  ;;  %v1623_v60 = vadd.f32 %v9110_v59, %v1388_v49  ;;  %v1393_v11 = vadd.f32 %v9111_v61, %v1159_v13  ;;  %v9116_v34 = vld [vmem:[#allocation28_spill] sm:$0xff]  ;;  %v9118_v13 = vld [vmem:[#allocation39_spill] sm:$0xff] }
 0x15c   :  { %v7599_v16 = vadd.f32 %v9112_v0, %v1162_v30  ;;  %v1854_v48 = vadd.f32 %v9113_v50, %v1620_v63  ;;  %v1622_v39 = vadd.f32 %v9114_v56, %v1387_v5  ;;  %v7613_v12 = vadd.f32 %v9116_v34, %v1164_v35 }
 0x15d   :  { %v7548_v37 = vpop.f32.mrf.mxu0  ;;  %v7616_v5 = vadd.f32 %v9117_v53, %v1163_v46  ;;  %v1625_v21 = vadd.f32 %v9118_v13, %v1390_v52  ;;  %v1857_v63 = vadd.f32 %v9119_v62, %v1623_v60  ;;  %v1823_v52 = vpop.f32.mrf.mxu1  ;;  %v1626_v55 = vadd.f32 %v7498_v45, %v1391_v44 }
 0x15e   :  { %v1856_v27 = vadd.f32 %v7492_v14, %v1622_v39  ;;  %v1628_v13 = vadd.f32 %v7522_v20, %v1393_v11  ;;  %v1631_v20 = vadd.f32 %v7534_v6, %v7599_v16 }
 0x15f   :  { %v7559_v58 = vpop.f32.mrf.mxu0  ;;  %v1859_v14 = vadd.f32 %v7514_v40, %v1625_v21 }
 0x161   :  { %v7571_v57 = vpop.f32.mrf.mxu0 }
 0x163   :  { %v5963_v4 = vpop.f32.mrf.mxu0 }
 0x164   :  { %v7586_v31 = vadd.f32 %v5963_v4, %v1853_v41  ;;  %v9115_v41 = vld [vmem:[#allocation25_spill] sm:$0xff] }
 0x165   :  { %v2007_v47 = vpop.f32.mrf.mxu0  ;;  %v1395_v9 = vadd.f32 %v9115_v41, %v1161_v51 }
 0x166   :  { %v7595_v29 = vadd.f32 %v2007_v47, %v1852_v28  ;;  %v2140_v7 = vmul.f32 %v7586_v31, %v7586_v31  ;;  %v2103_v4 = vsel %vm75_vm0, %v7586_v31, 0.0  ;;  %v1624_v28 = vadd.f32 %v7483_v43, %v1389_v19 }
 0x167   :  { %v5966_v42 = vpop.f32.mrf.mxu0  ;;  %v1627_v43 = vadd.f32 %v7487_v2, %v1392_v38  ;;  %v5941_v2 = vpop.f32.mrf.mxu1 }
 0x168   :  { %v2102_v15 = vsel %vm75_vm0, %v7595_v29, 0.0  ;;  %v2139_v49 = vmul.f32 %v7595_v29, %v7595_v29  ;;  %v7609_v23 = vadd.f32 %v5966_v42, %v1855_v8  ;;  %v2156_v33 = vsel %vm75_vm0, %v2140_v7, 0.0 }
 0x169   :  { %v2017_v30 = vpop.f32.mrf.mxu0  ;;  %v2104_v36 = vadd.f32 %v2103_v4, %v2102_v15  ;;  %v1858_v61 = vadd.f32 %v7541_v22, %v1624_v28  ;;  %v1861_v39 = vadd.f32 %v7565_v32, %v1627_v43  ;;  %v1629_v22 = vadd.f32 %v7507_v26, %v1394_v1  ;;  %v1833_v1 = vpop.f32.mrf.mxu1 }
 0x16a   :  { %v2155_v17 = vsel %vm75_vm0, %v2139_v49, 0.0  ;;  %v7623_v24 = vadd.f32 %v2017_v30, %v1854_v48  ;;  %v2142_v54 = vmul.f32 %v7609_v23, %v7609_v23  ;;  %v2107_v8 = vsel %vm75_vm0, %v7609_v23, 0.0 }
 0x16b   :  { %v5969_v51 = vpop.f32.mrf.mxu0  ;;  %v2157_v19 = vadd.f32 %v2156_v33, %v2155_v17  ;;  %v1860_v49 = vadd.f32 %v7584_v25, %v1626_v55  ;;  %v1863_v17 = vadd.f32 %v5938_v3, %v1629_v22 }
 0x16c   :  { %v2105_v35 = vsel %vm75_vm0, %v7623_v24, 0.0  ;;  %v2141_v10 = vmul.f32 %v7623_v24, %v7623_v24  ;;  %v7634_v46 = vadd.f32 %v5969_v51, %v1857_v63  ;;  %v2160_v0 = vsel %vm75_vm0, %v2142_v54, 0.0 }
 0x16d   :  { %v2106_v47 = vadd.f32 %v2105_v35, %v2104_v36  ;;  %v2027_v18 = vpop.f32.mrf.mxu0  ;;  %v1630_v36 = vadd.f32 %v7548_v37, %v1395_v9  ;;  %v1862_v35 = vadd.f32 %v1823_v52, %v1628_v13  ;;  %v1633_v52 = vadd.f32 %v7559_v58, %v7613_v12 }
 0x16e   :  { %v2158_v59 = vsel %vm75_vm0, %v2141_v10, 0.0  ;;  %v7642_v60 = vadd.f32 %v2027_v18, %v1856_v27  ;;  %v2144_v38 = vmul.f32 %v7634_v46, %v7634_v46  ;;  %v2111_v41 = vsel %vm75_vm0, %v7634_v46, 0.0 }
 0x16f   :  { %v2159_v50 = vadd.f32 %v2158_v59, %v2157_v19  ;;  %v2108_v40 = vadd.f32 %v2107_v8, %v2106_v47  ;;  %v5972_v48 = vpop.f32.mrf.mxu0  ;;  %v5944_v19 = vpop.f32.mrf.mxu1  ;;  %v1865_v47 = vadd.f32 %v5941_v2, %v1631_v20  ;;  %v1864_v59 = vadd.f32 %v1833_v1, %v1630_v36 }
 0x170   :  { %v2109_v45 = vsel %vm75_vm0, %v7642_v60, 0.0  ;;  %v2143_v44 = vmul.f32 %v7642_v60, %v7642_v60  ;;  %v7652_v56 = vadd.f32 %v5972_v48, %v1859_v14  ;;  %v2164_v62 = vsel %vm75_vm0, %v2144_v38, 0.0 }
 0x171   :  { %v2110_v42 = vadd.f32 %v2109_v45, %v2108_v40  ;;  %v2161_v7 = vadd.f32 %v2160_v0, %v2159_v50  ;;  %v2037_v15 = vpop.f32.mrf.mxu0  ;;  %v1632_v40 = vadd.f32 %v7571_v57, %v7616_v5  ;;  %v1843_v12 = vpop.f32.mrf.mxu1  ;;  %v1867_v5 = vadd.f32 %v5944_v19, %v1633_v52 }
 0x172   :  { %v2162_v34 = vsel %vm75_vm0, %v2143_v44, 0.0  ;;  %v7660_v53 = vadd.f32 %v2037_v15, %v1858_v61  ;;  %v2146_v32 = vmul.f32 %v7652_v56, %v7652_v56  ;;  %v2115_v54 = vsel %vm75_vm0, %v7652_v56, 0.0 }
 0x173   :  { %v2163_v21 = vadd.f32 %v2162_v34, %v2161_v7  ;;  %v2112_v30 = vadd.f32 %v2111_v41, %v2110_v42  ;;  %v5975_v26 = vpop.f32.mrf.mxu0  ;;  %v1866_v34 = vadd.f32 %v1843_v12, %v1632_v40 }
 0x174   :  { %v2113_v25 = vsel %vm75_vm0, %v7660_v53, 0.0  ;;  %v2145_v63 = vmul.f32 %v7660_v53, %v7660_v53  ;;  %v7670_v4 = vadd.f32 %v5975_v26, %v1861_v39  ;;  %v2168_v10 = vsel %vm75_vm0, %v2146_v32, 0.0 }
 0x175   :  { %v2114_v11 = vadd.f32 %v2113_v25, %v2112_v30  ;;  %v2165_v27 = vadd.f32 %v2164_v62, %v2163_v21  ;;  %v2047_v28 = vpop.f32.mrf.mxu0 }
 0x176   :  { %v2166_v51 = vsel %vm75_vm0, %v2145_v63, 0.0  ;;  %v7678_v33 = vadd.f32 %v2047_v28, %v1860_v49  ;;  %v2148_v6 = vmul.f32 %v7670_v4, %v7670_v4  ;;  %v2119_v61 = vsel %vm75_vm0, %v7670_v4, 0.0 }
 0x177   :  { %v2167_v14 = vadd.f32 %v2166_v51, %v2165_v27  ;;  %v2116_v3 = vadd.f32 %v2115_v54, %v2114_v11  ;;  %v5978_v43 = vpop.f32.mrf.mxu0 }
 0x178   :  { %v2117_v37 = vsel %vm75_vm0, %v7678_v33, 0.0  ;;  %v2147_v16 = vmul.f32 %v7678_v33, %v7678_v33  ;;  %v7687_v9 = vadd.f32 %v5978_v43, %v1863_v17  ;;  %v2172_v45 = vsel %vm75_vm0, %v2148_v6, 0.0 }
 0x179   :  { %v2118_v18 = vadd.f32 %v2117_v37, %v2116_v3  ;;  %v2169_v55 = vadd.f32 %v2168_v10, %v2167_v14  ;;  %v2057_v8 = vpop.f32.mrf.mxu0 }
 0x17a   :  { %v2170_v0 = vsel %vm75_vm0, %v2147_v16, 0.0  ;;  %v7694_v50 = vadd.f32 %v2057_v8, %v1862_v35  ;;  %v2150_v2 = vmul.f32 %v7687_v9, %v7687_v9  ;;  %v2123_v15 = vsel %vm75_vm0, %v7687_v9, 0.0 }
 0x17b   :  { %v2171_v48 = vadd.f32 %v2170_v0, %v2169_v55  ;;  %v2120_v38 = vadd.f32 %v2119_v61, %v2118_v18  ;;  %v5981_v58 = vpop.f32.mrf.mxu0 }
 0x17c   :  { %v2121_v44 = vsel %vm75_vm0, %v7694_v50, 0.0  ;;  %v2149_v39 = vmul.f32 %v7694_v50, %v7694_v50  ;;  %v7705_v22 = vadd.f32 %v5981_v58, %v1865_v47  ;;  %v2176_v13 = vsel %vm75_vm0, %v2150_v2, 0.0 }
 0x17d   :  { %v2122_v42 = vadd.f32 %v2121_v44, %v2120_v38  ;;  %v2173_v7 = vadd.f32 %v2172_v45, %v2171_v48  ;;  %v2067_v57 = vpop.f32.mrf.mxu0 }
 0x17e   :  { %v2174_v49 = vsel %vm75_vm0, %v2149_v39, 0.0  ;;  %v7710_v41 = vadd.f32 %v2067_v57, %v1864_v59  ;;  %v2152_v26 = vmul.f32 %v7705_v22, %v7705_v22  ;;  %v2127_v11 = vsel %vm75_vm0, %v7705_v22, 0.0 }
 0x17f   :  { %v2175_v21 = vadd.f32 %v2174_v49, %v2173_v7  ;;  %v2124_v32 = vadd.f32 %v2123_v15, %v2122_v42  ;;  %v5984_v30 = vpop.f32.mrf.mxu0  ;;  %v2204_v57 = vlaneseq  ;;  %v2196_v15 = vld [vmem:[%s9033_s2] sm:$0x1] }
 0x180   :  { %v2125_v1 = vsel %vm75_vm0, %v7710_v41, 0.0  ;;  %v2151_v62 = vmul.f32 %v7710_v41, %v7710_v41  ;;  %v7719_v25 = vadd.f32 %v5984_v30, %v1867_v5  ;;  %v2180_v51 = vsel %vm75_vm0, %v2152_v26, 0.0 }
 0x181   :  { %v2126_v63 = vadd.f32 %v2125_v1, %v2124_v32  ;;  %v2177_v17 = vadd.f32 %v2176_v13, %v2175_v21  ;;  %v2077_v20 = vpop.f32.mrf.mxu0  ;;  %v2205_v5 = vshrl.u32 %v2204_v57, 7  ;;  %v2200_v21 = vld [vmem:[%s9034_s3] sm:$0x1]  ;;  %v5039_v57 = vld [vmem:[%s9032_s4 + $0xf0] sm:$0xff] }
 0x182   :  { %v2178_v27 = vsel %vm75_vm0, %v2151_v62, 0.0  ;;  %v2100_v28 = vadd.f32 %v2077_v20, %v1866_v34  ;;  %v2154_v35 = vmul.f32 %v7719_v25, %v7719_v25  ;;  %v2131_v19 = vsel %vm75_vm0, %v7719_v25, 0.0 }
 0x183   :  { %v2179_v36 = vadd.f32 %v2178_v27, %v2177_v17  ;;  %v2128_v54 = vadd.f32 %v2127_v11, %v2126_v63  ;;  %v7735_v49 = vsub.s32 0, %v2205_v5  ;;  %v9121_v5 = vld [vmem:[#allocation27_spill] sm:$0xff] }
 0x184   :  { %v2129_v10 = vsel %vm75_vm0, %v2100_v28, 0.0  ;;  %v2153_v14 = vmul.f32 %v2100_v28, %v2100_v28  ;;  %v2184_v47 = vsel %vm75_vm0, %v2154_v35, 0.0 }
 0x185   :  { %v2130_v3 = vadd.f32 %v2129_v10, %v2128_v54  ;;  %v2181_v43 = vadd.f32 %v2180_v51, %v2179_v36  ;;  %9120 = vst [vmem:[#allocation3_spill] sm:$0xff] %v7735_v49 }
 0x186   :  { %v2182_v6 = vsel %vm75_vm0, %v2153_v14, 0.0 }
 0x187   :  { %v2132_v37 = vadd.f32 %v2131_v19, %v2130_v3  ;;  %v2183_v16 = vadd.f32 %v2182_v6, %v2181_v43 }
 0x189   :  { %v2133_v52 = vrot.slane %v2132_v37, 4  ;;  %v2185_v18 = vadd.f32 %v2184_v47, %v2183_v16 }
 0x18b   :  { %v2134_v55 = vadd.f32 %v2133_v52, %v2132_v37  ;;  %v2186_v8 = vrot.slane %v2185_v18, 4 }
 0x18d   :  { %v2135_v59 = vrot.slane %v2134_v55, 2  ;;  %v2187_v61 = vadd.f32 %v2186_v8, %v2185_v18 }
 0x18f   :  { %v2136_v0 = vadd.f32 %v2135_v59, %v2134_v55  ;;  %v2188_v40 = vrot.slane %v2187_v61, 2 }
 0x191   :  { %v2137_v48 = vrot.slane %v2136_v0, 1  ;;  %v2189_v2 = vadd.f32 %v2188_v40, %v2187_v61 }
 0x193   :  { %v2138_v38 = vadd.f32 %v2137_v48, %v2136_v0  ;;  %v2190_v58 = vrot.slane %v2189_v2, 1 }
 0x195   :  { %v2191_v12 = vadd.f32 %v2190_v58, %v2189_v2  ;;  %v2192_v45 = vmul.f32 0.0078125, %v2138_v38 }
 0x197   :  { %v2193_v44 = vmul.f32 0.0078125, %v2191_v12  ;;  %v2194_v39 = vmul.f32 %v2192_v45, %v2192_v45 }
 0x199   :  { %v2195_v42 = vsub.f32 %v2193_v44, %v2194_v39 }
 0x19b   :  { %v2197_v7 = vadd.f32 1e-05, %v2195_v42 }
 0x19d   :  { %6346 = vrsqrt.f32 %v2197_v7  ;;  %v5015_v7 = vld [vmem:[%s9032_s4 + $0xb0] sm:$0xff] }
 0x1aa   :  { %v6347_v34 = vpop.eup %6346 }
 0x1ab   :  { %v2199_v13 = vmul.f32 %v6347_v34, %v2196_v15  ;;  %v9122_v15 = vld [vmem:[#allocation40_spill] sm:$0xff] }
 0x1ad   :  { %v2201_v32 = vmul.f32 %v2199_v13, %v2192_v45  ;;  %v2207_v30 = vrot.slane %v2199_v13, %v7735_v49 }
 0x1af   :  { %v2202_v26 = vsub.f32 %v2200_v21, %v2201_v32  ;;  %v2223_v1 = vmul.f32 %v2207_v30, %v2100_v28  ;;  %v2209_v62 = vmul.f32 %v2207_v30, %v7595_v29  ;;  %v2210_v63 = vmul.f32 %v2207_v30, %v7586_v31  ;;  %v5014_v21 = vld [vmem:[%s9032_s4 + $0xa8] sm:$0xff] }
 0x1b0   :  { %v2211_v17 = vmul.f32 %v2207_v30, %v7623_v24  ;;  %v2212_v20 = vmul.f32 %v2207_v30, %v7609_v23  ;;  %v2213_v11 = vmul.f32 %v2207_v30, %v7642_v60  ;;  %v2214_v27 = vmul.f32 %v2207_v30, %v7634_v46 }
 0x1b1   :  { %v2229_v36 = vrot.slane %v2202_v26, %v7735_v49  ;;  %v2215_v54 = vmul.f32 %v2207_v30, %v7660_v53  ;;  %v2217_v51 = vmul.f32 %v2207_v30, %v7678_v33  ;;  %v2218_v28 = vmul.f32 %v2207_v30, %v7670_v4  ;;  %v5038_v26 = vld [vmem:[%s9032_s4 + $0xe8] sm:$0xff] }
 0x1b2   :  { %v2219_v29 = vmul.f32 %v2207_v30, %v7694_v50  ;;  %v2220_v31 = vmul.f32 %v2207_v30, %v7687_v9  ;;  %v2221_v24 = vmul.f32 %v2207_v30, %v7710_v41  ;;  %v2222_v23 = vmul.f32 %v2207_v30, %v7705_v22 }
 0x1b3   :  { %v2245_v35 = vadd.f32 %v2229_v36, %v2223_v1  ;;  %v2231_v60 = vadd.f32 %v2229_v36, %v2209_v62  ;;  %v2232_v10 = vadd.f32 %v2229_v36, %v2210_v63  ;;  %v2233_v46 = vadd.f32 %v2229_v36, %v2211_v17  ;;  %v5013_v63 = vld [vmem:[%s9032_s4 + $0xa0] sm:$0xff] }
 0x1b4   :  { %v2234_v14 = vadd.f32 %v2229_v36, %v2212_v20  ;;  %v2235_v3 = vadd.f32 %v2229_v36, %v2213_v11  ;;  %v2236_v43 = vadd.f32 %v2229_v36, %v2214_v27  ;;  %v2237_v53 = vadd.f32 %v2229_v36, %v2215_v54  ;;  %v5037_v11 = vld [vmem:[%s9032_s4 + $0xe0] sm:$0xff] }
 0x1b5   :  { %v2261_v19 = vmax.f32 %v2245_v35, 0.0  ;;  %v2247_v33 = vmax.f32 %v2231_v60, 0.0  ;;  %v2248_v6 = vmax.f32 %v2232_v10, 0.0  ;;  %v2249_v4 = vmax.f32 %v2233_v46, 0.0  ;;  %v2369_v27 = vld [vmem:[#allocation2 + $0xa1] sm:$0xff] }
 0x1b6   :  { %v2250_v37 = vmax.f32 %v2234_v14, 0.0  ;;  %v2251_v50 = vmax.f32 %v2235_v3, 0.0  ;;  %v2252_v16 = vmax.f32 %v2236_v43, 0.0  ;;  %v2253_v9 = vmax.f32 %v2237_v53, 0.0  ;;  %v5010_v10 = vld [vmem:[%s9032_s4 + $0x88] sm:$0xff]  ;;  %v5035_v3 = vld [vmem:[%s9032_s4 + $0xd0] sm:$0xff] }
 0x1b7   :  { %2319 = vst.msk [vmem:[#allocation2 + $0x111] sm:$0xff] %vm75_vm0, %v2261_v19  ;;  %2305 = vst.msk [vmem:[#allocation2 + $0x11] sm:$0xff] %vm75_vm0, %v2247_v33  ;;  %v2239_v22 = vadd.f32 %v2229_v36, %v2217_v51  ;;  %v2240_v41 = vadd.f32 %v2229_v36, %v2218_v28  ;;  %v2241_v47 = vadd.f32 %v2229_v36, %v2219_v29  ;;  %v5012_v28 = vld [vmem:[%s9032_s4 + $0x98] sm:$0xff]  ;;  %v5011_v29 = vld [vmem:[%s9032_s4 + $0x90] sm:$0xff] }
 0x1b8   :  { %2306 = vst.msk [vmem:[#allocation2 + $0x21] sm:$0xff] %vm75_vm0, %v2248_v6  ;;  %2307 = vst.msk [vmem:[#allocation2 + $0x31] sm:$0xff] %vm75_vm0, %v2249_v4  ;;  %v2242_v52 = vadd.f32 %v2229_v36, %v2220_v31  ;;  %v2243_v18 = vadd.f32 %v2229_v36, %v2221_v24  ;;  %v2244_v55 = vadd.f32 %v2229_v36, %v2222_v23  ;;  %v5036_v23 = vld [vmem:[%s9032_s4 + $0xd8] sm:$0xff]  ;;  %v5009_v19 = vld [vmem:[%s9032_s4 + $0x80] sm:$0xff] }
 0x1b9   :  { %2308 = vst.msk [vmem:[#allocation2 + $0x41] sm:$0xff] %vm75_vm0, %v2250_v37  ;;  %2309 = vst.msk [vmem:[#allocation2 + $0x51] sm:$0xff] %vm75_vm0, %v2251_v50  ;;  %v2216_v8 = vmul.f32 %v2207_v30, %v7652_v56  ;;  %v2224_v59 = vmul.f32 %v2207_v30, %v7719_v25  ;;  %v2255_v61 = vmax.f32 %v2239_v22, 0.0  ;;  %v2256_v0 = vmax.f32 %v2240_v41, 0.0  ;;  %v5034_v4 = vld [vmem:[%s9032_s4 + $0xc8] sm:$0xff] }
 0x1ba   :  { %2310 = vst.msk [vmem:[#allocation2 + $0x61] sm:$0xff] %vm75_vm0, %v2252_v16  ;;  %2311 = vst.msk [vmem:[#allocation2 + $0x71] sm:$0xff] %vm75_vm0, %v2253_v9  ;;  %v2257_v40 = vmax.f32 %v2241_v47, 0.0  ;;  %v2258_v48 = vmax.f32 %v2242_v52, 0.0  ;;  %v2259_v2 = vmax.f32 %v2243_v18, 0.0  ;;  %v2260_v38 = vmax.f32 %v2244_v55, 0.0 }
 0x1bb   :  { %v2238_v58 = vadd.f32 %v2229_v36, %v2216_v8  ;;  %v2246_v12 = vadd.f32 %v2229_v36, %v2224_v59  ;;  %2313 = vst.msk [vmem:[#allocation2 + $0xb1] sm:$0xff] %vm75_vm0, %v2255_v61  ;;  %2314 = vst.msk [vmem:[#allocation2 + $0xc1] sm:$0xff] %vm75_vm0, %v2256_v0  ;;  %v2345_v36 = vld [vmem:[#allocation2 + $0xa0] sm:$0xff]  ;;  %v5064_v47 = vld [vmem:[%s9032_s4 + $0x138] sm:$0xff] }
 0x1bc   :  { %2315 = vst.msk [vmem:[#allocation2 + $0xd1] sm:$0xff] %vm75_vm0, %v2257_v40  ;;  %2316 = vst.msk [vmem:[#allocation2 + $0xe1] sm:$0xff] %vm75_vm0, %v2258_v48  ;;  %v5033_v16 = vld [vmem:[%s9032_s4 + $0xc0] sm:$0xff]  ;;  %v5088_v52 = vld [vmem:[%s9032_s4 + $0x178] sm:$0xff] }
 0x1bd   :  { %2317 = vst.msk [vmem:[#allocation2 + $0xf1] sm:$0xff] %vm75_vm0, %v2259_v2  ;;  %2318 = vst.msk [vmem:[#allocation2 + $0x101] sm:$0xff] %vm75_vm0, %v2260_v38  ;;  %v2254_v56 = vmax.f32 %v2238_v58, 0.0  ;;  %v2262_v25 = vmax.f32 %v2246_v12, 0.0  ;;  %v2772_v41 = vld [vmem:[#allocation2 + $0x2] sm:$0xff]  ;;  %v5063_v8 = vld [vmem:[%s9032_s4 + $0x130] sm:$0xff] }
 0x1be   :  { %v7771_v45 = vld [vmem:[#allocation2 + $0x11] sm:$0xff]  ;;  %v5062_v40 = vld [vmem:[%s9032_s4 + $0x128] sm:$0xff]  ;;  %v5061_v58 = vld [vmem:[%s9032_s4 + $0x120] sm:$0xff] }
 0x1bf   :  { %v7773_v44 = vld [vmem:[#allocation2 + $0x10] sm:$0xff]  ;;  %v7775_v39 = vld [vmem:[#allocation2 + $0x21] sm:$0xff]  ;;  %2312 = vst.msk [vmem:[#allocation2 + $0x81] sm:$0xff] %vm75_vm0, %v2254_v56  ;;  %2320 = vst.msk [vmem:[#allocation2 + $0x121] sm:$0xff] %vm75_vm0, %v2262_v25  ;;  %6002 = vmatmul.mubr.msk.f32.vlgmr.msra.gmra.mxu1 %vm75_vm0, %v7771_v45 }
 0x1c0   :  { %6042 = vmatmul.mubr.msk.f32.vlgmr.msra.gmra.mxu0 %vm75_vm0, %v7773_v44  ;;  %v7783_v42 = vld [vmem:[#allocation2 + $0x20] sm:$0xff]  ;;  %6004 = vmatprep.mubr.msk.f32.mxu1 %vm75_vm0, %v7775_v39  ;;  %v7797_v34 = vld [vmem:[#allocation2 + $0x31] sm:$0xff]  ;;  %v5086_v48 = vld [vmem:[%s9032_s4 + $0x168] sm:$0xff] }
 0x1c1   :  { %6044 = vmatprep.mubr.msk.f32.mxu0 %vm75_vm0, %v7783_v42  ;;  %6066 = vmatpush3.msra.mxu1 %v9121_v5  ;;  %v7799_v13 = vld [vmem:[#allocation2 + $0x30] sm:$0xff]  ;;  %v7808_v32 = vld [vmem:[#allocation2 + $0x41] sm:$0xff] }
 0x1c2   :  { %6106 = vmatpush3.msra.mxu0 %v9122_v15  ;;  %6067 = vmatprep.subr.mxu1 %v5015_v7  ;;  %v7810_v30 = vld [vmem:[#allocation2 + $0x40] sm:$0xff]  ;;  %v7819_v1 = vld [vmem:[#allocation2 + $0x51] sm:$0xff] }
 0x1c3   :  { %6107 = vmatprep.subr.mxu0 %v5039_v57  ;;  %6005 = vmatmul.mubr.msk.f32.gmra.mxu1 %vm75_vm0, %v7797_v34  ;;  %v7821_v62 = vld [vmem:[#allocation2 + $0x50] sm:$0xff]  ;;  %v7830_v17 = vld [vmem:[#allocation2 + $0x61] sm:$0xff]  ;;  %v5084_v15 = vld [vmem:[%s9032_s4 + $0x158] sm:$0xff] }
 0x1c4   :  { %6045 = vmatmul.mubr.msk.f32.gmra.mxu0 %vm75_vm0, %v7799_v13  ;;  %6007 = vmatprep.mubr.msk.f32.mxu1 %vm75_vm0, %v7808_v32  ;;  %v7832_v20 = vld [vmem:[#allocation2 + $0x60] sm:$0xff]  ;;  %v7841_v54 = vld [vmem:[#allocation2 + $0x71] sm:$0xff] }
 0x1c5   :  { %6047 = vmatprep.mubr.msk.f32.mxu0 %vm75_vm0, %v7810_v30  ;;  %6068 = vmatpush3.msra.mxu1 %v5015_v7  ;;  %v7843_v51 = vld [vmem:[#allocation2 + $0x70] sm:$0xff]  ;;  %v7868_v35 = vld [vmem:[#allocation2 + $0xc1] sm:$0xff]  ;;  %v5060_v7 = vld [vmem:[%s9032_s4 + $0x118] sm:$0xff] }
 0x1c6   :  { %6108 = vmatpush3.msra.mxu0 %v5039_v57  ;;  %6069 = vmatprep.subr.mxu1 %v5014_v21  ;;  %v7857_v31 = vld [vmem:[#allocation2 + $0xb1] sm:$0xff]  ;;  %v7870_v60 = vld [vmem:[#allocation2 + $0xc0] sm:$0xff] }
 0x1c7   :  { %6109 = vmatprep.subr.mxu0 %v5038_v26  ;;  %6008 = vmatmul.mubr.msk.f32.gmra.mxu1 %vm75_vm0, %v7819_v1  ;;  %v7859_v24 = vld [vmem:[#allocation2 + $0xb0] sm:$0xff]  ;;  %v7890_v43 = vld [vmem:[#allocation2 + $0xe1] sm:$0xff] }
 0x1c8   :  { %6048 = vmatmul.mubr.msk.f32.gmra.mxu0 %vm75_vm0, %v7821_v62  ;;  %6010 = vmatprep.mubr.msk.f32.mxu1 %vm75_vm0, %v7830_v17  ;;  %v7879_v46 = vld [vmem:[#allocation2 + $0xd1] sm:$0xff]  ;;  %v7892_v53 = vld [vmem:[#allocation2 + $0xe0] sm:$0xff] }
 0x1c9   :  { %6050 = vmatprep.mubr.msk.f32.mxu0 %vm75_vm0, %v7832_v20  ;;  %6070 = vmatpush3.msra.mxu1 %v5014_v21  ;;  %v7881_v14 = vld [vmem:[#allocation2 + $0xd0] sm:$0xff]  ;;  %v7912_v37 = vld [vmem:[#allocation2 + $0x101] sm:$0xff] }
 0x1ca   :  { %6110 = vmatpush3.msra.mxu0 %v5038_v26  ;;  %6071 = vmatprep.subr.mxu1 %v5013_v63  ;;  %v7901_v33 = vld [vmem:[#allocation2 + $0xf1] sm:$0xff]  ;;  %v7914_v50 = vld [vmem:[#allocation2 + $0x100] sm:$0xff] }
 0x1cb   :  { %6111 = vmatprep.subr.mxu0 %v5037_v11  ;;  %6011 = vmatmul.mubr.msk.f32.gmra.mxu1 %vm75_vm0, %v7841_v54  ;;  %v7903_v6 = vld [vmem:[#allocation2 + $0xf0] sm:$0xff]  ;;  %v7946_v55 = vld [vmem:[#allocation2 + $0x22] sm:$0xff] }
 0x1cc   :  { %6051 = vmatmul.mubr.msk.f32.gmra.mxu0 %vm75_vm0, %v7843_v51  ;;  %6072 = vmatpush3.msra.mxu1 %v5013_v63  ;;  %v7923_v9 = vld [vmem:[#allocation2 + $0x111] sm:$0xff]  ;;  %v7964_v0 = vld [vmem:[#allocation2 + $0x42] sm:$0xff] }
 0x1cd   :  { %6013 = vmatprep.mubr.msk.f32.mxu1 %vm75_vm0, %v2369_v27  ;;  %6053 = vmatprep.mubr.msk.f32.mxu0 %vm75_vm0, %v2345_v36  ;;  %v7925_v22 = vld [vmem:[#allocation2 + $0x110] sm:$0xff]  ;;  %v7982_v38 = vld [vmem:[#allocation2 + $0x62] sm:$0xff] }
 0x1ce   :  { %6073 = vmatprep.subr.mxu1 %v5012_v28  ;;  %6112 = vmatpush3.msra.mxu0 %v5037_v11  ;;  %v7940_v18 = vld [vmem:[#allocation2 + $0x12] sm:$0xff]  ;;  %v5085_v12 = vld [vmem:[%s9032_s4 + $0x160] sm:$0xff]  ;;  %v5058_v63 = vld [vmem:[%s9032_s4 + $0x108] sm:$0xff] }
 0x1cf   :  { %6074 = vmatpush3.msra.mxu1 %v5012_v28  ;;  %6113 = vmatprep.subr.mxu0 %v5036_v23  ;;  %v5087_v59 = vld [vmem:[%s9032_s4 + $0x170] sm:$0xff]  ;;  %v2780_v56 = vld [vmem:[#allocation2 + $0xa2] sm:$0xff] }
 0x1d0   :  { %6014 = vmatmul.mubr.msk.f32.gmra.mxu1 %vm75_vm0, %v7857_v31  ;;  %6054 = vmatmul.mubr.msk.f32.gmra.mxu0 %vm75_vm0, %v7859_v24  ;;  %v7958_v61 = vld [vmem:[#allocation2 + $0x32] sm:$0xff]  ;;  %v8020_v21 = vld [vmem:[#allocation2 + $0xc2] sm:$0xff] }
 0x1d1   :  { %6016 = vmatprep.mubr.msk.f32.mxu1 %vm75_vm0, %v7868_v35  ;;  %6056 = vmatprep.mubr.msk.f32.mxu0 %vm75_vm0, %v7870_v60  ;;  %v7976_v2 = vld [vmem:[#allocation2 + $0x52] sm:$0xff]  ;;  %v8038_v27 = vld [vmem:[#allocation2 + $0xe2] sm:$0xff] }
 0x1d2   :  { %6075 = vmatprep.subr.mxu1 %v5011_v29  ;;  %6114 = vmatpush3.msra.mxu0 %v5036_v23  ;;  %v7994_v25 = vld [vmem:[#allocation2 + $0x72] sm:$0xff]  ;;  %v5057_v28 = vld [vmem:[%s9032_s4 + $0x100] sm:$0xff] }
 0x1d3   :  { %6076 = vmatpush3.msra.mxu1 %v5011_v29  ;;  %6115 = vmatprep.subr.mxu0 %v5035_v3  ;;  %v8008_v57 = vld [vmem:[#allocation2 + $0xb2] sm:$0xff]  ;;  %v5082_v29 = vld [vmem:[%s9032_s4 + $0x148] sm:$0xff]  ;;  %v5081_v23 = vld [vmem:[%s9032_s4 + $0x140] sm:$0xff] }
 0x1d4   :  { %6017 = vmatmul.mubr.msk.f32.gmra.mxu1 %vm75_vm0, %v7879_v46  ;;  %6057 = vmatmul.mubr.msk.f32.gmra.mxu0 %vm75_vm0, %v7881_v14  ;;  %v5059_v5 = vld [vmem:[%s9032_s4 + $0x110] sm:$0xff] }
 0x1d5   :  { %6019 = vmatprep.mubr.msk.f32.mxu1 %vm75_vm0, %v7890_v43  ;;  %6059 = vmatprep.mubr.msk.f32.mxu0 %vm75_vm0, %v7892_v53  ;;  %v8026_v26 = vld [vmem:[#allocation2 + $0xd2] sm:$0xff] }
 0x1d6   :  { %6077 = vmatprep.subr.mxu1 %v5010_v10  ;;  %6116 = vmatpush3.msra.mxu0 %v5035_v3  ;;  %v5083_v11 = vld [vmem:[%s9032_s4 + $0x150] sm:$0xff]  ;;  %v8067_v3 = vld [vmem:[#allocation2 + $0x120] sm:$0xff] }
 0x1d7   :  { %6078 = vmatpush3.msra.mxu1 %v5010_v10  ;;  %6117 = vmatprep.subr.mxu0 %v5034_v4  ;;  %v8044_v36 = vld [vmem:[#allocation2 + $0xf2] sm:$0xff] }
 0x1d8   :  { %6020 = vmatmul.mubr.msk.f32.gmra.mxu1 %vm75_vm0, %v7901_v33  ;;  %6060 = vmatmul.mubr.msk.f32.gmra.mxu0 %vm75_vm0, %v7903_v6  ;;  %v8065_v10 = vld [vmem:[#allocation2 + $0x112] sm:$0xff] }
 0x1d9   :  { %6022 = vmatprep.mubr.msk.f32.mxu1 %vm75_vm0, %v7912_v37  ;;  %6062 = vmatprep.mubr.msk.f32.mxu0 %vm75_vm0, %v7914_v50 }
 0x1da   :  { %6079 = vmatprep.subr.mxu1 %v5009_v19  ;;  %6118 = vmatpush3.msra.mxu0 %v5034_v4  ;;  %v5136_v4 = vld [vmem:[%s9032_s4 + $0x1f8] sm:$0xff] }
 0x1db   :  { %6080 = vmatpush3.msra.mxu1 %v5009_v19  ;;  %6119 = vmatprep.subr.mxu0 %v5033_v16  ;;  %v5112_v19 = vld [vmem:[%s9032_s4 + $0x1b8] sm:$0xff] }
 0x1dc   :  { %6023 = vmatmul.mubr.msk.f32.gmra.mxu1 %vm75_vm0, %v7923_v9  ;;  %6063 = vmatmul.mubr.msk.f32.gmra.mxu0 %vm75_vm0, %v7925_v22 }
 0x1dd   :  { %6121 = vmatprep.mubr.msk.f32.mxu0 %vm75_vm0, %v7773_v44  ;;  %6081 = vmatprep.mubr.msk.f32.mxu1 %vm75_vm0, %v2772_v41  ;;  %v7996_v44 = vld [vmem:[#allocation2 + $0x80] sm:$0xff]  ;;  %v5110_v41 = vld [vmem:[%s9032_s4 + $0x1a8] sm:$0xff] }
 0x1de   :  { %6120 = vmatpush3.msra.mxu0 %v5033_v16  ;;  %6145 = vmatprep.subr.mxu1 %v5064_v47  ;;  %v5135_v16 = vld [vmem:[%s9032_s4 + $0x1f0] sm:$0xff] }
 0x1df   :  { %6185 = vmatprep.subr.mxu0 %v5088_v52 }
 0x1e0   :  { %6082 = vmatmul.mubr.msk.f32.vlgmr.msra.gmra.mxu1 %vm75_vm0, %v7940_v18  ;;  %6122 = vmatmul.mubr.msk.f32.vlgmr.msra.gmra.mxu0 %vm75_vm0, %v7783_v42 }
 0x1e1   :  { %6084 = vmatprep.mubr.msk.f32.mxu1 %vm75_vm0, %v7946_v55  ;;  %6124 = vmatprep.mubr.msk.f32.mxu0 %vm75_vm0, %v7799_v13 }
 0x1e2   :  { %6146 = vmatpush3.msra.mxu1 %v5064_v47  ;;  %6186 = vmatpush3.msra.mxu0 %v5088_v52  ;;  %v5134_v47 = vld [vmem:[%s9032_s4 + $0x1e8] sm:$0xff]  ;;  %v5109_v52 = vld [vmem:[%s9032_s4 + $0x1a0] sm:$0xff] }
 0x1e3   :  { %6147 = vmatprep.subr.mxu1 %v5063_v8  ;;  %6187 = vmatprep.subr.mxu0 %v5087_v59 }
 0x1e4   :  { %6085 = vmatmul.mubr.msk.f32.gmra.mxu1 %vm75_vm0, %v7958_v61  ;;  %6125 = vmatmul.mubr.msk.f32.gmra.mxu0 %vm75_vm0, %v7810_v30 }
 0x1e5   :  { %6087 = vmatprep.mubr.msk.f32.mxu1 %vm75_vm0, %v7964_v0  ;;  %6127 = vmatprep.mubr.msk.f32.mxu0 %vm75_vm0, %v7821_v62 }
 0x1e6   :  { %6148 = vmatpush3.msra.mxu1 %v5063_v8  ;;  %6188 = vmatpush3.msra.mxu0 %v5087_v59  ;;  %v8124_v8 = vld [vmem:[#allocation2 + $0x82] sm:$0xff] }
 0x1e7   :  { %6149 = vmatprep.subr.mxu1 %v5062_v40  ;;  %6189 = vmatprep.subr.mxu0 %v5086_v48  ;;  %v5133_v59 = vld [vmem:[%s9032_s4 + $0x1e0] sm:$0xff] }
 0x1e8   :  { %6088 = vmatmul.mubr.msk.f32.gmra.mxu1 %vm75_vm0, %v7976_v2  ;;  %6128 = vmatmul.mubr.msk.f32.gmra.mxu0 %vm75_vm0, %v7832_v20 }
 0x1e9   :  { %6090 = vmatprep.mubr.msk.f32.mxu1 %vm75_vm0, %v7982_v38  ;;  %6130 = vmatprep.mubr.msk.f32.mxu0 %vm75_vm0, %v7843_v51 }
 0x1ea   :  { %6150 = vmatpush3.msra.mxu1 %v5062_v40  ;;  %6190 = vmatpush3.msra.mxu0 %v5086_v48  ;;  %v5108_v40 = vld [vmem:[%s9032_s4 + $0x198] sm:$0xff] }
 0x1eb   :  { %6151 = vmatprep.subr.mxu1 %v5061_v58  ;;  %6191 = vmatprep.subr.mxu0 %v5085_v12  ;;  %v5132_v48 = vld [vmem:[%s9032_s4 + $0x1d8] sm:$0xff] }
 0x1ec   :  { %6091 = vmatmul.mubr.msk.f32.gmra.mxu1 %vm75_vm0, %v7994_v25  ;;  %6131 = vmatmul.mubr.msk.f32.gmra.mxu0 %vm75_vm0, %v7996_v44 }
 0x1ed   :  { %6133 = vmatprep.mubr.msk.f32.mxu0 %vm75_vm0, %v7859_v24  ;;  %6152 = vmatpush3.msra.mxu1 %v5061_v58  ;;  %v8056_v24 = vld [vmem:[#allocation2 + $0x102] sm:$0xff]  ;;  %v5131_v58 = vld [vmem:[%s9032_s4 + $0x1d0] sm:$0xff] }
 0x1ee   :  { %6093 = vmatprep.mubr.msk.f32.mxu1 %vm75_vm0, %v2780_v56  ;;  %6153 = vmatprep.subr.mxu1 %v5060_v7  ;;  %v5130_v56 = vld [vmem:[%s9032_s4 + $0x1c8] sm:$0xff] }
 0x1ef   :  { %6154 = vmatpush3.msra.mxu1 %v5060_v7  ;;  %6192 = vmatpush3.msra.mxu0 %v5085_v12  ;;  %v5106_v12 = vld [vmem:[%s9032_s4 + $0x188] sm:$0xff]  ;;  %v5105_v7 = vld [vmem:[%s9032_s4 + $0x180] sm:$0xff] }
 0x1f0   :  { %6094 = vmatmul.mubr.msk.f32.gmra.mxu1 %vm75_vm0, %v8008_v57  ;;  %6134 = vmatmul.mubr.msk.f32.gmra.mxu0 %vm75_vm0, %v7870_v60 }
 0x1f1   :  { %6096 = vmatprep.mubr.msk.f32.mxu1 %vm75_vm0, %v8020_v21  ;;  %6136 = vmatprep.mubr.msk.f32.mxu0 %vm75_vm0, %v7881_v14 }
 0x1f2   :  { %6155 = vmatprep.subr.mxu1 %v5059_v5  ;;  %6193 = vmatprep.subr.mxu0 %v5084_v15 }
 0x1f3   :  { %6156 = vmatpush3.msra.mxu1 %v5059_v5  ;;  %6194 = vmatpush3.msra.mxu0 %v5084_v15  ;;  %v8182_v5 = vld [vmem:[#allocation2 + $0x122] sm:$0xff] }
 0x1f4   :  { %6097 = vmatmul.mubr.msk.f32.gmra.mxu1 %vm75_vm0, %v8026_v26  ;;  %6137 = vmatmul.mubr.msk.f32.gmra.mxu0 %vm75_vm0, %v7892_v53  ;;  %v5129_v15 = vld [vmem:[%s9032_s4 + $0x1c0] sm:$0xff] }
 0x1f5   :  { %6099 = vmatprep.mubr.msk.f32.mxu1 %vm75_vm0, %v8038_v27  ;;  %6139 = vmatprep.mubr.msk.f32.mxu0 %vm75_vm0, %v7903_v6 }
 0x1f6   :  { %6157 = vmatprep.subr.mxu1 %v5058_v63  ;;  %6195 = vmatprep.subr.mxu0 %v5083_v11 }
 0x1f7   :  { %6158 = vmatpush3.msra.mxu1 %v5058_v63  ;;  %6196 = vmatpush3.msra.mxu0 %v5083_v11  ;;  %v5160_v63 = vld [vmem:[%s9032_s4 + $0x238] sm:$0xff]  ;;  %v5159_v11 = vld [vmem:[%s9032_s4 + $0x230] sm:$0xff] }
 0x1f8   :  { %6100 = vmatmul.mubr.msk.f32.gmra.mxu1 %vm75_vm0, %v8044_v36  ;;  %6140 = vmatmul.mubr.msk.f32.gmra.mxu0 %vm75_vm0, %v7914_v50 }
 0x1f9   :  { %6102 = vmatprep.mubr.msk.f32.mxu1 %vm75_vm0, %v8056_v24  ;;  %6142 = vmatprep.mubr.msk.f32.mxu0 %vm75_vm0, %v7925_v22 }
 0x1fa   :  { %6159 = vmatprep.subr.mxu1 %v5057_v28  ;;  %6197 = vmatprep.subr.mxu0 %v5082_v29 }
 0x1fb   :  { %6160 = vmatpush3.msra.mxu1 %v5057_v28  ;;  %6198 = vmatpush3.msra.mxu0 %v5082_v29 }
 0x1fc   :  { %6103 = vmatmul.mubr.msk.f32.gmra.mxu1 %vm75_vm0, %v8065_v10  ;;  %6143 = vmatmul.mubr.msk.f32.gmra.mxu0 %vm75_vm0, %v8067_v3 }
 0x1fd   :  { %6161 = vmatprep.mubr.msk.f32.mxu1 %vm75_vm0, %v7771_v45  ;;  %6201 = vmatprep.mubr.msk.f32.mxu0 %vm75_vm0, %v7940_v18  ;;  %v5111_v45 = vld [vmem:[%s9032_s4 + $0x1b0] sm:$0xff]  ;;  %v8122_v18 = vld [vmem:[#allocation2 + $0x81] sm:$0xff] }
 0x1fe   :  { %6199 = vmatprep.subr.mxu0 %v5081_v23  ;;  %6225 = vmatprep.subr.mxu1 %v5112_v19 }
 0x1ff   :  { %6200 = vmatpush3.msra.mxu0 %v5081_v23 }
 0x200   :  { %6162 = vmatmul.mubr.msk.f32.vlgmr.msra.gmra.mxu1 %vm75_vm0, %v7775_v39  ;;  %6202 = vmatmul.mubr.msk.f32.vlgmr.msra.gmra.mxu0 %vm75_vm0, %v7946_v55 }
 0x201   :  { %6164 = vmatprep.mubr.msk.f32.mxu1 %vm75_vm0, %v7797_v34  ;;  %6204 = vmatprep.mubr.msk.f32.mxu0 %vm75_vm0, %v7958_v61 }
 0x202   :  { %6226 = vmatpush3.msra.mxu1 %v5112_v19  ;;  %6265 = vmatprep.subr.mxu0 %v5136_v4 }
 0x203   :  { %6227 = vmatprep.subr.mxu1 %v5111_v45  ;;  %6266 = vmatpush3.msra.mxu0 %v5136_v4 }
 0x204   :  { %6165 = vmatmul.mubr.msk.f32.gmra.mxu1 %vm75_vm0, %v7808_v32  ;;  %6205 = vmatmul.mubr.msk.f32.gmra.mxu0 %vm75_vm0, %v7964_v0 }
 0x205   :  { %6167 = vmatprep.mubr.msk.f32.mxu1 %vm75_vm0, %v7819_v1  ;;  %6207 = vmatprep.mubr.msk.f32.mxu0 %vm75_vm0, %v7976_v2 }
 0x206   :  { %6228 = vmatpush3.msra.mxu1 %v5111_v45  ;;  %6267 = vmatprep.subr.mxu0 %v5135_v16 }
 0x207   :  { %6229 = vmatprep.subr.mxu1 %v5110_v41  ;;  %6268 = vmatpush3.msra.mxu0 %v5135_v16 }
 0x208   :  { %6168 = vmatmul.mubr.msk.f32.gmra.mxu1 %vm75_vm0, %v7830_v17  ;;  %6208 = vmatmul.mubr.msk.f32.gmra.mxu0 %vm75_vm0, %v7982_v38 }
 0x209   :  { %6170 = vmatprep.mubr.msk.f32.mxu1 %vm75_vm0, %v7841_v54  ;;  %6210 = vmatprep.mubr.msk.f32.mxu0 %vm75_vm0, %v7994_v25 }
 0x20a   :  { %6230 = vmatpush3.msra.mxu1 %v5110_v41  ;;  %6269 = vmatprep.subr.mxu0 %v5134_v47 }
 0x20b   :  { %6231 = vmatprep.subr.mxu1 %v5109_v52  ;;  %6270 = vmatpush3.msra.mxu0 %v5134_v47 }
 0x20c   :  { %6171 = vmatmul.mubr.msk.f32.gmra.mxu1 %vm75_vm0, %v8122_v18  ;;  %6211 = vmatmul.mubr.msk.f32.gmra.mxu0 %vm75_vm0, %v8124_v8 }
 0x20d   :  { %6173 = vmatprep.mubr.msk.f32.mxu1 %vm75_vm0, %v7857_v31  ;;  %6213 = vmatprep.mubr.msk.f32.mxu0 %vm75_vm0, %v8008_v57  ;;  %v5107_v31 = vld [vmem:[%s9032_s4 + $0x190] sm:$0xff]  ;;  %v3255_v57 = vld [vmem:[#allocation2 + $0x121] sm:$0xff] }
 0x20e   :  { %6232 = vmatpush3.msra.mxu1 %v5109_v52  ;;  %6271 = vmatprep.subr.mxu0 %v5133_v59 }
 0x20f   :  { %6233 = vmatprep.subr.mxu1 %v5108_v40  ;;  %6272 = vmatpush3.msra.mxu0 %v5133_v59 }
 0x210   :  { %6174 = vmatmul.mubr.msk.f32.gmra.mxu1 %vm75_vm0, %v7868_v35  ;;  %6214 = vmatmul.mubr.msk.f32.gmra.mxu0 %vm75_vm0, %v8020_v21 }
 0x211   :  { %6176 = vmatprep.mubr.msk.f32.mxu1 %vm75_vm0, %v7879_v46  ;;  %6216 = vmatprep.mubr.msk.f32.mxu0 %vm75_vm0, %v8026_v26 }
 0x212   :  { %6234 = vmatpush3.msra.mxu1 %v5108_v40  ;;  %6273 = vmatprep.subr.mxu0 %v5132_v48 }
 0x213   :  { %6235 = vmatprep.subr.mxu1 %v5107_v31  ;;  %6274 = vmatpush3.msra.mxu0 %v5132_v48 }
 0x214   :  { %6177 = vmatmul.mubr.msk.f32.gmra.mxu1 %vm75_vm0, %v7890_v43  ;;  %6217 = vmatmul.mubr.msk.f32.gmra.mxu0 %vm75_vm0, %v8038_v27 }
 0x215   :  { %6179 = vmatprep.mubr.msk.f32.mxu1 %vm75_vm0, %v7901_v33  ;;  %6219 = vmatprep.mubr.msk.f32.mxu0 %vm75_vm0, %v8044_v36 }
 0x216   :  { %6236 = vmatpush3.msra.mxu1 %v5107_v31  ;;  %6275 = vmatprep.subr.mxu0 %v5131_v58 }
 0x217   :  { %6237 = vmatprep.subr.mxu1 %v5106_v12  ;;  %6276 = vmatpush3.msra.mxu0 %v5131_v58 }
 0x218   :  { %6180 = vmatmul.mubr.msk.f32.gmra.mxu1 %vm75_vm0, %v7912_v37  ;;  %6220 = vmatmul.mubr.msk.f32.gmra.mxu0 %vm75_vm0, %v8056_v24 }
 0x219   :  { %6182 = vmatprep.mubr.msk.f32.mxu1 %vm75_vm0, %v7923_v9  ;;  %6222 = vmatprep.mubr.msk.f32.mxu0 %vm75_vm0, %v8065_v10 }
 0x21a   :  { %6238 = vmatpush3.msra.mxu1 %v5106_v12  ;;  %6277 = vmatprep.subr.mxu0 %v5130_v56 }
 0x21b   :  { %6239 = vmatprep.subr.mxu1 %v5105_v7  ;;  %6278 = vmatpush3.msra.mxu0 %v5130_v56 }
 0x21c   :  { %6183 = vmatmul.mubr.msk.f32.gmra.mxu1 %vm75_vm0, %v3255_v57  ;;  %6223 = vmatmul.mubr.msk.f32.gmra.mxu0 %vm75_vm0, %v8182_v5 }
 0x21d   :  { %6240 = vmatpush3.msra.mxu1 %v5105_v7  ;;  %6241 = vmatprep.mubr.msk.f32.mxu1 %vm75_vm0, %v7783_v42  ;;  %v5157_v42 = vld [vmem:[%s9032_s4 + $0x220] sm:$0xff] }
 0x21e   :  { %6281 = vmatprep.mubr.msk.f32.mxu0 %vm75_vm0, %v7775_v39  ;;  %6279 = vmatprep.subr.mxu0 %v5129_v15  ;;  %v5158_v39 = vld [vmem:[%s9032_s4 + $0x228] sm:$0xff] }
 0x21f   :  { %6280 = vmatpush3.msra.mxu0 %v5129_v15  ;;  %6305 = vmatprep.subr.mxu1 %v5160_v63 }
 0x220   :  { %6242 = vmatmul.mubr.msk.f32.vlgmr.msra.gmra.mxu1 %vm75_vm0, %v7799_v13  ;;  %6282 = vmatmul.mubr.msk.f32.vlgmr.msra.gmra.mxu0 %vm75_vm0, %v7797_v34  ;;  %v3716_v34 = vld [vmem:[#allocation2 + $0x90] sm:$0xff] }
 0x221   :  { %6244 = vmatprep.mubr.msk.f32.mxu1 %vm75_vm0, %v7810_v30  ;;  %6284 = vmatprep.mubr.msk.f32.mxu0 %vm75_vm0, %v7808_v32  ;;  %v3950_v13 = vld [vmem:[#allocation2 + $0x91] sm:$0xff] }
 0x222   :  { %6306 = vmatpush3.msra.mxu1 %v5160_v63  ;;  %v5156_v32 = vld [vmem:[%s9032_s4 + $0x218] sm:$0xff]  ;;  %v5155_v30 = vld [vmem:[%s9032_s4 + $0x210] sm:$0xff] }
 0x223   :  { %6307 = vmatprep.subr.mxu1 %v5159_v11 }
 0x224   :  { %6245 = vmatmul.mubr.msk.f32.gmra.mxu1 %vm75_vm0, %v7821_v62  ;;  %6285 = vmatmul.mubr.msk.f32.gmra.mxu0 %vm75_vm0, %v7819_v1  ;;  %v5154_v1 = vld [vmem:[%s9032_s4 + $0x208] sm:$0xff]  ;;  %v5153_v62 = vld [vmem:[%s9032_s4 + $0x200] sm:$0xff] }
 0x225   :  { %6247 = vmatprep.mubr.msk.f32.mxu1 %vm75_vm0, %v7832_v20  ;;  %6287 = vmatprep.mubr.msk.f32.mxu0 %vm75_vm0, %v7830_v17  ;;  %v3724_v17 = vld [vmem:[#allocation2 + $0x130] sm:$0xff] }
 0x226   :  { %6308 = vmatpush3.msra.mxu1 %v5159_v11  ;;  %v3958_v20 = vld [vmem:[#allocation2 + $0x131] sm:$0xff] }
 0x227   :  { %6309 = vmatprep.subr.mxu1 %v5158_v39 }
 0x228   :  { %6248 = vmatmul.mubr.msk.f32.gmra.mxu1 %vm75_vm0, %v7843_v51  ;;  %6288 = vmatmul.mubr.msk.f32.gmra.mxu0 %vm75_vm0, %v7841_v54  ;;  %v4184_v54 = vld [vmem:[#allocation2 + $0x92] sm:$0xff] }
 0x229   :  { %6250 = vmatprep.mubr.msk.f32.mxu1 %vm75_vm0, %v7996_v44  ;;  %6290 = vmatprep.mubr.msk.f32.mxu0 %vm75_vm0, %v8122_v18  ;;  %v4192_v51 = vld [vmem:[#allocation2 + $0x132] sm:$0xff] }
 0x22a   :  { %6310 = vmatpush3.msra.mxu1 %v5158_v39 }
 0x22b   :  { %6311 = vmatprep.subr.mxu1 %v5157_v42 }
 0x22c   :  { %6251 = vmatmul.mubr.msk.f32.gmra.mxu1 %vm75_vm0, %v3716_v34  ;;  %6291 = vmatmul.mubr.msk.f32.gmra.mxu0 %vm75_vm0, %v3950_v13  ;;  %v9123_v34 = vmov 0.0  }
 0x22d   :  { %6253 = vmatprep.mubr.msk.f32.mxu1 %vm75_vm0, %v7870_v60  ;;  %6293 = vmatprep.mubr.msk.f32.mxu0 %vm75_vm0, %v7868_v35  ;;  %4590 = vst.msk [vmem:[%s9035_s7 + $0x10] sm:$0xff] %vm75_vm0, %v9123_v34  ;;  %4592 = vst.msk [vmem:[%s9035_s7 + $0x20] sm:$0xff] %vm75_vm0, %v9123_v34 }
 0x22e   :  { %6312 = vmatpush3.msra.mxu1 %v5157_v42  ;;  %4591 = vst.msk [vmem:[%s9035_s7 + $0x18] sm:$0x3] %vm2264_vm1, %v9123_v34  ;;  %4593 = vst.msk [vmem:[%s9035_s7 + $0x28] sm:$0x3] %vm2264_vm1, %v9123_v34 }
 0x22f   :  { %6313 = vmatprep.subr.mxu1 %v5156_v32  ;;  %4594 = vst.msk [vmem:[%s9035_s7 + $0x30] sm:$0xff] %vm75_vm0, %v9123_v34  ;;  %4596 = vst.msk [vmem:[%s9035_s7 + $0x40] sm:$0xff] %vm75_vm0, %v9123_v34 }
 0x230   :  { %6254 = vmatmul.mubr.msk.f32.gmra.mxu1 %vm75_vm0, %v7881_v14  ;;  %6294 = vmatmul.mubr.msk.f32.gmra.mxu0 %vm75_vm0, %v7879_v46  ;;  %4595 = vst.msk [vmem:[%s9035_s7 + $0x38] sm:$0x3] %vm2264_vm1, %v9123_v34  ;;  %4597 = vst.msk [vmem:[%s9035_s7 + $0x48] sm:$0x3] %vm2264_vm1, %v9123_v34 }
 0x231   :  { %6256 = vmatprep.mubr.msk.f32.mxu1 %vm75_vm0, %v7892_v53  ;;  %6296 = vmatprep.mubr.msk.f32.mxu0 %vm75_vm0, %v7890_v43  ;;  %4598 = vst.msk [vmem:[%s9035_s7 + $0x50] sm:$0xff] %vm75_vm0, %v9123_v34  ;;  %4600 = vst.msk [vmem:[%s9035_s7 + $0x60] sm:$0xff] %vm75_vm0, %v9123_v34 }
 0x232   :  { %6314 = vmatpush3.msra.mxu1 %v5156_v32  ;;  %4599 = vst.msk [vmem:[%s9035_s7 + $0x58] sm:$0x3] %vm2264_vm1, %v9123_v34  ;;  %4601 = vst.msk [vmem:[%s9035_s7 + $0x68] sm:$0x3] %vm2264_vm1, %v9123_v34 }
 0x233   :  { %6315 = vmatprep.subr.mxu1 %v5155_v30  ;;  %4602 = vst.msk [vmem:[%s9035_s7 + $0x70] sm:$0xff] %vm75_vm0, %v9123_v34  ;;  %4604 = vst.msk [vmem:[%s9035_s7 + $0x80] sm:$0xff] %vm75_vm0, %v9123_v34 }
 0x234   :  { %6257 = vmatmul.mubr.msk.f32.gmra.mxu1 %vm75_vm0, %v7903_v6  ;;  %6297 = vmatmul.mubr.msk.f32.gmra.mxu0 %vm75_vm0, %v7901_v33  ;;  %4603 = vst.msk [vmem:[%s9035_s7 + $0x78] sm:$0x3] %vm2264_vm1, %v9123_v34  ;;  %4605 = vst.msk [vmem:[%s9035_s7 + $0x88] sm:$0x3] %vm2264_vm1, %v9123_v34 }
 0x235   :  { %6259 = vmatprep.mubr.msk.f32.mxu1 %vm75_vm0, %v7914_v50  ;;  %6299 = vmatprep.mubr.msk.f32.mxu0 %vm75_vm0, %v7912_v37  ;;  %4610 = vst.msk [vmem:[%s9035_s7 + $0xb0] sm:$0xff] %vm75_vm0, %v9123_v34  ;;  %4612 = vst.msk [vmem:[%s9035_s7 + $0xc0] sm:$0xff] %vm75_vm0, %v9123_v34 }
 0x236   :  { %6316 = vmatpush3.msra.mxu1 %v5155_v30  ;;  %4611 = vst.msk [vmem:[%s9035_s7 + $0xb8] sm:$0x3] %vm2264_vm1, %v9123_v34  ;;  %4613 = vst.msk [vmem:[%s9035_s7 + $0xc8] sm:$0x3] %vm2264_vm1, %v9123_v34 }
 0x237   :  { %6317 = vmatprep.subr.mxu1 %v5154_v1  ;;  %4614 = vst.msk [vmem:[%s9035_s7 + $0xd0] sm:$0xff] %vm75_vm0, %v9123_v34  ;;  %4616 = vst.msk [vmem:[%s9035_s7 + $0xe0] sm:$0xff] %vm75_vm0, %v9123_v34 }
 0x238   :  { %6260 = vmatmul.mubr.msk.f32.gmra.mxu1 %vm75_vm0, %v7925_v22  ;;  %6300 = vmatmul.mubr.msk.f32.gmra.mxu0 %vm75_vm0, %v7923_v9  ;;  %4615 = vst.msk [vmem:[%s9035_s7 + $0xd8] sm:$0x3] %vm2264_vm1, %v9123_v34  ;;  %4617 = vst.msk [vmem:[%s9035_s7 + $0xe8] sm:$0x3] %vm2264_vm1, %v9123_v34 }
 0x239   :  { %6262 = vmatprep.mubr.msk.f32.mxu1 %vm75_vm0, %v8067_v3  ;;  %6302 = vmatprep.mubr.msk.f32.mxu0 %vm75_vm0, %v3255_v57  ;;  %4618 = vst.msk [vmem:[%s9035_s7 + $0xf0] sm:$0xff] %vm75_vm0, %v9123_v34  ;;  %4620 = vst.msk [vmem:[%s9035_s7 + $0x100] sm:$0xff] %vm75_vm0, %v9123_v34 }
 0x23a   :  { %6318 = vmatpush3.msra.mxu1 %v5154_v1  ;;  %4619 = vst.msk [vmem:[%s9035_s7 + $0xf8] sm:$0x3] %vm2264_vm1, %v9123_v34  ;;  %4621 = vst.msk [vmem:[%s9035_s7 + $0x108] sm:$0x3] %vm2264_vm1, %v9123_v34 }
 0x23b   :  { %6319 = vmatprep.subr.mxu1 %v5153_v62  ;;  %4622 = vst.msk [vmem:[%s9035_s7 + $0x110] sm:$0xff] %vm75_vm0, %v9123_v34  ;;  %4624 = vst.msk [vmem:[%s9035_s7 + $0x120] sm:$0xff] %vm75_vm0, %v9123_v34 }
 0x23c   :  { %6263 = vmatmul.mubr.msk.f32.gmra.mxu1 %vm75_vm0, %v3724_v17  ;;  %6303 = vmatmul.mubr.msk.f32.gmra.mxu0 %vm75_vm0, %v3958_v20  ;;  %4623 = vst.msk [vmem:[%s9035_s7 + $0x118] sm:$0x3] %vm2264_vm1, %v9123_v34  ;;  %4625 = vst.msk [vmem:[%s9035_s7 + $0x128] sm:$0x3] %vm2264_vm1, %v9123_v34 }
 0x23d   :  { %6320 = vmatpush3.msra.mxu1 %v5153_v62  ;;  %6321 = vmatprep.mubr.msk.f32.mxu1 %vm75_vm0, %v7946_v55  ;;  %4588 = vst.msk [vmem:[%s9035_s7] sm:$0xff] %vm75_vm0, %v9123_v34  ;;  %4606 = vst.msk [vmem:[%s9035_s7 + $0x90] sm:$0xff] %vm75_vm0, %v9123_v34 }
 0x23e   :  { %4589 = vst.msk [vmem:[%s9035_s7 + $0x8] sm:$0x3] %vm2264_vm1, %v9123_v34  ;;  %4607 = vst.msk [vmem:[%s9035_s7 + $0x98] sm:$0x3] %vm2264_vm1, %v9123_v34 }
 0x23f   :  { %4608 = vst.msk [vmem:[%s9035_s7 + $0xa0] sm:$0xff] %vm75_vm0, %v9123_v34  ;;  %4626 = vst.msk [vmem:[%s9035_s7 + $0x130] sm:$0xff] %vm75_vm0, %v9123_v34 }
 0x240   :  { %6322 = vmatmul.mubr.msk.f32.vlgmr.msra.gmra.mxu1 %vm75_vm0, %v7958_v61  ;;  %4609 = vst.msk [vmem:[%s9035_s7 + $0xa8] sm:$0x3] %vm2264_vm1, %v9123_v34  ;;  %4627 = vst.msk [vmem:[%s9035_s7 + $0x138] sm:$0x3] %vm2264_vm1, %v9123_v34 }
 0x241   :  { %6324 = vmatprep.mubr.msk.f32.mxu1 %vm75_vm0, %v7964_v0 }
 0x244   :  { %6325 = vmatmul.mubr.msk.f32.gmra.mxu1 %vm75_vm0, %v7976_v2 }
 0x245   :  { %6327 = vmatprep.mubr.msk.f32.mxu1 %vm75_vm0, %v7982_v38 }
 0x248   :  { %6328 = vmatmul.mubr.msk.f32.gmra.mxu1 %vm75_vm0, %v7994_v25 }
 0x249   :  { %6330 = vmatprep.mubr.msk.f32.mxu1 %vm75_vm0, %v8124_v8 }
 0x24c   :  { %6331 = vmatmul.mubr.msk.f32.gmra.mxu1 %vm75_vm0, %v4184_v54 }
 0x24d   :  { %6333 = vmatprep.mubr.msk.f32.mxu1 %vm75_vm0, %v8020_v21 }
 0x250   :  { %6334 = vmatmul.mubr.msk.f32.gmra.mxu1 %vm75_vm0, %v8026_v26 }
 0x251   :  { %6336 = vmatprep.mubr.msk.f32.mxu1 %vm75_vm0, %v8038_v27 }
 0x254   :  { %6337 = vmatmul.mubr.msk.f32.gmra.mxu1 %vm75_vm0, %v8044_v36 }
 0x255   :  { %6339 = vmatprep.mubr.msk.f32.mxu1 %vm75_vm0, %v8056_v24 }
 0x258   :  { %6340 = vmatmul.mubr.msk.f32.gmra.mxu1 %vm75_vm0, %v8065_v10 }
 0x259   :  { %6342 = vmatprep.mubr.msk.f32.mxu1 %vm75_vm0, %v8182_v5 }
 0x25c   :  { %6343 = vmatmul.mubr.msk.f32.gmra.mxu1 %vm75_vm0, %v4192_v51 }
 0x27f   :  { %v6003_v35 = vpop.f32.mrf.mxu1 }
 0x280   :  { %v6043_v60 = vpop.f32.mrf.mxu0 }
 0x281   :  { %v2699_v46 = vadd.f32 %v6043_v60, %v6003_v35  ;;  %v2500_v14 = vpop.f32.mrf.mxu1 }
 0x282   :  { %v2693_v43 = vpop.f32.mrf.mxu0 }
 0x283   :  { %v8303_v53 = vadd.f32 %v2693_v43, %v2500_v14  ;;  %v6006_v33 = vpop.f32.mrf.mxu1 }
 0x284   :  { %v6046_v6 = vpop.f32.mrf.mxu0 }
 0x285   :  { %v8305_v37 = vadd.f32 %v6046_v6, %v6006_v33  ;;  %v2510_v50 = vpop.f32.mrf.mxu1 }
 0x286   :  { %v2703_v9 = vpop.f32.mrf.mxu0 }
 0x287   :  { %v8307_v22 = vadd.f32 %v2703_v9, %v2510_v50  ;;  %v6009_v55 = vpop.f32.mrf.mxu1 }
 0x288   :  { %v6049_v61 = vpop.f32.mrf.mxu0 }
 0x289   :  { %v8309_v0 = vadd.f32 %v6049_v61, %v6009_v55  ;;  %v2520_v2 = vpop.f32.mrf.mxu1 }
 0x28a   :  { %v2713_v38 = vpop.f32.mrf.mxu0 }
 0x28b   :  { %v8311_v25 = vadd.f32 %v2713_v38, %v2520_v2  ;;  %v6012_v44 = vpop.f32.mrf.mxu1 }
 0x28c   :  { %v6052_v21 = vpop.f32.mrf.mxu0 }
 0x28d   :  { %v8313_v26 = vadd.f32 %v6052_v21, %v6012_v44  ;;  %v2530_v27 = vpop.f32.mrf.mxu1 }
 0x28e   :  { %v2723_v36 = vpop.f32.mrf.mxu0 }
 0x28f   :  { %v8315_v28 = vadd.f32 %v2723_v36, %v2530_v27 }
 0x290   :  { %v6015_v29 = vpop.f32.mrf.mxu1  ;;  %v6055_v24 = vpop.f32.mrf.mxu0 }
 0x291   :  { %v8317_v23 = vadd.f32 %v6055_v24, %v6015_v29 }
 0x292   :  { %v2540_v10 = vpop.f32.mrf.mxu1  ;;  %v2733_v3 = vpop.f32.mrf.mxu0 }
 0x293   :  { %v8319_v19 = vadd.f32 %v2733_v3, %v2540_v10 }
 0x294   :  { %v6018_v4 = vpop.f32.mrf.mxu1  ;;  %v6058_v45 = vpop.f32.mrf.mxu0 }
 0x295   :  { %v8321_v16 = vadd.f32 %v6058_v45, %v6018_v4 }
 0x296   :  { %v2550_v41 = vpop.f32.mrf.mxu1  ;;  %v2743_v47 = vpop.f32.mrf.mxu0 }
 0x297   :  { %v8323_v52 = vadd.f32 %v2743_v47, %v2550_v41 }
 0x298   :  { %v6021_v18 = vpop.f32.mrf.mxu1  ;;  %v6061_v8 = vpop.f32.mrf.mxu0 }
 0x299   :  { %v8325_v59 = vadd.f32 %v6061_v8, %v6021_v18 }
 0x29a   :  { %v2560_v40 = vpop.f32.mrf.mxu1  ;;  %v2753_v48 = vpop.f32.mrf.mxu0 }
 0x29b   :  { %v8327_v31 = vadd.f32 %v2753_v48, %v2560_v40 }
 0x29c   :  { %v6024_v58 = vpop.f32.mrf.mxu1  ;;  %v6064_v12 = vpop.f32.mrf.mxu0 }
 0x29d   :  { %v8329_v56 = vadd.f32 %v6064_v12, %v6024_v58 }
 0x29e   :  { %v2570_v7 = vpop.f32.mrf.mxu1  ;;  %v2763_v57 = vpop.f32.mrf.mxu0 }
 0x29f   :  { %v8331_v5 = vadd.f32 %v2763_v57, %v2570_v7 }
 0x2a0   :  { %v6083_v15 = vpop.f32.mrf.mxu1  ;;  %v8333_v63 = vpop.f32.mrf.mxu0 }
 0x2a1   :  { %v8335_v11 = vadd.f32 %v6083_v15, %v2699_v46 }
 0x2a2   :  { %v2911_v39 = vpop.f32.mrf.mxu1  ;;  %v8337_v42 = vpop.f32.mrf.mxu0 }
 0x2a3   :  { %v8540_v13 = vadd.f32 %v2911_v39, %v8303_v53 }
 0x2a4   :  { %v6086_v32 = vpop.f32.mrf.mxu1  ;;  %v8542_v30 = vpop.f32.mrf.mxu0 }
 0x2a5   :  { %v8545_v1 = vadd.f32 %v6086_v32, %v8305_v37 }
 0x2a6   :  { %v2921_v62 = vpop.f32.mrf.mxu1  ;;  %v8547_v17 = vpop.f32.mrf.mxu0 }
 0x2a7   :  { %v8550_v20 = vadd.f32 %v2921_v62, %v8307_v22 }
 0x2a8   :  { %v6089_v54 = vpop.f32.mrf.mxu1  ;;  %v8552_v51 = vpop.f32.mrf.mxu0 }
 0x2a9   :  { %v8555_v35 = vadd.f32 %v6089_v54, %v8309_v0 }
 0x2aa   :  { %v2931_v60 = vpop.f32.mrf.mxu1  ;;  %v8557_v46 = vpop.f32.mrf.mxu0 }
 0x2ab   :  { %v8560_v14 = vadd.f32 %v2931_v60, %v8311_v25 }
 0x2ac   :  { %v6092_v43 = vpop.f32.mrf.mxu1  ;;  %v8562_v53 = vpop.f32.mrf.mxu0 }
 0x2ad   :  { %v8565_v33 = vadd.f32 %v6092_v43, %v8313_v26 }
 0x2ae   :  { %v2941_v6 = vpop.f32.mrf.mxu1  ;;  %v8567_v37 = vpop.f32.mrf.mxu0 }
 0x2af   :  { %v8570_v50 = vadd.f32 %v2941_v6, %v8315_v28 }
 0x2b0   :  { %v6095_v9 = vpop.f32.mrf.mxu1  ;;  %v8572_v22 = vpop.f32.mrf.mxu0 }
 0x2b1   :  { %v8575_v55 = vadd.f32 %v6095_v9, %v8317_v23 }
 0x2b2   :  { %v2951_v61 = vpop.f32.mrf.mxu1  ;;  %v8577_v0 = vpop.f32.mrf.mxu0 }
 0x2b3   :  { %v8580_v2 = vadd.f32 %v2951_v61, %v8319_v19 }
 0x2b4   :  { %v6098_v38 = vpop.f32.mrf.mxu1  ;;  %v8582_v25 = vpop.f32.mrf.mxu0 }
 0x2b5   :  { %v8585_v44 = vadd.f32 %v6098_v38, %v8321_v16 }
 0x2b6   :  { %v2961_v21 = vpop.f32.mrf.mxu1  ;;  %v8587_v26 = vpop.f32.mrf.mxu0 }
 0x2b7   :  { %v8590_v27 = vadd.f32 %v2961_v21, %v8323_v52 }
 0x2b8   :  { %v6101_v36 = vpop.f32.mrf.mxu1  ;;  %v8592_v28 = vpop.f32.mrf.mxu0 }
 0x2b9   :  { %v8595_v29 = vadd.f32 %v6101_v36, %v8325_v59 }
 0x2ba   :  { %v2971_v24 = vpop.f32.mrf.mxu1  ;;  %v8597_v23 = vpop.f32.mrf.mxu0 }
 0x2bb   :  { %v8600_v10 = vadd.f32 %v2971_v24, %v8327_v31 }
 0x2bc   :  { %v6104_v3 = vpop.f32.mrf.mxu1  ;;  %v8602_v19 = vpop.f32.mrf.mxu0 }
 0x2bd   :  { %v8605_v4 = vadd.f32 %v6104_v3, %v8329_v56 }
 0x2be   :  { %v2981_v45 = vpop.f32.mrf.mxu1  ;;  %v8607_v16 = vpop.f32.mrf.mxu0 }
 0x2bf   :  { %v8610_v41 = vadd.f32 %v2981_v45, %v8331_v5 }
 0x2c0   :  { %v6163_v47 = vpop.f32.mrf.mxu1  ;;  %v6203_v52 = vpop.f32.mrf.mxu0 }
 0x2c2   :  { %v3379_v18 = vpop.f32.mrf.mxu1  ;;  %v8612_v8 = vpop.f32.mrf.mxu0 }
 0x2c4   :  { %v6166_v59 = vpop.f32.mrf.mxu1  ;;  %v8614_v40 = vpop.f32.mrf.mxu0 }
 0x2c6   :  { %v3389_v48 = vpop.f32.mrf.mxu1  ;;  %v8616_v31 = vpop.f32.mrf.mxu0 }
 0x2c8   :  { %v6169_v58 = vpop.f32.mrf.mxu1  ;;  %v8618_v12 = vpop.f32.mrf.mxu0 }
 0x2ca   :  { %v3399_v56 = vpop.f32.mrf.mxu1  ;;  %v8620_v7 = vpop.f32.mrf.mxu0 }
 0x2cc   :  { %v8622_v57 = vpop.f32.mrf.mxu1  ;;  %v8624_v5 = vpop.f32.mrf.mxu0 }
 0x2cd   :  { %9124 = vst [vmem:[#allocation4_spill] sm:$0xff] %v8624_v5 }
 0x2ce   :  { %v8626_v15 = vpop.f32.mrf.mxu1  ;;  %v8628_v39 = vpop.f32.mrf.mxu0 }
 0x2cf   :  { %9125 = vst [vmem:[#allocation10_spill] sm:$0xff] %v8628_v39 }
 0x2d0   :  { %v8630_v34 = vpop.f32.mrf.mxu1  ;;  %v8632_v32 = vpop.f32.mrf.mxu0 }
 0x2d1   :  { %9126 = vst [vmem:[#allocation6_spill] sm:$0xff] %v8632_v32 }
 0x2d2   :  { %v8634_v62 = vpop.f32.mrf.mxu1  ;;  %v8636_v54 = vpop.f32.mrf.mxu0 }
 0x2d3   :  { %9127 = vst [vmem:[#allocation12_spill] sm:$0xff] %v8636_v54 }
 0x2d4   :  { %v8638_v60 = vpop.f32.mrf.mxu1  ;;  %v8640_v43 = vpop.f32.mrf.mxu0 }
 0x2d5   :  { %9128 = vst [vmem:[#allocation14_spill] sm:$0xff] %v8640_v43 }
 0x2d6   :  { %v8642_v6 = vpop.f32.mrf.mxu1  ;;  %v8644_v9 = vpop.f32.mrf.mxu0 }
 0x2d7   :  { %9129 = vst [vmem:[#allocation5_spill] sm:$0xff] %v8642_v6  ;;  %9130 = vst [vmem:[#allocation7_spill] sm:$0xff] %v8644_v9 }
 0x2d8   :  { %v8646_v61 = vpop.f32.mrf.mxu1  ;;  %v8648_v38 = vpop.f32.mrf.mxu0 }
 0x2d9   :  { %9131 = vst [vmem:[#allocation8_spill] sm:$0xff] %v8646_v61  ;;  %9132 = vst [vmem:[#allocation16_spill] sm:$0xff] %v8648_v38 }
 0x2da   :  { %v8650_v21 = vpop.f32.mrf.mxu1  ;;  %v8652_v36 = vpop.f32.mrf.mxu0 }
 0x2db   :  { %9133 = vst [vmem:[#allocation9_spill] sm:$0xff] %v8650_v21  ;;  %9134 = vst [vmem:[#allocation18_spill] sm:$0xff] %v8652_v36 }
 0x2dc   :  { %v8654_v24 = vpop.f32.mrf.mxu1  ;;  %v8656_v3 = vpop.f32.mrf.mxu0 }
 0x2dd   :  { %9135 = vst [vmem:[#allocation31_spill] sm:$0xff] %v8654_v24  ;;  %9136 = vst [vmem:[#allocation33_spill] sm:$0xff] %v8656_v3 }
 0x2de   :  { %v8658_v45 = vpop.f32.mrf.mxu1  ;;  %v8660_v49 = vpop.f32.mrf.mxu0 }
 0x2df   :  { %9137 = vst [vmem:[#allocation11_spill] sm:$0xff] %v8658_v45  ;;  %9138 = vst [vmem:[#allocation20_spill] sm:$0xff] %v8660_v49 }
 0x2e0   :  { %v6243_v43 = vpop.f32.mrf.mxu1  ;;  %v6283_v54 = vpop.f32.mrf.mxu0 }
 0x2e2   :  { %v3848_v32 = vpop.f32.mrf.mxu1  ;;  %v8662_v9 = vpop.f32.mrf.mxu0 }
 0x2e3   :  { %9139 = vst [vmem:[#allocation22_spill] sm:$0xff] %v8662_v9  ;;  %v3225_v9 = vadd.f32 %v8333_v63, %v8335_v11  ;;  %v3229_v63 = vadd.f32 %v8552_v51, %v8555_v35  ;;  %v3228_v11 = vadd.f32 %v8557_v46, %v8560_v14  ;;  %v3235_v14 = vadd.f32 %v8582_v25, %v8585_v44 }
 0x2e4   :  { %v6246_v39 = vpop.f32.mrf.mxu1  ;;  %v8664_v38 = vpop.f32.mrf.mxu0 }
 0x2e5   :  { %9140 = vst [vmem:[#allocation35_spill] sm:$0xff] %v8664_v38  ;;  %v3463_v51 = vadd.f32 %v6169_v58, %v3229_v63  ;;  %v3462_v35 = vadd.f32 %v3399_v56, %v3228_v11  ;;  %v9150_v56 = vld [vmem:[#allocation5_spill] sm:$0xff] }
 0x2e6   :  { %v3858_v61 = vpop.f32.mrf.mxu1  ;;  %v8670_v24 = vpop.f32.mrf.mxu0 }
 0x2e7   :  { %9143 = vst [vmem:[#allocation32_spill] sm:$0xff] %v8670_v24  ;;  %v3459_v24 = vadd.f32 %v6163_v47, %v3225_v9 }
 0x2e8   :  { %v8666_v21 = vpop.f32.mrf.mxu1  ;;  %v8676_v49 = vpop.f32.mrf.mxu0 }
 0x2e9   :  { %9141 = vst [vmem:[#allocation13_spill] sm:$0xff] %v8666_v21  ;;  %9146 = vst [vmem:[#allocation26_spill] sm:$0xff] %v8676_v49  ;;  %v3693_v47 = vadd.f32 %v6203_v52, %v3459_v24  ;;  %v3469_v52 = vadd.f32 %v8638_v60, %v3235_v14  ;;  %v9156_v60 = vld [vmem:[#allocation31_spill] sm:$0xff]  ;;  %v9163_v14 = vld [vmem:[#allocation16_spill] sm:$0xff] }
 0x2ea   :  { %v8668_v36 = vpop.f32.mrf.mxu1  ;;  %v8684_v38 = vpop.f32.mrf.mxu0 }
 0x2eb   :  { %9142 = vst [vmem:[#allocation15_spill] sm:$0xff] %v8668_v36  ;;  %v3224_v36 = vadd.f32 %v8337_v42, %v8540_v13  ;;  %v3231_v42 = vadd.f32 %v8562_v53, %v8565_v33  ;;  %v3234_v53 = vadd.f32 %v8587_v26, %v8590_v27 }
 0x2ec   :  { %v8672_v3 = vpop.f32.mrf.mxu1 }
 0x2ed   :  { %9144 = vst [vmem:[#allocation17_spill] sm:$0xff] %v8672_v3  ;;  %v3458_v49 = vadd.f32 %v3379_v18, %v3224_v36  ;;  %v9157_v36 = vld [vmem:[#allocation11_spill] sm:$0xff] }
 0x2ee   :  { %v8674_v45 = vpop.f32.mrf.mxu1 }
 0x2ef   :  { %9145 = vst [vmem:[#allocation24_spill] sm:$0xff] %v8674_v45  ;;  %v3227_v45 = vadd.f32 %v8542_v30, %v8545_v1  ;;  %v3230_v30 = vadd.f32 %v8567_v37, %v8570_v50  ;;  %v3233_v1 = vadd.f32 %v8572_v22, %v8575_v55  ;;  %v3692_v33 = vadd.f32 %v8612_v8, %v3458_v49 }
 0x2f0   :  { %v8678_v6 = vpop.f32.mrf.mxu1  ;;  %v3928_v37 = vadd.f32 %v6243_v43, %v3693_v47  ;;  %v3237_v22 = vadd.f32 %v8592_v28, %v8595_v29  ;;  %v3236_v55 = vadd.f32 %v8597_v23, %v8600_v10  ;;  %v3238_v28 = vadd.f32 %v8607_v16, %v8610_v41  ;;  %v9151_v41 = vld [vmem:[#allocation8_spill] sm:$0xff]  ;;  %v9161_v47 = vld [vmem:[#allocation35_spill] sm:$0xff] }
 0x2f1   :  { %9147 = vst [vmem:[#allocation29_spill] sm:$0xff] %v8678_v6  ;;  %v8694_v6 = vpop.f32.mrf.mxu0  ;;  %v3461_v18 = vadd.f32 %v6166_v59, %v3227_v45  ;;  %v3464_v49 = vadd.f32 %v8626_v15, %v3230_v30  ;;  %v3467_v26 = vadd.f32 %v8630_v34, %v3233_v1  ;;  %v3927_v27 = vadd.f32 %v3848_v32, %v3692_v33  ;;  %v9153_v15 = vld [vmem:[#allocation6_spill] sm:$0xff]  ;;  %v9158_v45 = vld [vmem:[#allocation13_spill] sm:$0xff]  ;;  %v9164_v33 = vld [vmem:[#allocation32_spill] sm:$0xff] }
 0x2f2   :  { %v8680_v5 = vpop.f32.mrf.mxu1  ;;  %v3697_v23 = vadd.f32 %v8618_v12, %v3463_v51  ;;  %v3696_v10 = vadd.f32 %v8620_v7, %v3462_v35  ;;  %v4162_v8 = vadd.f32 %v6283_v54, %v3928_v37  ;;  %v3468_v16 = vadd.f32 %v9150_v56, %v3234_v53  ;;  %v9154_v32 = vld [vmem:[#allocation22_spill] sm:$0xff]  ;;  %v9155_v54 = vld [vmem:[#allocation9_spill] sm:$0xff]  ;;  %v9162_v51 = vld [vmem:[#allocation7_spill] sm:$0xff] }
 0x2f3   :  { %9148 = vst [vmem:[#allocation19_spill] sm:$0xff] %v8680_v5  ;;  %v3226_v5 = vadd.f32 %v8547_v17, %v8550_v20  ;;  %v3232_v17 = vadd.f32 %v8577_v0, %v8580_v2  ;;  %v8719_v50 = vpop.f32.mrf.mxu0  ;;  %v3239_v0 = vadd.f32 %v8602_v19, %v8605_v4  ;;  %v3465_v2 = vadd.f32 %v8622_v57, %v3231_v42  ;;  %v9159_v42 = vld [vmem:[#allocation12_spill] sm:$0xff]  ;;  %v9160_v30 = vld [vmem:[#allocation14_spill] sm:$0xff] }
 0x2f4   :  { %v8686_v21 = vpop.f32.mrf.mxu1  ;;  %v3695_v44 = vadd.f32 %v8614_v40, %v3461_v18  ;;  %v3701_v34 = vadd.f32 %v9153_v15, %v3467_v26  ;;  %v3472_v24 = vadd.f32 %v9157_v36, %v3238_v28  ;;  %v3932_v63 = vadd.f32 %v9158_v45, %v3697_v23 }
 0x2f5   :  { %v3460_v20 = vadd.f32 %v3389_v48, %v3226_v5  ;;  %v3466_v4 = vadd.f32 %v8634_v62, %v3232_v17  ;;  %v8742_v40 = vpop.f32.mrf.mxu0  ;;  %v9149_v48 = vld [vmem:[#allocation4_spill] sm:$0xff]  ;;  %v9152_v5 = vld [vmem:[#allocation10_spill] sm:$0xff]  ;;  %v4161_v62 = vadd.f32 %v9154_v32, %v3927_v27  ;;  %v3473_v9 = vadd.f32 %v9156_v60, %v3239_v0 }
 0x2f6   :  { %v8690_v3 = vpop.f32.mrf.mxu1  ;;  %v3930_v59 = vadd.f32 %v6246_v39, %v3695_v44  ;;  %v3699_v58 = vadd.f32 %v9149_v48, %v3465_v2  ;;  %v3698_v7 = vadd.f32 %v9152_v5, %v3464_v49  ;;  %v3470_v39 = vadd.f32 %v9155_v54, %v3236_v55  ;;  %v9166_v27 = vld [vmem:[#allocation18_spill] sm:$0xff]  ;;  %v9170_v48 = vld [vmem:[#allocation17_spill] sm:$0xff]  ;;  %v9171_v5 = vld [vmem:[#allocation24_spill] sm:$0xff] }
 0x2f7   :  { %v3694_v29 = vadd.f32 %v8616_v31, %v3460_v20  ;;  %v3471_v31 = vadd.f32 %v9151_v41, %v3237_v22  ;;  %v3703_v1 = vadd.f32 %v9160_v30, %v3469_v52  ;;  %v4122_v17 = vpop.f32.mrf.mxu0  ;;  %v3702_v35 = vadd.f32 %v9162_v51, %v3468_v16  ;;  %v9165_v22 = vld [vmem:[#allocation15_spill] sm:$0xff] }
 0x2f8   :  { %v8704_v13 = vpop.f32.mrf.mxu1  ;;  %v4164_v18 = vadd.f32 %v9161_v47, %v3930_v59  ;;  %v3931_v55 = vadd.f32 %v9165_v22, %v3696_v10  ;;  %v3704_v28 = vadd.f32 %v9166_v27, %v3470_v39  ;;  %v9169_v10 = vld [vmem:[#allocation26_spill] sm:$0xff]  ;;  %v3934_v56 = vadd.f32 %v9170_v48, %v3699_v58  ;;  %v9172_v36 = vld [vmem:[#allocation29_spill] sm:$0xff] }
 0x2f9   :  { %v3929_v57 = vadd.f32 %v3858_v61, %v3694_v29  ;;  %v3700_v61 = vadd.f32 %v9159_v42, %v3466_v4  ;;  %v8763_v53 = vadd.f32 %v9163_v14, %v3471_v31  ;;  %v9167_v29 = vld [vmem:[#allocation33_spill] sm:$0xff]  ;;  %v9168_v4 = vld [vmem:[#allocation20_spill] sm:$0xff]  ;;  %v6298_v16 = vpop.f32.mrf.mxu0  ;;  %v3933_v15 = vadd.f32 %v9171_v5, %v3698_v7 }
 0x2fa   :  { %v8712_v46 = vpop.f32.mrf.mxu1  ;;  %v8777_v23 = vadd.f32 %v9167_v29, %v3473_v9  ;;  %v8780_v52 = vadd.f32 %v9168_v4, %v3472_v24  ;;  %v3936_v24 = vadd.f32 %v9172_v36, %v3701_v34  ;;  %v4168_v42 = vadd.f32 %v8694_v6, %v3934_v56 }
 0x2fb   :  { %v4163_v37 = vadd.f32 %v9164_v33, %v3929_v57  ;;  %v4132_v30 = vpop.f32.mrf.mxu0  ;;  %v4167_v14 = vadd.f32 %v8719_v50, %v3933_v15  ;;  %v3938_v29 = vadd.f32 %v8686_v21, %v3703_v1  ;;  %v3937_v48 = vadd.f32 %v8690_v3, %v3702_v35 }
 0x2fc   :  { %v8728_v25 = vpop.f32.mrf.mxu1  ;;  %v3940_v5 = vadd.f32 %v8704_v13, %v8763_v53  ;;  %v3939_v3 = vadd.f32 %v8712_v46, %v3704_v28 }
 0x2fd   :  { %v6301_v4 = vpop.f32.mrf.mxu0  ;;  %v4171_v36 = vadd.f32 %v4132_v30, %v3937_v48 }
 0x2fe   :  { %v8738_v19 = vpop.f32.mrf.mxu1 }
 0x300   :  { %v6323_v12 = vpop.f32.mrf.mxu1 }
 0x301   :  { %v8750_v43 = vadd.f32 %v6323_v12, %v4162_v8  ;;  %v4166_v8 = vadd.f32 %v9169_v10, %v3932_v63  ;;  %v4165_v12 = vadd.f32 %v8684_v38, %v3931_v55  ;;  %v9173_v38 = vld [vmem:[#allocation19_spill] sm:$0xff] }
 0x302   :  { %v4316_v11 = vpop.f32.mrf.mxu1  ;;  %v3935_v45 = vadd.f32 %v9173_v38, %v3700_v61 }
 0x303   :  { %v8759_v20 = vadd.f32 %v4316_v11, %v4161_v62  ;;  %v4449_v2 = vmul.f32 %v8750_v43, %v8750_v43  ;;  %v4412_v41 = vsel %vm75_vm0, %v8750_v43, 0.0 }
 0x304   :  { %v6326_v0 = vpop.f32.mrf.mxu1 }
 0x305   :  { %v4411_v44 = vsel %vm75_vm0, %v8759_v20, 0.0  ;;  %v4448_v49 = vmul.f32 %v8759_v20, %v8759_v20  ;;  %v8773_v26 = vadd.f32 %v6326_v0, %v4164_v18  ;;  %v4465_v39 = vsel %vm75_vm0, %v4449_v2, 0.0 }
 0x306   :  { %v4326_v59 = vpop.f32.mrf.mxu1  ;;  %v4413_v32 = vadd.f32 %v4412_v41, %v4411_v44  ;;  %v4170_v2 = vadd.f32 %v8742_v40, %v3936_v24  ;;  %v4169_v44 = vadd.f32 %v4122_v17, %v3935_v45 }
 0x307   :  { %v4464_v31 = vsel %vm75_vm0, %v4448_v49, 0.0  ;;  %v8787_v57 = vadd.f32 %v4326_v59, %v4163_v37  ;;  %v4451_v62 = vmul.f32 %v8773_v26, %v8773_v26  ;;  %v4416_v47 = vsel %vm75_vm0, %v8773_v26, 0.0 }
 0x308   :  { %v6329_v54 = vpop.f32.mrf.mxu1  ;;  %v4466_v7 = vadd.f32 %v4465_v39, %v4464_v31 }
 0x309   :  { %v4414_v58 = vsel %vm75_vm0, %v8787_v57, 0.0  ;;  %v4450_v60 = vmul.f32 %v8787_v57, %v8787_v57  ;;  %v8798_v9 = vadd.f32 %v6329_v54, %v4166_v8  ;;  %v4469_v33 = vsel %vm75_vm0, %v4451_v62, 0.0  ;;  %v4142_v54 = vpop.f32.mrf.mxu0 }
 0x30a   :  { %v4415_v63 = vadd.f32 %v4414_v58, %v4413_v32  ;;  %v4336_v11 = vpop.f32.mrf.mxu1  ;;  %v4172_v62 = vadd.f32 %v6298_v16, %v3938_v29 }
 0x30b   :  { %v4467_v18 = vsel %vm75_vm0, %v4450_v60, 0.0  ;;  %v8806_v51 = vadd.f32 %v4336_v11, %v4165_v12  ;;  %v4453_v22 = vmul.f32 %v8798_v9, %v8798_v9  ;;  %v4420_v10 = vsel %vm75_vm0, %v8798_v9, 0.0  ;;  %v6304_v53 = vpop.f32.mrf.mxu0 }
 0x30c   :  { %v4468_v34 = vadd.f32 %v4467_v18, %v4466_v7  ;;  %v4417_v37 = vadd.f32 %v4416_v47, %v4415_v63  ;;  %v6332_v61 = vpop.f32.mrf.mxu1  ;;  %v4174_v63 = vadd.f32 %v6301_v4, %v3940_v5  ;;  %v4173_v11 = vadd.f32 %v4142_v54, %v3939_v3 }
 0x30d   :  { %v4418_v6 = vsel %vm75_vm0, %v8806_v51, 0.0  ;;  %v4452_v55 = vmul.f32 %v8806_v51, %v8806_v51  ;;  %v8816_v0 = vadd.f32 %v6332_v61, %v4168_v42  ;;  %v4473_v31 = vsel %vm75_vm0, %v4453_v22, 0.0 }
 0x30e   :  { %v4419_v50 = vadd.f32 %v4418_v6, %v4417_v37  ;;  %v4470_v49 = vadd.f32 %v4469_v33, %v4468_v34  ;;  %v4346_v27 = vpop.f32.mrf.mxu1  ;;  %v3942_v18 = vadd.f32 %v8728_v25, %v8777_v23  ;;  %v3941_v37 = vadd.f32 %v8738_v19, %v8780_v52 }
 0x30f   :  { %v4471_v8 = vsel %vm75_vm0, %v4452_v55, 0.0  ;;  %v8823_v59 = vadd.f32 %v4346_v27, %v4167_v14  ;;  %v4455_v40 = vmul.f32 %v8816_v0, %v8816_v0  ;;  %v4424_v39 = vsel %vm75_vm0, %v8816_v0, 0.0 }
 0x310   :  { %v4472_v56 = vadd.f32 %v4471_v8, %v4470_v49  ;;  %v4421_v17 = vadd.f32 %v4420_v10, %v4419_v50  ;;  %v6335_v41 = vpop.f32.mrf.mxu1  ;;  %v4176_v52 = vadd.f32 %v6304_v53, %v3942_v18 }
 0x311   :  { %v4422_v21 = vsel %vm75_vm0, %v8823_v59, 0.0  ;;  %v4454_v1 = vmul.f32 %v8823_v59, %v8823_v59  ;;  %v8833_v12 = vadd.f32 %v6335_v41, %v4170_v2  ;;  %v4477_v24 = vsel %vm75_vm0, %v4455_v40, 0.0  ;;  %v4152_v2 = vpop.f32.mrf.mxu0 }
 0x312   :  { %v4423_v35 = vadd.f32 %v4422_v21, %v4421_v17  ;;  %v4474_v15 = vadd.f32 %v4473_v31, %v4472_v56  ;;  %v4356_v32 = vpop.f32.mrf.mxu1  ;;  %v4175_v8 = vadd.f32 %v4152_v2, %v3941_v37 }
 0x313   :  { %v4475_v58 = vsel %vm75_vm0, %v4454_v1, 0.0  ;;  %v8841_v60 = vadd.f32 %v4356_v32, %v4169_v44  ;;  %v4457_v46 = vmul.f32 %v8833_v12, %v8833_v12  ;;  %v4428_v14 = vsel %vm75_vm0, %v8833_v12, 0.0 }
 0x314   :  { %v4476_v38 = vadd.f32 %v4475_v58, %v4474_v15  ;;  %v4425_v45 = vadd.f32 %v4424_v39, %v4423_v35  ;;  %v6338_v13 = vpop.f32.mrf.mxu1 }
 0x315   :  { %v4426_v28 = vsel %vm75_vm0, %v8841_v60, 0.0  ;;  %v4456_v16 = vmul.f32 %v8841_v60, %v8841_v60  ;;  %v8850_v7 = vadd.f32 %v6338_v13, %v4172_v62  ;;  %v4481_v44 = vsel %vm75_vm0, %v4457_v46, 0.0 }
 0x316   :  { %v4427_v42 = vadd.f32 %v4426_v28, %v4425_v45  ;;  %v4478_v30 = vadd.f32 %v4477_v24, %v4476_v38  ;;  %v4366_v47 = vpop.f32.mrf.mxu1 }
 0x317   :  { %v4479_v33 = vsel %vm75_vm0, %v4456_v16, 0.0  ;;  %v8857_v34 = vadd.f32 %v4366_v47, %v4171_v36  ;;  %v4459_v22 = vmul.f32 %v8850_v7, %v8850_v7  ;;  %v4432_v29 = vsel %vm75_vm0, %v8850_v7, 0.0 }
 0x318   :  { %v4480_v61 = vadd.f32 %v4479_v33, %v4478_v30  ;;  %v4429_v6 = vadd.f32 %v4428_v14, %v4427_v42  ;;  %v6341_v55 = vpop.f32.mrf.mxu1 }
 0x319   :  { %v4430_v25 = vsel %vm75_vm0, %v8857_v34, 0.0  ;;  %v4458_v23 = vmul.f32 %v8857_v34, %v8857_v34  ;;  %v8868_v50 = vadd.f32 %v6341_v55, %v4174_v63  ;;  %v4485_v48 = vsel %vm75_vm0, %v4459_v22, 0.0 }
 0x31a   :  { %v4431_v49 = vadd.f32 %v4430_v25, %v4429_v6  ;;  %v4482_v27 = vadd.f32 %v4481_v44, %v4480_v61  ;;  %v4376_v19 = vpop.f32.mrf.mxu1 }
 0x31b   :  { %v4483_v4 = vsel %vm75_vm0, %v4458_v23, 0.0  ;;  %v8873_v10 = vadd.f32 %v4376_v19, %v4173_v11  ;;  %v4461_v41 = vmul.f32 %v8868_v50, %v8868_v50  ;;  %v4436_v15 = vsel %vm75_vm0, %v8868_v50, 0.0  ;;  %v4505_v19 = vld [vmem:[%s9036_s5] sm:$0x1] }
 0x31c   :  { %v4484_v56 = vadd.f32 %v4483_v4, %v4482_v27  ;;  %v4433_v40 = vadd.f32 %v4432_v29, %v4431_v49  ;;  %v6344_v17 = vpop.f32.mrf.mxu1  ;;  %v4509_v4 = vld [vmem:[%s9037_s6] sm:$0x1] }
 0x31d   :  { %v4434_v31 = vsel %vm75_vm0, %v8873_v10, 0.0  ;;  %v4460_v21 = vmul.f32 %v8873_v10, %v8873_v10  ;;  %v8882_v1 = vadd.f32 %v6344_v17, %v4176_v52  ;;  %v4489_v58 = vsel %vm75_vm0, %v4461_v41, 0.0 }
 0x31e   :  { %v4435_v5 = vadd.f32 %v4434_v31, %v4433_v40  ;;  %v4486_v3 = vadd.f32 %v4485_v48, %v4484_v56  ;;  %v4386_v35 = vpop.f32.mrf.mxu1  ;;  %v9174_v48 = vld [vmem:[#allocation3_spill] sm:$0xff] }
 0x31f   :  { %v4487_v32 = vsel %vm75_vm0, %v4460_v21, 0.0  ;;  %v4409_v62 = vadd.f32 %v4386_v35, %v4175_v8  ;;  %v4463_v36 = vmul.f32 %v8882_v1, %v8882_v1  ;;  %v4440_v53 = vsel %vm75_vm0, %v8882_v1, 0.0 }
 0x320   :  { %v4488_v54 = vadd.f32 %v4487_v32, %v4486_v3  ;;  %v4437_v39 = vadd.f32 %v4436_v15, %v4435_v5 }
 0x321   :  { %v4438_v24 = vsel %vm75_vm0, %v4409_v62, 0.0  ;;  %v4462_v38 = vmul.f32 %v4409_v62, %v4409_v62  ;;  %v4493_v63 = vsel %vm75_vm0, %v4463_v36, 0.0 }
 0x322   :  { %v4439_v45 = vadd.f32 %v4438_v24, %v4437_v39  ;;  %v4490_v13 = vadd.f32 %v4489_v58, %v4488_v54  ;;  %v4959_v58 = vld [vmem:[%s9031_s0 + $0x71] sm:$0xff] }
 0x323   :  { %v4491_v46 = vsel %vm75_vm0, %v4462_v38, 0.0 }
 0x324   :  { %v4441_v28 = vadd.f32 %v4440_v53, %v4439_v45  ;;  %v4492_v16 = vadd.f32 %v4491_v46, %v4490_v13  ;;  %v4960_v13 = vld [vmem:[%s9031_s0 + $0x81] sm:$0xff]  ;;  %v4961_v53 = vld [vmem:[%s9031_s0 + $0xb1] sm:$0xff] }
 0x325   :  { %v4962_v46 = vld [vmem:[%s9031_s0 + $0xc1] sm:$0xff] }
 0x326   :  { %v4442_v11 = vrot.slane %v4441_v28, 4  ;;  %v4494_v42 = vadd.f32 %v4493_v63, %v4492_v16 }
 0x328   :  { %v4443_v30 = vadd.f32 %v4442_v11, %v4441_v28  ;;  %v4495_v47 = vrot.slane %v4494_v42, 4 }
 0x32a   :  { %v4444_v18 = vrot.slane %v4443_v30, 2  ;;  %v4496_v14 = vadd.f32 %v4495_v47, %v4494_v42  ;;  %v4963_v42 = vld [vmem:[%s9031_s0 + $0xd1] sm:$0xff] }
 0x32b   :  { %v4965_v47 = vld [vmem:[%s9031_s0 + $0xf1] sm:$0xff] }
 0x32c   :  { %v4445_v33 = vadd.f32 %v4444_v18, %v4443_v30  ;;  %v4497_v37 = vrot.slane %v4496_v14, 2  ;;  %v4964_v30 = vld [vmem:[%s9031_s0 + $0xe1] sm:$0xff] }
 0x32e   :  { %v4446_v61 = vrot.slane %v4445_v33, 1  ;;  %v4498_v22 = vadd.f32 %v4497_v37, %v4496_v14 }
 0x330   :  { %v4447_v6 = vadd.f32 %v4446_v61, %v4445_v33  ;;  %v4499_v55 = vrot.slane %v4498_v22, 1  ;;  %v4966_v61 = vld [vmem:[%s9031_s0 + $0x101] sm:$0xff] }
 0x332   :  { %v4500_v2 = vadd.f32 %v4499_v55, %v4498_v22  ;;  %v4501_v44 = vmul.f32 0.0078125, %v4447_v6  ;;  %v4967_v22 = vld [vmem:[%s9031_s0 + $0x111] sm:$0xff]  ;;  %v4968_v6 = vld [vmem:[%s9031_s0 + $0x121] sm:$0xff] }
 0x334   :  { %v4502_v25 = vmul.f32 0.0078125, %v4500_v2  ;;  %v4503_v23 = vmul.f32 %v4501_v44, %v4501_v44 }
 0x336   :  { %v4504_v49 = vsub.f32 %v4502_v25, %v4503_v23 }
 0x338   :  { %v4506_v27 = vadd.f32 1e-05, %v4504_v49 }
 0x33a   :  { %6348 = vrsqrt.f32 %v4506_v27 }
 0x347   :  { %v6349_v52 = vpop.eup %6348 }
 0x348   :  { %v4508_v29 = vmul.f32 %v6349_v52, %v4505_v19 }
 0x34a   :  { %v4510_v8 = vmul.f32 %v4508_v29, %v4501_v44  ;;  %v4516_v56 = vrot.slane %v4508_v29, %v9174_v48 }
 0x34c   :  { %v4511_v40 = vsub.f32 %v4509_v4, %v4510_v8  ;;  %v4518_v17 = vmul.f32 %v4516_v56, %v8759_v20  ;;  %v4519_v41 = vmul.f32 %v4516_v56, %v8750_v43  ;;  %v4522_v31 = vmul.f32 %v4516_v56, %v8806_v51 }
 0x34d   :  { %v4523_v21 = vmul.f32 %v4516_v56, %v8798_v9  ;;  %v4524_v5 = vmul.f32 %v4516_v56, %v8823_v59  ;;  %v4525_v3 = vmul.f32 %v4516_v56, %v8816_v0  ;;  %v4526_v35 = vmul.f32 %v4516_v56, %v8841_v60  ;;  %v4954_v60 = vld [vmem:[%s9031_s0 + $0x21] sm:$0xff] }
 0x34e   :  { %v4527_v15 = vmul.f32 %v4516_v56, %v8833_v12  ;;  %v4528_v32 = vmul.f32 %v4516_v56, %v8857_v34  ;;  %v4529_v54 = vmul.f32 %v4516_v56, %v8850_v7  ;;  %v4530_v20 = vmul.f32 %v4516_v56, %v8873_v10  ;;  %v4953_v12 = vld [vmem:[%s9031_s0 + $0x11] sm:$0xff] }
 0x34f   :  { %v4531_v43 = vmul.f32 %v4516_v56, %v8868_v50  ;;  %v4532_v39 = vmul.f32 %v4516_v56, %v4409_v62  ;;  %v4520_v51 = vmul.f32 %v4516_v56, %v8787_v57  ;;  %v4521_v9 = vmul.f32 %v4516_v56, %v8773_v26  ;;  %v4955_v7 = vld [vmem:[%s9031_s0 + $0x31] sm:$0xff]  ;;  %v4956_v26 = vld [vmem:[%s9031_s0 + $0x41] sm:$0xff] }
 0x350   :  { %v4533_v59 = vmul.f32 %v4516_v56, %v8882_v1  ;;  %v4538_v0 = vrot.slane %v4511_v40, %v9174_v48  ;;  %v4957_v1 = vld [vmem:[%s9031_s0 + $0x51] sm:$0xff]  ;;  %v4958_v62 = vld [vmem:[%s9031_s0 + $0x61] sm:$0xff] }
 0x352   :  { %v4540_v57 = vadd.f32 %v4538_v0, %v4518_v17  ;;  %v4541_v34 = vadd.f32 %v4538_v0, %v4519_v41  ;;  %v4542_v50 = vadd.f32 %v4538_v0, %v4520_v51  ;;  %v4543_v10 = vadd.f32 %v4538_v0, %v4521_v9 }
 0x353   :  { %v4544_v36 = vadd.f32 %v4538_v0, %v4522_v31  ;;  %v4545_v24 = vadd.f32 %v4538_v0, %v4523_v21  ;;  %v4546_v38 = vadd.f32 %v4538_v0, %v4524_v5  ;;  %v4547_v45 = vadd.f32 %v4538_v0, %v4525_v3 }
 0x354   :  { %v4548_v28 = vadd.f32 %v4538_v0, %v4526_v35  ;;  %v4549_v16 = vadd.f32 %v4538_v0, %v4527_v15  ;;  %v4550_v63 = vadd.f32 %v4538_v0, %v4528_v32  ;;  %v4551_v11 = vadd.f32 %v4538_v0, %v4529_v54 }
 0x355   :  { %v4552_v18 = vadd.f32 %v4538_v0, %v4530_v20  ;;  %v4553_v14 = vadd.f32 %v4538_v0, %v4531_v43  ;;  %v4554_v33 = vadd.f32 %v4538_v0, %v4532_v39  ;;  %v4555_v37 = vadd.f32 %v4538_v0, %v4533_v59 }
 0x356   :  { %v4556_v55 = vadd.f32 %v4953_v12, %v4540_v57  ;;  %v4557_v2 = vadd.f32 %v4954_v60, %v4541_v34  ;;  %v4558_v44 = vadd.f32 %v4955_v7, %v4542_v50  ;;  %v4559_v25 = vadd.f32 %v4956_v26, %v4543_v10 }
 0x357   :  { %v4560_v23 = vadd.f32 %v4957_v1, %v4544_v36  ;;  %v4561_v49 = vadd.f32 %v4958_v62, %v4545_v24  ;;  %v4562_v27 = vadd.f32 %v4959_v58, %v4546_v38  ;;  %v4563_v19 = vadd.f32 %v4960_v13, %v4547_v45 }
 0x358   :  { %v4564_v52 = vadd.f32 %v4961_v53, %v4548_v28  ;;  %v4565_v29 = vadd.f32 %v4962_v46, %v4549_v16  ;;  %v4566_v4 = vadd.f32 %v4963_v42, %v4550_v63  ;;  %v4567_v8 = vadd.f32 %v4964_v30, %v4551_v11 }
 0x359   :  { %v4568_v48 = vadd.f32 %v4965_v47, %v4552_v18  ;;  %v4569_v56 = vadd.f32 %v4966_v61, %v4553_v14  ;;  %v4570_v40 = vadd.f32 %v4967_v22, %v4554_v33  ;;  %v4571_v17 = vadd.f32 %v4968_v6, %v4555_v37 }
 0x35a   :  { %v4572_v41 = vmax.f32 %v4556_v55, 0.0  ;;  %v4573_v31 = vmax.f32 %v4557_v2, 0.0  ;;  %v4574_v21 = vmax.f32 %v4558_v44, 0.0  ;;  %v4575_v5 = vmax.f32 %v4559_v25, 0.0 }
 0x35b   :  { %v4576_v3 = vmax.f32 %v4560_v23, 0.0  ;;  %v4577_v35 = vmax.f32 %v4561_v49, 0.0  ;;  %v4578_v15 = vmax.f32 %v4562_v27, 0.0  ;;  %v4579_v32 = vmax.f32 %v4563_v19, 0.0 }
 0x35c   :  { %v4580_v54 = vmax.f32 %v4564_v52, 0.0  ;;  %v4581_v20 = vmax.f32 %v4565_v29, 0.0  ;;  %v4582_v43 = vmax.f32 %v4566_v4, 0.0  ;;  %v4583_v39 = vmax.f32 %v4567_v8, 0.0  ;;  %5177 = vst.msk [vmem:[%s9035_s7 + $0x11] sm:$0xff] %vm75_vm0, %v4572_v41  ;;  %5178 = vst.msk [vmem:[%s9035_s7 + $0x21] sm:$0xff] %vm75_vm0, %v4573_v31 }
 0x35d   :  { %5179 = vst.msk [vmem:[%s9035_s7 + $0x31] sm:$0xff] %vm75_vm0, %v4574_v21  ;;  %5180 = vst.msk [vmem:[%s9035_s7 + $0x41] sm:$0xff] %vm75_vm0, %v4575_v5  ;;  %v4584_v51 = vmax.f32 %v4568_v48, 0.0  ;;  %v4585_v9 = vmax.f32 %v4569_v56, 0.0  ;;  %v4586_v59 = vmax.f32 %v4570_v40, 0.0  ;;  %v4587_v0 = vmax.f32 %v4571_v17, 0.0 }
 0x35e   :  { %5181 = vst.msk [vmem:[%s9035_s7 + $0x51] sm:$0xff] %vm75_vm0, %v4576_v3  ;;  %5182 = vst.msk [vmem:[%s9035_s7 + $0x61] sm:$0xff] %vm75_vm0, %v4577_v35 }
 0x35f   :  { %5183 = vst.msk [vmem:[%s9035_s7 + $0x71] sm:$0xff] %vm75_vm0, %v4578_v15  ;;  %5184 = vst.msk [vmem:[%s9035_s7 + $0x81] sm:$0xff] %vm75_vm0, %v4579_v32 }
 0x360   :  { %5185 = vst.msk [vmem:[%s9035_s7 + $0xb1] sm:$0xff] %vm75_vm0, %v4580_v54  ;;  %5186 = vst.msk [vmem:[%s9035_s7 + $0xc1] sm:$0xff] %vm75_vm0, %v4581_v20 }
 0x361   :  { %5187 = vst.msk [vmem:[%s9035_s7 + $0xd1] sm:$0xff] %vm75_vm0, %v4582_v43  ;;  %5188 = vst.msk [vmem:[%s9035_s7 + $0xe1] sm:$0xff] %vm75_vm0, %v4583_v39 }
 0x362   :  { %5189 = vst.msk [vmem:[%s9035_s7 + $0xf1] sm:$0xff] %vm75_vm0, %v4584_v51  ;;  %5190 = vst.msk [vmem:[%s9035_s7 + $0x101] sm:$0xff] %vm75_vm0, %v4585_v9 }
 0x363   :  { %5191 = vst.msk [vmem:[%s9035_s7 + $0x111] sm:$0xff] %vm75_vm0, %v4586_v59  ;;  %5192 = vst.msk [vmem:[%s9035_s7 + $0x121] sm:$0xff] %vm75_vm0, %v4587_v0 }

// kernel: resnet_forward.3
= control target key start
LH: loop header
LB: loop body
LE: loop exit
PB: predicated region body
PF: predicated region fallthrough
CT: control target
= control target key end

     0   :  { %v5467_v0 = vmov 0.0   ;;  %vm562_vm0 = vcmask 523264   ;;  %vm1110_vm1 = vcmask 517120   ;;  %vm1713_vm2 = vcmask 516096   ;;  %s5462_s1 = inlined_call_operand.vmem [shape: f32[256,64], index: 1, kind: input, shape index: {}]   ;;  %s5463_s0 = inlined_call_operand.vmem [shape: f32[512,256], index: 0, kind: input, shape index: {}]   ;;  %s5464_s4 = inlined_call_operand.vmem [shape: f32[2,10,10,64], index: 4, kind: output, shape index: {}]   ;;  %s5465_s2 = inlined_call_operand.vmem [shape: f32[1,64], index: 2, kind: input, shape index: {}]   ;;  %s5466_s3 = inlined_call_operand.vmem [shape: f32[1,64], index: 3, kind: input, shape index: {}]  }
   0x1   :  { %177 = vmatprep.subr.mxu0 %v5467_v0  ;;  %v160_v1 = vld [vmem:[%s5462_s1 + $0x78] sm:$0xff]  ;;  %v159_v2 = vld [vmem:[%s5462_s1 + $0x70] sm:$0xff]  ;;  %2534 = vmatprep.subr.mxu1 %v5467_v0  ;;  %v158_v3 = vld [vmem:[%s5462_s1 + $0x68] sm:$0xff]  ;;  %1594 = vst.msk [vmem:[%s5464_s4 + $0x10] sm:$0xff] %vm562_vm0, %v5467_v0 }
   0x2   :  { %178 = vmatpush1.msra.mxu0 %v160_v1  ;;  %2566 = vmatpush1.msra.mxu1 %v160_v1  ;;  %v157_v4 = vld [vmem:[%s5462_s1 + $0x60] sm:$0xff]  ;;  %v156_v5 = vld [vmem:[%s5462_s1 + $0x58] sm:$0xff]  ;;  %v155_v6 = vld [vmem:[%s5462_s1 + $0x50] sm:$0xff]  ;;  %1596 = vst.msk [vmem:[%s5464_s4 + $0x20] sm:$0xff] %vm562_vm0, %v5467_v0 }
   0x3   :  { %179 = vmatprep.subr.mxu0 %v5467_v0  ;;  %2535 = vmatprep.subr.mxu1 %v5467_v0  ;;  %v154_v7 = vld [vmem:[%s5462_s1 + $0x48] sm:$0xff]  ;;  %v153_v9 = vld [vmem:[%s5462_s1 + $0x40] sm:$0xff]  ;;  %v152_v10 = vld [vmem:[%s5462_s1 + $0x38] sm:$0xff]  ;;  %1598 = vst.msk [vmem:[%s5464_s4 + $0x30] sm:$0xff] %vm562_vm0, %v5467_v0 }
   0x4   :  { %180 = vmatpush1.msra.mxu0 %v159_v2  ;;  %2567 = vmatpush1.msra.mxu1 %v159_v2  ;;  %v18_v8 = vld [vmem:[%s5463_s0 + $0x8] sm:$0xff]  ;;  %v151_v11 = vld [vmem:[%s5462_s1 + $0x30] sm:$0xff]  ;;  %v149_v13 = vld [vmem:[%s5462_s1 + $0x20] sm:$0xff]  ;;  %1600 = vst.msk [vmem:[%s5464_s4 + $0x40] sm:$0xff] %vm562_vm0, %v5467_v0 }
   0x5   :  { %181 = vmatprep.subr.mxu0 %v5467_v0  ;;  %2536 = vmatprep.subr.mxu1 %v5467_v0  ;;  %v150_v12 = vld [vmem:[%s5462_s1 + $0x28] sm:$0xff]  ;;  %v148_v14 = vld [vmem:[%s5462_s1 + $0x18] sm:$0xff]  ;;  %v147_v15 = vld [vmem:[%s5462_s1 + $0x10] sm:$0xff]  ;;  %1602 = vst.msk [vmem:[%s5464_s4 + $0x50] sm:$0xff] %vm562_vm0, %v5467_v0 }
   0x6   :  { %182 = vmatpush1.msra.mxu0 %v158_v3  ;;  %2568 = vmatpush1.msra.mxu1 %v158_v3  ;;  %v146_v16 = vld [vmem:[%s5462_s1 + $0x8] sm:$0xff]  ;;  %v145_v17 = vld [vmem:[%s5462_s1] sm:$0xff]  ;;  %v176_v18 = vld [vmem:[%s5462_s1 + $0xf8] sm:$0xff]  ;;  %1604 = vst.msk [vmem:[%s5464_s4 + $0x60] sm:$0xff] %vm562_vm0, %v5467_v0 }
   0x7   :  { %183 = vmatprep.subr.mxu0 %v5467_v0  ;;  %2537 = vmatprep.subr.mxu1 %v5467_v0  ;;  %v175_v19 = vld [vmem:[%s5462_s1 + $0xf0] sm:$0xff]  ;;  %v174_v20 = vld [vmem:[%s5462_s1 + $0xe8] sm:$0xff]  ;;  %v173_v21 = vld [vmem:[%s5462_s1 + $0xe0] sm:$0xff]  ;;  %1606 = vst.msk [vmem:[%s5464_s4 + $0x70] sm:$0xff] %vm562_vm0, %v5467_v0 }
   0x8   :  { %184 = vmatpush1.msra.mxu0 %v157_v4  ;;  %2569 = vmatpush1.msra.mxu1 %v157_v4  ;;  %v172_v22 = vld [vmem:[%s5462_s1 + $0xd8] sm:$0xff]  ;;  %v171_v23 = vld [vmem:[%s5462_s1 + $0xd0] sm:$0xff]  ;;  %v170_v24 = vld [vmem:[%s5462_s1 + $0xc8] sm:$0xff]  ;;  %1608 = vst.msk [vmem:[%s5464_s4 + $0x80] sm:$0xff] %vm562_vm0, %v5467_v0 }
   0x9   :  { %185 = vmatprep.subr.mxu0 %v5467_v0  ;;  %2538 = vmatprep.subr.mxu1 %v5467_v0  ;;  %v169_v25 = vld [vmem:[%s5462_s1 + $0xc0] sm:$0xff]  ;;  %v168_v26 = vld [vmem:[%s5462_s1 + $0xb8] sm:$0xff]  ;;  %v167_v27 = vld [vmem:[%s5462_s1 + $0xb0] sm:$0xff]  ;;  %1614 = vst.msk [vmem:[%s5464_s4 + $0xb0] sm:$0xff] %vm562_vm0, %v5467_v0 }
   0xa   :  { %186 = vmatpush1.msra.mxu0 %v156_v5  ;;  %2570 = vmatpush1.msra.mxu1 %v156_v5  ;;  %v166_v28 = vld [vmem:[%s5462_s1 + $0xa8] sm:$0xff]  ;;  %v165_v29 = vld [vmem:[%s5462_s1 + $0xa0] sm:$0xff]  ;;  %v164_v30 = vld [vmem:[%s5462_s1 + $0x98] sm:$0xff]  ;;  %1616 = vst.msk [vmem:[%s5464_s4 + $0xc0] sm:$0xff] %vm562_vm0, %v5467_v0 }
   0xb   :  { %187 = vmatprep.subr.mxu0 %v5467_v0  ;;  %2539 = vmatprep.subr.mxu1 %v5467_v0  ;;  %v163_v31 = vld [vmem:[%s5462_s1 + $0x90] sm:$0xff]  ;;  %v162_v32 = vld [vmem:[%s5462_s1 + $0x88] sm:$0xff]  ;;  %v161_v33 = vld [vmem:[%s5462_s1 + $0x80] sm:$0xff]  ;;  %1618 = vst.msk [vmem:[%s5464_s4 + $0xd0] sm:$0xff] %vm562_vm0, %v5467_v0 }
   0xc   :  { %188 = vmatpush1.msra.mxu0 %v155_v6  ;;  %241 = vmatprep.mubr.f32.mxu0 %v18_v8  ;;  %v17_v34 = vld [vmem:[%s5463_s0] sm:$0xff]  ;;  %v20_v35 = vld [vmem:[%s5463_s0 + $0x18] sm:$0xff]  ;;  %v82_v36 = vld [vmem:[%s5463_s0 + $0x208] sm:$0xff]  ;;  %1620 = vst.msk [vmem:[%s5464_s4 + $0xe0] sm:$0xff] %vm562_vm0, %v5467_v0 }
   0xd   :  { %189 = vmatprep.subr.mxu0 %v5467_v0  ;;  %2571 = vmatpush1.msra.mxu1 %v155_v6  ;;  %v81_v37 = vld [vmem:[%s5463_s0 + $0x200] sm:$0xff]  ;;  %v84_v38 = vld [vmem:[%s5463_s0 + $0x218] sm:$0xff]  ;;  %v19_v39 = vld [vmem:[%s5463_s0 + $0x10] sm:$0xff]  ;;  %1622 = vst.msk [vmem:[%s5464_s4 + $0xf0] sm:$0xff] %vm562_vm0, %v5467_v0 }
   0xe   :  { %190 = vmatpush1.msra.mxu0 %v154_v7  ;;  %2540 = vmatprep.subr.mxu1 %v5467_v0  ;;  %v22_v40 = vld [vmem:[%s5463_s0 + $0x28] sm:$0xff]  ;;  %v83_v41 = vld [vmem:[%s5463_s0 + $0x210] sm:$0xff]  ;;  %v21_v43 = vld [vmem:[%s5463_s0 + $0x20] sm:$0xff]  ;;  %1624 = vst.msk [vmem:[%s5464_s4 + $0x100] sm:$0xff] %vm562_vm0, %v5467_v0 }
   0xf   :  { %191 = vmatprep.subr.mxu0 %v5467_v0  ;;  %2572 = vmatpush1.msra.mxu1 %v154_v7  ;;  %v86_v42 = vld [vmem:[%s5463_s0 + $0x228] sm:$0xff]  ;;  %v24_v44 = vld [vmem:[%s5463_s0 + $0x38] sm:$0xff]  ;;  %v85_v45 = vld [vmem:[%s5463_s0 + $0x220] sm:$0xff]  ;;  %1626 = vst.msk [vmem:[%s5464_s4 + $0x110] sm:$0xff] %vm562_vm0, %v5467_v0 }
  0x10   :  { %192 = vmatpush1.msra.mxu0 %v153_v9  ;;  %2541 = vmatprep.subr.mxu1 %v5467_v0  ;;  %v88_v46 = vld [vmem:[%s5463_s0 + $0x238] sm:$0xff]  ;;  %v23_v47 = vld [vmem:[%s5463_s0 + $0x30] sm:$0xff]  ;;  %v26_v48 = vld [vmem:[%s5463_s0 + $0x48] sm:$0xff]  ;;  %1628 = vst.msk [vmem:[%s5464_s4 + $0x120] sm:$0xff] %vm562_vm0, %v5467_v0 }
  0x11   :  { %193 = vmatprep.subr.mxu0 %v5467_v0  ;;  %2573 = vmatpush1.msra.mxu1 %v153_v9  ;;  %v87_v49 = vld [vmem:[%s5463_s0 + $0x230] sm:$0xff]  ;;  %v90_v50 = vld [vmem:[%s5463_s0 + $0x248] sm:$0xff]  ;;  %v25_v51 = vld [vmem:[%s5463_s0 + $0x40] sm:$0xff]  ;;  %1592 = vst.msk [vmem:[%s5464_s4] sm:$0xff] %vm562_vm0, %v5467_v0 }
  0x12   :  { %194 = vmatpush1.msra.mxu0 %v152_v10  ;;  %2542 = vmatprep.subr.mxu1 %v5467_v0  ;;  %v28_v52 = vld [vmem:[%s5463_s0 + $0x58] sm:$0xff]  ;;  %v89_v53 = vld [vmem:[%s5463_s0 + $0x240] sm:$0xff]  ;;  %v27_v55 = vld [vmem:[%s5463_s0 + $0x50] sm:$0xff]  ;;  %1610 = vst.msk [vmem:[%s5464_s4 + $0x90] sm:$0xff] %vm562_vm0, %v5467_v0 }
  0x13   :  { %195 = vmatprep.subr.mxu0 %v5467_v0  ;;  %2574 = vmatpush1.msra.mxu1 %v152_v10  ;;  %v92_v54 = vld [vmem:[%s5463_s0 + $0x258] sm:$0xff]  ;;  %v30_v56 = vld [vmem:[%s5463_s0 + $0x68] sm:$0xff]  ;;  %v91_v57 = vld [vmem:[%s5463_s0 + $0x250] sm:$0xff]  ;;  %1612 = vst.msk [vmem:[%s5464_s4 + $0xa0] sm:$0xff] %vm562_vm0, %v5467_v0 }
  0x14   :  { %196 = vmatpush1.msra.mxu0 %v151_v11  ;;  %2543 = vmatprep.subr.mxu1 %v5467_v0  ;;  %v94_v58 = vld [vmem:[%s5463_s0 + $0x268] sm:$0xff]  ;;  %v29_v59 = vld [vmem:[%s5463_s0 + $0x60] sm:$0xff]  ;;  %v32_v60 = vld [vmem:[%s5463_s0 + $0x78] sm:$0xff]  ;;  %1630 = vst.msk [vmem:[%s5464_s4 + $0x130] sm:$0xff] %vm562_vm0, %v5467_v0 }
  0x15   :  { %197 = vmatprep.subr.mxu0 %v5467_v0  ;;  %2575 = vmatpush1.msra.mxu1 %v151_v11  ;;  %v93_v61 = vld [vmem:[%s5463_s0 + $0x260] sm:$0xff]  ;;  %v96_v62 = vld [vmem:[%s5463_s0 + $0x278] sm:$0xff]  ;;  %v31_v63 = vld [vmem:[%s5463_s0 + $0x70] sm:$0xff] }
  0x16   :  { %198 = vmatpush1.msra.mxu0 %v150_v12  ;;  %2544 = vmatprep.subr.mxu1 %v5467_v0  ;;  %v34_v1 = vld [vmem:[%s5463_s0 + $0x88] sm:$0xff]  ;;  %v95_v2 = vld [vmem:[%s5463_s0 + $0x270] sm:$0xff]  ;;  %v33_v4 = vld [vmem:[%s5463_s0 + $0x80] sm:$0xff] }
  0x17   :  { %199 = vmatprep.subr.mxu0 %v5467_v0  ;;  %2576 = vmatpush1.msra.mxu1 %v150_v12  ;;  %v98_v3 = vld [vmem:[%s5463_s0 + $0x288] sm:$0xff]  ;;  %v36_v5 = vld [vmem:[%s5463_s0 + $0x98] sm:$0xff]  ;;  %v97_v6 = vld [vmem:[%s5463_s0 + $0x280] sm:$0xff] }
  0x18   :  { %200 = vmatpush1.msra.mxu0 %v149_v13  ;;  %2545 = vmatprep.subr.mxu1 %v5467_v0  ;;  %v100_v7 = vld [vmem:[%s5463_s0 + $0x298] sm:$0xff]  ;;  %v35_v8 = vld [vmem:[%s5463_s0 + $0x90] sm:$0xff]  ;;  %v38_v9 = vld [vmem:[%s5463_s0 + $0xa8] sm:$0xff] }
  0x19   :  { %201 = vmatprep.subr.mxu0 %v5467_v0  ;;  %2577 = vmatpush1.msra.mxu1 %v149_v13  ;;  %v99_v10 = vld [vmem:[%s5463_s0 + $0x290] sm:$0xff]  ;;  %v102_v11 = vld [vmem:[%s5463_s0 + $0x2a8] sm:$0xff]  ;;  %v37_v12 = vld [vmem:[%s5463_s0 + $0xa0] sm:$0xff] }
  0x1a   :  { %202 = vmatpush1.msra.mxu0 %v148_v14  ;;  %2546 = vmatprep.subr.mxu1 %v5467_v0  ;;  %v40_v13 = vld [vmem:[%s5463_s0 + $0xb8] sm:$0xff] }
  0x1b   :  { %203 = vmatprep.subr.mxu0 %v5467_v0  ;;  %2578 = vmatpush1.msra.mxu1 %v148_v14  ;;  %v101_v14 = vld [vmem:[%s5463_s0 + $0x2a0] sm:$0xff] }
  0x1c   :  { %204 = vmatpush1.msra.mxu0 %v147_v15  ;;  %2547 = vmatprep.subr.mxu1 %v5467_v0 }
  0x1d   :  { %205 = vmatprep.subr.mxu0 %v5467_v0  ;;  %2579 = vmatpush1.msra.mxu1 %v147_v15  ;;  %v104_v15 = vld [vmem:[%s5463_s0 + $0x2b8] sm:$0xff] }
  0x1e   :  { %206 = vmatpush1.msra.mxu0 %v146_v16  ;;  %2548 = vmatprep.subr.mxu1 %v5467_v0 }
  0x1f   :  { %207 = vmatprep.subr.mxu0 %v5467_v0  ;;  %2580 = vmatpush1.msra.mxu1 %v146_v16  ;;  %v39_v16 = vld [vmem:[%s5463_s0 + $0xb0] sm:$0xff] }
  0x20   :  { %208 = vmatpush1.msra.mxu0 %v145_v17  ;;  %2549 = vmatprep.subr.mxu1 %v5467_v0 }
  0x21   :  { %209 = vmatprep.subr.mxu0 %v5467_v0  ;;  %2581 = vmatpush1.msra.mxu1 %v145_v17  ;;  %v42_v17 = vld [vmem:[%s5463_s0 + $0xc8] sm:$0xff] }
  0x22   :  { %210 = vmatpush2.msra.mxu0 %v176_v18  ;;  %2550 = vmatprep.subr.mxu1 %v5467_v0 }
  0x23   :  { %211 = vmatprep.subr.mxu0 %v5467_v0  ;;  %2582 = vmatpush2.msra.mxu1 %v176_v18  ;;  %v103_v18 = vld [vmem:[%s5463_s0 + $0x2b0] sm:$0xff] }
  0x24   :  { %212 = vmatpush2.msra.mxu0 %v175_v19  ;;  %2551 = vmatprep.subr.mxu1 %v5467_v0 }
  0x25   :  { %213 = vmatprep.subr.mxu0 %v5467_v0  ;;  %2583 = vmatpush2.msra.mxu1 %v175_v19  ;;  %v106_v19 = vld [vmem:[%s5463_s0 + $0x2c8] sm:$0xff] }
  0x26   :  { %214 = vmatpush2.msra.mxu0 %v174_v20  ;;  %2552 = vmatprep.subr.mxu1 %v5467_v0 }
  0x27   :  { %215 = vmatprep.subr.mxu0 %v5467_v0  ;;  %2584 = vmatpush2.msra.mxu1 %v174_v20  ;;  %v41_v20 = vld [vmem:[%s5463_s0 + $0xc0] sm:$0xff] }
  0x28   :  { %216 = vmatpush2.msra.mxu0 %v173_v21  ;;  %2553 = vmatprep.subr.mxu1 %v5467_v0 }
  0x29   :  { %217 = vmatprep.subr.mxu0 %v5467_v0  ;;  %2585 = vmatpush2.msra.mxu1 %v173_v21  ;;  %v44_v21 = vld [vmem:[%s5463_s0 + $0xd8] sm:$0xff] }
  0x2a   :  { %218 = vmatpush2.msra.mxu0 %v172_v22  ;;  %2554 = vmatprep.subr.mxu1 %v5467_v0 }
  0x2b   :  { %219 = vmatprep.subr.mxu0 %v5467_v0  ;;  %2586 = vmatpush2.msra.mxu1 %v172_v22  ;;  %v105_v22 = vld [vmem:[%s5463_s0 + $0x2c0] sm:$0xff] }
  0x2c   :  { %220 = vmatpush2.msra.mxu0 %v171_v23  ;;  %2555 = vmatprep.subr.mxu1 %v5467_v0 }
  0x2d   :  { %221 = vmatprep.subr.mxu0 %v5467_v0  ;;  %2587 = vmatpush2.msra.mxu1 %v171_v23  ;;  %v108_v23 = vld [vmem:[%s5463_s0 + $0x2d8] sm:$0xff] }
  0x2e   :  { %222 = vmatpush2.msra.mxu0 %v170_v24  ;;  %2556 = vmatprep.subr.mxu1 %v5467_v0 }
  0x2f   :  { %223 = vmatprep.subr.mxu0 %v5467_v0  ;;  %2588 = vmatpush2.msra.mxu1 %v170_v24  ;;  %v43_v24 = vld [vmem:[%s5463_s0 + $0xd0] sm:$0xff] }
  0x30   :  { %224 = vmatpush2.msra.mxu0 %v169_v25  ;;  %2557 = vmatprep.subr.mxu1 %v5467_v0 }
  0x31   :  { %225 = vmatprep.subr.mxu0 %v5467_v0  ;;  %2589 = vmatpush2.msra.mxu1 %v169_v25  ;;  %v46_v25 = vld [vmem:[%s5463_s0 + $0xe8] sm:$0xff] }
  0x32   :  { %226 = vmatpush2.msra.mxu0 %v168_v26  ;;  %2558 = vmatprep.subr.mxu1 %v5467_v0 }
  0x33   :  { %227 = vmatprep.subr.mxu0 %v5467_v0  ;;  %2590 = vmatpush2.msra.mxu1 %v168_v26  ;;  %v107_v26 = vld [vmem:[%s5463_s0 + $0x2d0] sm:$0xff] }
  0x34   :  { %228 = vmatpush2.msra.mxu0 %v167_v27  ;;  %2559 = vmatprep.subr.mxu1 %v5467_v0 }
  0x35   :  { %229 = vmatprep.subr.mxu0 %v5467_v0  ;;  %2591 = vmatpush2.msra.mxu1 %v167_v27  ;;  %v110_v27 = vld [vmem:[%s5463_s0 + $0x2e8] sm:$0xff] }
  0x36   :  { %230 = vmatpush2.msra.mxu0 %v166_v28  ;;  %2560 = vmatprep.subr.mxu1 %v5467_v0 }
  0x37   :  { %231 = vmatprep.subr.mxu0 %v5467_v0  ;;  %2592 = vmatpush2.msra.mxu1 %v166_v28  ;;  %v45_v28 = vld [vmem:[%s5463_s0 + $0xe0] sm:$0xff] }
  0x38   :  { %232 = vmatpush2.msra.mxu0 %v165_v29  ;;  %2561 = vmatprep.subr.mxu1 %v5467_v0 }
  0x39   :  { %233 = vmatprep.subr.mxu0 %v5467_v0  ;;  %2593 = vmatpush2.msra.mxu1 %v165_v29  ;;  %v48_v29 = vld [vmem:[%s5463_s0 + $0xf8] sm:$0xff] }
  0x3a   :  { %234 = vmatpush2.msra.mxu0 %v164_v30  ;;  %2562 = vmatprep.subr.mxu1 %v5467_v0 }
  0x3b   :  { %235 = vmatprep.subr.mxu0 %v5467_v0  ;;  %2594 = vmatpush2.msra.mxu1 %v164_v30  ;;  %v109_v30 = vld [vmem:[%s5463_s0 + $0x2e0] sm:$0xff] }
  0x3c   :  { %236 = vmatpush2.msra.mxu0 %v163_v31  ;;  %2563 = vmatprep.subr.mxu1 %v5467_v0 }
  0x3d   :  { %237 = vmatprep.subr.mxu0 %v5467_v0  ;;  %2595 = vmatpush2.msra.mxu1 %v163_v31  ;;  %v112_v31 = vld [vmem:[%s5463_s0 + $0x2f8] sm:$0xff] }
  0x3e   :  { %238 = vmatpush2.msra.mxu0 %v162_v32  ;;  %2564 = vmatprep.subr.mxu1 %v5467_v0 }
  0x3f   :  { %239 = vmatprep.subr.mxu0 %v5467_v0  ;;  %2596 = vmatpush2.msra.mxu1 %v162_v32  ;;  %v47_v32 = vld [vmem:[%s5463_s0 + $0xf0] sm:$0xff] }
  0x40   :  { %240 = vmatpush2.msra.mxu0 %v161_v33  ;;  %2565 = vmatprep.subr.mxu1 %v5467_v0 }
  0x41   :  { %242 = vmatmul.mubr.f32.vlgmr.msra.gmra.mxu0 %v17_v34  ;;  %2597 = vmatpush2.msra.mxu1 %v161_v33  ;;  %v50_v33 = vld [vmem:[%s5463_s0 + $0x108] sm:$0xff]  ;;  %v111_v34 = vld [vmem:[%s5463_s0 + $0x2f0] sm:$0xff] }
  0x42   :  { %246 = vmatprep.mubr.f32.mxu0 %v20_v35  ;;  %401 = vmatprep.mubr.f32.mxu1 %v82_v36  ;;  %v114_v35 = vld [vmem:[%s5463_s0 + $0x308] sm:$0xff]  ;;  %v49_v36 = vld [vmem:[%s5463_s0 + $0x100] sm:$0xff] }
  0x43   :  { %402 = vmatmul.mubr.f32.vlgmr.msra.gmra.mxu1 %v81_v37  ;;  %v52_v37 = vld [vmem:[%s5463_s0 + $0x118] sm:$0xff] }
  0x44   :  { %406 = vmatprep.mubr.f32.mxu1 %v84_v38  ;;  %v113_v38 = vld [vmem:[%s5463_s0 + $0x300] sm:$0xff] }
  0x45   :  { %247 = vmatmul.mubr.f32.gmra.mxu0 %v19_v39  ;;  %v116_v39 = vld [vmem:[%s5463_s0 + $0x318] sm:$0xff] }
  0x46   :  { %251 = vmatprep.mubr.f32.mxu0 %v22_v40  ;;  %v51_v40 = vld [vmem:[%s5463_s0 + $0x110] sm:$0xff] }
  0x47   :  { %407 = vmatmul.mubr.f32.gmra.mxu1 %v83_v41  ;;  %v54_v41 = vld [vmem:[%s5463_s0 + $0x128] sm:$0xff] }
  0x48   :  { %411 = vmatprep.mubr.f32.mxu1 %v86_v42  ;;  %v115_v42 = vld [vmem:[%s5463_s0 + $0x310] sm:$0xff] }
  0x49   :  { %252 = vmatmul.mubr.f32.gmra.mxu0 %v21_v43  ;;  %v118_v43 = vld [vmem:[%s5463_s0 + $0x328] sm:$0xff] }
  0x4a   :  { %256 = vmatprep.mubr.f32.mxu0 %v24_v44  ;;  %v53_v44 = vld [vmem:[%s5463_s0 + $0x120] sm:$0xff] }
  0x4b   :  { %412 = vmatmul.mubr.f32.gmra.mxu1 %v85_v45  ;;  %v56_v45 = vld [vmem:[%s5463_s0 + $0x138] sm:$0xff] }
  0x4c   :  { %416 = vmatprep.mubr.f32.mxu1 %v88_v46  ;;  %v117_v46 = vld [vmem:[%s5463_s0 + $0x320] sm:$0xff] }
  0x4d   :  { %257 = vmatmul.mubr.f32.gmra.mxu0 %v23_v47  ;;  %v120_v47 = vld [vmem:[%s5463_s0 + $0x338] sm:$0xff] }
  0x4e   :  { %261 = vmatprep.mubr.f32.mxu0 %v26_v48  ;;  %v55_v48 = vld [vmem:[%s5463_s0 + $0x130] sm:$0xff] }
  0x4f   :  { %417 = vmatmul.mubr.f32.gmra.mxu1 %v87_v49  ;;  %v58_v49 = vld [vmem:[%s5463_s0 + $0x148] sm:$0xff] }
  0x50   :  { %421 = vmatprep.mubr.f32.mxu1 %v90_v50  ;;  %v119_v50 = vld [vmem:[%s5463_s0 + $0x330] sm:$0xff] }
  0x51   :  { %262 = vmatmul.mubr.f32.gmra.mxu0 %v25_v51  ;;  %v122_v51 = vld [vmem:[%s5463_s0 + $0x348] sm:$0xff] }
  0x52   :  { %266 = vmatprep.mubr.f32.mxu0 %v28_v52  ;;  %v57_v52 = vld [vmem:[%s5463_s0 + $0x140] sm:$0xff] }
  0x53   :  { %422 = vmatmul.mubr.f32.gmra.mxu1 %v89_v53  ;;  %v60_v53 = vld [vmem:[%s5463_s0 + $0x158] sm:$0xff] }
  0x54   :  { %426 = vmatprep.mubr.f32.mxu1 %v92_v54  ;;  %v121_v54 = vld [vmem:[%s5463_s0 + $0x340] sm:$0xff] }
  0x55   :  { %267 = vmatmul.mubr.f32.gmra.mxu0 %v27_v55  ;;  %v124_v55 = vld [vmem:[%s5463_s0 + $0x358] sm:$0xff] }
  0x56   :  { %271 = vmatprep.mubr.f32.mxu0 %v30_v56  ;;  %v59_v56 = vld [vmem:[%s5463_s0 + $0x150] sm:$0xff] }
  0x57   :  { %427 = vmatmul.mubr.f32.gmra.mxu1 %v91_v57  ;;  %v62_v57 = vld [vmem:[%s5463_s0 + $0x168] sm:$0xff] }
  0x58   :  { %431 = vmatprep.mubr.f32.mxu1 %v94_v58  ;;  %v123_v58 = vld [vmem:[%s5463_s0 + $0x350] sm:$0xff] }
  0x59   :  { %272 = vmatmul.mubr.f32.gmra.mxu0 %v29_v59  ;;  %v126_v59 = vld [vmem:[%s5463_s0 + $0x368] sm:$0xff] }
  0x5a   :  { %276 = vmatprep.mubr.f32.mxu0 %v32_v60  ;;  %v61_v60 = vld [vmem:[%s5463_s0 + $0x160] sm:$0xff] }
  0x5b   :  { %432 = vmatmul.mubr.f32.gmra.mxu1 %v93_v61  ;;  %v64_v61 = vld [vmem:[%s5463_s0 + $0x178] sm:$0xff] }
  0x5c   :  { %436 = vmatprep.mubr.f32.mxu1 %v96_v62  ;;  %v125_v62 = vld [vmem:[%s5463_s0 + $0x360] sm:$0xff] }
  0x5d   :  { %277 = vmatmul.mubr.f32.gmra.mxu0 %v31_v63  ;;  %v128_v63 = vld [vmem:[%s5463_s0 + $0x378] sm:$0xff] }
  0x5e   :  { %281 = vmatprep.mubr.f32.mxu0 %v34_v1  ;;  %v63_v1 = vld [vmem:[%s5463_s0 + $0x170] sm:$0xff] }
  0x5f   :  { %437 = vmatmul.mubr.f32.gmra.mxu1 %v95_v2  ;;  %v66_v2 = vld [vmem:[%s5463_s0 + $0x188] sm:$0xff] }
  0x60   :  { %441 = vmatprep.mubr.f32.mxu1 %v98_v3  ;;  %v127_v3 = vld [vmem:[%s5463_s0 + $0x370] sm:$0xff] }
  0x61   :  { %282 = vmatmul.mubr.f32.gmra.mxu0 %v33_v4  ;;  %v130_v4 = vld [vmem:[%s5463_s0 + $0x388] sm:$0xff] }
  0x62   :  { %286 = vmatprep.mubr.f32.mxu0 %v36_v5  ;;  %v65_v5 = vld [vmem:[%s5463_s0 + $0x180] sm:$0xff] }
  0x63   :  { %442 = vmatmul.mubr.f32.gmra.mxu1 %v97_v6  ;;  %v68_v6 = vld [vmem:[%s5463_s0 + $0x198] sm:$0xff] }
  0x64   :  { %446 = vmatprep.mubr.f32.mxu1 %v100_v7  ;;  %v129_v7 = vld [vmem:[%s5463_s0 + $0x380] sm:$0xff] }
  0x65   :  { %287 = vmatmul.mubr.f32.gmra.mxu0 %v35_v8  ;;  %v132_v8 = vld [vmem:[%s5463_s0 + $0x398] sm:$0xff] }
  0x66   :  { %291 = vmatprep.mubr.f32.mxu0 %v38_v9  ;;  %v67_v9 = vld [vmem:[%s5463_s0 + $0x190] sm:$0xff] }
  0x67   :  { %447 = vmatmul.mubr.f32.gmra.mxu1 %v99_v10  ;;  %v70_v10 = vld [vmem:[%s5463_s0 + $0x1a8] sm:$0xff] }
  0x68   :  { %451 = vmatprep.mubr.f32.mxu1 %v102_v11  ;;  %v131_v11 = vld [vmem:[%s5463_s0 + $0x390] sm:$0xff] }
  0x69   :  { %292 = vmatmul.mubr.f32.gmra.mxu0 %v37_v12  ;;  %v134_v12 = vld [vmem:[%s5463_s0 + $0x3a8] sm:$0xff] }
  0x6a   :  { %296 = vmatprep.mubr.f32.mxu0 %v40_v13  ;;  %v69_v13 = vld [vmem:[%s5463_s0 + $0x1a0] sm:$0xff] }
  0x6b   :  { %452 = vmatmul.mubr.f32.gmra.mxu1 %v101_v14  ;;  %v72_v14 = vld [vmem:[%s5463_s0 + $0x1b8] sm:$0xff] }
  0x6c   :  { %456 = vmatprep.mubr.f32.mxu1 %v104_v15  ;;  %v133_v15 = vld [vmem:[%s5463_s0 + $0x3a0] sm:$0xff] }
  0x6d   :  { %297 = vmatmul.mubr.f32.gmra.mxu0 %v39_v16  ;;  %v136_v16 = vld [vmem:[%s5463_s0 + $0x3b8] sm:$0xff] }
  0x6e   :  { %301 = vmatprep.mubr.f32.mxu0 %v42_v17  ;;  %v71_v17 = vld [vmem:[%s5463_s0 + $0x1b0] sm:$0xff] }
  0x6f   :  { %457 = vmatmul.mubr.f32.gmra.mxu1 %v103_v18  ;;  %v74_v18 = vld [vmem:[%s5463_s0 + $0x1c8] sm:$0xff] }
  0x70   :  { %461 = vmatprep.mubr.f32.mxu1 %v106_v19  ;;  %v135_v19 = vld [vmem:[%s5463_s0 + $0x3b0] sm:$0xff] }
  0x71   :  { %302 = vmatmul.mubr.f32.gmra.mxu0 %v41_v20  ;;  %v138_v20 = vld [vmem:[%s5463_s0 + $0x3c8] sm:$0xff] }
  0x72   :  { %306 = vmatprep.mubr.f32.mxu0 %v44_v21  ;;  %v73_v21 = vld [vmem:[%s5463_s0 + $0x1c0] sm:$0xff] }
  0x73   :  { %462 = vmatmul.mubr.f32.gmra.mxu1 %v105_v22  ;;  %v76_v22 = vld [vmem:[%s5463_s0 + $0x1d8] sm:$0xff] }
  0x74   :  { %466 = vmatprep.mubr.f32.mxu1 %v108_v23  ;;  %v137_v23 = vld [vmem:[%s5463_s0 + $0x3c0] sm:$0xff] }
  0x75   :  { %307 = vmatmul.mubr.f32.gmra.mxu0 %v43_v24  ;;  %v140_v24 = vld [vmem:[%s5463_s0 + $0x3d8] sm:$0xff] }
  0x76   :  { %311 = vmatprep.mubr.f32.mxu0 %v46_v25  ;;  %v75_v25 = vld [vmem:[%s5463_s0 + $0x1d0] sm:$0xff] }
  0x77   :  { %467 = vmatmul.mubr.f32.gmra.mxu1 %v107_v26  ;;  %v78_v26 = vld [vmem:[%s5463_s0 + $0x1e8] sm:$0xff] }
  0x78   :  { %471 = vmatprep.mubr.f32.mxu1 %v110_v27  ;;  %v139_v27 = vld [vmem:[%s5463_s0 + $0x3d0] sm:$0xff] }
  0x79   :  { %312 = vmatmul.mubr.f32.gmra.mxu0 %v45_v28  ;;  %v142_v28 = vld [vmem:[%s5463_s0 + $0x3e8] sm:$0xff] }
  0x7a   :  { %316 = vmatprep.mubr.f32.mxu0 %v48_v29  ;;  %v77_v29 = vld [vmem:[%s5463_s0 + $0x1e0] sm:$0xff] }
  0x7b   :  { %472 = vmatmul.mubr.f32.gmra.mxu1 %v109_v30  ;;  %v80_v30 = vld [vmem:[%s5463_s0 + $0x1f8] sm:$0xff] }
  0x7c   :  { %476 = vmatprep.mubr.f32.mxu1 %v112_v31  ;;  %v141_v31 = vld [vmem:[%s5463_s0 + $0x3e0] sm:$0xff] }
  0x7d   :  { %317 = vmatmul.mubr.f32.gmra.mxu0 %v47_v32  ;;  %v144_v32 = vld [vmem:[%s5463_s0 + $0x3f8] sm:$0xff] }
  0x7e   :  { %321 = vmatprep.mubr.f32.mxu0 %v50_v33  ;;  %v79_v33 = vld [vmem:[%s5463_s0 + $0x1f0] sm:$0xff] }
  0x7f   :  { %477 = vmatmul.mubr.f32.gmra.mxu1 %v111_v34  ;;  %v143_v34 = vld [vmem:[%s5463_s0 + $0x3f0] sm:$0xff] }
  0x80   :  { %481 = vmatprep.mubr.f32.mxu1 %v114_v35 }
  0x81   :  { %322 = vmatmul.mubr.f32.gmra.mxu0 %v49_v36 }
  0x82   :  { %326 = vmatprep.mubr.f32.mxu0 %v52_v37 }
  0x83   :  { %482 = vmatmul.mubr.f32.gmra.mxu1 %v113_v38 }
  0x84   :  { %486 = vmatprep.mubr.f32.mxu1 %v116_v39 }
  0x85   :  { %327 = vmatmul.mubr.f32.gmra.mxu0 %v51_v40 }
  0x86   :  { %331 = vmatprep.mubr.f32.mxu0 %v54_v41 }
  0x87   :  { %487 = vmatmul.mubr.f32.gmra.mxu1 %v115_v42 }
  0x88   :  { %491 = vmatprep.mubr.f32.mxu1 %v118_v43 }
  0x89   :  { %332 = vmatmul.mubr.f32.gmra.mxu0 %v53_v44 }
  0x8a   :  { %336 = vmatprep.mubr.f32.mxu0 %v56_v45 }
  0x8b   :  { %492 = vmatmul.mubr.f32.gmra.mxu1 %v117_v46 }
  0x8c   :  { %496 = vmatprep.mubr.f32.mxu1 %v120_v47 }
  0x8d   :  { %337 = vmatmul.mubr.f32.gmra.mxu0 %v55_v48 }
  0x8e   :  { %341 = vmatprep.mubr.f32.mxu0 %v58_v49 }
  0x8f   :  { %497 = vmatmul.mubr.f32.gmra.mxu1 %v119_v50 }
  0x90   :  { %501 = vmatprep.mubr.f32.mxu1 %v122_v51 }
  0x91   :  { %342 = vmatmul.mubr.f32.gmra.mxu0 %v57_v52 }
  0x92   :  { %346 = vmatprep.mubr.f32.mxu0 %v60_v53 }
  0x93   :  { %502 = vmatmul.mubr.f32.gmra.mxu1 %v121_v54 }
  0x94   :  { %506 = vmatprep.mubr.f32.mxu1 %v124_v55 }
  0x95   :  { %347 = vmatmul.mubr.f32.gmra.mxu0 %v59_v56 }
  0x96   :  { %351 = vmatprep.mubr.f32.mxu0 %v62_v57 }
  0x97   :  { %507 = vmatmul.mubr.f32.gmra.mxu1 %v123_v58 }
  0x98   :  { %511 = vmatprep.mubr.f32.mxu1 %v126_v59 }
  0x99   :  { %352 = vmatmul.mubr.f32.gmra.mxu0 %v61_v60 }
  0x9a   :  { %356 = vmatprep.mubr.f32.mxu0 %v64_v61 }
  0x9b   :  { %512 = vmatmul.mubr.f32.gmra.mxu1 %v125_v62 }
  0x9c   :  { %516 = vmatprep.mubr.f32.mxu1 %v128_v63 }
  0x9d   :  { %357 = vmatmul.mubr.f32.gmra.mxu0 %v63_v1 }
  0x9e   :  { %361 = vmatprep.mubr.f32.mxu0 %v66_v2 }
  0x9f   :  { %517 = vmatmul.mubr.f32.gmra.mxu1 %v127_v3 }
  0xa0   :  { %521 = vmatprep.mubr.f32.mxu1 %v130_v4 }
  0xa1   :  { %362 = vmatmul.mubr.f32.gmra.mxu0 %v65_v5 }
  0xa2   :  { %366 = vmatprep.mubr.f32.mxu0 %v68_v6 }
  0xa3   :  { %522 = vmatmul.mubr.f32.gmra.mxu1 %v129_v7 }
  0xa4   :  { %526 = vmatprep.mubr.f32.mxu1 %v132_v8 }
  0xa5   :  { %367 = vmatmul.mubr.f32.gmra.mxu0 %v67_v9 }
  0xa6   :  { %371 = vmatprep.mubr.f32.mxu0 %v70_v10 }
  0xa7   :  { %527 = vmatmul.mubr.f32.gmra.mxu1 %v131_v11 }
  0xa8   :  { %531 = vmatprep.mubr.f32.mxu1 %v134_v12 }
  0xa9   :  { %372 = vmatmul.mubr.f32.gmra.mxu0 %v69_v13 }
  0xaa   :  { %376 = vmatprep.mubr.f32.mxu0 %v72_v14 }
  0xab   :  { %532 = vmatmul.mubr.f32.gmra.mxu1 %v133_v15 }
  0xac   :  { %536 = vmatprep.mubr.f32.mxu1 %v136_v16 }
  0xad   :  { %377 = vmatmul.mubr.f32.gmra.mxu0 %v71_v17 }
  0xae   :  { %381 = vmatprep.mubr.f32.mxu0 %v74_v18 }
  0xaf   :  { %537 = vmatmul.mubr.f32.gmra.mxu1 %v135_v19 }
  0xb0   :  { %541 = vmatprep.mubr.f32.mxu1 %v138_v20 }
  0xb1   :  { %382 = vmatmul.mubr.f32.gmra.mxu0 %v73_v21 }
  0xb2   :  { %386 = vmatprep.mubr.f32.mxu0 %v76_v22 }
  0xb3   :  { %542 = vmatmul.mubr.f32.gmra.mxu1 %v137_v23 }
  0xb4   :  { %546 = vmatprep.mubr.f32.mxu1 %v140_v24 }
  0xb5   :  { %387 = vmatmul.mubr.f32.gmra.mxu0 %v75_v25 }
  0xb6   :  { %391 = vmatprep.mubr.f32.mxu0 %v78_v26 }
  0xb7   :  { %547 = vmatmul.mubr.f32.gmra.mxu1 %v139_v27 }
  0xb8   :  { %551 = vmatprep.mubr.f32.mxu1 %v142_v28 }
  0xb9   :  { %392 = vmatmul.mubr.f32.gmra.mxu0 %v77_v29 }
  0xba   :  { %396 = vmatprep.mubr.f32.mxu0 %v80_v30 }
  0xbb   :  { %552 = vmatmul.mubr.f32.gmra.mxu1 %v141_v31 }
  0xbc   :  { %556 = vmatprep.mubr.f32.mxu1 %v144_v32 }
  0xbd   :  { %397 = vmatmul.mubr.f32.gmra.mxu0 %v79_v33 }
  0xbf   :  { %557 = vmatmul.mubr.f32.gmra.mxu1 %v143_v34 }
 0x101   :  { %v3173_v35 = vpop.f32.mrf.mxu0 }
 0x103   :  { %v245_v36 = vpop.f32.mrf.mxu0  ;;  %v3175_v37 = vpop.f32.mrf.mxu1 }
 0x104   :  { %5495 = vst [vmem:[#allocation4_spill] sm:$0xff] %v3175_v37 }
 0x105   :  { %v3177_v38 = vpop.f32.mrf.mxu0  ;;  %v405_v39 = vpop.f32.mrf.mxu1 }
 0x106   :  { %v697_v33 = vmul.f32 %v3177_v38, %v3177_v38  ;;  %v696_v39 = vmul.f32 %v3173_v35, %v3173_v35 }
 0x107   :  { %v250_v40 = vpop.f32.mrf.mxu0  ;;  %v3179_v41 = vpop.f32.mrf.mxu1 }
 0x108   :  { %v564_v40 = vsel %vm562_vm0, %v3177_v38, 0.0 }
 0x109   :  { %v3181_v42 = vpop.f32.mrf.mxu0  ;;  %v410_v43 = vpop.f32.mrf.mxu1 }
 0x10a   :  { %v698_v43 = vmul.f32 %v3181_v42, %v3181_v42 }
 0x10b   :  { %v255_v44 = vpop.f32.mrf.mxu0  ;;  %v3183_v45 = vpop.f32.mrf.mxu1 }
 0x10d   :  { %v3185_v46 = vpop.f32.mrf.mxu0  ;;  %v415_v47 = vpop.f32.mrf.mxu1 }
 0x10f   :  { %v260_v48 = vpop.f32.mrf.mxu0  ;;  %v3187_v49 = vpop.f32.mrf.mxu1 }
 0x110   :  { %v563_v48 = vsel %vm562_vm0, %v3173_v35, 0.0 }
 0x111   :  { %v3189_v50 = vpop.f32.mrf.mxu0  ;;  %v420_v51 = vpop.f32.mrf.mxu1 }
 0x112   :  { %v761_v51 = vsel %vm562_vm0, %v697_v33, 0.0 }
 0x113   :  { %v265_v52 = vpop.f32.mrf.mxu0  ;;  %v3191_v53 = vpop.f32.mrf.mxu1 }
 0x114   :  { %v566_v52 = vsel %vm562_vm0, %v3181_v42, 0.0 }
 0x115   :  { %v3193_v54 = vpop.f32.mrf.mxu0  ;;  %v425_v55 = vpop.f32.mrf.mxu1 }
 0x116   :  { %v699_v55 = vmul.f32 %v3185_v46, %v3185_v46 }
 0x117   :  { %v270_v56 = vpop.f32.mrf.mxu0  ;;  %v3195_v57 = vpop.f32.mrf.mxu1 }
 0x118   :  { %v565_v56 = vadd.f32 %v564_v40, %v563_v48 }
 0x119   :  { %v3197_v58 = vpop.f32.mrf.mxu0  ;;  %v430_v59 = vpop.f32.mrf.mxu1 }
 0x11a   :  { %v702_v33 = vmul.f32 %v3197_v58, %v3197_v58  ;;  %v574_v48 = vsel %vm562_vm0, %v3197_v58, 0.0 }
 0x11b   :  { %v275_v60 = vpop.f32.mrf.mxu0  ;;  %v3199_v61 = vpop.f32.mrf.mxu1 }
 0x11d   :  { %v3201_v62 = vpop.f32.mrf.mxu0  ;;  %v435_v63 = vpop.f32.mrf.mxu1 }
 0x11e   :  { %v760_v63 = vsel %vm562_vm0, %v696_v39, 0.0 }
 0x11f   :  { %v280_v1 = vpop.f32.mrf.mxu0  ;;  %v3203_v2 = vpop.f32.mrf.mxu1 }
 0x120   :  { %v763_v1 = vsel %vm562_vm0, %v698_v43, 0.0 }
 0x121   :  { %v3205_v3 = vpop.f32.mrf.mxu0  ;;  %v440_v4 = vpop.f32.mrf.mxu1 }
 0x122   :  { %v568_v4 = vsel %vm562_vm0, %v3185_v46, 0.0 }
 0x123   :  { %v285_v5 = vpop.f32.mrf.mxu0  ;;  %v3207_v6 = vpop.f32.mrf.mxu1 }
 0x124   :  { %v700_v5 = vmul.f32 %v3189_v50, %v3189_v50 }
 0x125   :  { %v3209_v7 = vpop.f32.mrf.mxu0  ;;  %v445_v8 = vpop.f32.mrf.mxu1 }
 0x126   :  { %v762_v8 = vadd.f32 %v761_v51, %v760_v63  ;;  %v703_v51 = vmul.f32 %v3201_v62, %v3201_v62  ;;  %v771_v63 = vsel %vm562_vm0, %v702_v33, 0.0  ;;  %v580_v33 = vsel %vm562_vm0, %v3209_v7, 0.0 }
 0x127   :  { %v290_v9 = vpop.f32.mrf.mxu0  ;;  %v3211_v10 = vpop.f32.mrf.mxu1 }
 0x128   :  { %v567_v9 = vadd.f32 %v566_v52, %v565_v56 }
 0x129   :  { %v3213_v11 = vpop.f32.mrf.mxu0  ;;  %v450_v12 = vpop.f32.mrf.mxu1 }
 0x12b   :  { %v295_v13 = vpop.f32.mrf.mxu0  ;;  %v3215_v14 = vpop.f32.mrf.mxu1 }
 0x12d   :  { %v3217_v15 = vpop.f32.mrf.mxu0  ;;  %v455_v16 = vpop.f32.mrf.mxu1 }
 0x12e   :  { %v765_v16 = vsel %vm562_vm0, %v699_v55, 0.0 }
 0x12f   :  { %v300_v17 = vpop.f32.mrf.mxu0  ;;  %v3219_v18 = vpop.f32.mrf.mxu1 }
 0x130   :  { %v570_v17 = vsel %vm562_vm0, %v3189_v50, 0.0 }
 0x131   :  { %v3221_v19 = vpop.f32.mrf.mxu0  ;;  %v460_v20 = vpop.f32.mrf.mxu1 }
 0x132   :  { %v701_v20 = vmul.f32 %v3193_v54, %v3193_v54 }
 0x133   :  { %v305_v21 = vpop.f32.mrf.mxu0  ;;  %v3223_v22 = vpop.f32.mrf.mxu1 }
 0x134   :  { %v764_v21 = vadd.f32 %v763_v1, %v762_v8  ;;  %v576_v1 = vsel %vm562_vm0, %v3201_v62, 0.0 }
 0x135   :  { %v3225_v23 = vpop.f32.mrf.mxu0  ;;  %v465_v24 = vpop.f32.mrf.mxu1 }
 0x136   :  { %v569_v24 = vadd.f32 %v568_v4, %v567_v9  ;;  %v704_v4 = vmul.f32 %v3205_v3, %v3205_v3 }
 0x137   :  { %v310_v25 = vpop.f32.mrf.mxu0  ;;  %v3227_v26 = vpop.f32.mrf.mxu1 }
 0x138   :  { %v571_v39 = vadd.f32 %v570_v17, %v569_v24  ;;  %v578_v17 = vsel %vm562_vm0, %v3205_v3, 0.0 }
 0x139   :  { %v3229_v27 = vpop.f32.mrf.mxu0  ;;  %v470_v28 = vpop.f32.mrf.mxu1 }
 0x13a   :  { %5496 = vst [vmem:[#allocation5_spill] sm:$0xff] %v3229_v27 }
 0x13b   :  { %v315_v29 = vpop.f32.mrf.mxu0  ;;  %v3231_v30 = vpop.f32.mrf.mxu1 }
 0x13c   :  { %v767_v29 = vsel %vm562_vm0, %v700_v5, 0.0 }
 0x13d   :  { %v3233_v31 = vpop.f32.mrf.mxu0  ;;  %v475_v32 = vpop.f32.mrf.mxu1 }
 0x13e   :  { %5497 = vst [vmem:[#allocation6_spill] sm:$0xff] %v3233_v31  ;;  %v572_v32 = vsel %vm562_vm0, %v3193_v54, 0.0 }
 0x13f   :  { %v320_v34 = vpop.f32.mrf.mxu0  ;;  %v3237_v36 = vpop.f32.mrf.mxu1  ;;  %v573_v55 = vadd.f32 %v572_v32, %v571_v39  ;;  %v775_v32 = vsel %vm562_vm0, %v704_v4, 0.0 }
 0x140   :  { %v766_v34 = vadd.f32 %v765_v16, %v764_v21  ;;  %v773_v16 = vsel %vm562_vm0, %v703_v51, 0.0 }
 0x141   :  { %v3345_v44 = vpop.f32.mrf.mxu0  ;;  %v480_v47 = vpop.f32.mrf.mxu1  ;;  %v575_v8 = vadd.f32 %v574_v48, %v573_v55  ;;  %v707_v55 = vmul.f32 %v3217_v15, %v3217_v15 }
 0x142   :  { %5498 = vst [vmem:[#allocation7_spill] sm:$0xff] %v3345_v44  ;;  %v769_v47 = vsel %vm562_vm0, %v701_v20, 0.0  ;;  %v768_v52 = vadd.f32 %v767_v29, %v766_v34  ;;  %v705_v20 = vmul.f32 %v3209_v7, %v3209_v7  ;;  %v706_v34 = vmul.f32 %v3213_v11, %v3213_v11 }
 0x143   :  { %v325_v59 = vpop.f32.mrf.mxu0  ;;  %v3354_v60 = vpop.f32.mrf.mxu1  ;;  %v577_v24 = vadd.f32 %v576_v1, %v575_v8  ;;  %v584_v8 = vsel %vm562_vm0, %v3217_v15, 0.0 }
 0x144   :  { %v770_v5 = vadd.f32 %v769_v47, %v768_v52  ;;  %v777_v51 = vsel %vm562_vm0, %v705_v20, 0.0  ;;  %v582_v52 = vsel %vm562_vm0, %v3213_v11, 0.0 }
 0x145   :  { %v3362_v12 = vpop.f32.mrf.mxu0  ;;  %v485_v13 = vpop.f32.mrf.mxu1 }
 0x146   :  { %5499 = vst [vmem:[#allocation8_spill] sm:$0xff] %v3362_v12  ;;  %v772_v21 = vadd.f32 %v771_v63, %v770_v5  ;;  %v779_v5 = vsel %vm562_vm0, %v706_v34, 0.0 }
 0x147   :  { %v330_v25 = vpop.f32.mrf.mxu0  ;;  %v3369_v28 = vpop.f32.mrf.mxu1 }
 0x148   :  { %v774_v39 = vadd.f32 %v773_v16, %v772_v21 }
 0x149   :  { %v3376_v40 = vpop.f32.mrf.mxu0  ;;  %v490_v43 = vpop.f32.mrf.mxu1 }
 0x14a   :  { %5500 = vst [vmem:[#allocation9_spill] sm:$0xff] %v3376_v40  ;;  %v579_v43 = vadd.f32 %v578_v17, %v577_v24  ;;  %v781_v24 = vsel %vm562_vm0, %v707_v55, 0.0 }
 0x14b   :  { %v335_v56 = vpop.f32.mrf.mxu0  ;;  %v3383_v59 = vpop.f32.mrf.mxu1 }
 0x14c   :  { %v776_v56 = vadd.f32 %v775_v32, %v774_v39  ;;  %v581_v63 = vadd.f32 %v580_v33, %v579_v43  ;;  %v709_v32 = vmul.f32 %v3225_v23, %v3225_v23 }
 0x14d   :  { %v3390_v9 = vpop.f32.mrf.mxu0  ;;  %v495_v13 = vpop.f32.mrf.mxu1 }
 0x14e   :  { %5501 = vst [vmem:[#allocation10_spill] sm:$0xff] %v3390_v9  ;;  %v708_v13 = vmul.f32 %v3221_v19, %v3221_v19  ;;  %v778_v16 = vadd.f32 %v777_v51, %v776_v56  ;;  %v583_v17 = vadd.f32 %v582_v52, %v581_v63  ;;  %v588_v51 = vsel %vm562_vm0, %v3225_v23, 0.0 }
 0x14f   :  { %v340_v25 = vpop.f32.mrf.mxu0  ;;  %v3397_v29 = vpop.f32.mrf.mxu1  ;;  %v710_v52 = vmul.f32 %v3229_v27, %v3229_v27 }
 0x150   :  { %v586_v25 = vsel %vm562_vm0, %v3221_v19, 0.0  ;;  %v780_v33 = vadd.f32 %v779_v5, %v778_v16  ;;  %v585_v34 = vadd.f32 %v584_v8, %v583_v17  ;;  %v590_v5 = vsel %vm562_vm0, %v3229_v27, 0.0 }
 0x151   :  { %v3404_v47 = vpop.f32.mrf.mxu0  ;;  %v500_v48 = vpop.f32.mrf.mxu1  ;;  %v711_v8 = vmul.f32 %v3233_v31, %v3233_v31  ;;  %v787_v0 = vsel %vm562_vm0, %v710_v52, 0.0 }
 0x152   :  { %5502 = vst [vmem:[#allocation11_spill] sm:$0xff] %v3404_v47  ;;  %v783_v48 = vsel %vm562_vm0, %v708_v13, 0.0  ;;  %v782_v55 = vadd.f32 %v781_v24, %v780_v33  ;;  %v587_v56 = vadd.f32 %v586_v25, %v585_v34  ;;  %v592_v24 = vsel %vm562_vm0, %v3233_v31, 0.0 }
 0x153   :  { %v345_v1 = vpop.f32.mrf.mxu0  ;;  %v3411_v4 = vpop.f32.mrf.mxu1  ;;  %v712_v25 = vmul.f32 %v3345_v44, %v3345_v44  ;;  %v789_v27 = vsel %vm562_vm0, %v711_v8, 0.0 }
 0x154   :  { %v784_v13 = vadd.f32 %v783_v48, %v782_v55  ;;  %v589_v16 = vadd.f32 %v588_v51, %v587_v56  ;;  %v594_v48 = vsel %vm562_vm0, %v3345_v44, 0.0  ;;  %v713_v51 = vmul.f32 %v3362_v12, %v3362_v12 }
 0x155   :  { %v3418_v20 = vpop.f32.mrf.mxu0  ;;  %v505_v21 = vpop.f32.mrf.mxu1  ;;  %v791_v31 = vsel %vm562_vm0, %v712_v25, 0.0 }
 0x156   :  { %5503 = vst [vmem:[#allocation12_spill] sm:$0xff] %v3418_v20  ;;  %v785_v21 = vsel %vm562_vm0, %v709_v32, 0.0  ;;  %v591_v33 = vadd.f32 %v590_v5, %v589_v16  ;;  %v714_v5 = vmul.f32 %v3376_v40, %v3376_v40  ;;  %v793_v44 = vsel %vm562_vm0, %v713_v51, 0.0 }
 0x157   :  { %v350_v39 = vpop.f32.mrf.mxu0  ;;  %v3425_v43 = vpop.f32.mrf.mxu1  ;;  %v786_v32 = vadd.f32 %v785_v21, %v784_v13  ;;  %v596_v21 = vsel %vm562_vm0, %v3362_v12, 0.0 }
 0x158   :  { %v593_v55 = vadd.f32 %v592_v24, %v591_v33  ;;  %v715_v24 = vmul.f32 %v3390_v9, %v3390_v9  ;;  %v795_v12 = vsel %vm562_vm0, %v714_v5, 0.0 }
 0x159   :  { %v3432_v63 = vpop.f32.mrf.mxu0  ;;  %v510_v1 = vpop.f32.mrf.mxu1  ;;  %v788_v52 = vadd.f32 %v787_v0, %v786_v32  ;;  %v598_v0 = vsel %vm562_vm0, %v3376_v40, 0.0 }
 0x15a   :  { %5504 = vst [vmem:[#allocation13_spill] sm:$0xff] %v3432_v63  ;;  %v595_v13 = vadd.f32 %v594_v48, %v593_v55  ;;  %v716_v48 = vmul.f32 %v3404_v47, %v3404_v47  ;;  %v797_v40 = vsel %vm562_vm0, %v715_v24, 0.0 }
 0x15b   :  { %v355_v17 = vpop.f32.mrf.mxu0  ;;  %v3439_v39 = vpop.f32.mrf.mxu1  ;;  %v790_v8 = vadd.f32 %v789_v27, %v788_v52  ;;  %v600_v27 = vsel %vm562_vm0, %v3390_v9, 0.0 }
 0x15c   :  { %v597_v32 = vadd.f32 %v596_v21, %v595_v13  ;;  %v717_v21 = vmul.f32 %v3418_v20, %v3418_v20  ;;  %v799_v9 = vsel %vm562_vm0, %v716_v48, 0.0 }
 0x15d   :  { %v3446_v34 = vpop.f32.mrf.mxu0  ;;  %v515_v1 = vpop.f32.mrf.mxu1  ;;  %v792_v25 = vadd.f32 %v791_v31, %v790_v8  ;;  %v602_v31 = vsel %vm562_vm0, %v3404_v47, 0.0 }
 0x15e   :  { %5505 = vst [vmem:[#allocation14_spill] sm:$0xff] %v3446_v34  ;;  %v599_v52 = vadd.f32 %v598_v0, %v597_v32  ;;  %v718_v0 = vmul.f32 %v3432_v63, %v3432_v63  ;;  %v801_v47 = vsel %vm562_vm0, %v717_v21, 0.0 }
 0x15f   :  { %v360_v56 = vpop.f32.mrf.mxu0  ;;  %v3453_v17 = vpop.f32.mrf.mxu1  ;;  %v794_v51 = vadd.f32 %v793_v44, %v792_v25  ;;  %v604_v44 = vsel %vm562_vm0, %v3418_v20, 0.0 }
 0x160   :  { %v601_v8 = vadd.f32 %v600_v27, %v599_v52  ;;  %v719_v27 = vmul.f32 %v3446_v34, %v3446_v34  ;;  %v803_v20 = vsel %vm562_vm0, %v718_v0, 0.0 }
 0x161   :  { %v3460_v16 = vpop.f32.mrf.mxu0  ;;  %v520_v1 = vpop.f32.mrf.mxu1  ;;  %v796_v5 = vadd.f32 %v795_v12, %v794_v51  ;;  %v606_v12 = vsel %vm562_vm0, %v3432_v63, 0.0 }
 0x162   :  { %5506 = vst [vmem:[#allocation15_spill] sm:$0xff] %v3460_v16  ;;  %v603_v25 = vadd.f32 %v602_v31, %v601_v8  ;;  %v720_v31 = vmul.f32 %v3460_v16, %v3460_v16  ;;  %v805_v63 = vsel %vm562_vm0, %v719_v27, 0.0 }
 0x163   :  { %v365_v33 = vpop.f32.mrf.mxu0  ;;  %v3467_v56 = vpop.f32.mrf.mxu1  ;;  %v798_v24 = vadd.f32 %v797_v40, %v796_v5  ;;  %v608_v40 = vsel %vm562_vm0, %v3446_v34, 0.0 }
 0x164   :  { %5507 = vst [vmem:[#allocation16_spill] sm:$0xff] %v3467_v56  ;;  %v605_v51 = vadd.f32 %v604_v44, %v603_v25  ;;  %v807_v34 = vsel %vm562_vm0, %v720_v31, 0.0 }
 0x165   :  { %v3474_v55 = vpop.f32.mrf.mxu0  ;;  %v525_v1 = vpop.f32.mrf.mxu1  ;;  %v800_v48 = vadd.f32 %v799_v9, %v798_v24  ;;  %v610_v9 = vsel %vm562_vm0, %v3460_v16, 0.0 }
 0x166   :  { %5508 = vst [vmem:[#allocation17_spill] sm:$0xff] %v3474_v55  ;;  %v607_v5 = vadd.f32 %v606_v12, %v605_v51  ;;  %v721_v44 = vmul.f32 %v3474_v55, %v3474_v55 }
 0x167   :  { %v370_v13 = vpop.f32.mrf.mxu0  ;;  %v3481_v33 = vpop.f32.mrf.mxu1  ;;  %v802_v21 = vadd.f32 %v801_v47, %v800_v48  ;;  %v612_v47 = vsel %vm562_vm0, %v3474_v55, 0.0 }
 0x168   :  { %5509 = vst [vmem:[#allocation18_spill] sm:$0xff] %v3481_v33  ;;  %v609_v24 = vadd.f32 %v608_v40, %v607_v5  ;;  %v809_v16 = vsel %vm562_vm0, %v721_v44, 0.0 }
 0x169   :  { %v3488_v32 = vpop.f32.mrf.mxu0  ;;  %v530_v1 = vpop.f32.mrf.mxu1  ;;  %v804_v0 = vadd.f32 %v803_v20, %v802_v21 }
 0x16a   :  { %5510 = vst [vmem:[#allocation19_spill] sm:$0xff] %v3488_v32  ;;  %v722_v12 = vmul.f32 %v3488_v32, %v3488_v32  ;;  %v611_v48 = vadd.f32 %v610_v9, %v609_v24  ;;  %v614_v20 = vsel %vm562_vm0, %v3488_v32, 0.0 }
 0x16b   :  { %v375_v52 = vpop.f32.mrf.mxu0  ;;  %v3495_v13 = vpop.f32.mrf.mxu1  ;;  %v806_v27 = vadd.f32 %v805_v63, %v804_v0 }
 0x16c   :  { %5511 = vst [vmem:[#allocation20_spill] sm:$0xff] %v3495_v13  ;;  %v613_v21 = vadd.f32 %v612_v47, %v611_v48  ;;  %v811_v55 = vsel %vm562_vm0, %v722_v12, 0.0 }
 0x16d   :  { %v3502_v8 = vpop.f32.mrf.mxu0  ;;  %v535_v1 = vpop.f32.mrf.mxu1  ;;  %v808_v31 = vadd.f32 %v807_v34, %v806_v27 }
 0x16e   :  { %5512 = vst [vmem:[#allocation21_spill] sm:$0xff] %v3502_v8  ;;  %v723_v40 = vmul.f32 %v3502_v8, %v3502_v8  ;;  %v616_v63 = vsel %vm562_vm0, %v3502_v8, 0.0  ;;  %v615_v0 = vadd.f32 %v614_v20, %v613_v21 }
 0x16f   :  { %v380_v25 = vpop.f32.mrf.mxu0  ;;  %v3509_v52 = vpop.f32.mrf.mxu1  ;;  %v810_v44 = vadd.f32 %v809_v16, %v808_v31 }
 0x170   :  { %5513 = vst [vmem:[#allocation22_spill] sm:$0xff] %v3509_v52  ;;  %v813_v32 = vsel %vm562_vm0, %v723_v40, 0.0  ;;  %v617_v27 = vadd.f32 %v616_v63, %v615_v0 }
 0x171   :  { %v3516_v51 = vpop.f32.mrf.mxu0  ;;  %v540_v1 = vpop.f32.mrf.mxu1  ;;  %v812_v12 = vadd.f32 %v811_v55, %v810_v44 }
 0x172   :  { %5514 = vst [vmem:[#allocation23_spill] sm:$0xff] %v3516_v51  ;;  %v724_v9 = vmul.f32 %v3516_v51, %v3516_v51  ;;  %v618_v34 = vsel %vm562_vm0, %v3516_v51, 0.0 }
 0x173   :  { %v385_v5 = vpop.f32.mrf.mxu0  ;;  %v3523_v25 = vpop.f32.mrf.mxu1  ;;  %v814_v20 = vadd.f32 %v813_v32, %v812_v12  ;;  %v619_v31 = vadd.f32 %v618_v34, %v617_v27 }
 0x174   :  { %5515 = vst [vmem:[#allocation24_spill] sm:$0xff] %v3523_v25  ;;  %v815_v8 = vsel %vm562_vm0, %v724_v9, 0.0 }
 0x175   :  { %v3530_v24 = vpop.f32.mrf.mxu0  ;;  %v545_v1 = vpop.f32.mrf.mxu1  ;;  %v816_v63 = vadd.f32 %v815_v8, %v814_v20 }
 0x176   :  { %v725_v47 = vmul.f32 %v3530_v24, %v3530_v24  ;;  %v620_v16 = vsel %vm562_vm0, %v3530_v24, 0.0 }
 0x177   :  { %v390_v48 = vpop.f32.mrf.mxu0  ;;  %v3537_v5 = vpop.f32.mrf.mxu1  ;;  %v621_v44 = vadd.f32 %v620_v16, %v619_v31 }
 0x178   :  { %5516 = vst [vmem:[#allocation25_spill] sm:$0xff] %v3537_v5  ;;  %v817_v1 = vsel %vm562_vm0, %v725_v47, 0.0  ;;  %v728_v47 = vmul.f32 %v3175_v37, %v3175_v37 }
 0x179   :  { %v3542_v21 = vpop.f32.mrf.mxu0  ;;  %v550_v40 = vpop.f32.mrf.mxu1  ;;  %v818_v32 = vadd.f32 %v817_v1, %v816_v63  ;;  %v729_v1 = vmul.f32 %v3179_v41, %v3179_v41 }
 0x17a   :  { %5517 = vst [vmem:[#allocation26_spill] sm:$0xff] %v3542_v21  ;;  %v622_v51 = vsel %vm562_vm0, %v3542_v21, 0.0  ;;  %v726_v55 = vmul.f32 %v3542_v21, %v3542_v21  ;;  %v823_v21 = vsel %vm562_vm0, %v728_v47, 0.0 }
 0x17b   :  { %v395_v0 = vpop.f32.mrf.mxu0  ;;  %v3549_v9 = vpop.f32.mrf.mxu1  ;;  %v623_v34 = vadd.f32 %v622_v51, %v621_v44  ;;  %v626_v51 = vsel %vm562_vm0, %v3175_v37, 0.0  ;;  %v630_v37 = vsel %vm562_vm0, %v3183_v45, 0.0 }
 0x17c   :  { %5518 = vst [vmem:[#allocation27_spill] sm:$0xff] %v3549_v9  ;;  %v819_v48 = vsel %vm562_vm0, %v726_v55, 0.0 }
 0x17d   :  { %v3552_v12 = vpop.f32.mrf.mxu0  ;;  %v555_v27 = vpop.f32.mrf.mxu1  ;;  %v820_v16 = vadd.f32 %v819_v48, %v818_v32  ;;  %v628_v48 = vsel %vm562_vm0, %v3179_v41, 0.0  ;;  %v730_v32 = vmul.f32 %v3183_v45, %v3183_v45 }
 0x17e   :  { %v624_v40 = vsel %vm562_vm0, %v3552_v12, 0.0  ;;  %v727_v8 = vmul.f32 %v3552_v12, %v3552_v12 }
 0x17f   :  { %v625_v20 = vadd.f32 %v624_v40, %v623_v34  ;;  %v400_v31 = vpop.f32.mrf.mxu0  ;;  %v3560_v0 = vpop.f32.mrf.mxu1  ;;  %v827_v47 = vsel %vm562_vm0, %v730_v32, 0.0 }
 0x180   :  { %5519 = vst [vmem:[#allocation28_spill] sm:$0xff] %v3560_v0  ;;  %v821_v55 = vsel %vm562_vm0, %v727_v8, 0.0  ;;  %v825_v31 = vsel %vm562_vm0, %v729_v1, 0.0  ;;  %v731_v8 = vmul.f32 %v3187_v49, %v3187_v49 }
 0x181   :  { %v627_v63 = vadd.f32 %v626_v51, %v625_v20  ;;  %v822_v44 = vadd.f32 %v821_v55, %v820_v16  ;;  %v560_v27 = vpop.f32.mrf.mxu1  ;;  %v632_v51 = vsel %vm562_vm0, %v3187_v49, 0.0  ;;  %v732_v55 = vmul.f32 %v3191_v53, %v3191_v53 }
 0x182   :  { %v829_v1 = vsel %vm562_vm0, %v731_v8, 0.0  ;;  %v733_v27 = vmul.f32 %v3195_v57, %v3195_v57 }
 0x183   :  { %v629_v34 = vadd.f32 %v628_v48, %v627_v63  ;;  %v824_v40 = vadd.f32 %v823_v21, %v822_v44  ;;  %v634_v44 = vsel %vm562_vm0, %v3191_v53, 0.0  ;;  %v831_v32 = vsel %vm562_vm0, %v732_v55, 0.0 }
 0x184   :  { %v833_v8 = vsel %vm562_vm0, %v733_v27, 0.0 }
 0x185   :  { %v631_v16 = vadd.f32 %v630_v37, %v629_v34  ;;  %v826_v20 = vadd.f32 %v825_v31, %v824_v40  ;;  %v636_v34 = vsel %vm562_vm0, %v3195_v57, 0.0  ;;  %v734_v40 = vmul.f32 %v3199_v61, %v3199_v61 }
 0x187   :  { %v633_v63 = vadd.f32 %v632_v51, %v631_v16  ;;  %v828_v21 = vadd.f32 %v827_v47, %v826_v20  ;;  %v638_v20 = vsel %vm562_vm0, %v3199_v61, 0.0  ;;  %v735_v47 = vmul.f32 %v3203_v2, %v3203_v2 }
 0x188   :  { %v835_v55 = vsel %vm562_vm0, %v734_v40, 0.0 }
 0x189   :  { %v635_v37 = vadd.f32 %v634_v44, %v633_v63  ;;  %v830_v48 = vadd.f32 %v829_v1, %v828_v21  ;;  %v640_v21 = vsel %vm562_vm0, %v3203_v2, 0.0  ;;  %v736_v1 = vmul.f32 %v3207_v6, %v3207_v6 }
 0x18a   :  { %v837_v27 = vsel %vm562_vm0, %v735_v47, 0.0 }
 0x18b   :  { %v637_v31 = vadd.f32 %v636_v34, %v635_v37  ;;  %v832_v16 = vadd.f32 %v831_v32, %v830_v48  ;;  %v642_v48 = vsel %vm562_vm0, %v3207_v6, 0.0  ;;  %v737_v32 = vmul.f32 %v3211_v10, %v3211_v10 }
 0x18c   :  { %v839_v40 = vsel %vm562_vm0, %v736_v1, 0.0 }
 0x18d   :  { %v639_v51 = vadd.f32 %v638_v20, %v637_v31  ;;  %v834_v63 = vadd.f32 %v833_v8, %v832_v16  ;;  %v644_v16 = vsel %vm562_vm0, %v3211_v10, 0.0  ;;  %v738_v8 = vmul.f32 %v3215_v14, %v3215_v14 }
 0x18e   :  { %v739_v20 = vmul.f32 %v3219_v18, %v3219_v18 }
 0x18f   :  { %v641_v44 = vadd.f32 %v640_v21, %v639_v51  ;;  %v836_v37 = vadd.f32 %v835_v55, %v834_v63  ;;  %v841_v63 = vsel %vm562_vm0, %v737_v32, 0.0  ;;  %v646_v55 = vsel %vm562_vm0, %v3215_v14, 0.0 }
 0x190   :  { %v843_v1 = vsel %vm562_vm0, %v738_v8, 0.0  ;;  %v650_v32 = vsel %vm562_vm0, %v3223_v22, 0.0 }
 0x191   :  { %v838_v34 = vadd.f32 %v837_v27, %v836_v37  ;;  %v643_v31 = vadd.f32 %v642_v48, %v641_v44  ;;  %v648_v37 = vsel %vm562_vm0, %v3219_v18, 0.0  ;;  %v3622_v27 = vmul.f32 %v3223_v22, %v3223_v22 }
 0x192   :  { %v845_v48 = vsel %vm562_vm0, %v739_v20, 0.0  ;;  %v5520_v20 = vmov 0.0  }
 0x193   :  { %v645_v47 = vadd.f32 %v644_v16, %v643_v31  ;;  %v840_v51 = vadd.f32 %v839_v40, %v838_v34  ;;  %v3629_v40 = vmul.f32 %v3227_v26, %v3227_v26  ;;  %1595 = vst.msk [vmem:[%s5464_s4 + $0x18] sm:$0x3] %vm1110_vm1, %v5520_v20  ;;  %1597 = vst.msk [vmem:[%s5464_s4 + $0x28] sm:$0x3] %vm1110_vm1, %v5520_v20 }
 0x194   :  { %1599 = vst.msk [vmem:[%s5464_s4 + $0x38] sm:$0x3] %vm1110_vm1, %v5520_v20  ;;  %1601 = vst.msk [vmem:[%s5464_s4 + $0x48] sm:$0x3] %vm1110_vm1, %v5520_v20 }
 0x195   :  { %v647_v21 = vadd.f32 %v646_v55, %v645_v47  ;;  %v842_v44 = vadd.f32 %v841_v63, %v840_v51  ;;  %v2603_v47 = vmov -inf   ;;  %1603 = vst.msk [vmem:[%s5464_s4 + $0x58] sm:$0x3] %vm1110_vm1, %v5520_v20  ;;  %1605 = vst.msk [vmem:[%s5464_s4 + $0x68] sm:$0x3] %vm1110_vm1, %v5520_v20  ;;  %v847_v51 = vsel %vm562_vm0, %v3622_v27, 0.0 }
 0x196   :  { %1108 = vst.msk [vmem:[#allocation2] sm:$0xff] %vm562_vm0, %v2603_v47  ;;  %1109 = vst.msk [vmem:[#allocation2 + $0x8] sm:$0xff] %vm562_vm0, %v2603_v47  ;;  %v652_v63 = vsel %vm562_vm0, %v3227_v26, 0.0  ;;  %v742_v55 = vmul.f32 %v3231_v30, %v3231_v30 }
 0x197   :  { %v649_v31 = vadd.f32 %v648_v37, %v647_v21  ;;  %v844_v34 = vadd.f32 %v843_v1, %v842_v44  ;;  %1111 = vst.msk [vmem:[#allocation2 + $0x10] sm:$0x3] %vm1110_vm1, %v2603_v47  ;;  %1114 = vst.msk [vmem:[#allocation2 + $0x28] sm:$0x3] %vm1110_vm1, %v2603_v47  ;;  %v849_v1 = vsel %vm562_vm0, %v3629_v40, 0.0  ;;  %v654_v37 = vsel %vm562_vm0, %v3231_v30, 0.0 }
 0x198   :  { %1112 = vst.msk [vmem:[#allocation2 + $0x18] sm:$0xff] %vm562_vm0, %v2603_v47  ;;  %1113 = vst.msk [vmem:[#allocation2 + $0x20] sm:$0xff] %vm562_vm0, %v2603_v47 }
 0x199   :  { %v3631_v16 = vadd.f32 %v650_v32, %v649_v31  ;;  %v3633_v8 = vadd.f32 %v845_v48, %v844_v34  ;;  %1115 = vst.msk [vmem:[#allocation2 + $0x30] sm:$0xff] %vm562_vm0, %v2603_v47  ;;  %1116 = vst.msk [vmem:[#allocation2 + $0x38] sm:$0xff] %vm562_vm0, %v2603_v47  ;;  %v743_v48 = vmul.f32 %v3237_v36, %v3237_v36  ;;  %v851_v34 = vsel %vm562_vm0, %v742_v55, 0.0 }
 0x19a   :  { %1117 = vst.msk [vmem:[#allocation2 + $0x40] sm:$0x3] %vm1110_vm1, %v2603_v47  ;;  %1120 = vst.msk [vmem:[#allocation2 + $0x58] sm:$0x3] %vm1110_vm1, %v2603_v47  ;;  %v656_v32 = vsel %vm562_vm0, %v3237_v36, 0.0 }
 0x19b   :  { %1118 = vst.msk [vmem:[#allocation2 + $0x48] sm:$0xff] %vm562_vm0, %v2603_v47  ;;  %1119 = vst.msk [vmem:[#allocation2 + $0x50] sm:$0xff] %vm562_vm0, %v2603_v47  ;;  %v653_v21 = vadd.f32 %v652_v63, %v3631_v16  ;;  %v848_v44 = vadd.f32 %v847_v51, %v3633_v8  ;;  %v744_v16 = vmul.f32 %v3354_v60, %v3354_v60  ;;  %v853_v40 = vsel %vm562_vm0, %v743_v48, 0.0 }
 0x19c   :  { %1121 = vst.msk [vmem:[#allocation2 + $0x60] sm:$0xff] %vm562_vm0, %v2603_v47  ;;  %1122 = vst.msk [vmem:[#allocation2 + $0x68] sm:$0xff] %vm562_vm0, %v2603_v47  ;;  %v745_v51 = vmul.f32 %v3369_v28, %v3369_v28 }
 0x19d   :  { %1123 = vst.msk [vmem:[#allocation2 + $0x70] sm:$0x3] %vm1110_vm1, %v2603_v47  ;;  %1126 = vst.msk [vmem:[#allocation2 + $0x88] sm:$0x3] %vm1110_vm1, %v2603_v47  ;;  %v655_v27 = vadd.f32 %v654_v37, %v653_v21  ;;  %v850_v31 = vadd.f32 %v849_v1, %v848_v44  ;;  %v855_v55 = vsel %vm562_vm0, %v744_v16, 0.0  ;;  %v660_v44 = vsel %vm562_vm0, %v3369_v28, 0.0 }
 0x19e   :  { %1124 = vst.msk [vmem:[#allocation2 + $0x78] sm:$0xff] %vm562_vm0, %v2603_v47  ;;  %1125 = vst.msk [vmem:[#allocation2 + $0x80] sm:$0xff] %vm562_vm0, %v2603_v47  ;;  %v746_v1 = vmul.f32 %v3383_v59, %v3383_v59  ;;  %v857_v48 = vsel %vm562_vm0, %v745_v51, 0.0 }
 0x19f   :  { %1127 = vst.msk [vmem:[#allocation2 + $0x90] sm:$0xff] %vm562_vm0, %v2603_v47  ;;  %1128 = vst.msk [vmem:[#allocation2 + $0x98] sm:$0xff] %vm562_vm0, %v2603_v47  ;;  %v657_v8 = vadd.f32 %v656_v32, %v655_v27 }
 0x1a0   :  { %1129 = vst.msk [vmem:[#allocation2 + $0xa0] sm:$0x3] %vm1110_vm1, %v2603_v47  ;;  %1132 = vst.msk [vmem:[#allocation2 + $0xb8] sm:$0x3] %vm1110_vm1, %v2603_v47  ;;  %v859_v16 = vsel %vm562_vm0, %v746_v1, 0.0 }
 0x1a1   :  { %1130 = vst.msk [vmem:[#allocation2 + $0xa8] sm:$0xff] %vm562_vm0, %v2603_v47  ;;  %1131 = vst.msk [vmem:[#allocation2 + $0xb0] sm:$0xff] %vm562_vm0, %v2603_v47 }
 0x1a2   :  { %1133 = vst.msk [vmem:[#allocation2 + $0xc0] sm:$0xff] %vm562_vm0, %v2603_v47  ;;  %1134 = vst.msk [vmem:[#allocation2 + $0xc8] sm:$0xff] %vm562_vm0, %v2603_v47 }
 0x1a3   :  { %1135 = vst.msk [vmem:[#allocation2 + $0xd0] sm:$0x3] %vm1110_vm1, %v2603_v47  ;;  %1138 = vst.msk [vmem:[#allocation2 + $0xe8] sm:$0x3] %vm1110_vm1, %v2603_v47 }
 0x1a4   :  { %1136 = vst.msk [vmem:[#allocation2 + $0xd8] sm:$0xff] %vm562_vm0, %v2603_v47  ;;  %1137 = vst.msk [vmem:[#allocation2 + $0xe0] sm:$0xff] %vm562_vm0, %v2603_v47 }
 0x1a5   :  { %1139 = vst.msk [vmem:[#allocation2 + $0xf0] sm:$0xff] %vm562_vm0, %v2603_v47  ;;  %1140 = vst.msk [vmem:[#allocation2 + $0xf8] sm:$0xff] %vm562_vm0, %v2603_v47 }
 0x1a6   :  { %1141 = vst.msk [vmem:[#allocation2 + $0x100] sm:$0x3] %vm1110_vm1, %v2603_v47  ;;  %1144 = vst.msk [vmem:[#allocation2 + $0x118] sm:$0x3] %vm1110_vm1, %v2603_v47 }
 0x1a7   :  { %1142 = vst.msk [vmem:[#allocation2 + $0x108] sm:$0xff] %vm562_vm0, %v2603_v47  ;;  %1143 = vst.msk [vmem:[#allocation2 + $0x110] sm:$0xff] %vm562_vm0, %v2603_v47 }
 0x1a8   :  { %1145 = vst.msk [vmem:[#allocation2 + $0x120] sm:$0xff] %vm562_vm0, %v2603_v47  ;;  %1146 = vst.msk [vmem:[#allocation2 + $0x128] sm:$0xff] %vm562_vm0, %v2603_v47 }
 0x1a9   :  { %1147 = vst.msk [vmem:[#allocation2 + $0x130] sm:$0x3] %vm1110_vm1, %v2603_v47  ;;  %1150 = vst.msk [vmem:[#allocation2 + $0x148] sm:$0x3] %vm1110_vm1, %v2603_v47 }
 0x1aa   :  { %1148 = vst.msk [vmem:[#allocation2 + $0x138] sm:$0xff] %vm562_vm0, %v2603_v47  ;;  %1149 = vst.msk [vmem:[#allocation2 + $0x140] sm:$0xff] %vm562_vm0, %v2603_v47 }
 0x1ab   :  { %1151 = vst.msk [vmem:[#allocation2 + $0x150] sm:$0xff] %vm562_vm0, %v2603_v47  ;;  %1152 = vst.msk [vmem:[#allocation2 + $0x158] sm:$0xff] %vm562_vm0, %v2603_v47 }
 0x1ac   :  { %1153 = vst.msk [vmem:[#allocation2 + $0x160] sm:$0x3] %vm1110_vm1, %v2603_v47  ;;  %1156 = vst.msk [vmem:[#allocation2 + $0x178] sm:$0x3] %vm1110_vm1, %v2603_v47 }
 0x1ad   :  { %1154 = vst.msk [vmem:[#allocation2 + $0x168] sm:$0xff] %vm562_vm0, %v2603_v47  ;;  %1155 = vst.msk [vmem:[#allocation2 + $0x170] sm:$0xff] %vm562_vm0, %v2603_v47 }
 0x1ae   :  { %1157 = vst.msk [vmem:[#allocation2 + $0x180] sm:$0xff] %vm562_vm0, %v2603_v47  ;;  %1158 = vst.msk [vmem:[#allocation2 + $0x188] sm:$0xff] %vm562_vm0, %v2603_v47 }
 0x1af   :  { %1159 = vst.msk [vmem:[#allocation2 + $0x190] sm:$0x3] %vm1110_vm1, %v2603_v47  ;;  %1165 = vst.msk [vmem:[#allocation2 + $0x1c0] sm:$0x3] %vm1110_vm1, %v2603_v47 }
 0x1b0   :  { %1163 = vst.msk [vmem:[#allocation2 + $0x1b0] sm:$0xff] %vm562_vm0, %v2603_v47  ;;  %1164 = vst.msk [vmem:[#allocation2 + $0x1b8] sm:$0xff] %vm562_vm0, %v2603_v47 }
 0x1b1   :  { %1166 = vst.msk [vmem:[#allocation2 + $0x1c8] sm:$0xff] %vm562_vm0, %v2603_v47  ;;  %1167 = vst.msk [vmem:[#allocation2 + $0x1d0] sm:$0xff] %vm562_vm0, %v2603_v47 }
 0x1b2   :  { %1168 = vst.msk [vmem:[#allocation2 + $0x1d8] sm:$0x3] %vm1110_vm1, %v2603_v47  ;;  %1171 = vst.msk [vmem:[#allocation2 + $0x1f0] sm:$0x3] %vm1110_vm1, %v2603_v47 }
 0x1b3   :  { %1169 = vst.msk [vmem:[#allocation2 + $0x1e0] sm:$0xff] %vm562_vm0, %v2603_v47  ;;  %1170 = vst.msk [vmem:[#allocation2 + $0x1e8] sm:$0xff] %vm562_vm0, %v2603_v47 }
 0x1b4   :  { %1172 = vst.msk [vmem:[#allocation2 + $0x1f8] sm:$0xff] %vm562_vm0, %v2603_v47  ;;  %1173 = vst.msk [vmem:[#allocation2 + $0x200] sm:$0xff] %vm562_vm0, %v2603_v47 }
 0x1b5   :  { %1174 = vst.msk [vmem:[#allocation2 + $0x208] sm:$0x3] %vm1110_vm1, %v2603_v47  ;;  %1177 = vst.msk [vmem:[#allocation2 + $0x220] sm:$0x3] %vm1110_vm1, %v2603_v47 }
 0x1b6   :  { %1175 = vst.msk [vmem:[#allocation2 + $0x210] sm:$0xff] %vm562_vm0, %v2603_v47  ;;  %1176 = vst.msk [vmem:[#allocation2 + $0x218] sm:$0xff] %vm562_vm0, %v2603_v47 }
 0x1b7   :  { %1178 = vst.msk [vmem:[#allocation2 + $0x228] sm:$0xff] %vm562_vm0, %v2603_v47  ;;  %1179 = vst.msk [vmem:[#allocation2 + $0x230] sm:$0xff] %vm562_vm0, %v2603_v47 }
 0x1b8   :  { %1180 = vst.msk [vmem:[#allocation2 + $0x238] sm:$0x3] %vm1110_vm1, %v2603_v47  ;;  %1183 = vst.msk [vmem:[#allocation2 + $0x250] sm:$0x3] %vm1110_vm1, %v2603_v47 }
 0x1b9   :  { %1181 = vst.msk [vmem:[#allocation2 + $0x240] sm:$0xff] %vm562_vm0, %v2603_v47  ;;  %1182 = vst.msk [vmem:[#allocation2 + $0x248] sm:$0xff] %vm562_vm0, %v2603_v47 }
 0x1ba   :  { %1184 = vst.msk [vmem:[#allocation2 + $0x258] sm:$0xff] %vm562_vm0, %v2603_v47  ;;  %1185 = vst.msk [vmem:[#allocation2 + $0x260] sm:$0xff] %vm562_vm0, %v2603_v47 }
 0x1bb   :  { %1186 = vst.msk [vmem:[#allocation2 + $0x268] sm:$0x3] %vm1110_vm1, %v2603_v47  ;;  %1189 = vst.msk [vmem:[#allocation2 + $0x280] sm:$0x3] %vm1110_vm1, %v2603_v47 }
 0x1bc   :  { %1187 = vst.msk [vmem:[#allocation2 + $0x270] sm:$0xff] %vm562_vm0, %v2603_v47  ;;  %1188 = vst.msk [vmem:[#allocation2 + $0x278] sm:$0xff] %vm562_vm0, %v2603_v47 }
 0x1bd   :  { %1190 = vst.msk [vmem:[#allocation2 + $0x288] sm:$0xff] %vm562_vm0, %v2603_v47  ;;  %1191 = vst.msk [vmem:[#allocation2 + $0x290] sm:$0xff] %vm562_vm0, %v2603_v47 }
 0x1be   :  { %1192 = vst.msk [vmem:[#allocation2 + $0x298] sm:$0x3] %vm1110_vm1, %v2603_v47  ;;  %1195 = vst.msk [vmem:[#allocation2 + $0x2b0] sm:$0x3] %vm1110_vm1, %v2603_v47 }
 0x1bf   :  { %1193 = vst.msk [vmem:[#allocation2 + $0x2a0] sm:$0xff] %vm562_vm0, %v2603_v47  ;;  %1194 = vst.msk [vmem:[#allocation2 + $0x2a8] sm:$0xff] %vm562_vm0, %v2603_v47 }
 0x1c0   :  { %1196 = vst.msk [vmem:[#allocation2 + $0x2b8] sm:$0xff] %vm562_vm0, %v2603_v47  ;;  %1197 = vst.msk [vmem:[#allocation2 + $0x2c0] sm:$0xff] %vm562_vm0, %v2603_v47 }
 0x1c1   :  { %1198 = vst.msk [vmem:[#allocation2 + $0x2c8] sm:$0x3] %vm1110_vm1, %v2603_v47  ;;  %1201 = vst.msk [vmem:[#allocation2 + $0x2e0] sm:$0x3] %vm1110_vm1, %v2603_v47 }
 0x1c2   :  { %1199 = vst.msk [vmem:[#allocation2 + $0x2d0] sm:$0xff] %vm562_vm0, %v2603_v47  ;;  %1200 = vst.msk [vmem:[#allocation2 + $0x2d8] sm:$0xff] %vm562_vm0, %v2603_v47 }
 0x1c3   :  { %1202 = vst.msk [vmem:[#allocation2 + $0x2e8] sm:$0xff] %vm562_vm0, %v2603_v47  ;;  %1203 = vst.msk [vmem:[#allocation2 + $0x2f0] sm:$0xff] %vm562_vm0, %v2603_v47 }
 0x1c4   :  { %1204 = vst.msk [vmem:[#allocation2 + $0x2f8] sm:$0x3] %vm1110_vm1, %v2603_v47  ;;  %1207 = vst.msk [vmem:[#allocation2 + $0x310] sm:$0x3] %vm1110_vm1, %v2603_v47 }
 0x1c5   :  { %1205 = vst.msk [vmem:[#allocation2 + $0x300] sm:$0xff] %vm562_vm0, %v2603_v47  ;;  %1206 = vst.msk [vmem:[#allocation2 + $0x308] sm:$0xff] %vm562_vm0, %v2603_v47 }
 0x1c6   :  { %1208 = vst.msk [vmem:[#allocation2 + $0x318] sm:$0xff] %vm562_vm0, %v2603_v47  ;;  %1209 = vst.msk [vmem:[#allocation2 + $0x320] sm:$0xff] %vm562_vm0, %v2603_v47 }
 0x1c7   :  { %1210 = vst.msk [vmem:[#allocation2 + $0x328] sm:$0x3] %vm1110_vm1, %v2603_v47  ;;  %1213 = vst.msk [vmem:[#allocation2 + $0x340] sm:$0x3] %vm1110_vm1, %v2603_v47 }
 0x1c8   :  { %1211 = vst.msk [vmem:[#allocation2 + $0x330] sm:$0xff] %vm562_vm0, %v2603_v47  ;;  %1212 = vst.msk [vmem:[#allocation2 + $0x338] sm:$0xff] %vm562_vm0, %v2603_v47  ;;  %v852_v47 = vadd.f32 %v851_v34, %v850_v31  ;;  %v662_v31 = vsel %vm562_vm0, %v3383_v59, 0.0  ;;  %v747_v34 = vmul.f32 %v3397_v29, %v3397_v29 }
 0x1c9   :  { %1607 = vst.msk [vmem:[%s5464_s4 + $0x78] sm:$0x3] %vm1110_vm1, %v5520_v20  ;;  %1609 = vst.msk [vmem:[%s5464_s4 + $0x88] sm:$0x3] %vm1110_vm1, %v5520_v20 }
 0x1ca   :  { %1615 = vst.msk [vmem:[%s5464_s4 + $0xb8] sm:$0x3] %vm1110_vm1, %v5520_v20  ;;  %1617 = vst.msk [vmem:[%s5464_s4 + $0xc8] sm:$0x3] %vm1110_vm1, %v5520_v20  ;;  %v854_v21 = vadd.f32 %v853_v40, %v852_v47  ;;  %v664_v47 = vsel %vm562_vm0, %v3397_v29, 0.0  ;;  %v748_v40 = vmul.f32 %v3411_v4, %v3411_v4  ;;  %v861_v51 = vsel %vm562_vm0, %v747_v34, 0.0 }
 0x1cb   :  { %1619 = vst.msk [vmem:[%s5464_s4 + $0xd8] sm:$0x3] %vm1110_vm1, %v5520_v20  ;;  %1621 = vst.msk [vmem:[%s5464_s4 + $0xe8] sm:$0x3] %vm1110_vm1, %v5520_v20 }
 0x1cc   :  { %1623 = vst.msk [vmem:[%s5464_s4 + $0xf8] sm:$0x3] %vm1110_vm1, %v5520_v20  ;;  %1625 = vst.msk [vmem:[%s5464_s4 + $0x108] sm:$0x3] %vm1110_vm1, %v5520_v20  ;;  %v856_v37 = vadd.f32 %v855_v55, %v854_v21  ;;  %v666_v21 = vsel %vm562_vm0, %v3411_v4, 0.0  ;;  %v749_v55 = vmul.f32 %v3425_v43, %v3425_v43  ;;  %v863_v1 = vsel %vm562_vm0, %v748_v40, 0.0 }
 0x1cd   :  { %1627 = vst.msk [vmem:[%s5464_s4 + $0x118] sm:$0x3] %vm1110_vm1, %v5520_v20  ;;  %1629 = vst.msk [vmem:[%s5464_s4 + $0x128] sm:$0x3] %vm1110_vm1, %v5520_v20 }
 0x1ce   :  { %1593 = vst.msk [vmem:[%s5464_s4 + $0x8] sm:$0x3] %vm1110_vm1, %v5520_v20  ;;  %1611 = vst.msk [vmem:[%s5464_s4 + $0x98] sm:$0x3] %vm1110_vm1, %v5520_v20  ;;  %v858_v32 = vadd.f32 %v857_v48, %v856_v37  ;;  %v750_v48 = vmul.f32 %v3439_v39, %v3439_v39  ;;  %v865_v34 = vsel %vm562_vm0, %v749_v55, 0.0 }
 0x1cf   :  { %1613 = vst.msk [vmem:[%s5464_s4 + $0xa8] sm:$0x3] %vm1110_vm1, %v5520_v20  ;;  %1631 = vst.msk [vmem:[%s5464_s4 + $0x138] sm:$0x3] %vm1110_vm1, %v5520_v20  ;;  %v658_v20 = vsel %vm562_vm0, %v3354_v60, 0.0 }
 0x1d0   :  { %v659_v63 = vadd.f32 %v658_v20, %v657_v8  ;;  %v860_v20 = vadd.f32 %v859_v16, %v858_v32  ;;  %v751_v16 = vmul.f32 %v3453_v17, %v3453_v17  ;;  %v867_v40 = vsel %vm562_vm0, %v750_v48, 0.0 }
 0x1d2   :  { %v661_v27 = vadd.f32 %v660_v44, %v659_v63  ;;  %v862_v44 = vadd.f32 %v861_v51, %v860_v20  ;;  %v752_v51 = vmul.f32 %v3467_v56, %v3467_v56  ;;  %v869_v55 = vsel %vm562_vm0, %v751_v16, 0.0 }
 0x1d4   :  { %v663_v8 = vadd.f32 %v662_v31, %v661_v27  ;;  %v668_v27 = vsel %vm562_vm0, %v3425_v43, 0.0  ;;  %v864_v31 = vadd.f32 %v863_v1, %v862_v44  ;;  %v753_v1 = vmul.f32 %v3481_v33, %v3481_v33 }
 0x1d5   :  { %v871_v48 = vsel %vm562_vm0, %v752_v51, 0.0 }
 0x1d6   :  { %v665_v63 = vadd.f32 %v664_v47, %v663_v8  ;;  %v670_v8 = vsel %vm562_vm0, %v3439_v39, 0.0  ;;  %v866_v47 = vadd.f32 %v865_v34, %v864_v31  ;;  %v754_v34 = vmul.f32 %v3495_v13, %v3495_v13 }
 0x1d7   :  { %v873_v16 = vsel %vm562_vm0, %v753_v1, 0.0 }
 0x1d8   :  { %v667_v37 = vadd.f32 %v666_v21, %v665_v63  ;;  %v672_v63 = vsel %vm562_vm0, %v3453_v17, 0.0  ;;  %v868_v21 = vadd.f32 %v867_v40, %v866_v47  ;;  %v755_v40 = vmul.f32 %v3509_v52, %v3509_v52 }
 0x1d9   :  { %v875_v51 = vsel %vm562_vm0, %v754_v34, 0.0 }
 0x1da   :  { %v669_v32 = vadd.f32 %v668_v27, %v667_v37  ;;  %v674_v37 = vsel %vm562_vm0, %v3467_v56, 0.0  ;;  %v870_v27 = vadd.f32 %v869_v55, %v868_v21  ;;  %v756_v55 = vmul.f32 %v3523_v25, %v3523_v25 }
 0x1db   :  { %v877_v1 = vsel %vm562_vm0, %v755_v40, 0.0 }
 0x1dc   :  { %v671_v20 = vadd.f32 %v670_v8, %v669_v32  ;;  %v676_v32 = vsel %vm562_vm0, %v3481_v33, 0.0  ;;  %v872_v8 = vadd.f32 %v871_v48, %v870_v27  ;;  %v757_v48 = vmul.f32 %v3537_v5, %v3537_v5 }
 0x1dd   :  { %v879_v34 = vsel %vm562_vm0, %v756_v55, 0.0 }
 0x1de   :  { %v673_v44 = vadd.f32 %v672_v63, %v671_v20  ;;  %v678_v20 = vsel %vm562_vm0, %v3495_v13, 0.0  ;;  %v874_v63 = vadd.f32 %v873_v16, %v872_v8  ;;  %v758_v16 = vmul.f32 %v3549_v9, %v3549_v9 }
 0x1e0   :  { %v675_v31 = vadd.f32 %v674_v37, %v673_v44  ;;  %v680_v44 = vsel %vm562_vm0, %v3509_v52, 0.0  ;;  %v876_v37 = vadd.f32 %v875_v51, %v874_v63  ;;  %v686_v51 = vsel %vm562_vm0, %v3549_v9, 0.0 }
 0x1e2   :  { %v677_v47 = vadd.f32 %v676_v32, %v675_v31  ;;  %v682_v31 = vsel %vm562_vm0, %v3523_v25, 0.0  ;;  %v878_v32 = vadd.f32 %v877_v1, %v876_v37 }
 0x1e4   :  { %v679_v21 = vadd.f32 %v678_v20, %v677_v47  ;;  %v684_v47 = vsel %vm562_vm0, %v3537_v5, 0.0  ;;  %v759_v20 = vmul.f32 %v3560_v0, %v3560_v0  ;;  %v880_v40 = vadd.f32 %v879_v34, %v878_v32 }
 0x1e6   :  { %v681_v27 = vadd.f32 %v680_v44, %v679_v21  ;;  %v881_v21 = vsel %vm562_vm0, %v757_v48, 0.0  ;;  %v688_v44 = vsel %vm562_vm0, %v3560_v0, 0.0  ;;  %v885_v1 = vsel %vm562_vm0, %v759_v20, 0.0 }
 0x1e7   :  { %v882_v55 = vadd.f32 %v881_v21, %v880_v40 }
 0x1e8   :  { %v683_v8 = vadd.f32 %v682_v31, %v681_v27  ;;  %v883_v27 = vsel %vm562_vm0, %v758_v16, 0.0 }
 0x1e9   :  { %v884_v31 = vadd.f32 %v883_v27, %v882_v55 }
 0x1ea   :  { %v685_v63 = vadd.f32 %v684_v47, %v683_v8 }
 0x1eb   :  { %v886_v52 = vadd.f32 %v885_v1, %v884_v31 }
 0x1ec   :  { %v687_v37 = vadd.f32 %v686_v51, %v685_v63 }
 0x1ed   :  { %v887_v8 = vrot.slane %v886_v52, 4 }
 0x1ee   :  { %v689_v5 = vadd.f32 %v688_v44, %v687_v37  ;;  %v905_v44 = vlaneseq }
 0x1ef   :  { %v888_v48 = vadd.f32 %v887_v8, %v886_v52  ;;  %v897_v52 = vld [vmem:[%s5465_s2] sm:$0x1]  ;;  %v5521_v8 = vld [vmem:[#allocation5_spill] sm:$0xff] }
 0x1f0   :  { %v690_v25 = vrot.slane %v689_v5, 4  ;;  %v4037_v55 = vshrl.u32 %v905_v44, 7 }
 0x1f1   :  { %v889_v13 = vrot.slane %v888_v48, 2 }
 0x1f2   :  { %v691_v32 = vadd.f32 %v690_v25, %v689_v5  ;;  %v5494_v25 = vsub.s32 0, %v4037_v55 }
 0x1f3   :  { %v890_v33 = vadd.f32 %v889_v13, %v888_v48  ;;  %v5523_v48 = vld [vmem:[#allocation7_spill] sm:$0xff] }
 0x1f4   :  { %v692_v34 = vrot.slane %v691_v32, 2 }
 0x1f5   :  { %v891_v0 = vrot.slane %v890_v33, 1 }
 0x1f6   :  { %v693_v47 = vadd.f32 %v692_v34, %v691_v32  ;;  %v5522_v34 = vld [vmem:[#allocation6_spill] sm:$0xff] }
 0x1f7   :  { %v892_v40 = vadd.f32 %v891_v0, %v890_v33 }
 0x1f8   :  { %v694_v9 = vrot.slane %v693_v47, 1 }
 0x1f9   :  { %v894_v21 = vmul.f32 0.001953125, %v892_v40  ;;  %v5525_v40 = vld [vmem:[#allocation9_spill] sm:$0xff] }
 0x1fa   :  { %v695_v56 = vadd.f32 %v694_v9, %v693_v47  ;;  %v5524_v47 = vld [vmem:[#allocation8_spill] sm:$0xff] }
 0x1fc   :  { %v893_v63 = vmul.f32 0.001953125, %v695_v56  ;;  %v4046_v56 = vld [vmem:[%s5466_s3] sm:$0x1] }
 0x1fe   :  { %v895_v16 = vmul.f32 %v893_v63, %v893_v63 }
 0x200   :  { %v896_v51 = vsub.f32 %v894_v21, %v895_v16  ;;  %v5527_v16 = vld [vmem:[#allocation11_spill] sm:$0xff] }
 0x202   :  { %v898_v20 = vadd.f32 1e-05, %v896_v51 }
 0x204   :  { %2600 = vrsqrt.f32 %v898_v20  ;;  %v5528_v20 = vld [vmem:[#allocation12_spill] sm:$0xff] }
 0x211   :  { %v2601_v5 = vpop.eup %2600 }
 0x212   :  { %v900_v13 = vmul.f32 %v2601_v5, %v897_v52  ;;  %v5529_v52 = vld [vmem:[#allocation13_spill] sm:$0xff] }
 0x214   :  { %v4048_v33 = vmul.f32 %v900_v13, %v893_v63  ;;  %v4052_v9 = vrot.slane %v900_v13, %v5494_v25  ;;  %v5526_v63 = vld [vmem:[#allocation10_spill] sm:$0xff]  ;;  %v5537_v25 = vld [vmem:[#allocation4_spill] sm:$0xff] }
 0x215   :  { %v5530_v13 = vld [vmem:[#allocation14_spill] sm:$0xff] }
 0x216   :  { %v903_v0 = vsub.f32 %v4046_v56, %v4048_v33  ;;  %v4058_v37 = vmul.f32 %v4052_v9, %v3173_v35  ;;  %v4062_v27 = vmul.f32 %v4052_v9, %v3177_v38  ;;  %v4066_v1 = vmul.f32 %v4052_v9, %v3181_v42  ;;  %v5531_v33 = vld [vmem:[#allocation15_spill] sm:$0xff] }
 0x217   :  { %v4070_v31 = vmul.f32 %v4052_v9, %v3185_v46  ;;  %v4074_v32 = vmul.f32 %v4052_v9, %v3189_v50  ;;  %v4078_v35 = vmul.f32 %v4052_v9, %v3193_v54  ;;  %v4082_v38 = vmul.f32 %v4052_v9, %v3197_v58 }
 0x218   :  { %v4086_v42 = vmul.f32 %v4052_v9, %v3201_v62  ;;  %v4090_v46 = vmul.f32 %v4052_v9, %v3205_v3  ;;  %v4094_v50 = vmul.f32 %v4052_v9, %v3209_v7  ;;  %v4098_v54 = vmul.f32 %v4052_v9, %v3213_v11 }
 0x219   :  { %v4102_v58 = vmul.f32 %v4052_v9, %v3217_v15  ;;  %v4106_v62 = vmul.f32 %v4052_v9, %v3221_v19  ;;  %v4110_v3 = vmul.f32 %v4052_v9, %v3225_v23  ;;  %v4114_v7 = vmul.f32 %v4052_v9, %v5521_v8 }
 0x21a   :  { %v4118_v11 = vmul.f32 %v4052_v9, %v5522_v34  ;;  %v4122_v15 = vmul.f32 %v4052_v9, %v5523_v48  ;;  %v4126_v19 = vmul.f32 %v4052_v9, %v5524_v47  ;;  %v4130_v23 = vmul.f32 %v4052_v9, %v5525_v40  ;;  %v5532_v34 = vld [vmem:[#allocation17_spill] sm:$0xff]  ;;  %v5533_v47 = vld [vmem:[#allocation19_spill] sm:$0xff] }
 0x21b   :  { %v4134_v21 = vmul.f32 %v4052_v9, %v5526_v63  ;;  %v4138_v51 = vmul.f32 %v4052_v9, %v5527_v16  ;;  %v4142_v44 = vmul.f32 %v4052_v9, %v5528_v20  ;;  %v4146_v5 = vmul.f32 %v4052_v9, %v5529_v52  ;;  %v5534_v63 = vld [vmem:[#allocation21_spill] sm:$0xff]  ;;  %v5535_v20 = vld [vmem:[#allocation23_spill] sm:$0xff] }
 0x21c   :  { %v4150_v56 = vmul.f32 %v4052_v9, %v5530_v13  ;;  %v4154_v8 = vmul.f32 %v4052_v9, %v5531_v33  ;;  %v4158_v48 = vmul.f32 %v4052_v9, %v5532_v34  ;;  %v4162_v40 = vmul.f32 %v4052_v9, %v5533_v47  ;;  %v5536_v33 = vld [vmem:[#allocation26_spill] sm:$0xff] }
 0x21d   :  { %v4166_v16 = vmul.f32 %v4052_v9, %v5534_v63  ;;  %v4170_v52 = vmul.f32 %v4052_v9, %v5535_v20  ;;  %v4174_v13 = vmul.f32 %v4052_v9, %v3530_v24  ;;  %v4178_v34 = vmul.f32 %v4052_v9, %v5536_v33 }
 0x21e   :  { %v4182_v47 = vmul.f32 %v4052_v9, %v3552_v12  ;;  %v4186_v63 = vmul.f32 %v4052_v9, %v5537_v25  ;;  %v4190_v20 = vmul.f32 %v4052_v9, %v3179_v41  ;;  %v4194_v24 = vmul.f32 %v4052_v9, %v3183_v45 }
 0x21f   :  { %v4198_v33 = vmul.f32 %v4052_v9, %v3187_v49  ;;  %v4202_v12 = vmul.f32 %v4052_v9, %v3191_v53  ;;  %v4206_v25 = vmul.f32 %v4052_v9, %v3195_v57  ;;  %v4210_v41 = vmul.f32 %v4052_v9, %v3199_v61 }
 0x220   :  { %v4214_v45 = vmul.f32 %v4052_v9, %v3203_v2  ;;  %v4218_v49 = vmul.f32 %v4052_v9, %v3207_v6  ;;  %v4222_v53 = vmul.f32 %v4052_v9, %v3211_v10  ;;  %v4226_v57 = vmul.f32 %v4052_v9, %v3215_v14 }
 0x221   :  { %v4230_v61 = vmul.f32 %v4052_v9, %v3219_v18  ;;  %v4234_v2 = vmul.f32 %v4052_v9, %v3223_v22  ;;  %v4238_v6 = vmul.f32 %v4052_v9, %v3227_v26  ;;  %v4242_v10 = vmul.f32 %v4052_v9, %v3231_v30 }
 0x222   :  { %v4246_v14 = vmul.f32 %v4052_v9, %v3237_v36  ;;  %v4250_v18 = vmul.f32 %v4052_v9, %v3354_v60  ;;  %v4254_v22 = vmul.f32 %v4052_v9, %v3369_v28  ;;  %v4258_v26 = vmul.f32 %v4052_v9, %v3383_v59 }
 0x223   :  { %v4262_v30 = vmul.f32 %v4052_v9, %v3397_v29  ;;  %v4266_v36 = vmul.f32 %v4052_v9, %v3411_v4  ;;  %v4270_v60 = vmul.f32 %v4052_v9, %v3425_v43  ;;  %v4274_v28 = vmul.f32 %v4052_v9, %v3439_v39 }
 0x224   :  { %5538 = vst [vmem:[#allocation5_spill] sm:$0xff] %v4258_v26  ;;  %v4278_v59 = vmul.f32 %v4052_v9, %v3453_v17  ;;  %v5544_v26 = vld [vmem:[#allocation16_spill] sm:$0xff] }
 0x225   :  { %5539 = vst [vmem:[#allocation6_spill] sm:$0xff] %v4262_v30  ;;  %5540 = vst [vmem:[#allocation7_spill] sm:$0xff] %v4266_v36  ;;  %v4282_v29 = vmul.f32 %v4052_v9, %v5544_v26  ;;  %v5546_v30 = vld [vmem:[#allocation18_spill] sm:$0xff]  ;;  %v5548_v36 = vld [vmem:[#allocation20_spill] sm:$0xff] }
 0x226   :  { %5541 = vst [vmem:[#allocation8_spill] sm:$0xff] %v4270_v60  ;;  %5542 = vst [vmem:[#allocation9_spill] sm:$0xff] %v4274_v28  ;;  %v4286_v4 = vmul.f32 %v4052_v9, %v5546_v30  ;;  %v4290_v43 = vmul.f32 %v4052_v9, %v5548_v36  ;;  %v5550_v60 = vld [vmem:[#allocation22_spill] sm:$0xff]  ;;  %v5551_v28 = vsub.s32 0, %v4037_v55 }
 0x227   :  { %5543 = vst [vmem:[#allocation10_spill] sm:$0xff] %v4278_v59  ;;  %5545 = vst [vmem:[#allocation11_spill] sm:$0xff] %v4282_v29  ;;  %v4294_v39 = vmul.f32 %v4052_v9, %v5550_v60  ;;  %v5552_v59 = vld [vmem:[#allocation24_spill] sm:$0xff]  ;;  %v5553_v29 = vld [vmem:[#allocation25_spill] sm:$0xff] }
 0x228   :  { %5547 = vst [vmem:[#allocation12_spill] sm:$0xff] %v4286_v4  ;;  %5549 = vst [vmem:[#allocation13_spill] sm:$0xff] %v4290_v43  ;;  %v4298_v17 = vrot.slane %v903_v0, %v5551_v28  ;;  %v4302_v26 = vmul.f32 %v4052_v9, %v5552_v59  ;;  %v4306_v30 = vmul.f32 %v4052_v9, %v5553_v29  ;;  %v5554_v4 = vld [vmem:[#allocation27_spill] sm:$0xff]  ;;  %v5555_v43 = vld [vmem:[#allocation28_spill] sm:$0xff] }
 0x229   :  { %v4310_v36 = vmul.f32 %v4052_v9, %v5554_v4  ;;  %v4314_v60 = vmul.f32 %v4052_v9, %v5555_v43 }
 0x22a   :  { %v4318_v55 = vadd.f32 %v4298_v17, %v4058_v37  ;;  %v4322_v0 = vadd.f32 %v4298_v17, %v4062_v27  ;;  %v4326_v28 = vadd.f32 %v4298_v17, %v4066_v1  ;;  %v4330_v59 = vadd.f32 %v4298_v17, %v4070_v31 }
 0x22b   :  { %v4334_v9 = vadd.f32 %v4298_v17, %v4074_v32  ;;  %v4338_v37 = vadd.f32 %v4298_v17, %v4078_v35  ;;  %v4342_v27 = vadd.f32 %v4298_v17, %v4082_v38  ;;  %v4346_v1 = vadd.f32 %v4298_v17, %v4086_v42  ;;  %v5559_v29 = vld [vmem:[#allocation5_spill] sm:$0xff] }
 0x22c   :  { %v4350_v31 = vadd.f32 %v4298_v17, %v4090_v46  ;;  %v4354_v32 = vadd.f32 %v4298_v17, %v4094_v50  ;;  %v4358_v35 = vadd.f32 %v4298_v17, %v4098_v54  ;;  %v4362_v38 = vadd.f32 %v4298_v17, %v4102_v58  ;;  %v5561_v4 = vld [vmem:[#allocation6_spill] sm:$0xff]  ;;  %v5563_v43 = vld [vmem:[#allocation7_spill] sm:$0xff] }
 0x22d   :  { %v4366_v42 = vadd.f32 %v4298_v17, %v4106_v62  ;;  %v4370_v46 = vadd.f32 %v4298_v17, %v4110_v3  ;;  %v4374_v50 = vadd.f32 %v4298_v17, %v4114_v7  ;;  %v4378_v54 = vadd.f32 %v4298_v17, %v4118_v11 }
 0x22e   :  { %v4382_v58 = vadd.f32 %v4298_v17, %v4122_v15  ;;  %v4386_v62 = vadd.f32 %v4298_v17, %v4126_v19  ;;  %v4390_v3 = vadd.f32 %v4298_v17, %v4130_v23  ;;  %v4394_v7 = vadd.f32 %v4298_v17, %v4134_v21 }
 0x22f   :  { %v4398_v11 = vadd.f32 %v4298_v17, %v4138_v51  ;;  %v4402_v15 = vadd.f32 %v4298_v17, %v4142_v44  ;;  %v4406_v19 = vadd.f32 %v4298_v17, %v4146_v5  ;;  %v4410_v23 = vadd.f32 %v4298_v17, %v4150_v56 }
 0x230   :  { %v4414_v21 = vadd.f32 %v4298_v17, %v4154_v8  ;;  %v4418_v51 = vadd.f32 %v4298_v17, %v4158_v48  ;;  %v4422_v44 = vadd.f32 %v4298_v17, %v4162_v40  ;;  %v4426_v5 = vadd.f32 %v4298_v17, %v4166_v16 }
 0x231   :  { %v4430_v56 = vadd.f32 %v4298_v17, %v4170_v52  ;;  %v4434_v8 = vadd.f32 %v4298_v17, %v4174_v13  ;;  %v4438_v48 = vadd.f32 %v4298_v17, %v4178_v34  ;;  %v4442_v40 = vadd.f32 %v4298_v17, %v4182_v47 }
 0x232   :  { %v4446_v16 = vadd.f32 %v4298_v17, %v4186_v63  ;;  %v4450_v52 = vadd.f32 %v4298_v17, %v4190_v20  ;;  %v4454_v13 = vadd.f32 %v4298_v17, %v4194_v24  ;;  %v4458_v34 = vadd.f32 %v4298_v17, %v4198_v33 }
 0x233   :  { %v4462_v47 = vadd.f32 %v4298_v17, %v4202_v12  ;;  %v4466_v63 = vadd.f32 %v4298_v17, %v4206_v25  ;;  %v4470_v20 = vadd.f32 %v4298_v17, %v4210_v41  ;;  %v4474_v24 = vadd.f32 %v4298_v17, %v4214_v45 }
 0x234   :  { %v4478_v33 = vadd.f32 %v4298_v17, %v4218_v49  ;;  %v4482_v12 = vadd.f32 %v4298_v17, %v4222_v53  ;;  %v4486_v25 = vadd.f32 %v4298_v17, %v4226_v57  ;;  %v4490_v41 = vadd.f32 %v4298_v17, %v4230_v61 }
 0x235   :  { %v4494_v45 = vadd.f32 %v4298_v17, %v4234_v2  ;;  %v4498_v49 = vadd.f32 %v4298_v17, %v4238_v6  ;;  %v4502_v53 = vadd.f32 %v4298_v17, %v4242_v10  ;;  %v4506_v57 = vadd.f32 %v4298_v17, %v4246_v14 }
 0x236   :  { %v4510_v61 = vadd.f32 %v4298_v17, %v4250_v18  ;;  %v4514_v2 = vadd.f32 %v4298_v17, %v4254_v22  ;;  %v4518_v6 = vadd.f32 %v4298_v17, %v5559_v29  ;;  %v4522_v10 = vadd.f32 %v4298_v17, %v5561_v4 }
 0x237   :  { %5556 = vst [vmem:[#allocation14_spill] sm:$0xff] %v4506_v57  ;;  %v4526_v14 = vadd.f32 %v4298_v17, %v5563_v43  ;;  %v5565_v57 = vld [vmem:[#allocation8_spill] sm:$0xff] }
 0x238   :  { %5557 = vst [vmem:[#allocation15_spill] sm:$0xff] %v4510_v61  ;;  %5558 = vst [vmem:[#allocation17_spill] sm:$0xff] %v4514_v2  ;;  %v4530_v18 = vadd.f32 %v4298_v17, %v5565_v57  ;;  %v5566_v61 = vld [vmem:[#allocation9_spill] sm:$0xff]  ;;  %v5567_v2 = vld [vmem:[#allocation10_spill] sm:$0xff] }
 0x239   :  { %5560 = vst [vmem:[#allocation19_spill] sm:$0xff] %v4518_v6  ;;  %5562 = vst [vmem:[#allocation21_spill] sm:$0xff] %v4522_v10  ;;  %v4534_v22 = vadd.f32 %v4298_v17, %v5566_v61  ;;  %v4538_v29 = vadd.f32 %v4298_v17, %v5567_v2  ;;  %v5568_v6 = vld [vmem:[#allocation11_spill] sm:$0xff]  ;;  %v5569_v10 = vld [vmem:[#allocation12_spill] sm:$0xff]  ;;  %v4554_v61 = vadd.f32 %v4298_v17, %v4294_v39  ;;  %v1045_v39 = vmax.f32 %v4322_v0, 0.0 }
 0x23a   :  { %5564 = vst [vmem:[#allocation23_spill] sm:$0xff] %v4526_v14  ;;  %v4542_v4 = vadd.f32 %v4298_v17, %v5568_v6  ;;  %v4546_v43 = vadd.f32 %v4298_v17, %v5569_v10  ;;  %v5570_v14 = vld [vmem:[#allocation13_spill] sm:$0xff]  ;;  %v4558_v2 = vadd.f32 %v4298_v17, %v4302_v26  ;;  %v4562_v6 = vadd.f32 %v4298_v17, %v4306_v30 }
 0x23b   :  { %v4550_v57 = vadd.f32 %v4298_v17, %v5570_v14  ;;  %5572 = vst [vmem:[#allocation4_spill] sm:$0xff] %v4554_v61  ;;  %v4566_v10 = vadd.f32 %v4298_v17, %v4310_v36  ;;  %v4570_v14 = vadd.f32 %v4298_v17, %v4314_v60  ;;  %v1046_v61 = vmax.f32 %v4326_v28, 0.0  ;;  %1219 = vst.msk [vmem:[#allocation2 + $0x21] sm:$0xff] %vm562_vm0, %v1045_v39 }
 0x23c   :  { %5573 = vst [vmem:[#allocation16_spill] sm:$0xff] %v4558_v2  ;;  %5574 = vst [vmem:[#allocation18_spill] sm:$0xff] %v4562_v6  ;;  %v1047_v26 = vmax.f32 %v4330_v59, 0.0  ;;  %v1048_v2 = vmax.f32 %v4334_v9, 0.0  ;;  %v1049_v30 = vmax.f32 %v4338_v37, 0.0  ;;  %v1050_v6 = vmax.f32 %v4342_v27, 0.0 }
 0x23d   :  { %5571 = vst [vmem:[#allocation26_spill] sm:$0xff] %v4550_v57  ;;  %5575 = vst [vmem:[#allocation20_spill] sm:$0xff] %v4566_v10  ;;  %v1044_v57 = vmax.f32 %v4318_v55, 0.0  ;;  %v1051_v36 = vmax.f32 %v4346_v1, 0.0  ;;  %v1052_v10 = vmax.f32 %v4350_v31, 0.0  ;;  %v1053_v17 = vmax.f32 %v4354_v32, 0.0 }
 0x23e   :  { %v1054_v60 = vmax.f32 %v4358_v35, 0.0  ;;  %v1055_v55 = vmax.f32 %v4362_v38, 0.0  ;;  %1220 = vst.msk [vmem:[#allocation2 + $0x31] sm:$0xff] %vm562_vm0, %v1046_v61  ;;  %1221 = vst.msk [vmem:[#allocation2 + $0x39] sm:$0xff] %vm562_vm0, %v1047_v26  ;;  %v1056_v0 = vmax.f32 %v4366_v42, 0.0  ;;  %v1057_v28 = vmax.f32 %v4370_v46, 0.0 }
 0x23f   :  { %1218 = vst.msk [vmem:[#allocation2 + $0x19] sm:$0xff] %vm562_vm0, %v1044_v57  ;;  %v1058_v59 = vmax.f32 %v4374_v50, 0.0  ;;  %v1059_v9 = vmax.f32 %v4378_v54, 0.0  ;;  %1222 = vst.msk [vmem:[#allocation2 + $0x49] sm:$0xff] %vm562_vm0, %v1048_v2  ;;  %v1060_v37 = vmax.f32 %v4382_v58, 0.0  ;;  %v1061_v27 = vmax.f32 %v4386_v62, 0.0 }
 0x240   :  { %1223 = vst.msk [vmem:[#allocation2 + $0x51] sm:$0xff] %vm562_vm0, %v1049_v30  ;;  %1224 = vst.msk [vmem:[#allocation2 + $0x61] sm:$0xff] %vm562_vm0, %v1050_v6  ;;  %v1062_v1 = vmax.f32 %v4390_v3, 0.0  ;;  %v1063_v31 = vmax.f32 %v4394_v7, 0.0  ;;  %v1064_v32 = vmax.f32 %v4398_v11, 0.0  ;;  %v1065_v35 = vmax.f32 %v4402_v15, 0.0 }
 0x241   :  { %1225 = vst.msk [vmem:[#allocation2 + $0x69] sm:$0xff] %vm562_vm0, %v1051_v36  ;;  %1226 = vst.msk [vmem:[#allocation2 + $0x79] sm:$0xff] %vm562_vm0, %v1052_v10  ;;  %v1066_v38 = vmax.f32 %v4406_v19, 0.0  ;;  %v1067_v42 = vmax.f32 %v4410_v23, 0.0  ;;  %v1068_v46 = vmax.f32 %v4414_v21, 0.0  ;;  %v1069_v50 = vmax.f32 %v4418_v51, 0.0 }
 0x242   :  { %1227 = vst.msk [vmem:[#allocation2 + $0x81] sm:$0xff] %vm562_vm0, %v1053_v17  ;;  %1228 = vst.msk [vmem:[#allocation2 + $0x91] sm:$0xff] %vm562_vm0, %v1054_v60  ;;  %v1070_v54 = vmax.f32 %v4422_v44, 0.0  ;;  %v1071_v58 = vmax.f32 %v4426_v5, 0.0  ;;  %v1072_v62 = vmax.f32 %v4430_v56, 0.0  ;;  %v1073_v3 = vmax.f32 %v4434_v8, 0.0 }
 0x243   :  { %1229 = vst.msk [vmem:[#allocation2 + $0x99] sm:$0xff] %vm562_vm0, %v1055_v55  ;;  %1230 = vst.msk [vmem:[#allocation2 + $0xa9] sm:$0xff] %vm562_vm0, %v1056_v0  ;;  %v1074_v7 = vmax.f32 %v4438_v48, 0.0  ;;  %v1075_v11 = vmax.f32 %v4442_v40, 0.0  ;;  %v1076_v15 = vmax.f32 %v4446_v16, 0.0  ;;  %v1077_v19 = vmax.f32 %v4450_v52, 0.0 }
 0x244   :  { %1231 = vst.msk [vmem:[#allocation2 + $0xb1] sm:$0xff] %vm562_vm0, %v1057_v28  ;;  %1232 = vst.msk [vmem:[#allocation2 + $0xc1] sm:$0xff] %vm562_vm0, %v1058_v59  ;;  %v1078_v23 = vmax.f32 %v4454_v13, 0.0  ;;  %v1079_v21 = vmax.f32 %v4458_v34, 0.0  ;;  %v1080_v51 = vmax.f32 %v4462_v47, 0.0  ;;  %v1081_v44 = vmax.f32 %v4466_v63, 0.0 }
 0x245   :  { %1233 = vst.msk [vmem:[#allocation2 + $0xc9] sm:$0xff] %vm562_vm0, %v1059_v9  ;;  %1234 = vst.msk [vmem:[#allocation2 + $0xd9] sm:$0xff] %vm562_vm0, %v1060_v37  ;;  %v1082_v5 = vmax.f32 %v4470_v20, 0.0  ;;  %v1083_v56 = vmax.f32 %v4474_v24, 0.0  ;;  %v1084_v8 = vmax.f32 %v4478_v33, 0.0  ;;  %v1085_v48 = vmax.f32 %v4482_v12, 0.0 }
 0x246   :  { %1235 = vst.msk [vmem:[#allocation2 + $0xe1] sm:$0xff] %vm562_vm0, %v1061_v27  ;;  %1236 = vst.msk [vmem:[#allocation2 + $0xf1] sm:$0xff] %vm562_vm0, %v1062_v1  ;;  %v1086_v40 = vmax.f32 %v4486_v25, 0.0  ;;  %v1087_v16 = vmax.f32 %v4490_v41, 0.0  ;;  %v1088_v52 = vmax.f32 %v4494_v45, 0.0  ;;  %v1089_v13 = vmax.f32 %v4498_v49, 0.0 }
 0x247   :  { %1237 = vst.msk [vmem:[#allocation2 + $0xf9] sm:$0xff] %vm562_vm0, %v1063_v31  ;;  %1238 = vst.msk [vmem:[#allocation2 + $0x109] sm:$0xff] %vm562_vm0, %v1064_v32  ;;  %v1090_v34 = vmax.f32 %v4502_v53, 0.0  ;;  %v5576_v47 = vld [vmem:[#allocation14_spill] sm:$0xff]  ;;  %v4660_v20 = vld [vmem:[#allocation2] sm:$0xff]  ;;  %v1097_v17 = vmax.f32 %v4530_v18, 0.0 }
 0x248   :  { %1239 = vst.msk [vmem:[#allocation2 + $0x111] sm:$0xff] %vm562_vm0, %v1065_v35  ;;  %1240 = vst.msk [vmem:[#allocation2 + $0x121] sm:$0xff] %vm562_vm0, %v1066_v38  ;;  %v1091_v63 = vmax.f32 %v5576_v47, 0.0  ;;  %v4662_v24 = vld [vmem:[#allocation2 + $0x8] sm:$0xff]  ;;  %v4664_v33 = vld [vmem:[#allocation2 + $0x10] sm:$0x3] }
 0x249   :  { %1241 = vst.msk [vmem:[#allocation2 + $0x129] sm:$0xff] %vm562_vm0, %v1067_v42  ;;  %1242 = vst.msk [vmem:[#allocation2 + $0x139] sm:$0xff] %vm562_vm0, %v1068_v46  ;;  %v4666_v12 = vld [vmem:[#allocation2 + $0x18] sm:$0xff]  ;;  %v4668_v25 = vld [vmem:[#allocation2 + $0x20] sm:$0xff]  ;;  %v1098_v60 = vmax.f32 %v4534_v22, 0.0  ;;  %v1099_v55 = vmax.f32 %v4538_v29, 0.0 }
 0x24a   :  { %1243 = vst.msk [vmem:[#allocation2 + $0x141] sm:$0xff] %vm562_vm0, %v1069_v50  ;;  %1244 = vst.msk [vmem:[#allocation2 + $0x151] sm:$0xff] %vm562_vm0, %v1070_v54  ;;  %v4670_v41 = vld [vmem:[#allocation2 + $0x28] sm:$0x3]  ;;  %v5577_v45 = vld [vmem:[#allocation15_spill] sm:$0xff]  ;;  %v1100_v37 = vmax.f32 %v4542_v4, 0.0 }
 0x24b   :  { %1245 = vst.msk [vmem:[#allocation2 + $0x159] sm:$0xff] %vm562_vm0, %v1071_v58  ;;  %1246 = vst.msk [vmem:[#allocation2 + $0x169] sm:$0xff] %vm562_vm0, %v1072_v62  ;;  %v1092_v49 = vmax.f32 %v5577_v45, 0.0  ;;  %v5578_v53 = vld [vmem:[#allocation17_spill] sm:$0xff]  ;;  %v5579_v61 = vld [vmem:[#allocation19_spill] sm:$0xff]  ;;  %v1101_v18 = vmax.f32 %v4546_v43, 0.0  ;;  %v1302_v62 = vmax.f32 %v4662_v24, %v4668_v25 }
 0x24c   :  { %1247 = vst.msk [vmem:[#allocation2 + $0x171] sm:$0xff] %vm562_vm0, %v1073_v3  ;;  %1248 = vst.msk [vmem:[#allocation2 + $0x181] sm:$0xff] %vm562_vm0, %v1074_v7  ;;  %v1093_v57 = vmax.f32 %v5578_v53, 0.0  ;;  %v1094_v2 = vmax.f32 %v5579_v61, 0.0  ;;  %v5580_v6 = vld [vmem:[#allocation21_spill] sm:$0xff]  ;;  %v4680_v39 = vld [vmem:[#allocation2 + $0x30] sm:$0xff]  ;;  %v1303_v3 = vmax.f32 %v4664_v33, %v4670_v41 }
 0x24d   :  { %1249 = vst.msk [vmem:[#allocation2 + $0x189] sm:$0xff] %vm562_vm0, %v1075_v11  ;;  %1250 = vst.msk [vmem:[#allocation2 + $0x1c9] sm:$0xff] %vm562_vm0, %v1076_v15  ;;  %v1095_v10 = vmax.f32 %v5580_v6, 0.0  ;;  %v4682_v26 = vld [vmem:[#allocation2 + $0x38] sm:$0xff]  ;;  %v1285_v0 = vld [vmem:[#allocation2 + $0x1b0] sm:$0xff]  ;;  %v1107_v50 = vmax.f32 %v4570_v14, 0.0  ;;  %v1301_v14 = vmax.f32 %v4660_v20, %v4666_v12 }
 0x24e   :  { %1251 = vst.msk [vmem:[#allocation2 + $0x1d1] sm:$0xff] %vm562_vm0, %v1077_v19  ;;  %1252 = vst.msk [vmem:[#allocation2 + $0x1e1] sm:$0xff] %vm562_vm0, %v1078_v23  ;;  %v5581_v30 = vld [vmem:[#allocation23_spill] sm:$0xff]  ;;  %v1287_v59 = vld [vmem:[#allocation2 + $0x1c0] sm:$0x3] }
 0x24f   :  { %1253 = vst.msk [vmem:[#allocation2 + $0x1e9] sm:$0xff] %vm562_vm0, %v1079_v21  ;;  %1254 = vst.msk [vmem:[#allocation2 + $0x1f9] sm:$0xff] %vm562_vm0, %v1080_v51  ;;  %v1096_v36 = vmax.f32 %v5581_v30, 0.0  ;;  %v1286_v28 = vld [vmem:[#allocation2 + $0x1b8] sm:$0xff]  ;;  %v4692_v9 = vld [vmem:[#allocation2 + $0x40] sm:$0x3] }
 0x250   :  { %1255 = vst.msk [vmem:[#allocation2 + $0x201] sm:$0xff] %vm562_vm0, %v1081_v44  ;;  %1256 = vst.msk [vmem:[#allocation2 + $0x211] sm:$0xff] %vm562_vm0, %v1082_v5  ;;  %v5582_v22 = vld [vmem:[#allocation26_spill] sm:$0xff]  ;;  %v5583_v29 = vld [vmem:[#allocation4_spill] sm:$0xff] }
 0x251   :  { %1257 = vst.msk [vmem:[#allocation2 + $0x219] sm:$0xff] %vm562_vm0, %v1083_v56  ;;  %1258 = vst.msk [vmem:[#allocation2 + $0x229] sm:$0xff] %vm562_vm0, %v1084_v8  ;;  %v1102_v27 = vmax.f32 %v5582_v22, 0.0  ;;  %v1103_v1 = vmax.f32 %v5583_v29, 0.0  ;;  %v1326_v31 = vld [vmem:[#allocation2 + $0x48] sm:$0xff]  ;;  %v1327_v32 = vld [vmem:[#allocation2 + $0x50] sm:$0xff] }
 0x252   :  { %1259 = vst.msk [vmem:[#allocation2 + $0x231] sm:$0xff] %vm562_vm0, %v1085_v48  ;;  %1260 = vst.msk [vmem:[#allocation2 + $0x241] sm:$0xff] %vm562_vm0, %v1086_v40  ;;  %v5584_v35 = vld [vmem:[#allocation16_spill] sm:$0xff]  ;;  %v5585_v42 = vld [vmem:[#allocation18_spill] sm:$0xff]  ;;  %v1339_v15 = vmax.f32 %v4680_v39, %v1326_v31  ;;  %v1340_v51 = vmax.f32 %v4682_v26, %v1327_v32 }
 0x253   :  { %1261 = vst.msk [vmem:[#allocation2 + $0x249] sm:$0xff] %vm562_vm0, %v1087_v16  ;;  %1262 = vst.msk [vmem:[#allocation2 + $0x259] sm:$0xff] %vm562_vm0, %v1088_v52  ;;  %v1104_v38 = vmax.f32 %v5584_v35, 0.0  ;;  %v1105_v4 = vmax.f32 %v5585_v42, 0.0  ;;  %v5586_v46 = vld [vmem:[#allocation20_spill] sm:$0xff]  ;;  %v4722_v11 = vld [vmem:[#allocation2 + $0x68] sm:$0xff]  ;;  %v1307_v52 = vmax.f32 %v1301_v14, %v4680_v39 }
 0x254   :  { %1263 = vst.msk [vmem:[#allocation2 + $0x261] sm:$0xff] %vm562_vm0, %v1089_v13  ;;  %1264 = vst.msk [vmem:[#allocation2 + $0x271] sm:$0xff] %vm562_vm0, %v1090_v34  ;;  %v1106_v43 = vmax.f32 %v5586_v46, 0.0  ;;  %v1328_v54 = vld [vmem:[#allocation2 + $0x58] sm:$0x3]  ;;  %v4720_v7 = vld [vmem:[#allocation2 + $0x60] sm:$0xff]  ;;  %v1308_v34 = vmax.f32 %v1302_v62, %v4682_v26  ;;  %v1346_v12 = vmax.f32 %v1340_v51, %v4722_v11 }
 0x255   :  { %1265 = vst.msk [vmem:[#allocation2 + $0x279] sm:$0xff] %vm562_vm0, %v1091_v63  ;;  %1266 = vst.msk [vmem:[#allocation2 + $0x289] sm:$0xff] %vm562_vm0, %v1092_v49  ;;  %v1297_v58 = vld [vmem:[#allocation2 + $0x40] sm:$0x3]  ;;  %v1291_v19 = vld [vmem:[#allocation2 + $0x1c8] sm:$0xff]  ;;  %v1341_v44 = vmax.f32 %v4692_v9, %v1328_v54  ;;  %v1345_v33 = vmax.f32 %v1339_v15, %v4720_v7 }
 0x256   :  { %1267 = vst.msk [vmem:[#allocation2 + $0x291] sm:$0xff] %vm562_vm0, %v1093_v57  ;;  %1268 = vst.msk [vmem:[#allocation2 + $0x2a1] sm:$0xff] %vm562_vm0, %v1094_v2  ;;  %v1292_v23 = vld [vmem:[#allocation2 + $0x1d0] sm:$0xff]  ;;  %v1293_v21 = vld [vmem:[#allocation2 + $0x1d8] sm:$0x3]  ;;  %v1304_v48 = vmax.f32 %v1285_v0, %v1291_v19  ;;  %v1309_v47 = vmax.f32 %v1303_v3, %v1297_v58 }
 0x257   :  { %1269 = vst.msk [vmem:[#allocation2 + $0x2a9] sm:$0xff] %vm562_vm0, %v1095_v10  ;;  %1270 = vst.msk [vmem:[#allocation2 + $0x2b9] sm:$0xff] %vm562_vm0, %v1096_v36  ;;  %v1298_v5 = vld [vmem:[#allocation2 + $0x1e0] sm:$0xff]  ;;  %v1299_v56 = vld [vmem:[#allocation2 + $0x1e8] sm:$0xff]  ;;  %v1305_v40 = vmax.f32 %v1286_v28, %v1292_v23  ;;  %v1306_v16 = vmax.f32 %v1287_v59, %v1293_v21 }
 0x258   :  { %1271 = vst.msk [vmem:[#allocation2 + $0x2c1] sm:$0xff] %vm562_vm0, %v1097_v17  ;;  %1272 = vst.msk [vmem:[#allocation2 + $0x2d1] sm:$0xff] %vm562_vm0, %v1098_v60  ;;  %v1300_v8 = vld [vmem:[#allocation2 + $0x1f0] sm:$0x3]  ;;  %v1329_v20 = vld [vmem:[#allocation2 + $0x1f8] sm:$0xff]  ;;  %v1310_v25 = vmax.f32 %v1304_v48, %v1298_v5 }
 0x259   :  { %1273 = vst.msk [vmem:[#allocation2 + $0x2d9] sm:$0xff] %vm562_vm0, %v1099_v55  ;;  %1274 = vst.msk [vmem:[#allocation2 + $0x2e9] sm:$0xff] %vm562_vm0, %v1100_v37  ;;  %v1335_v13 = vld [vmem:[#allocation2 + $0x70] sm:$0x3]  ;;  %v1330_v24 = vld [vmem:[#allocation2 + $0x200] sm:$0xff]  ;;  %v1311_v41 = vmax.f32 %v1305_v40, %v1299_v56  ;;  %v1312_v45 = vmax.f32 %v1306_v16, %v1300_v8  ;;  %v1342_v61 = vmax.f32 %v1298_v5, %v1329_v20 }
 0x25a   :  { %1275 = vst.msk [vmem:[#allocation2 + $0x2f1] sm:$0xff] %vm562_vm0, %v1101_v18  ;;  %1276 = vst.msk [vmem:[#allocation2 + $0x301] sm:$0xff] %vm562_vm0, %v1102_v27  ;;  %v1324_v63 = vld [vmem:[#allocation2 + $0x1f0] sm:$0x3]  ;;  %v1331_v49 = vld [vmem:[#allocation2 + $0x208] sm:$0x3]  ;;  %v1343_v6 = vmax.f32 %v1299_v56, %v1330_v24  ;;  %v1347_v39 = vmax.f32 %v1341_v44, %v1335_v13 }
 0x25b   :  { %1277 = vst.msk [vmem:[#allocation2 + $0x309] sm:$0xff] %vm562_vm0, %v1103_v1  ;;  %1278 = vst.msk [vmem:[#allocation2 + $0x319] sm:$0xff] %vm562_vm0, %v1104_v38  ;;  %v1336_v53 = vld [vmem:[#allocation2 + $0x210] sm:$0xff]  ;;  %v1337_v57 = vld [vmem:[#allocation2 + $0x218] sm:$0xff]  ;;  %v1344_v10 = vmax.f32 %v1324_v63, %v1331_v49 }
 0x25c   :  { %1279 = vst.msk [vmem:[#allocation2 + $0x321] sm:$0xff] %vm562_vm0, %v1105_v4  ;;  %1280 = vst.msk [vmem:[#allocation2 + $0x331] sm:$0xff] %vm562_vm0, %v1106_v43  ;;  %v1338_v2 = vld [vmem:[#allocation2 + $0x220] sm:$0x3]  ;;  %v1360_v26 = vld [vmem:[#allocation2 + $0x70] sm:$0x3]  ;;  %v1348_v36 = vmax.f32 %v1342_v61, %v1336_v53  ;;  %v1349_v0 = vmax.f32 %v1343_v6, %v1337_v57 }
 0x25d   :  { %1281 = vst.msk [vmem:[#allocation2 + $0x339] sm:$0xff] %vm562_vm0, %v1107_v50  ;;  %1313 = vst.msk [vmem:[#allocation3] sm:$0xff] %vm562_vm0, %v1307_v52  ;;  %v1363_v30 = vld [vmem:[#allocation2 + $0x220] sm:$0x3]  ;;  %v1365_v17 = vld [vmem:[#allocation2 + $0x78] sm:$0xff]  ;;  %v1350_v28 = vmax.f32 %v1344_v10, %v1338_v2 }
 0x25e   :  { %1314 = vst.msk [vmem:[#allocation3 + $0x8] sm:$0xff] %vm562_vm0, %v1308_v34  ;;  %1352 = vst.msk [vmem:[#allocation3 + $0x18] sm:$0xff] %vm562_vm0, %v1345_v33  ;;  %v1366_v60 = vld [vmem:[#allocation2 + $0x80] sm:$0xff]  ;;  %v1367_v55 = vld [vmem:[#allocation2 + $0x88] sm:$0x3]  ;;  %v1378_v18 = vmax.f32 %v4720_v7, %v1365_v17 }
 0x25f   :  { %1315 = vst.msk [vmem:[#allocation3 + $0x10] sm:$0x3] %vm1110_vm1, %v1309_v47  ;;  %1318 = vst.msk [vmem:[#allocation3 + $0xd0] sm:$0x3] %vm1110_vm1, %v1312_v45  ;;  %v1368_v59 = vld [vmem:[#allocation2 + $0x228] sm:$0xff]  ;;  %v1369_v9 = vld [vmem:[#allocation2 + $0x230] sm:$0xff]  ;;  %v1379_v22 = vmax.f32 %v4722_v11, %v1366_v60  ;;  %v1380_v31 = vmax.f32 %v1360_v26, %v1367_v55 }
 0x260   :  { %1353 = vst.msk [vmem:[#allocation3 + $0x20] sm:$0xff] %vm562_vm0, %v1346_v12  ;;  %1316 = vst.msk [vmem:[#allocation3 + $0xc0] sm:$0xff] %vm562_vm0, %v1310_v25  ;;  %v1370_v37 = vld [vmem:[#allocation2 + $0x238] sm:$0x3]  ;;  %v1372_v27 = vld [vmem:[#allocation2 + $0x90] sm:$0xff]  ;;  %v1381_v32 = vmax.f32 %v1336_v53, %v1368_v59  ;;  %v1382_v35 = vmax.f32 %v1337_v57, %v1369_v9 }
 0x261   :  { %1317 = vst.msk [vmem:[#allocation3 + $0xc8] sm:$0xff] %vm562_vm0, %v1311_v41  ;;  %1355 = vst.msk [vmem:[#allocation3 + $0xd8] sm:$0xff] %vm562_vm0, %v1348_v36  ;;  %v1373_v29 = vld [vmem:[#allocation2 + $0x98] sm:$0xff]  ;;  %v1374_v1 = vld [vmem:[#allocation2 + $0xa0] sm:$0x3]  ;;  %v1383_v38 = vmax.f32 %v1363_v30, %v1370_v37  ;;  %v1384_v43 = vmax.f32 %v1378_v18, %v1372_v27 }
 0x262   :  { %1354 = vst.msk [vmem:[#allocation3 + $0x28] sm:$0x3] %vm1110_vm1, %v1347_v39  ;;  %1357 = vst.msk [vmem:[#allocation3 + $0xe8] sm:$0x3] %vm1110_vm1, %v1350_v28  ;;  %v1375_v42 = vld [vmem:[#allocation2 + $0x240] sm:$0xff]  ;;  %v1376_v4 = vld [vmem:[#allocation2 + $0x248] sm:$0xff]  ;;  %v1385_v50 = vmax.f32 %v1379_v22, %v1373_v29  ;;  %v1386_v54 = vmax.f32 %v1380_v31, %v1374_v1 }
 0x263   :  { %1356 = vst.msk [vmem:[#allocation3 + $0xe0] sm:$0xff] %vm562_vm0, %v1349_v0  ;;  %v1377_v46 = vld [vmem:[#allocation2 + $0x250] sm:$0x3]  ;;  %v1387_v58 = vmax.f32 %v1381_v32, %v1375_v42  ;;  %v1388_v14 = vmax.f32 %v1382_v35, %v1376_v4  ;;  %v1399_v3 = vld [vmem:[#allocation2 + $0xa0] sm:$0x3]  ;;  %v1404_v11 = vld [vmem:[#allocation2 + $0xa8] sm:$0xff] }
 0x264   :  { %v1389_v62 = vmax.f32 %v1383_v38, %v1377_v46  ;;  %v1402_v7 = vld [vmem:[#allocation2 + $0x250] sm:$0x3]  ;;  %1391 = vst.msk [vmem:[#allocation3 + $0x30] sm:$0xff] %vm562_vm0, %v1384_v43  ;;  %1392 = vst.msk [vmem:[#allocation3 + $0x38] sm:$0xff] %vm562_vm0, %v1385_v50  ;;  %v1406_v19 = vld [vmem:[#allocation2 + $0xb8] sm:$0x3]  ;;  %v1417_v21 = vmax.f32 %v1372_v27, %v1404_v11 }
 0x265   :  { %v1405_v15 = vld [vmem:[#allocation2 + $0xb0] sm:$0xff]  ;;  %v1407_v23 = vld [vmem:[#allocation2 + $0x258] sm:$0xff]  ;;  %1393 = vst.msk [vmem:[#allocation3 + $0x40] sm:$0x3] %vm1110_vm1, %v1386_v54  ;;  %v1408_v51 = vld [vmem:[#allocation2 + $0x260] sm:$0xff]  ;;  %v1419_v8 = vmax.f32 %v1399_v3, %v1406_v19 }
 0x266   :  { %1394 = vst.msk [vmem:[#allocation3 + $0xf0] sm:$0xff] %vm562_vm0, %v1387_v58  ;;  %1395 = vst.msk [vmem:[#allocation3 + $0xf8] sm:$0xff] %vm562_vm0, %v1388_v14  ;;  %v1409_v44 = vld [vmem:[#allocation2 + $0x268] sm:$0x3]  ;;  %v1411_v5 = vld [vmem:[#allocation2 + $0xc0] sm:$0xff]  ;;  %v1418_v56 = vmax.f32 %v1373_v29, %v1405_v15  ;;  %v1420_v48 = vmax.f32 %v1375_v42, %v1407_v23  ;;  %v1421_v13 = vmax.f32 %v1376_v4, %v1408_v51 }
 0x267   :  { %1396 = vst.msk [vmem:[#allocation3 + $0x100] sm:$0x3] %vm1110_vm1, %v1389_v62  ;;  %v1412_v40 = vld [vmem:[#allocation2 + $0xc8] sm:$0xff]  ;;  %v1413_v16 = vld [vmem:[#allocation2 + $0xd0] sm:$0x3]  ;;  %v1422_v34 = vmax.f32 %v1402_v7, %v1409_v44  ;;  %v1423_v47 = vmax.f32 %v1417_v21, %v1411_v5  ;;  %v1415_v63 = vld [vmem:[#allocation2 + $0x278] sm:$0xff] }
 0x268   :  { %v1414_v52 = vld [vmem:[#allocation2 + $0x270] sm:$0xff]  ;;  %v1416_v20 = vld [vmem:[#allocation2 + $0x280] sm:$0x3]  ;;  %v1424_v24 = vmax.f32 %v1418_v56, %v1412_v40  ;;  %v1425_v33 = vmax.f32 %v1419_v8, %v1413_v16  ;;  %v1427_v41 = vmax.f32 %v1421_v13, %v1415_v63  ;;  %v1443_v53 = vld [vmem:[#allocation2 + $0xd8] sm:$0xff] }
 0x269   :  { %v1426_v12 = vmax.f32 %v1420_v48, %v1414_v52  ;;  %v1438_v25 = vld [vmem:[#allocation2 + $0xd0] sm:$0x3]  ;;  %v1428_v45 = vmax.f32 %v1422_v34, %v1416_v20  ;;  %1430 = vst.msk [vmem:[#allocation3 + $0x48] sm:$0xff] %vm562_vm0, %v1423_v47  ;;  %v1441_v49 = vld [vmem:[#allocation2 + $0x280] sm:$0x3]  ;;  %v1446_v2 = vld [vmem:[#allocation2 + $0x288] sm:$0xff]  ;;  %v1456_v10 = vmax.f32 %v1411_v5, %v1443_v53 }
 0x26a   :  { %v1444_v57 = vld [vmem:[#allocation2 + $0xe0] sm:$0xff]  ;;  %1431 = vst.msk [vmem:[#allocation3 + $0x50] sm:$0xff] %vm562_vm0, %v1424_v24  ;;  %v1445_v61 = vld [vmem:[#allocation2 + $0xe8] sm:$0x3]  ;;  %v1447_v6 = vld [vmem:[#allocation2 + $0x290] sm:$0xff]  ;;  %v1459_v60 = vmax.f32 %v1414_v52, %v1446_v2 }
 0x26b   :  { %1432 = vst.msk [vmem:[#allocation3 + $0x58] sm:$0x3] %vm1110_vm1, %v1425_v33  ;;  %v1457_v39 = vmax.f32 %v1412_v40, %v1444_v57  ;;  %1435 = vst.msk [vmem:[#allocation3 + $0x118] sm:$0x3] %vm1110_vm1, %v1428_v45  ;;  %v1448_v26 = vld [vmem:[#allocation2 + $0x298] sm:$0x3]  ;;  %v1458_v17 = vmax.f32 %v1438_v25, %v1445_v61  ;;  %v1460_v55 = vmax.f32 %v1415_v63, %v1447_v6 }
 0x26c   :  { %1433 = vst.msk [vmem:[#allocation3 + $0x108] sm:$0xff] %vm562_vm0, %v1426_v12  ;;  %1434 = vst.msk [vmem:[#allocation3 + $0x110] sm:$0xff] %vm562_vm0, %v1427_v41  ;;  %v1450_v30 = vld [vmem:[#allocation2 + $0xf0] sm:$0xff]  ;;  %v1451_v36 = vld [vmem:[#allocation2 + $0xf8] sm:$0xff]  ;;  %v1461_v9 = vmax.f32 %v1441_v49, %v1448_v26 }
 0x26d   :  { %v1452_v0 = vld [vmem:[#allocation2 + $0x100] sm:$0x3]  ;;  %v1454_v59 = vld [vmem:[#allocation2 + $0x2a8] sm:$0xff]  ;;  %v1462_v37 = vmax.f32 %v1456_v10, %v1450_v30  ;;  %v1463_v18 = vmax.f32 %v1457_v39, %v1451_v36  ;;  %v1455_v22 = vld [vmem:[#allocation2 + $0x2b0] sm:$0x3] }
 0x26e   :  { %v1453_v28 = vld [vmem:[#allocation2 + $0x2a0] sm:$0xff]  ;;  %v1464_v27 = vmax.f32 %v1458_v17, %v1452_v0  ;;  %v1466_v1 = vmax.f32 %v1460_v55, %v1454_v59  ;;  %v1480_v32 = vld [vmem:[#allocation2 + $0x2b0] sm:$0x3]  ;;  %v1467_v35 = vmax.f32 %v1461_v9, %v1455_v22  ;;  %v1482_v38 = vld [vmem:[#allocation2 + $0x108] sm:$0xff] }
 0x26f   :  { %v1465_v29 = vmax.f32 %v1459_v60, %v1453_v28  ;;  %v1477_v31 = vld [vmem:[#allocation2 + $0x100] sm:$0x3]  ;;  %1469 = vst.msk [vmem:[#allocation3 + $0x60] sm:$0xff] %vm562_vm0, %v1462_v37  ;;  %1470 = vst.msk [vmem:[#allocation3 + $0x68] sm:$0xff] %vm562_vm0, %v1463_v18  ;;  %v1483_v42 = vld [vmem:[#allocation2 + $0x110] sm:$0xff]  ;;  %v1495_v54 = vmax.f32 %v1450_v30, %v1482_v38 }
 0x270   :  { %v1484_v4 = vld [vmem:[#allocation2 + $0x118] sm:$0x3]  ;;  %1471 = vst.msk [vmem:[#allocation3 + $0x70] sm:$0x3] %vm1110_vm1, %v1464_v27  ;;  %v1486_v43 = vld [vmem:[#allocation2 + $0x2c0] sm:$0xff]  ;;  %v1496_v58 = vmax.f32 %v1451_v36, %v1483_v42  ;;  %v1490_v3 = vld [vmem:[#allocation2 + $0x128] sm:$0xff] }
 0x271   :  { %1472 = vst.msk [vmem:[#allocation3 + $0x120] sm:$0xff] %vm562_vm0, %v1465_v29  ;;  %1473 = vst.msk [vmem:[#allocation3 + $0x128] sm:$0xff] %vm562_vm0, %v1466_v1  ;;  %v1485_v46 = vld [vmem:[#allocation2 + $0x2b8] sm:$0xff]  ;;  %v1487_v50 = vld [vmem:[#allocation2 + $0x2c8] sm:$0x3]  ;;  %v1497_v14 = vmax.f32 %v1477_v31, %v1484_v4  ;;  %v1499_v15 = vmax.f32 %v1454_v59, %v1486_v43 }
 0x272   :  { %1474 = vst.msk [vmem:[#allocation3 + $0x130] sm:$0x3] %vm1110_vm1, %v1467_v35  ;;  %v1489_v62 = vld [vmem:[#allocation2 + $0x120] sm:$0xff]  ;;  %v1491_v7 = vld [vmem:[#allocation2 + $0x130] sm:$0x3]  ;;  %v1498_v11 = vmax.f32 %v1453_v28, %v1485_v46  ;;  %v1500_v19 = vmax.f32 %v1480_v32, %v1487_v50  ;;  %v1493_v21 = vld [vmem:[#allocation2 + $0x2d8] sm:$0xff]  ;;  %v1502_v5 = vmax.f32 %v1496_v58, %v1490_v3 }
 0x273   :  { %v1492_v23 = vld [vmem:[#allocation2 + $0x2d0] sm:$0xff]  ;;  %v1494_v51 = vld [vmem:[#allocation2 + $0x2e0] sm:$0x3]  ;;  %v1501_v44 = vmax.f32 %v1495_v54, %v1489_v62  ;;  %v1503_v56 = vmax.f32 %v1497_v14, %v1491_v7  ;;  %v1505_v48 = vmax.f32 %v1499_v15, %v1493_v21  ;;  %v1521_v13 = vld [vmem:[#allocation2 + $0x138] sm:$0xff] }
 0x274   :  { %v1504_v8 = vmax.f32 %v1498_v11, %v1492_v23  ;;  %v1506_v40 = vmax.f32 %v1500_v19, %v1494_v51  ;;  %v1516_v16 = vld [vmem:[#allocation2 + $0x130] sm:$0x3]  ;;  %v1519_v52 = vld [vmem:[#allocation2 + $0x2e0] sm:$0x3]  ;;  %1509 = vst.msk [vmem:[#allocation3 + $0x80] sm:$0xff] %vm562_vm0, %v1502_v5  ;;  %v1524_v63 = vld [vmem:[#allocation2 + $0x2e8] sm:$0xff]  ;;  %v1534_v20 = vmax.f32 %v1489_v62, %v1521_v13 }
 0x275   :  { %1508 = vst.msk [vmem:[#allocation3 + $0x78] sm:$0xff] %vm562_vm0, %v1501_v44  ;;  %v1522_v34 = vld [vmem:[#allocation2 + $0x140] sm:$0xff]  ;;  %v1523_v47 = vld [vmem:[#allocation2 + $0x148] sm:$0x3]  ;;  %1512 = vst.msk [vmem:[#allocation3 + $0x140] sm:$0xff] %vm562_vm0, %v1505_v48  ;;  %v1537_v45 = vmax.f32 %v1492_v23, %v1524_v63 }
 0x276   :  { %1510 = vst.msk [vmem:[#allocation3 + $0x88] sm:$0x3] %vm1110_vm1, %v1503_v56  ;;  %1513 = vst.msk [vmem:[#allocation3 + $0x148] sm:$0x3] %vm1110_vm1, %v1506_v40  ;;  %v1525_v24 = vld [vmem:[#allocation2 + $0x2f0] sm:$0xff]  ;;  %v1535_v25 = vmax.f32 %v1490_v3, %v1522_v34  ;;  %v1536_v41 = vmax.f32 %v1516_v16, %v1523_v47  ;;  %v1529_v49 = vld [vmem:[#allocation2 + $0x158] sm:$0xff] }
 0x277   :  { %1511 = vst.msk [vmem:[#allocation3 + $0x138] sm:$0xff] %vm562_vm0, %v1504_v8  ;;  %v1526_v33 = vld [vmem:[#allocation2 + $0x2f8] sm:$0x3]  ;;  %v1528_v12 = vld [vmem:[#allocation2 + $0x150] sm:$0xff]  ;;  %v1530_v53 = vld [vmem:[#allocation2 + $0x160] sm:$0x3]  ;;  %v1538_v61 = vmax.f32 %v1493_v21, %v1525_v24 }
 0x278   :  { %v1531_v57 = vld [vmem:[#allocation2 + $0x300] sm:$0xff]  ;;  %v1539_v2 = vmax.f32 %v1519_v52, %v1526_v33  ;;  %v1540_v6 = vmax.f32 %v1534_v20, %v1528_v12  ;;  %v1532_v10 = vld [vmem:[#allocation2 + $0x308] sm:$0xff]  ;;  %v1533_v39 = vld [vmem:[#allocation2 + $0x310] sm:$0x3]  ;;  %v1541_v26 = vmax.f32 %v1535_v25, %v1529_v49  ;;  %v1542_v30 = vmax.f32 %v1536_v41, %v1530_v53 }
 0x279   :  { %v1543_v36 = vmax.f32 %v1537_v45, %v1531_v57  ;;  %v1555_v17 = vld [vmem:[#allocation2 + $0x160] sm:$0x3]  ;;  %v1544_v60 = vmax.f32 %v1538_v61, %v1532_v10  ;;  %v1558_v0 = vld [vmem:[#allocation2 + $0x310] sm:$0x3]  ;;  %v1560_v28 = vld [vmem:[#allocation2 + $0x168] sm:$0xff] }
 0x27a   :  { %v1545_v55 = vmax.f32 %v1539_v2, %v1533_v39  ;;  %1547 = vst.msk [vmem:[#allocation3 + $0x90] sm:$0xff] %vm562_vm0, %v1540_v6  ;;  %v1561_v59 = vld [vmem:[#allocation2 + $0x170] sm:$0xff]  ;;  %1548 = vst.msk [vmem:[#allocation3 + $0x98] sm:$0xff] %vm562_vm0, %v1541_v26  ;;  %v1562_v9 = vld [vmem:[#allocation2 + $0x178] sm:$0x3]  ;;  %v1573_v22 = vmax.f32 %v1528_v12, %v1560_v28 }
 0x27b   :  { %1549 = vst.msk [vmem:[#allocation3 + $0xa0] sm:$0x3] %vm1110_vm1, %v1542_v30  ;;  %v1563_v37 = vld [vmem:[#allocation2 + $0x318] sm:$0xff]  ;;  %v1564_v18 = vld [vmem:[#allocation2 + $0x320] sm:$0xff]  ;;  %v1574_v27 = vmax.f32 %v1529_v49, %v1561_v59  ;;  %v1565_v29 = vld [vmem:[#allocation2 + $0x328] sm:$0x3]  ;;  %v1575_v32 = vmax.f32 %v1555_v17, %v1562_v9 }
 0x27c   :  { %1550 = vst.msk [vmem:[#allocation3 + $0x150] sm:$0xff] %vm562_vm0, %v1543_v36  ;;  %1551 = vst.msk [vmem:[#allocation3 + $0x158] sm:$0xff] %vm562_vm0, %v1544_v60  ;;  %v1567_v1 = vld [vmem:[#allocation2 + $0x180] sm:$0xff]  ;;  %v1568_v31 = vld [vmem:[#allocation2 + $0x188] sm:$0xff]  ;;  %v1576_v35 = vmax.f32 %v1531_v57, %v1563_v37  ;;  %v1577_v38 = vmax.f32 %v1532_v10, %v1564_v18  ;;  %v1578_v43 = vmax.f32 %v1558_v0, %v1565_v29 }
 0x27d   :  { %1552 = vst.msk [vmem:[#allocation3 + $0x160] sm:$0x3] %vm1110_vm1, %v1545_v55  ;;  %v1569_v42 = vld [vmem:[#allocation2 + $0x190] sm:$0x3]  ;;  %v1571_v46 = vld [vmem:[#allocation2 + $0x338] sm:$0xff]  ;;  %v1579_v50 = vmax.f32 %v1573_v22, %v1567_v1  ;;  %v1580_v54 = vmax.f32 %v1574_v27, %v1568_v31 }
 0x27e   :  { %v1570_v4 = vld [vmem:[#allocation2 + $0x330] sm:$0xff]  ;;  %v1572_v58 = vld [vmem:[#allocation2 + $0x340] sm:$0x3]  ;;  %v1581_v14 = vmax.f32 %v1575_v32, %v1569_v42  ;;  %v1583_v3 = vmax.f32 %v1577_v38, %v1571_v46  ;;  %v1633_v15 = vld [vmem:[#allocation3 + $0x18] sm:$0x1] }
 0x27f   :  { %v1582_v62 = vmax.f32 %v1576_v35, %v1570_v4  ;;  %v1584_v7 = vmax.f32 %v1578_v43, %v1572_v58  ;;  %1586 = vst.msk [vmem:[#allocation3 + $0xa8] sm:$0xff] %vm562_vm0, %v1579_v50  ;;  %1587 = vst.msk [vmem:[#allocation3 + $0xb0] sm:$0xff] %vm562_vm0, %v1580_v54  ;;  %v1632_v11 = vld [vmem:[#allocation3] sm:$0x1]  ;;  %v1634_v19 = vld [vmem:[#allocation3 + $0x30] sm:$0x1] }
 0x280   :  { %1588 = vst.msk [vmem:[#allocation3 + $0xb8] sm:$0x3] %vm1110_vm1, %v1581_v14  ;;  %v1635_v23 = vld [vmem:[#allocation3 + $0x48] sm:$0x1]  ;;  %v1636_v21 = vld [vmem:[#allocation3 + $0x60] sm:$0x1] }
 0x281   :  { %1589 = vst.msk [vmem:[#allocation3 + $0x168] sm:$0xff] %vm562_vm0, %v1582_v62  ;;  %1590 = vst.msk [vmem:[#allocation3 + $0x170] sm:$0xff] %vm562_vm0, %v1583_v3  ;;  %v1637_v51 = vld [vmem:[#allocation3 + $0x78] sm:$0x1]  ;;  %v1638_v44 = vld [vmem:[#allocation3 + $0x90] sm:$0x1] }
 0x282   :  { %1591 = vst.msk [vmem:[#allocation3 + $0x178] sm:$0x3] %vm1110_vm1, %v1584_v7  ;;  %v1640_v5 = vld [vmem:[#allocation3 + $0xc0] sm:$0x1]  ;;  %v4785_v56 = vld [vmem:[#allocation3 + $0xd8] sm:$0x1] }
 0x283   :  { %v1648_v8 = vld [vmem:[#allocation3 + $0x1] sm:$0x1]  ;;  %v1649_v48 = vld [vmem:[#allocation3 + $0x19] sm:$0x1]  ;;  %v1650_v40 = vld [vmem:[#allocation3 + $0x31] sm:$0x1] }
 0x284   :  { %v4787_v16 = vld [vmem:[#allocation3 + $0xf0] sm:$0x1]  ;;  %v4789_v52 = vld [vmem:[#allocation3 + $0x108] sm:$0x1]  ;;  %v4791_v13 = vld [vmem:[#allocation3 + $0x120] sm:$0x1]  ;;  %v1680_v53 = vmax.f32 %v1632_v11, %v1648_v8  ;;  %v1681_v57 = vmax.f32 %v1633_v15, %v1649_v48  ;;  %v1682_v61 = vmax.f32 %v1634_v19, %v1650_v40 }
 0x285   :  { %v4793_v34 = vld [vmem:[#allocation3 + $0x138] sm:$0x1]  ;;  %v1651_v47 = vld [vmem:[#allocation3 + $0x49] sm:$0x1]  ;;  %v1652_v63 = vld [vmem:[#allocation3 + $0x61] sm:$0x1] }
 0x286   :  { %v1653_v20 = vld [vmem:[#allocation3 + $0x79] sm:$0x1]  ;;  %v4795_v24 = vld [vmem:[#allocation3 + $0x150] sm:$0x1]  ;;  %v1654_v33 = vld [vmem:[#allocation3 + $0x91] sm:$0x1]  ;;  %v1683_v39 = vmax.f32 %v1635_v23, %v1651_v47  ;;  %v1684_v26 = vmax.f32 %v1636_v21, %v1652_v63 }
 0x287   :  { %v1656_v12 = vld [vmem:[#allocation3 + $0xc1] sm:$0x1]  ;;  %v1657_v25 = vld [vmem:[#allocation3 + $0xd9] sm:$0x1]  ;;  %v1639_v41 = vld [vmem:[#allocation3 + $0xa8] sm:$0x1]  ;;  %v1685_v30 = vmax.f32 %v1637_v51, %v1653_v20  ;;  %v1686_v55 = vmax.f32 %v1638_v44, %v1654_v33 }
 0x288   :  { %v1655_v45 = vld [vmem:[#allocation3 + $0xa9] sm:$0x1]  ;;  %v1658_v49 = vld [vmem:[#allocation3 + $0xf1] sm:$0x1]  ;;  %v1647_v2 = vld [vmem:[#allocation3 + $0x168] sm:$0x1]  ;;  %v1688_v28 = vmax.f32 %v1640_v5, %v1656_v12  ;;  %v1689_v59 = vmax.f32 %v4785_v56, %v1657_v25 }
 0x289   :  { %v1659_v6 = vld [vmem:[#allocation3 + $0x109] sm:$0x1]  ;;  %v1660_v10 = vld [vmem:[#allocation3 + $0x121] sm:$0x1]  ;;  %v1661_v36 = vld [vmem:[#allocation3 + $0x139] sm:$0x1]  ;;  %v1687_v0 = vmax.f32 %v1639_v41, %v1655_v45  ;;  %v1690_v22 = vmax.f32 %v4787_v16, %v1658_v49 }
 0x28a   :  { %v1662_v17 = vld [vmem:[#allocation3 + $0x151] sm:$0x1]  ;;  %v1663_v60 = vld [vmem:[#allocation3 + $0x169] sm:$0x1]  ;;  %v1664_v9 = vld [vmem:[#allocation3 + $0x2] sm:$0x1]  ;;  %v1691_v27 = vmax.f32 %v4789_v52, %v1659_v6  ;;  %v1692_v29 = vmax.f32 %v4791_v13, %v1660_v10  ;;  %v1693_v1 = vmax.f32 %v4793_v34, %v1661_v36 }
 0x28b   :  { %v1665_v37 = vld [vmem:[#allocation3 + $0x1a] sm:$0x1]  ;;  %v1666_v18 = vld [vmem:[#allocation3 + $0x32] sm:$0x1]  ;;  %v1667_v31 = vld [vmem:[#allocation3 + $0x4a] sm:$0x1]  ;;  %v1694_v38 = vmax.f32 %v4795_v24, %v1662_v17  ;;  %v1696_v42 = vmax.f32 %v1680_v53, %v1664_v9  ;;  %v1695_v58 = vmax.f32 %v1647_v2, %v1663_v60 }
 0x28c   :  { %v1668_v32 = vld [vmem:[#allocation3 + $0x62] sm:$0x1]  ;;  %v1669_v35 = vld [vmem:[#allocation3 + $0x7a] sm:$0x1]  ;;  %v1697_v4 = vmax.f32 %v1681_v57, %v1665_v37  ;;  %v1698_v46 = vmax.f32 %v1682_v61, %v1666_v18  ;;  %v1670_v43 = vld [vmem:[#allocation3 + $0x92] sm:$0x1]  ;;  %v1699_v14 = vmax.f32 %v1683_v39, %v1667_v31 }
 0x28d   :  { %v1671_v50 = vld [vmem:[#allocation3 + $0xaa] sm:$0x1]  ;;  %v1672_v54 = vld [vmem:[#allocation3 + $0xc2] sm:$0x1]  ;;  %v1700_v62 = vmax.f32 %v1684_v26, %v1668_v32  ;;  %v1701_v3 = vmax.f32 %v1685_v30, %v1669_v35  ;;  %v1673_v7 = vld [vmem:[#allocation3 + $0xda] sm:$0x1]  ;;  %v1702_v19 = vmax.f32 %v1686_v55, %v1670_v43 }
 0x28e   :  { %v1674_v11 = vld [vmem:[#allocation3 + $0xf2] sm:$0x1]  ;;  %v1675_v15 = vld [vmem:[#allocation3 + $0x10a] sm:$0x1]  ;;  %v1703_v23 = vmax.f32 %v1687_v0, %v1671_v50  ;;  %v1704_v21 = vmax.f32 %v1688_v28, %v1672_v54  ;;  %2406 = vst.msk [vmem:[%s5464_s4 + $0x11] sm:$0x1] %vm1713_vm2, %v1696_v42  ;;  %v1705_v56 = vmax.f32 %v1689_v59, %v1673_v7 }
 0x28f   :  { %2407 = vst.msk [vmem:[%s5464_s4 + $0x21] sm:$0x1] %vm1713_vm2, %v1697_v4  ;;  %2408 = vst.msk [vmem:[%s5464_s4 + $0x31] sm:$0x1] %vm1713_vm2, %v1698_v46  ;;  %v1676_v51 = vld [vmem:[#allocation3 + $0x122] sm:$0x1]  ;;  %v1706_v8 = vmax.f32 %v1690_v22, %v1674_v11  ;;  %v1707_v48 = vmax.f32 %v1691_v27, %v1675_v15 }
 0x290   :  { %v1677_v44 = vld [vmem:[#allocation3 + $0x13a] sm:$0x1]  ;;  %v1678_v5 = vld [vmem:[#allocation3 + $0x152] sm:$0x1]  ;;  %2409 = vst.msk [vmem:[%s5464_s4 + $0x41] sm:$0x1] %vm1713_vm2, %v1699_v14  ;;  %v1708_v16 = vmax.f32 %v1692_v29, %v1676_v51 }
 0x291   :  { %2410 = vst.msk [vmem:[%s5464_s4 + $0x51] sm:$0x1] %vm1713_vm2, %v1700_v62  ;;  %2411 = vst.msk [vmem:[%s5464_s4 + $0x61] sm:$0x1] %vm1713_vm2, %v1701_v3  ;;  %v1679_v40 = vld [vmem:[#allocation3 + $0x16a] sm:$0x1]  ;;  %v1709_v52 = vmax.f32 %v1693_v1, %v1677_v44  ;;  %v1710_v13 = vmax.f32 %v1694_v38, %v1678_v5 }
 0x292   :  { %2412 = vst.msk [vmem:[%s5464_s4 + $0x71] sm:$0x1] %vm1713_vm2, %v1702_v19  ;;  %2413 = vst.msk [vmem:[%s5464_s4 + $0x81] sm:$0x1] %vm1713_vm2, %v1703_v23  ;;  %v1711_v34 = vmax.f32 %v1695_v58, %v1679_v40  ;;  %v1730_v47 = vld [vmem:[#allocation3 + $0x2] sm:$0x1] }
 0x293   :  { %2414 = vst.msk [vmem:[%s5464_s4 + $0xb1] sm:$0x1] %vm1713_vm2, %v1704_v21  ;;  %2415 = vst.msk [vmem:[%s5464_s4 + $0xc1] sm:$0x1] %vm1713_vm2, %v1705_v56  ;;  %v1731_v63 = vld [vmem:[#allocation3 + $0x1a] sm:$0x1] }
 0x294   :  { %2416 = vst.msk [vmem:[%s5464_s4 + $0xd1] sm:$0x1] %vm1713_vm2, %v1706_v8  ;;  %2417 = vst.msk [vmem:[%s5464_s4 + $0xe1] sm:$0x1] %vm1713_vm2, %v1707_v48  ;;  %v1732_v20 = vld [vmem:[#allocation3 + $0x32] sm:$0x1] }
 0x295   :  { %2418 = vst.msk [vmem:[%s5464_s4 + $0xf1] sm:$0x1] %vm1713_vm2, %v1708_v16  ;;  %2419 = vst.msk [vmem:[%s5464_s4 + $0x101] sm:$0x1] %vm1713_vm2, %v1709_v52  ;;  %v1733_v24 = vld [vmem:[#allocation3 + $0x4a] sm:$0x1] }
 0x296   :  { %2420 = vst.msk [vmem:[%s5464_s4 + $0x111] sm:$0x1] %vm1713_vm2, %v1710_v13  ;;  %2421 = vst.msk [vmem:[%s5464_s4 + $0x121] sm:$0x1] %vm1713_vm2, %v1711_v34  ;;  %v1734_v33 = vld [vmem:[#allocation3 + $0x62] sm:$0x1] }
 0x297   :  { %v1735_v12 = vld [vmem:[#allocation3 + $0x7a] sm:$0x1]  ;;  %v1736_v25 = vld [vmem:[#allocation3 + $0x92] sm:$0x1]  ;;  %v1737_v41 = vld [vmem:[#allocation3 + $0xaa] sm:$0x1] }
 0x298   :  { %v1738_v45 = vld [vmem:[#allocation3 + $0xc2] sm:$0x1]  ;;  %v4867_v49 = vld [vmem:[#allocation3 + $0xda] sm:$0x1]  ;;  %v1746_v53 = vld [vmem:[#allocation3 + $0x3] sm:$0x1] }
 0x299   :  { %v4869_v57 = vld [vmem:[#allocation3 + $0xf2] sm:$0x1]  ;;  %v4871_v61 = vld [vmem:[#allocation3 + $0x10a] sm:$0x1]  ;;  %v4873_v2 = vld [vmem:[#allocation3 + $0x122] sm:$0x1]  ;;  %v1778_v9 = vmax.f32 %v1730_v47, %v1746_v53 }
 0x29a   :  { %v4875_v6 = vld [vmem:[#allocation3 + $0x13a] sm:$0x1]  ;;  %v1747_v10 = vld [vmem:[#allocation3 + $0x1b] sm:$0x1]  ;;  %v1748_v39 = vld [vmem:[#allocation3 + $0x33] sm:$0x1] }
 0x29b   :  { %v1749_v26 = vld [vmem:[#allocation3 + $0x4b] sm:$0x1]  ;;  %v4877_v30 = vld [vmem:[#allocation3 + $0x152] sm:$0x1]  ;;  %v1750_v36 = vld [vmem:[#allocation3 + $0x63] sm:$0x1]  ;;  %v1779_v37 = vmax.f32 %v1731_v63, %v1747_v10  ;;  %v1780_v18 = vmax.f32 %v1732_v20, %v1748_v39 }
 0x29c   :  { %v1751_v17 = vld [vmem:[#allocation3 + $0x7b] sm:$0x1]  ;;  %v1752_v60 = vld [vmem:[#allocation3 + $0x93] sm:$0x1]  ;;  %v4879_v55 = vld [vmem:[#allocation3 + $0x16a] sm:$0x1]  ;;  %v1781_v1 = vmax.f32 %v1733_v24, %v1749_v26  ;;  %v1782_v31 = vmax.f32 %v1734_v33, %v1750_v36 }
 0x29d   :  { %v1753_v0 = vld [vmem:[#allocation3 + $0xab] sm:$0x1]  ;;  %v1754_v28 = vld [vmem:[#allocation3 + $0xc3] sm:$0x1]  ;;  %v1755_v59 = vld [vmem:[#allocation3 + $0xdb] sm:$0x1]  ;;  %v1783_v32 = vmax.f32 %v1735_v12, %v1751_v17  ;;  %v1784_v4 = vmax.f32 %v1736_v25, %v1752_v60 }
 0x29e   :  { %v1756_v22 = vld [vmem:[#allocation3 + $0xf3] sm:$0x1]  ;;  %v1757_v27 = vld [vmem:[#allocation3 + $0x10b] sm:$0x1]  ;;  %v1758_v29 = vld [vmem:[#allocation3 + $0x123] sm:$0x1]  ;;  %v1785_v46 = vmax.f32 %v1737_v41, %v1753_v0  ;;  %v1786_v43 = vmax.f32 %v1738_v45, %v1754_v28  ;;  %v1787_v50 = vmax.f32 %v4867_v49, %v1755_v59 }
 0x29f   :  { %v1759_v35 = vld [vmem:[#allocation3 + $0x13b] sm:$0x1]  ;;  %v1760_v38 = vld [vmem:[#allocation3 + $0x153] sm:$0x1]  ;;  %v1761_v42 = vld [vmem:[#allocation3 + $0x16b] sm:$0x1]  ;;  %v1788_v62 = vmax.f32 %v4869_v57, %v1756_v22  ;;  %v1789_v3 = vmax.f32 %v4871_v61, %v1757_v27  ;;  %v1790_v7 = vmax.f32 %v4873_v2, %v1758_v29 }
 0x2a0   :  { %v1762_v54 = vld [vmem:[#allocation3 + $0x4] sm:$0x1]  ;;  %v1763_v58 = vld [vmem:[#allocation3 + $0x1c] sm:$0x1]  ;;  %v1764_v14 = vld [vmem:[#allocation3 + $0x34] sm:$0x1]  ;;  %v1791_v11 = vmax.f32 %v4875_v6, %v1759_v35  ;;  %v1792_v21 = vmax.f32 %v4877_v30, %v1760_v38  ;;  %v1793_v40 = vmax.f32 %v4879_v55, %v1761_v42 }
 0x2a1   :  { %v1765_v15 = vld [vmem:[#allocation3 + $0x4c] sm:$0x1]  ;;  %v1766_v19 = vld [vmem:[#allocation3 + $0x64] sm:$0x1]  ;;  %v1767_v23 = vld [vmem:[#allocation3 + $0x7c] sm:$0x1]  ;;  %v1794_v51 = vmax.f32 %v1778_v9, %v1762_v54  ;;  %v1795_v44 = vmax.f32 %v1779_v37, %v1763_v58  ;;  %v1796_v5 = vmax.f32 %v1780_v18, %v1764_v14 }
 0x2a2   :  { %v1768_v56 = vld [vmem:[#allocation3 + $0x94] sm:$0x1]  ;;  %v1769_v8 = vld [vmem:[#allocation3 + $0xac] sm:$0x1]  ;;  %v1770_v48 = vld [vmem:[#allocation3 + $0xc4] sm:$0x1]  ;;  %v1797_v16 = vmax.f32 %v1781_v1, %v1765_v15  ;;  %v1798_v52 = vmax.f32 %v1782_v31, %v1766_v19  ;;  %v1799_v13 = vmax.f32 %v1783_v32, %v1767_v23 }
 0x2a3   :  { %v1771_v34 = vld [vmem:[#allocation3 + $0xdc] sm:$0x1]  ;;  %v1772_v47 = vld [vmem:[#allocation3 + $0xf4] sm:$0x1]  ;;  %v1773_v63 = vld [vmem:[#allocation3 + $0x10c] sm:$0x1]  ;;  %v1800_v20 = vmax.f32 %v1784_v4, %v1768_v56  ;;  %v1801_v24 = vmax.f32 %v1785_v46, %v1769_v8  ;;  %v1802_v33 = vmax.f32 %v1786_v43, %v1770_v48 }
 0x2a4   :  { %2422 = vst.msk [vmem:[%s5464_s4 + $0x12] sm:$0x1] %vm1713_vm2, %v1794_v51  ;;  %2423 = vst.msk [vmem:[%s5464_s4 + $0x22] sm:$0x1] %vm1713_vm2, %v1795_v44  ;;  %v1774_v12 = vld [vmem:[#allocation3 + $0x124] sm:$0x1]  ;;  %v1803_v45 = vmax.f32 %v1787_v50, %v1771_v34  ;;  %v1804_v49 = vmax.f32 %v1788_v62, %v1772_v47  ;;  %v1805_v53 = vmax.f32 %v1789_v3, %v1773_v63 }
 0x2a5   :  { %2424 = vst.msk [vmem:[%s5464_s4 + $0x32] sm:$0x1] %vm1713_vm2, %v1796_v5  ;;  %v1775_v25 = vld [vmem:[#allocation3 + $0x13c] sm:$0x1]  ;;  %v1776_v41 = vld [vmem:[#allocation3 + $0x154] sm:$0x1]  ;;  %v1806_v61 = vmax.f32 %v1790_v7, %v1774_v12 }
 0x2a6   :  { %2425 = vst.msk [vmem:[%s5464_s4 + $0x42] sm:$0x1] %vm1713_vm2, %v1797_v16  ;;  %2426 = vst.msk [vmem:[%s5464_s4 + $0x52] sm:$0x1] %vm1713_vm2, %v1798_v52  ;;  %v1777_v57 = vld [vmem:[#allocation3 + $0x16c] sm:$0x1]  ;;  %v1807_v2 = vmax.f32 %v1791_v11, %v1775_v25  ;;  %v1808_v6 = vmax.f32 %v1792_v21, %v1776_v41 }
 0x2a7   :  { %2427 = vst.msk [vmem:[%s5464_s4 + $0x62] sm:$0x1] %vm1713_vm2, %v1799_v13  ;;  %2428 = vst.msk [vmem:[%s5464_s4 + $0x72] sm:$0x1] %vm1713_vm2, %v1800_v20  ;;  %v1809_v10 = vmax.f32 %v1793_v40, %v1777_v57  ;;  %v1826_v39 = vld [vmem:[#allocation3 + $0x4] sm:$0x1] }
 0x2a8   :  { %2429 = vst.msk [vmem:[%s5464_s4 + $0x82] sm:$0x1] %vm1713_vm2, %v1801_v24  ;;  %2430 = vst.msk [vmem:[%s5464_s4 + $0xb2] sm:$0x1] %vm1713_vm2, %v1802_v33  ;;  %v1827_v26 = vld [vmem:[#allocation3 + $0x1c] sm:$0x1] }
 0x2a9   :  { %2431 = vst.msk [vmem:[%s5464_s4 + $0xc2] sm:$0x1] %vm1713_vm2, %v1803_v45  ;;  %2432 = vst.msk [vmem:[%s5464_s4 + $0xd2] sm:$0x1] %vm1713_vm2, %v1804_v49  ;;  %v1828_v30 = vld [vmem:[#allocation3 + $0x34] sm:$0x1] }
 0x2aa   :  { %2433 = vst.msk [vmem:[%s5464_s4 + $0xe2] sm:$0x1] %vm1713_vm2, %v1805_v53  ;;  %2434 = vst.msk [vmem:[%s5464_s4 + $0xf2] sm:$0x1] %vm1713_vm2, %v1806_v61  ;;  %v1829_v36 = vld [vmem:[#allocation3 + $0x4c] sm:$0x1] }
 0x2ab   :  { %2435 = vst.msk [vmem:[%s5464_s4 + $0x102] sm:$0x1] %vm1713_vm2, %v1807_v2  ;;  %2436 = vst.msk [vmem:[%s5464_s4 + $0x112] sm:$0x1] %vm1713_vm2, %v1808_v6  ;;  %v1830_v17 = vld [vmem:[#allocation3 + $0x64] sm:$0x1] }
 0x2ac   :  { %2437 = vst.msk [vmem:[%s5464_s4 + $0x122] sm:$0x1] %vm1713_vm2, %v1809_v10  ;;  %v1831_v60 = vld [vmem:[#allocation3 + $0x7c] sm:$0x1]  ;;  %v1832_v55 = vld [vmem:[#allocation3 + $0x94] sm:$0x1] }
 0x2ad   :  { %v1833_v0 = vld [vmem:[#allocation3 + $0xac] sm:$0x1]  ;;  %v1834_v28 = vld [vmem:[#allocation3 + $0xc4] sm:$0x1]  ;;  %v4952_v59 = vld [vmem:[#allocation3 + $0xdc] sm:$0x1] }
 0x2ae   :  { %v1842_v9 = vld [vmem:[#allocation3 + $0x5] sm:$0x1]  ;;  %v4954_v37 = vld [vmem:[#allocation3 + $0xf4] sm:$0x1]  ;;  %v4956_v18 = vld [vmem:[#allocation3 + $0x10c] sm:$0x1] }
 0x2af   :  { %v4958_v22 = vld [vmem:[#allocation3 + $0x124] sm:$0x1]  ;;  %v4960_v27 = vld [vmem:[#allocation3 + $0x13c] sm:$0x1]  ;;  %v1843_v29 = vld [vmem:[#allocation3 + $0x1d] sm:$0x1]  ;;  %v1874_v54 = vmax.f32 %v1826_v39, %v1842_v9 }
 0x2b0   :  { %v1844_v1 = vld [vmem:[#allocation3 + $0x35] sm:$0x1]  ;;  %v1845_v31 = vld [vmem:[#allocation3 + $0x4d] sm:$0x1]  ;;  %v4962_v32 = vld [vmem:[#allocation3 + $0x154] sm:$0x1]  ;;  %v1875_v58 = vmax.f32 %v1827_v26, %v1843_v29 }
 0x2b1   :  { %v1846_v35 = vld [vmem:[#allocation3 + $0x65] sm:$0x1]  ;;  %v1847_v38 = vld [vmem:[#allocation3 + $0x7d] sm:$0x1]  ;;  %v1848_v42 = vld [vmem:[#allocation3 + $0x95] sm:$0x1]  ;;  %v1876_v14 = vmax.f32 %v1828_v30, %v1844_v1  ;;  %v1877_v11 = vmax.f32 %v1829_v36, %v1845_v31 }
 0x2b2   :  { %v4964_v4 = vld [vmem:[#allocation3 + $0x16c] sm:$0x1]  ;;  %v1849_v46 = vld [vmem:[#allocation3 + $0xad] sm:$0x1]  ;;  %v1850_v43 = vld [vmem:[#allocation3 + $0xc5] sm:$0x1]  ;;  %v1878_v15 = vmax.f32 %v1830_v17, %v1846_v35  ;;  %v1879_v19 = vmax.f32 %v1831_v60, %v1847_v38  ;;  %v1880_v44 = vmax.f32 %v1832_v55, %v1848_v42 }
 0x2b3   :  { %v1851_v50 = vld [vmem:[#allocation3 + $0xdd] sm:$0x1]  ;;  %v1852_v62 = vld [vmem:[#allocation3 + $0xf5] sm:$0x1]  ;;  %v1853_v3 = vld [vmem:[#allocation3 + $0x10d] sm:$0x1]  ;;  %v1881_v5 = vmax.f32 %v1833_v0, %v1849_v46  ;;  %v1882_v56 = vmax.f32 %v1834_v28, %v1850_v43 }
 0x2b4   :  { %v1854_v7 = vld [vmem:[#allocation3 + $0x125] sm:$0x1]  ;;  %v1855_v23 = vld [vmem:[#allocation3 + $0x13d] sm:$0x1]  ;;  %v1856_v21 = vld [vmem:[#allocation3 + $0x155] sm:$0x1]  ;;  %v1883_v8 = vmax.f32 %v4952_v59, %v1851_v50  ;;  %v1884_v52 = vmax.f32 %v4954_v37, %v1852_v62  ;;  %v1885_v13 = vmax.f32 %v4956_v18, %v1853_v3 }
 0x2b5   :  { %v1857_v51 = vld [vmem:[#allocation3 + $0x16d] sm:$0x1]  ;;  %v1858_v48 = vld [vmem:[#allocation3 + $0x6] sm:$0x1]  ;;  %v1859_v40 = vld [vmem:[#allocation3 + $0x1e] sm:$0x1]  ;;  %v1886_v34 = vmax.f32 %v4958_v22, %v1854_v7  ;;  %v1887_v47 = vmax.f32 %v4960_v27, %v1855_v23  ;;  %v1888_v33 = vmax.f32 %v4962_v32, %v1856_v21 }
 0x2b6   :  { %v1860_v16 = vld [vmem:[#allocation3 + $0x36] sm:$0x1]  ;;  %v1861_v63 = vld [vmem:[#allocation3 + $0x4e] sm:$0x1]  ;;  %v1862_v20 = vld [vmem:[#allocation3 + $0x66] sm:$0x1]  ;;  %v1890_v12 = vmax.f32 %v1874_v54, %v1858_v48  ;;  %v1891_v25 = vmax.f32 %v1875_v58, %v1859_v40  ;;  %v1889_v57 = vmax.f32 %v4964_v4, %v1857_v51 }
 0x2b7   :  { %v1863_v24 = vld [vmem:[#allocation3 + $0x7e] sm:$0x1]  ;;  %v1892_v41 = vmax.f32 %v1876_v14, %v1860_v16  ;;  %v1864_v45 = vld [vmem:[#allocation3 + $0x96] sm:$0x1]  ;;  %v1865_v49 = vld [vmem:[#allocation3 + $0xae] sm:$0x1]  ;;  %v1893_v61 = vmax.f32 %v1877_v11, %v1861_v63  ;;  %v1894_v2 = vmax.f32 %v1878_v15, %v1862_v20 }
 0x2b8   :  { %v1866_v53 = vld [vmem:[#allocation3 + $0xc6] sm:$0x1]  ;;  %v1895_v6 = vmax.f32 %v1879_v19, %v1863_v24  ;;  %v1867_v10 = vld [vmem:[#allocation3 + $0xde] sm:$0x1]  ;;  %v1868_v39 = vld [vmem:[#allocation3 + $0xf6] sm:$0x1]  ;;  %v1896_v30 = vmax.f32 %v1880_v44, %v1864_v45  ;;  %v1897_v36 = vmax.f32 %v1881_v5, %v1865_v49 }
 0x2b9   :  { %v1869_v26 = vld [vmem:[#allocation3 + $0x10e] sm:$0x1]  ;;  %v1898_v17 = vmax.f32 %v1882_v56, %v1866_v53  ;;  %2438 = vst.msk [vmem:[%s5464_s4 + $0x13] sm:$0x1] %vm1713_vm2, %v1890_v12  ;;  %2439 = vst.msk [vmem:[%s5464_s4 + $0x23] sm:$0x1] %vm1713_vm2, %v1891_v25  ;;  %v1899_v28 = vmax.f32 %v1883_v8, %v1867_v10  ;;  %v1900_v59 = vmax.f32 %v1884_v52, %v1868_v39 }
 0x2ba   :  { %2440 = vst.msk [vmem:[%s5464_s4 + $0x33] sm:$0x1] %vm1713_vm2, %v1892_v41  ;;  %v1870_v60 = vld [vmem:[#allocation3 + $0x126] sm:$0x1]  ;;  %v1871_v55 = vld [vmem:[#allocation3 + $0x13e] sm:$0x1]  ;;  %v1901_v9 = vmax.f32 %v1885_v13, %v1869_v26 }
 0x2bb   :  { %v1872_v0 = vld [vmem:[#allocation3 + $0x156] sm:$0x1]  ;;  %2441 = vst.msk [vmem:[%s5464_s4 + $0x43] sm:$0x1] %vm1713_vm2, %v1893_v61  ;;  %2442 = vst.msk [vmem:[%s5464_s4 + $0x53] sm:$0x1] %vm1713_vm2, %v1894_v2  ;;  %v1902_v18 = vmax.f32 %v1886_v34, %v1870_v60  ;;  %v1903_v22 = vmax.f32 %v1887_v47, %v1871_v55 }
 0x2bc   :  { %2443 = vst.msk [vmem:[%s5464_s4 + $0x63] sm:$0x1] %vm1713_vm2, %v1895_v6  ;;  %v1873_v37 = vld [vmem:[#allocation3 + $0x16e] sm:$0x1]  ;;  %v1904_v27 = vmax.f32 %v1888_v33, %v1872_v0  ;;  %2444 = vst.msk [vmem:[%s5464_s4 + $0x73] sm:$0x1] %vm1713_vm2, %v1896_v30 }
 0x2bd   :  { %2445 = vst.msk [vmem:[%s5464_s4 + $0x83] sm:$0x1] %vm1713_vm2, %v1897_v36  ;;  %2446 = vst.msk [vmem:[%s5464_s4 + $0xb3] sm:$0x1] %vm1713_vm2, %v1898_v17  ;;  %v1905_v29 = vmax.f32 %v1889_v57, %v1873_v37  ;;  %v1922_v1 = vld [vmem:[#allocation3 + $0x6] sm:$0x1] }
 0x2be   :  { %2447 = vst.msk [vmem:[%s5464_s4 + $0xc3] sm:$0x1] %vm1713_vm2, %v1899_v28  ;;  %2448 = vst.msk [vmem:[%s5464_s4 + $0xd3] sm:$0x1] %vm1713_vm2, %v1900_v59  ;;  %v1923_v31 = vld [vmem:[#allocation3 + $0x1e] sm:$0x1] }
 0x2bf   :  { %2449 = vst.msk [vmem:[%s5464_s4 + $0xe3] sm:$0x1] %vm1713_vm2, %v1901_v9  ;;  %2450 = vst.msk [vmem:[%s5464_s4 + $0xf3] sm:$0x1] %vm1713_vm2, %v1902_v18  ;;  %v1924_v32 = vld [vmem:[#allocation3 + $0x36] sm:$0x1] }
 0x2c0   :  { %2451 = vst.msk [vmem:[%s5464_s4 + $0x103] sm:$0x1] %vm1713_vm2, %v1903_v22  ;;  %2452 = vst.msk [vmem:[%s5464_s4 + $0x113] sm:$0x1] %vm1713_vm2, %v1904_v27  ;;  %v1925_v35 = vld [vmem:[#allocation3 + $0x4e] sm:$0x1] }
 0x2c1   :  { %2453 = vst.msk [vmem:[%s5464_s4 + $0x123] sm:$0x1] %vm1713_vm2, %v1905_v29  ;;  %v1926_v38 = vld [vmem:[#allocation3 + $0x66] sm:$0x1]  ;;  %v1927_v42 = vld [vmem:[#allocation3 + $0x7e] sm:$0x1] }
 0x2c2   :  { %v1928_v4 = vld [vmem:[#allocation3 + $0x96] sm:$0x1]  ;;  %v1929_v46 = vld [vmem:[#allocation3 + $0xae] sm:$0x1]  ;;  %v1930_v43 = vld [vmem:[#allocation3 + $0xc6] sm:$0x1] }
 0x2c3   :  { %v5037_v50 = vld [vmem:[#allocation3 + $0xde] sm:$0x1]  ;;  %v1938_v54 = vld [vmem:[#allocation3 + $0x7] sm:$0x1]  ;;  %v5039_v58 = vld [vmem:[#allocation3 + $0xf6] sm:$0x1] }
 0x2c4   :  { %v5041_v14 = vld [vmem:[#allocation3 + $0x10e] sm:$0x1]  ;;  %v5043_v62 = vld [vmem:[#allocation3 + $0x126] sm:$0x1]  ;;  %v5045_v3 = vld [vmem:[#allocation3 + $0x13e] sm:$0x1]  ;;  %v1970_v48 = vmax.f32 %v1922_v1, %v1938_v54 }
 0x2c5   :  { %v1939_v7 = vld [vmem:[#allocation3 + $0x1f] sm:$0x1]  ;;  %v1940_v11 = vld [vmem:[#allocation3 + $0x37] sm:$0x1]  ;;  %v1941_v15 = vld [vmem:[#allocation3 + $0x4f] sm:$0x1] }
 0x2c6   :  { %v5047_v19 = vld [vmem:[#allocation3 + $0x156] sm:$0x1]  ;;  %v1942_v23 = vld [vmem:[#allocation3 + $0x67] sm:$0x1]  ;;  %v1943_v21 = vld [vmem:[#allocation3 + $0x7f] sm:$0x1]  ;;  %v1971_v40 = vmax.f32 %v1923_v31, %v1939_v7  ;;  %v1972_v16 = vmax.f32 %v1924_v32, %v1940_v11  ;;  %v1973_v47 = vmax.f32 %v1925_v35, %v1941_v15 }
 0x2c7   :  { %v1944_v51 = vld [vmem:[#allocation3 + $0x97] sm:$0x1]  ;;  %v5049_v44 = vld [vmem:[#allocation3 + $0x16e] sm:$0x1]  ;;  %v1945_v5 = vld [vmem:[#allocation3 + $0xaf] sm:$0x1]  ;;  %v1974_v63 = vmax.f32 %v1926_v38, %v1942_v23  ;;  %v1975_v20 = vmax.f32 %v1927_v42, %v1943_v21 }
 0x2c8   :  { %v1946_v56 = vld [vmem:[#allocation3 + $0xc7] sm:$0x1]  ;;  %v1947_v8 = vld [vmem:[#allocation3 + $0xdf] sm:$0x1]  ;;  %v1948_v52 = vld [vmem:[#allocation3 + $0xf7] sm:$0x1]  ;;  %v1976_v25 = vmax.f32 %v1928_v4, %v1944_v51  ;;  %v1977_v41 = vmax.f32 %v1929_v46, %v1945_v5 }
 0x2c9   :  { %v1949_v13 = vld [vmem:[#allocation3 + $0x10f] sm:$0x1]  ;;  %v1950_v34 = vld [vmem:[#allocation3 + $0x127] sm:$0x1]  ;;  %v1951_v24 = vld [vmem:[#allocation3 + $0x13f] sm:$0x1]  ;;  %v1978_v45 = vmax.f32 %v1930_v43, %v1946_v56  ;;  %v1979_v49 = vmax.f32 %v5037_v50, %v1947_v8  ;;  %v1980_v2 = vmax.f32 %v5039_v58, %v1948_v52 }
 0x2ca   :  { %v1952_v33 = vld [vmem:[#allocation3 + $0x157] sm:$0x1]  ;;  %v1953_v12 = vld [vmem:[#allocation3 + $0x16f] sm:$0x1]  ;;  %v1954_v53 = vld [vmem:[#allocation3 + $0x8] sm:$0x1]  ;;  %v1981_v6 = vmax.f32 %v5041_v14, %v1949_v13  ;;  %v1982_v10 = vmax.f32 %v5043_v62, %v1950_v34  ;;  %v1983_v39 = vmax.f32 %v5045_v3, %v1951_v24 }
 0x2cb   :  { %v1955_v57 = vld [vmem:[#allocation3 + $0x20] sm:$0x1]  ;;  %v1956_v61 = vld [vmem:[#allocation3 + $0x38] sm:$0x1]  ;;  %v1957_v26 = vld [vmem:[#allocation3 + $0x50] sm:$0x1]  ;;  %v1984_v17 = vmax.f32 %v5047_v19, %v1952_v33  ;;  %v1986_v60 = vmax.f32 %v1970_v48, %v1954_v53  ;;  %v1985_v37 = vmax.f32 %v5049_v44, %v1953_v12 }
 0x2cc   :  { %v1958_v30 = vld [vmem:[#allocation3 + $0x68] sm:$0x1]  ;;  %v1959_v36 = vld [vmem:[#allocation3 + $0x80] sm:$0x1]  ;;  %v1987_v55 = vmax.f32 %v1971_v40, %v1955_v57  ;;  %v1988_v0 = vmax.f32 %v1972_v16, %v1956_v61  ;;  %v1960_v28 = vld [vmem:[#allocation3 + $0x98] sm:$0x1]  ;;  %v1989_v18 = vmax.f32 %v1973_v47, %v1957_v26 }
 0x2cd   :  { %v1961_v59 = vld [vmem:[#allocation3 + $0xb0] sm:$0x1]  ;;  %v1962_v9 = vld [vmem:[#allocation3 + $0xc8] sm:$0x1]  ;;  %v1990_v22 = vmax.f32 %v1974_v63, %v1958_v30  ;;  %v1991_v27 = vmax.f32 %v1975_v20, %v1959_v36  ;;  %v1963_v29 = vld [vmem:[#allocation3 + $0xe0] sm:$0x1]  ;;  %v1992_v32 = vmax.f32 %v1976_v25, %v1960_v28 }
 0x2ce   :  { %v1964_v1 = vld [vmem:[#allocation3 + $0xf8] sm:$0x1]  ;;  %v1965_v31 = vld [vmem:[#allocation3 + $0x110] sm:$0x1]  ;;  %v1993_v35 = vmax.f32 %v1977_v41, %v1961_v59  ;;  %v1994_v38 = vmax.f32 %v1978_v45, %v1962_v9  ;;  %2454 = vst.msk [vmem:[%s5464_s4 + $0x14] sm:$0x1] %vm1713_vm2, %v1986_v60  ;;  %v1995_v43 = vmax.f32 %v1979_v49, %v1963_v29 }
 0x2cf   :  { %2455 = vst.msk [vmem:[%s5464_s4 + $0x24] sm:$0x1] %vm1713_vm2, %v1987_v55  ;;  %2456 = vst.msk [vmem:[%s5464_s4 + $0x34] sm:$0x1] %vm1713_vm2, %v1988_v0  ;;  %v1966_v42 = vld [vmem:[#allocation3 + $0x128] sm:$0x1]  ;;  %v1996_v50 = vmax.f32 %v1980_v2, %v1964_v1  ;;  %v1997_v54 = vmax.f32 %v1981_v6, %v1965_v31 }
 0x2d0   :  { %v1967_v4 = vld [vmem:[#allocation3 + $0x140] sm:$0x1]  ;;  %v1968_v46 = vld [vmem:[#allocation3 + $0x158] sm:$0x1]  ;;  %2457 = vst.msk [vmem:[%s5464_s4 + $0x44] sm:$0x1] %vm1713_vm2, %v1989_v18  ;;  %v1998_v14 = vmax.f32 %v1982_v10, %v1966_v42 }
 0x2d1   :  { %2458 = vst.msk [vmem:[%s5464_s4 + $0x54] sm:$0x1] %vm1713_vm2, %v1990_v22  ;;  %2459 = vst.msk [vmem:[%s5464_s4 + $0x64] sm:$0x1] %vm1713_vm2, %v1991_v27  ;;  %v1969_v58 = vld [vmem:[#allocation3 + $0x170] sm:$0x1]  ;;  %v1999_v62 = vmax.f32 %v1983_v39, %v1967_v4  ;;  %v2000_v3 = vmax.f32 %v1984_v17, %v1968_v46 }
 0x2d2   :  { %2460 = vst.msk [vmem:[%s5464_s4 + $0x74] sm:$0x1] %vm1713_vm2, %v1992_v32  ;;  %2461 = vst.msk [vmem:[%s5464_s4 + $0x84] sm:$0x1] %vm1713_vm2, %v1993_v35  ;;  %v2001_v7 = vmax.f32 %v1985_v37, %v1969_v58  ;;  %v2018_v11 = vld [vmem:[#allocation3 + $0x8] sm:$0x1] }
 0x2d3   :  { %2462 = vst.msk [vmem:[%s5464_s4 + $0xb4] sm:$0x1] %vm1713_vm2, %v1994_v38  ;;  %2463 = vst.msk [vmem:[%s5464_s4 + $0xc4] sm:$0x1] %vm1713_vm2, %v1995_v43  ;;  %v2019_v15 = vld [vmem:[#allocation3 + $0x20] sm:$0x1] }
 0x2d4   :  { %2464 = vst.msk [vmem:[%s5464_s4 + $0xd4] sm:$0x1] %vm1713_vm2, %v1996_v50  ;;  %2465 = vst.msk [vmem:[%s5464_s4 + $0xe4] sm:$0x1] %vm1713_vm2, %v1997_v54  ;;  %v2020_v19 = vld [vmem:[#allocation3 + $0x38] sm:$0x1] }
 0x2d5   :  { %2466 = vst.msk [vmem:[%s5464_s4 + $0xf4] sm:$0x1] %vm1713_vm2, %v1998_v14  ;;  %2467 = vst.msk [vmem:[%s5464_s4 + $0x104] sm:$0x1] %vm1713_vm2, %v1999_v62  ;;  %v2021_v23 = vld [vmem:[#allocation3 + $0x50] sm:$0x1] }
 0x2d6   :  { %2468 = vst.msk [vmem:[%s5464_s4 + $0x114] sm:$0x1] %vm1713_vm2, %v2000_v3  ;;  %2469 = vst.msk [vmem:[%s5464_s4 + $0x124] sm:$0x1] %vm1713_vm2, %v2001_v7  ;;  %v2022_v21 = vld [vmem:[#allocation3 + $0x68] sm:$0x1] }
 0x2d7   :  { %v2023_v51 = vld [vmem:[#allocation3 + $0x80] sm:$0x1]  ;;  %v2024_v44 = vld [vmem:[#allocation3 + $0x98] sm:$0x1]  ;;  %v2025_v5 = vld [vmem:[#allocation3 + $0xb0] sm:$0x1] }
 0x2d8   :  { %v2026_v56 = vld [vmem:[#allocation3 + $0xc8] sm:$0x1]  ;;  %v5122_v8 = vld [vmem:[#allocation3 + $0xe0] sm:$0x1]  ;;  %v2034_v48 = vld [vmem:[#allocation3 + $0x9] sm:$0x1] }
 0x2d9   :  { %v5124_v40 = vld [vmem:[#allocation3 + $0xf8] sm:$0x1]  ;;  %v5126_v16 = vld [vmem:[#allocation3 + $0x110] sm:$0x1]  ;;  %v5128_v52 = vld [vmem:[#allocation3 + $0x128] sm:$0x1]  ;;  %v2066_v53 = vmax.f32 %v2018_v11, %v2034_v48 }
 0x2da   :  { %v5130_v13 = vld [vmem:[#allocation3 + $0x140] sm:$0x1]  ;;  %v2035_v34 = vld [vmem:[#allocation3 + $0x21] sm:$0x1]  ;;  %v2036_v47 = vld [vmem:[#allocation3 + $0x39] sm:$0x1] }
 0x2db   :  { %v2037_v63 = vld [vmem:[#allocation3 + $0x51] sm:$0x1]  ;;  %v5132_v20 = vld [vmem:[#allocation3 + $0x158] sm:$0x1]  ;;  %v2038_v24 = vld [vmem:[#allocation3 + $0x69] sm:$0x1]  ;;  %v2067_v57 = vmax.f32 %v2019_v15, %v2035_v34  ;;  %v2068_v61 = vmax.f32 %v2020_v19, %v2036_v47 }
 0x2dc   :  { %v2039_v33 = vld [vmem:[#allocation3 + $0x81] sm:$0x1]  ;;  %v2040_v12 = vld [vmem:[#allocation3 + $0x99] sm:$0x1]  ;;  %v5134_v25 = vld [vmem:[#allocation3 + $0x170] sm:$0x1]  ;;  %v2069_v39 = vmax.f32 %v2021_v23, %v2037_v63  ;;  %v2070_v26 = vmax.f32 %v2022_v21, %v2038_v24 }
 0x2dd   :  { %v2041_v41 = vld [vmem:[#allocation3 + $0xb1] sm:$0x1]  ;;  %v2042_v45 = vld [vmem:[#allocation3 + $0xc9] sm:$0x1]  ;;  %v2043_v49 = vld [vmem:[#allocation3 + $0xe1] sm:$0x1]  ;;  %v2071_v30 = vmax.f32 %v2023_v51, %v2039_v33  ;;  %v2072_v55 = vmax.f32 %v2024_v44, %v2040_v12 }
 0x2de   :  { %v2044_v2 = vld [vmem:[#allocation3 + $0xf9] sm:$0x1]  ;;  %v2045_v6 = vld [vmem:[#allocation3 + $0x111] sm:$0x1]  ;;  %v2046_v10 = vld [vmem:[#allocation3 + $0x129] sm:$0x1]  ;;  %v2073_v0 = vmax.f32 %v2025_v5, %v2041_v41  ;;  %v2074_v28 = vmax.f32 %v2026_v56, %v2042_v45  ;;  %v2075_v59 = vmax.f32 %v5122_v8, %v2043_v49 }
 0x2df   :  { %v2047_v36 = vld [vmem:[#allocation3 + $0x141] sm:$0x1]  ;;  %v2048_v17 = vld [vmem:[#allocation3 + $0x159] sm:$0x1]  ;;  %v2049_v60 = vld [vmem:[#allocation3 + $0x171] sm:$0x1]  ;;  %v2076_v22 = vmax.f32 %v5124_v40, %v2044_v2  ;;  %v2077_v27 = vmax.f32 %v5126_v16, %v2045_v6  ;;  %v2078_v29 = vmax.f32 %v5128_v52, %v2046_v10 }
 0x2e0   :  { %v2050_v9 = vld [vmem:[#allocation3 + $0xa] sm:$0x1]  ;;  %v2051_v37 = vld [vmem:[#allocation3 + $0x22] sm:$0x1]  ;;  %v2052_v18 = vld [vmem:[#allocation3 + $0x3a] sm:$0x1]  ;;  %v2079_v1 = vmax.f32 %v5130_v13, %v2047_v36  ;;  %v2080_v38 = vmax.f32 %v5132_v20, %v2048_v17  ;;  %v2081_v58 = vmax.f32 %v5134_v25, %v2049_v60 }
 0x2e1   :  { %v2053_v31 = vld [vmem:[#allocation3 + $0x52] sm:$0x1]  ;;  %v2054_v32 = vld [vmem:[#allocation3 + $0x6a] sm:$0x1]  ;;  %v2055_v35 = vld [vmem:[#allocation3 + $0x82] sm:$0x1]  ;;  %v2082_v42 = vmax.f32 %v2066_v53, %v2050_v9  ;;  %v2083_v4 = vmax.f32 %v2067_v57, %v2051_v37  ;;  %v2084_v46 = vmax.f32 %v2068_v61, %v2052_v18 }
 0x2e2   :  { %v2056_v43 = vld [vmem:[#allocation3 + $0x9a] sm:$0x1]  ;;  %v2057_v50 = vld [vmem:[#allocation3 + $0xb2] sm:$0x1]  ;;  %v2058_v54 = vld [vmem:[#allocation3 + $0xca] sm:$0x1]  ;;  %v2085_v14 = vmax.f32 %v2069_v39, %v2053_v31  ;;  %v2086_v62 = vmax.f32 %v2070_v26, %v2054_v32  ;;  %v2087_v3 = vmax.f32 %v2071_v30, %v2055_v35 }
 0x2e3   :  { %v2059_v7 = vld [vmem:[#allocation3 + $0xe2] sm:$0x1]  ;;  %v2060_v11 = vld [vmem:[#allocation3 + $0xfa] sm:$0x1]  ;;  %v2061_v15 = vld [vmem:[#allocation3 + $0x112] sm:$0x1]  ;;  %v2088_v19 = vmax.f32 %v2072_v55, %v2056_v43  ;;  %v2089_v23 = vmax.f32 %v2073_v0, %v2057_v50  ;;  %v2090_v21 = vmax.f32 %v2074_v28, %v2058_v54 }
 0x2e4   :  { %2470 = vst.msk [vmem:[%s5464_s4 + $0x15] sm:$0x1] %vm1713_vm2, %v2082_v42  ;;  %2471 = vst.msk [vmem:[%s5464_s4 + $0x25] sm:$0x1] %vm1713_vm2, %v2083_v4  ;;  %v2062_v51 = vld [vmem:[#allocation3 + $0x12a] sm:$0x1]  ;;  %v2091_v56 = vmax.f32 %v2075_v59, %v2059_v7  ;;  %v2092_v8 = vmax.f32 %v2076_v22, %v2060_v11  ;;  %v2093_v48 = vmax.f32 %v2077_v27, %v2061_v15 }
 0x2e5   :  { %2472 = vst.msk [vmem:[%s5464_s4 + $0x35] sm:$0x1] %vm1713_vm2, %v2084_v46  ;;  %v2063_v44 = vld [vmem:[#allocation3 + $0x142] sm:$0x1]  ;;  %v2064_v5 = vld [vmem:[#allocation3 + $0x15a] sm:$0x1]  ;;  %v2094_v16 = vmax.f32 %v2078_v29, %v2062_v51 }
 0x2e6   :  { %2473 = vst.msk [vmem:[%s5464_s4 + $0x45] sm:$0x1] %vm1713_vm2, %v2085_v14  ;;  %2474 = vst.msk [vmem:[%s5464_s4 + $0x55] sm:$0x1] %vm1713_vm2, %v2086_v62  ;;  %v2065_v40 = vld [vmem:[#allocation3 + $0x172] sm:$0x1]  ;;  %v2095_v52 = vmax.f32 %v2079_v1, %v2063_v44  ;;  %v2096_v13 = vmax.f32 %v2080_v38, %v2064_v5 }
 0x2e7   :  { %2475 = vst.msk [vmem:[%s5464_s4 + $0x65] sm:$0x1] %vm1713_vm2, %v2087_v3  ;;  %2476 = vst.msk [vmem:[%s5464_s4 + $0x75] sm:$0x1] %vm1713_vm2, %v2088_v19  ;;  %v2097_v34 = vmax.f32 %v2081_v58, %v2065_v40  ;;  %v2114_v47 = vld [vmem:[#allocation3 + $0xa] sm:$0x1] }
 0x2e8   :  { %2477 = vst.msk [vmem:[%s5464_s4 + $0x85] sm:$0x1] %vm1713_vm2, %v2089_v23  ;;  %2478 = vst.msk [vmem:[%s5464_s4 + $0xb5] sm:$0x1] %vm1713_vm2, %v2090_v21  ;;  %v2115_v63 = vld [vmem:[#allocation3 + $0x22] sm:$0x1] }
 0x2e9   :  { %2479 = vst.msk [vmem:[%s5464_s4 + $0xc5] sm:$0x1] %vm1713_vm2, %v2091_v56  ;;  %2480 = vst.msk [vmem:[%s5464_s4 + $0xd5] sm:$0x1] %vm1713_vm2, %v2092_v8  ;;  %v2116_v20 = vld [vmem:[#allocation3 + $0x3a] sm:$0x1] }
 0x2ea   :  { %2481 = vst.msk [vmem:[%s5464_s4 + $0xe5] sm:$0x1] %vm1713_vm2, %v2093_v48  ;;  %2482 = vst.msk [vmem:[%s5464_s4 + $0xf5] sm:$0x1] %vm1713_vm2, %v2094_v16  ;;  %v2117_v24 = vld [vmem:[#allocation3 + $0x52] sm:$0x1] }
 0x2eb   :  { %2483 = vst.msk [vmem:[%s5464_s4 + $0x105] sm:$0x1] %vm1713_vm2, %v2095_v52  ;;  %2484 = vst.msk [vmem:[%s5464_s4 + $0x115] sm:$0x1] %vm1713_vm2, %v2096_v13  ;;  %v2118_v33 = vld [vmem:[#allocation3 + $0x6a] sm:$0x1] }
 0x2ec   :  { %2485 = vst.msk [vmem:[%s5464_s4 + $0x125] sm:$0x1] %vm1713_vm2, %v2097_v34  ;;  %v2119_v12 = vld [vmem:[#allocation3 + $0x82] sm:$0x1]  ;;  %v2120_v25 = vld [vmem:[#allocation3 + $0x9a] sm:$0x1] }
 0x2ed   :  { %v2121_v41 = vld [vmem:[#allocation3 + $0xb2] sm:$0x1]  ;;  %v2122_v45 = vld [vmem:[#allocation3 + $0xca] sm:$0x1]  ;;  %v5207_v49 = vld [vmem:[#allocation3 + $0xe2] sm:$0x1] }
 0x2ee   :  { %v2130_v53 = vld [vmem:[#allocation3 + $0xb] sm:$0x1]  ;;  %v5209_v57 = vld [vmem:[#allocation3 + $0xfa] sm:$0x1]  ;;  %v5211_v61 = vld [vmem:[#allocation3 + $0x112] sm:$0x1] }
 0x2ef   :  { %v5213_v2 = vld [vmem:[#allocation3 + $0x12a] sm:$0x1]  ;;  %v5215_v6 = vld [vmem:[#allocation3 + $0x142] sm:$0x1]  ;;  %v2131_v10 = vld [vmem:[#allocation3 + $0x23] sm:$0x1]  ;;  %v2162_v9 = vmax.f32 %v2114_v47, %v2130_v53 }
 0x2f0   :  { %v2132_v39 = vld [vmem:[#allocation3 + $0x3b] sm:$0x1]  ;;  %v2133_v26 = vld [vmem:[#allocation3 + $0x53] sm:$0x1]  ;;  %v5217_v30 = vld [vmem:[#allocation3 + $0x15a] sm:$0x1]  ;;  %v2163_v37 = vmax.f32 %v2115_v63, %v2131_v10 }
 0x2f1   :  { %v2134_v36 = vld [vmem:[#allocation3 + $0x6b] sm:$0x1]  ;;  %v2135_v17 = vld [vmem:[#allocation3 + $0x83] sm:$0x1]  ;;  %v2136_v60 = vld [vmem:[#allocation3 + $0x9b] sm:$0x1]  ;;  %v2164_v18 = vmax.f32 %v2116_v20, %v2132_v39  ;;  %v2165_v1 = vmax.f32 %v2117_v24, %v2133_v26 }
 0x2f2   :  { %v5219_v55 = vld [vmem:[#allocation3 + $0x172] sm:$0x1]  ;;  %v2137_v0 = vld [vmem:[#allocation3 + $0xb3] sm:$0x1]  ;;  %v2138_v28 = vld [vmem:[#allocation3 + $0xcb] sm:$0x1]  ;;  %v2166_v31 = vmax.f32 %v2118_v33, %v2134_v36  ;;  %v2167_v32 = vmax.f32 %v2119_v12, %v2135_v17  ;;  %v2168_v4 = vmax.f32 %v2120_v25, %v2136_v60 }
 0x2f3   :  { %v2139_v59 = vld [vmem:[#allocation3 + $0xe3] sm:$0x1]  ;;  %v2140_v22 = vld [vmem:[#allocation3 + $0xfb] sm:$0x1]  ;;  %v2141_v27 = vld [vmem:[#allocation3 + $0x113] sm:$0x1]  ;;  %v2169_v46 = vmax.f32 %v2121_v41, %v2137_v0  ;;  %v2170_v43 = vmax.f32 %v2122_v45, %v2138_v28 }
 0x2f4   :  { %v2142_v29 = vld [vmem:[#allocation3 + $0x12b] sm:$0x1]  ;;  %v2143_v35 = vld [vmem:[#allocation3 + $0x143] sm:$0x1]  ;;  %v2144_v38 = vld [vmem:[#allocation3 + $0x15b] sm:$0x1]  ;;  %v2171_v50 = vmax.f32 %v5207_v49, %v2139_v59  ;;  %v2172_v62 = vmax.f32 %v5209_v57, %v2140_v22  ;;  %v2173_v3 = vmax.f32 %v5211_v61, %v2141_v27 }
 0x2f5   :  { %v2145_v42 = vld [vmem:[#allocation3 + $0x173] sm:$0x1]  ;;  %v2146_v54 = vld [vmem:[#allocation3 + $0xc] sm:$0x1]  ;;  %v2147_v58 = vld [vmem:[#allocation3 + $0x24] sm:$0x1]  ;;  %v2174_v7 = vmax.f32 %v5213_v2, %v2142_v29  ;;  %v2175_v11 = vmax.f32 %v5215_v6, %v2143_v35  ;;  %v2176_v21 = vmax.f32 %v5217_v30, %v2144_v38 }
 0x2f6   :  { %v2148_v14 = vld [vmem:[#allocation3 + $0x3c] sm:$0x1]  ;;  %v2149_v15 = vld [vmem:[#allocation3 + $0x54] sm:$0x1]  ;;  %v2150_v19 = vld [vmem:[#allocation3 + $0x6c] sm:$0x1]  ;;  %v2178_v51 = vmax.f32 %v2162_v9, %v2146_v54  ;;  %v2179_v44 = vmax.f32 %v2163_v37, %v2147_v58  ;;  %v2177_v40 = vmax.f32 %v5219_v55, %v2145_v42 }
 0x2f7   :  { %v2151_v23 = vld [vmem:[#allocation3 + $0x84] sm:$0x1]  ;;  %v2180_v5 = vmax.f32 %v2164_v18, %v2148_v14  ;;  %v2152_v56 = vld [vmem:[#allocation3 + $0x9c] sm:$0x1]  ;;  %v2153_v8 = vld [vmem:[#allocation3 + $0xb4] sm:$0x1]  ;;  %v2181_v16 = vmax.f32 %v2165_v1, %v2149_v15  ;;  %v2182_v52 = vmax.f32 %v2166_v31, %v2150_v19 }
 0x2f8   :  { %v2154_v48 = vld [vmem:[#allocation3 + $0xcc] sm:$0x1]  ;;  %v2183_v13 = vmax.f32 %v2167_v32, %v2151_v23  ;;  %v2155_v34 = vld [vmem:[#allocation3 + $0xe4] sm:$0x1]  ;;  %v2156_v47 = vld [vmem:[#allocation3 + $0xfc] sm:$0x1]  ;;  %v2184_v20 = vmax.f32 %v2168_v4, %v2152_v56  ;;  %v2185_v24 = vmax.f32 %v2169_v46, %v2153_v8 }
 0x2f9   :  { %v2157_v63 = vld [vmem:[#allocation3 + $0x114] sm:$0x1]  ;;  %v2186_v33 = vmax.f32 %v2170_v43, %v2154_v48  ;;  %2486 = vst.msk [vmem:[%s5464_s4 + $0x16] sm:$0x1] %vm1713_vm2, %v2178_v51  ;;  %2487 = vst.msk [vmem:[%s5464_s4 + $0x26] sm:$0x1] %vm1713_vm2, %v2179_v44  ;;  %v2187_v45 = vmax.f32 %v2171_v50, %v2155_v34  ;;  %v2188_v49 = vmax.f32 %v2172_v62, %v2156_v47 }
 0x2fa   :  { %2488 = vst.msk [vmem:[%s5464_s4 + $0x36] sm:$0x1] %vm1713_vm2, %v2180_v5  ;;  %v2158_v12 = vld [vmem:[#allocation3 + $0x12c] sm:$0x1]  ;;  %v2159_v25 = vld [vmem:[#allocation3 + $0x144] sm:$0x1]  ;;  %v2189_v53 = vmax.f32 %v2173_v3, %v2157_v63 }
 0x2fb   :  { %v2160_v41 = vld [vmem:[#allocation3 + $0x15c] sm:$0x1]  ;;  %2489 = vst.msk [vmem:[%s5464_s4 + $0x46] sm:$0x1] %vm1713_vm2, %v2181_v16  ;;  %2490 = vst.msk [vmem:[%s5464_s4 + $0x56] sm:$0x1] %vm1713_vm2, %v2182_v52  ;;  %v2190_v61 = vmax.f32 %v2174_v7, %v2158_v12  ;;  %v2191_v2 = vmax.f32 %v2175_v11, %v2159_v25 }
 0x2fc   :  { %2491 = vst.msk [vmem:[%s5464_s4 + $0x66] sm:$0x1] %vm1713_vm2, %v2183_v13  ;;  %v2161_v57 = vld [vmem:[#allocation3 + $0x174] sm:$0x1]  ;;  %v2192_v6 = vmax.f32 %v2176_v21, %v2160_v41  ;;  %2492 = vst.msk [vmem:[%s5464_s4 + $0x76] sm:$0x1] %vm1713_vm2, %v2184_v20 }
 0x2fd   :  { %2493 = vst.msk [vmem:[%s5464_s4 + $0x86] sm:$0x1] %vm1713_vm2, %v2185_v24  ;;  %2494 = vst.msk [vmem:[%s5464_s4 + $0xb6] sm:$0x1] %vm1713_vm2, %v2186_v33  ;;  %v2193_v10 = vmax.f32 %v2177_v40, %v2161_v57  ;;  %v2210_v39 = vld [vmem:[#allocation3 + $0xc] sm:$0x1] }
 0x2fe   :  { %2495 = vst.msk [vmem:[%s5464_s4 + $0xc6] sm:$0x1] %vm1713_vm2, %v2187_v45  ;;  %2496 = vst.msk [vmem:[%s5464_s4 + $0xd6] sm:$0x1] %vm1713_vm2, %v2188_v49  ;;  %v2211_v26 = vld [vmem:[#allocation3 + $0x24] sm:$0x1] }
 0x2ff   :  { %2497 = vst.msk [vmem:[%s5464_s4 + $0xe6] sm:$0x1] %vm1713_vm2, %v2189_v53  ;;  %2498 = vst.msk [vmem:[%s5464_s4 + $0xf6] sm:$0x1] %vm1713_vm2, %v2190_v61  ;;  %v2212_v30 = vld [vmem:[#allocation3 + $0x3c] sm:$0x1] }
 0x300   :  { %2499 = vst.msk [vmem:[%s5464_s4 + $0x106] sm:$0x1] %vm1713_vm2, %v2191_v2  ;;  %2500 = vst.msk [vmem:[%s5464_s4 + $0x116] sm:$0x1] %vm1713_vm2, %v2192_v6  ;;  %v2213_v36 = vld [vmem:[#allocation3 + $0x54] sm:$0x1] }
 0x301   :  { %2501 = vst.msk [vmem:[%s5464_s4 + $0x126] sm:$0x1] %vm1713_vm2, %v2193_v10  ;;  %v2214_v17 = vld [vmem:[#allocation3 + $0x6c] sm:$0x1]  ;;  %v2215_v60 = vld [vmem:[#allocation3 + $0x84] sm:$0x1] }
 0x302   :  { %v2216_v55 = vld [vmem:[#allocation3 + $0x9c] sm:$0x1]  ;;  %v2217_v0 = vld [vmem:[#allocation3 + $0xb4] sm:$0x1]  ;;  %v2218_v28 = vld [vmem:[#allocation3 + $0xcc] sm:$0x1] }
 0x303   :  { %v5292_v59 = vld [vmem:[#allocation3 + $0xe4] sm:$0x1]  ;;  %v2226_v9 = vld [vmem:[#allocation3 + $0xd] sm:$0x1]  ;;  %v5294_v37 = vld [vmem:[#allocation3 + $0xfc] sm:$0x1] }
 0x304   :  { %v5296_v18 = vld [vmem:[#allocation3 + $0x114] sm:$0x1]  ;;  %v5298_v22 = vld [vmem:[#allocation3 + $0x12c] sm:$0x1]  ;;  %v5300_v27 = vld [vmem:[#allocation3 + $0x144] sm:$0x1]  ;;  %v2258_v54 = vmax.f32 %v2210_v39, %v2226_v9 }
 0x305   :  { %v2227_v29 = vld [vmem:[#allocation3 + $0x25] sm:$0x1]  ;;  %v2228_v1 = vld [vmem:[#allocation3 + $0x3d] sm:$0x1]  ;;  %v2229_v31 = vld [vmem:[#allocation3 + $0x55] sm:$0x1] }
 0x306   :  { %v5302_v32 = vld [vmem:[#allocation3 + $0x15c] sm:$0x1]  ;;  %v2230_v35 = vld [vmem:[#allocation3 + $0x6d] sm:$0x1]  ;;  %v2231_v38 = vld [vmem:[#allocation3 + $0x85] sm:$0x1]  ;;  %v2259_v58 = vmax.f32 %v2211_v26, %v2227_v29  ;;  %v2260_v14 = vmax.f32 %v2212_v30, %v2228_v1  ;;  %v2261_v11 = vmax.f32 %v2213_v36, %v2229_v31 }
 0x307   :  { %v2232_v42 = vld [vmem:[#allocation3 + $0x9d] sm:$0x1]  ;;  %v5304_v4 = vld [vmem:[#allocation3 + $0x174] sm:$0x1]  ;;  %v2233_v46 = vld [vmem:[#allocation3 + $0xb5] sm:$0x1]  ;;  %v2262_v15 = vmax.f32 %v2214_v17, %v2230_v35  ;;  %v2263_v19 = vmax.f32 %v2215_v60, %v2231_v38 }
 0x308   :  { %v2234_v43 = vld [vmem:[#allocation3 + $0xcd] sm:$0x1]  ;;  %v2235_v50 = vld [vmem:[#allocation3 + $0xe5] sm:$0x1]  ;;  %v2236_v62 = vld [vmem:[#allocation3 + $0xfd] sm:$0x1]  ;;  %v2264_v44 = vmax.f32 %v2216_v55, %v2232_v42  ;;  %v2265_v5 = vmax.f32 %v2217_v0, %v2233_v46 }
 0x309   :  { %v2237_v3 = vld [vmem:[#allocation3 + $0x115] sm:$0x1]  ;;  %v2238_v7 = vld [vmem:[#allocation3 + $0x12d] sm:$0x1]  ;;  %v2239_v23 = vld [vmem:[#allocation3 + $0x145] sm:$0x1]  ;;  %v2266_v56 = vmax.f32 %v2218_v28, %v2234_v43  ;;  %v2267_v8 = vmax.f32 %v5292_v59, %v2235_v50  ;;  %v2268_v52 = vmax.f32 %v5294_v37, %v2236_v62 }
 0x30a   :  { %v2240_v21 = vld [vmem:[#allocation3 + $0x15d] sm:$0x1]  ;;  %v2241_v51 = vld [vmem:[#allocation3 + $0x175] sm:$0x1]  ;;  %v2242_v48 = vld [vmem:[#allocation3 + $0xe] sm:$0x1]  ;;  %v2269_v13 = vmax.f32 %v5296_v18, %v2237_v3  ;;  %v2270_v34 = vmax.f32 %v5298_v22, %v2238_v7  ;;  %v2271_v47 = vmax.f32 %v5300_v27, %v2239_v23 }
 0x30b   :  { %v2243_v40 = vld [vmem:[#allocation3 + $0x26] sm:$0x1]  ;;  %v2244_v16 = vld [vmem:[#allocation3 + $0x3e] sm:$0x1]  ;;  %v2245_v63 = vld [vmem:[#allocation3 + $0x56] sm:$0x1]  ;;  %v2272_v33 = vmax.f32 %v5302_v32, %v2240_v21  ;;  %v2274_v12 = vmax.f32 %v2258_v54, %v2242_v48  ;;  %v2273_v57 = vmax.f32 %v5304_v4, %v2241_v51 }
 0x30c   :  { %v2246_v20 = vld [vmem:[#allocation3 + $0x6e] sm:$0x1]  ;;  %v2247_v24 = vld [vmem:[#allocation3 + $0x86] sm:$0x1]  ;;  %v2275_v25 = vmax.f32 %v2259_v58, %v2243_v40  ;;  %v2276_v41 = vmax.f32 %v2260_v14, %v2244_v16  ;;  %v2248_v45 = vld [vmem:[#allocation3 + $0x9e] sm:$0x1]  ;;  %v2277_v61 = vmax.f32 %v2261_v11, %v2245_v63 }
 0x30d   :  { %v2249_v49 = vld [vmem:[#allocation3 + $0xb6] sm:$0x1]  ;;  %v2250_v53 = vld [vmem:[#allocation3 + $0xce] sm:$0x1]  ;;  %v2278_v2 = vmax.f32 %v2262_v15, %v2246_v20  ;;  %v2279_v6 = vmax.f32 %v2263_v19, %v2247_v24  ;;  %v2251_v10 = vld [vmem:[#allocation3 + $0xe6] sm:$0x1]  ;;  %v2280_v30 = vmax.f32 %v2264_v44, %v2248_v45 }
 0x30e   :  { %v2252_v39 = vld [vmem:[#allocation3 + $0xfe] sm:$0x1]  ;;  %v2253_v26 = vld [vmem:[#allocation3 + $0x116] sm:$0x1]  ;;  %v2281_v36 = vmax.f32 %v2265_v5, %v2249_v49  ;;  %v2282_v17 = vmax.f32 %v2266_v56, %v2250_v53  ;;  %2502 = vst.msk [vmem:[%s5464_s4 + $0x17] sm:$0x1] %vm1713_vm2, %v2274_v12  ;;  %v2283_v28 = vmax.f32 %v2267_v8, %v2251_v10 }
 0x30f   :  { %2503 = vst.msk [vmem:[%s5464_s4 + $0x27] sm:$0x1] %vm1713_vm2, %v2275_v25  ;;  %2504 = vst.msk [vmem:[%s5464_s4 + $0x37] sm:$0x1] %vm1713_vm2, %v2276_v41  ;;  %v2254_v60 = vld [vmem:[#allocation3 + $0x12e] sm:$0x1]  ;;  %v2284_v59 = vmax.f32 %v2268_v52, %v2252_v39  ;;  %v2285_v9 = vmax.f32 %v2269_v13, %v2253_v26 }
 0x310   :  { %v2255_v55 = vld [vmem:[#allocation3 + $0x146] sm:$0x1]  ;;  %v2256_v0 = vld [vmem:[#allocation3 + $0x15e] sm:$0x1]  ;;  %2505 = vst.msk [vmem:[%s5464_s4 + $0x47] sm:$0x1] %vm1713_vm2, %v2277_v61  ;;  %v2286_v18 = vmax.f32 %v2270_v34, %v2254_v60 }
 0x311   :  { %2506 = vst.msk [vmem:[%s5464_s4 + $0x57] sm:$0x1] %vm1713_vm2, %v2278_v2  ;;  %2507 = vst.msk [vmem:[%s5464_s4 + $0x67] sm:$0x1] %vm1713_vm2, %v2279_v6  ;;  %v2257_v37 = vld [vmem:[#allocation3 + $0x176] sm:$0x1]  ;;  %v2287_v22 = vmax.f32 %v2271_v47, %v2255_v55  ;;  %v2288_v27 = vmax.f32 %v2272_v33, %v2256_v0 }
 0x312   :  { %2508 = vst.msk [vmem:[%s5464_s4 + $0x77] sm:$0x1] %vm1713_vm2, %v2280_v30  ;;  %2509 = vst.msk [vmem:[%s5464_s4 + $0x87] sm:$0x1] %vm1713_vm2, %v2281_v36  ;;  %v2289_v29 = vmax.f32 %v2273_v57, %v2257_v37  ;;  %v2306_v1 = vld [vmem:[#allocation3 + $0xe] sm:$0x1] }
 0x313   :  { %2510 = vst.msk [vmem:[%s5464_s4 + $0xb7] sm:$0x1] %vm1713_vm2, %v2282_v17  ;;  %2511 = vst.msk [vmem:[%s5464_s4 + $0xc7] sm:$0x1] %vm1713_vm2, %v2283_v28  ;;  %v2307_v31 = vld [vmem:[#allocation3 + $0x26] sm:$0x1] }
 0x314   :  { %2512 = vst.msk [vmem:[%s5464_s4 + $0xd7] sm:$0x1] %vm1713_vm2, %v2284_v59  ;;  %2513 = vst.msk [vmem:[%s5464_s4 + $0xe7] sm:$0x1] %vm1713_vm2, %v2285_v9  ;;  %v2308_v32 = vld [vmem:[#allocation3 + $0x3e] sm:$0x1] }
 0x315   :  { %2514 = vst.msk [vmem:[%s5464_s4 + $0xf7] sm:$0x1] %vm1713_vm2, %v2286_v18  ;;  %2515 = vst.msk [vmem:[%s5464_s4 + $0x107] sm:$0x1] %vm1713_vm2, %v2287_v22  ;;  %v2309_v35 = vld [vmem:[#allocation3 + $0x56] sm:$0x1] }
 0x316   :  { %2516 = vst.msk [vmem:[%s5464_s4 + $0x117] sm:$0x1] %vm1713_vm2, %v2288_v27  ;;  %2517 = vst.msk [vmem:[%s5464_s4 + $0x127] sm:$0x1] %vm1713_vm2, %v2289_v29  ;;  %v2310_v38 = vld [vmem:[#allocation3 + $0x6e] sm:$0x1] }
 0x317   :  { %v2311_v42 = vld [vmem:[#allocation3 + $0x86] sm:$0x1]  ;;  %v2312_v4 = vld [vmem:[#allocation3 + $0x9e] sm:$0x1]  ;;  %v2313_v46 = vld [vmem:[#allocation3 + $0xb6] sm:$0x1] }
 0x318   :  { %v2314_v43 = vld [vmem:[#allocation3 + $0xce] sm:$0x1]  ;;  %v5377_v50 = vld [vmem:[#allocation3 + $0xe6] sm:$0x1]  ;;  %v2322_v54 = vld [vmem:[#allocation3 + $0xf] sm:$0x1] }
 0x319   :  { %v5379_v58 = vld [vmem:[#allocation3 + $0xfe] sm:$0x1]  ;;  %v5381_v14 = vld [vmem:[#allocation3 + $0x116] sm:$0x1]  ;;  %v5383_v62 = vld [vmem:[#allocation3 + $0x12e] sm:$0x1]  ;;  %v2354_v48 = vmax.f32 %v2306_v1, %v2322_v54 }
 0x31a   :  { %v5385_v3 = vld [vmem:[#allocation3 + $0x146] sm:$0x1]  ;;  %v2323_v7 = vld [vmem:[#allocation3 + $0x27] sm:$0x1]  ;;  %v2324_v11 = vld [vmem:[#allocation3 + $0x3f] sm:$0x1] }
 0x31b   :  { %v2325_v15 = vld [vmem:[#allocation3 + $0x57] sm:$0x1]  ;;  %v5387_v19 = vld [vmem:[#allocation3 + $0x15e] sm:$0x1]  ;;  %v2326_v23 = vld [vmem:[#allocation3 + $0x6f] sm:$0x1]  ;;  %v2355_v40 = vmax.f32 %v2307_v31, %v2323_v7  ;;  %v2356_v16 = vmax.f32 %v2308_v32, %v2324_v11 }
 0x31c   :  { %v2327_v21 = vld [vmem:[#allocation3 + $0x87] sm:$0x1]  ;;  %v2328_v51 = vld [vmem:[#allocation3 + $0x9f] sm:$0x1]  ;;  %v5389_v44 = vld [vmem:[#allocation3 + $0x176] sm:$0x1]  ;;  %v2357_v47 = vmax.f32 %v2309_v35, %v2325_v15  ;;  %v2358_v63 = vmax.f32 %v2310_v38, %v2326_v23 }
 0x31d   :  { %v2329_v5 = vld [vmem:[#allocation3 + $0xb7] sm:$0x1]  ;;  %v2330_v56 = vld [vmem:[#allocation3 + $0xcf] sm:$0x1]  ;;  %v2331_v8 = vld [vmem:[#allocation3 + $0xe7] sm:$0x1]  ;;  %v2359_v20 = vmax.f32 %v2311_v42, %v2327_v21  ;;  %v2360_v25 = vmax.f32 %v2312_v4, %v2328_v51 }
 0x31e   :  { %v2332_v52 = vld [vmem:[#allocation3 + $0xff] sm:$0x1]  ;;  %v2333_v13 = vld [vmem:[#allocation3 + $0x117] sm:$0x1]  ;;  %v2334_v34 = vld [vmem:[#allocation3 + $0x12f] sm:$0x1]  ;;  %v2361_v41 = vmax.f32 %v2313_v46, %v2329_v5  ;;  %v2362_v45 = vmax.f32 %v2314_v43, %v2330_v56  ;;  %v2363_v49 = vmax.f32 %v5377_v50, %v2331_v8 }
 0x31f   :  { %v2335_v24 = vld [vmem:[#allocation3 + $0x147] sm:$0x1]  ;;  %v2336_v33 = vld [vmem:[#allocation3 + $0x15f] sm:$0x1]  ;;  %v2337_v12 = vld [vmem:[#allocation3 + $0x177] sm:$0x1]  ;;  %v2364_v2 = vmax.f32 %v5379_v58, %v2332_v52  ;;  %v2365_v6 = vmax.f32 %v5381_v14, %v2333_v13  ;;  %v2366_v10 = vmax.f32 %v5383_v62, %v2334_v34 }
 0x320   :  { %v2338_v53 = vld [vmem:[#allocation3 + $0x10] sm:$0x1]  ;;  %v2339_v57 = vld [vmem:[#allocation3 + $0x28] sm:$0x1]  ;;  %v2340_v61 = vld [vmem:[#allocation3 + $0x40] sm:$0x1]  ;;  %v2367_v39 = vmax.f32 %v5385_v3, %v2335_v24  ;;  %v2368_v17 = vmax.f32 %v5387_v19, %v2336_v33  ;;  %v2369_v37 = vmax.f32 %v5389_v44, %v2337_v12 }
 0x321   :  { %v2341_v26 = vld [vmem:[#allocation3 + $0x58] sm:$0x1]  ;;  %v2342_v30 = vld [vmem:[#allocation3 + $0x70] sm:$0x1]  ;;  %v2343_v36 = vld [vmem:[#allocation3 + $0x88] sm:$0x1]  ;;  %v2370_v60 = vmax.f32 %v2354_v48, %v2338_v53  ;;  %v2371_v55 = vmax.f32 %v2355_v40, %v2339_v57  ;;  %v2372_v0 = vmax.f32 %v2356_v16, %v2340_v61 }
 0x322   :  { %v2344_v28 = vld [vmem:[#allocation3 + $0xa0] sm:$0x1]  ;;  %v2345_v59 = vld [vmem:[#allocation3 + $0xb8] sm:$0x1]  ;;  %v2346_v9 = vld [vmem:[#allocation3 + $0xd0] sm:$0x1]  ;;  %v2373_v18 = vmax.f32 %v2357_v47, %v2341_v26  ;;  %v2374_v22 = vmax.f32 %v2358_v63, %v2342_v30  ;;  %v2375_v27 = vmax.f32 %v2359_v20, %v2343_v36 }
 0x323   :  { %v2347_v29 = vld [vmem:[#allocation3 + $0xe8] sm:$0x1]  ;;  %v2348_v1 = vld [vmem:[#allocation3 + $0x100] sm:$0x1]  ;;  %v2349_v31 = vld [vmem:[#allocation3 + $0x118] sm:$0x1]  ;;  %v2376_v32 = vmax.f32 %v2360_v25, %v2344_v28  ;;  %v2377_v35 = vmax.f32 %v2361_v41, %v2345_v59  ;;  %v2378_v38 = vmax.f32 %v2362_v45, %v2346_v9 }
 0x324   :  { %2518 = vst.msk [vmem:[%s5464_s4 + $0x18] sm:$0x1] %vm1713_vm2, %v2370_v60  ;;  %2519 = vst.msk [vmem:[%s5464_s4 + $0x28] sm:$0x1] %vm1713_vm2, %v2371_v55  ;;  %v2350_v42 = vld [vmem:[#allocation3 + $0x130] sm:$0x1]  ;;  %v2379_v43 = vmax.f32 %v2363_v49, %v2347_v29  ;;  %v2380_v50 = vmax.f32 %v2364_v2, %v2348_v1  ;;  %v2381_v54 = vmax.f32 %v2365_v6, %v2349_v31 }
 0x325   :  { %2520 = vst.msk [vmem:[%s5464_s4 + $0x38] sm:$0x1] %vm1713_vm2, %v2372_v0  ;;  %v2351_v4 = vld [vmem:[#allocation3 + $0x148] sm:$0x1]  ;;  %v2352_v46 = vld [vmem:[#allocation3 + $0x160] sm:$0x1]  ;;  %v2382_v14 = vmax.f32 %v2366_v10, %v2350_v42 }
 0x326   :  { %2521 = vst.msk [vmem:[%s5464_s4 + $0x48] sm:$0x1] %vm1713_vm2, %v2373_v18  ;;  %2522 = vst.msk [vmem:[%s5464_s4 + $0x58] sm:$0x1] %vm1713_vm2, %v2374_v22  ;;  %v2353_v58 = vld [vmem:[#allocation3 + $0x178] sm:$0x1]  ;;  %v2383_v62 = vmax.f32 %v2367_v39, %v2351_v4  ;;  %v2384_v3 = vmax.f32 %v2368_v17, %v2352_v46 }
 0x327   :  { %2523 = vst.msk [vmem:[%s5464_s4 + $0x68] sm:$0x1] %vm1713_vm2, %v2375_v27  ;;  %2524 = vst.msk [vmem:[%s5464_s4 + $0x78] sm:$0x1] %vm1713_vm2, %v2376_v32  ;;  %v2385_v7 = vmax.f32 %v2369_v37, %v2353_v58 }
 0x328   :  { %2525 = vst.msk [vmem:[%s5464_s4 + $0x88] sm:$0x1] %vm1713_vm2, %v2377_v35  ;;  %2526 = vst.msk [vmem:[%s5464_s4 + $0xb8] sm:$0x1] %vm1713_vm2, %v2378_v38 }
 0x329   :  { %2527 = vst.msk [vmem:[%s5464_s4 + $0xc8] sm:$0x1] %vm1713_vm2, %v2379_v43  ;;  %2528 = vst.msk [vmem:[%s5464_s4 + $0xd8] sm:$0x1] %vm1713_vm2, %v2380_v50 }
 0x32a   :  { %2529 = vst.msk [vmem:[%s5464_s4 + $0xe8] sm:$0x1] %vm1713_vm2, %v2381_v54  ;;  %2530 = vst.msk [vmem:[%s5464_s4 + $0xf8] sm:$0x1] %vm1713_vm2, %v2382_v14 }
 0x32b   :  { %2531 = vst.msk [vmem:[%s5464_s4 + $0x108] sm:$0x1] %vm1713_vm2, %v2383_v62  ;;  %2532 = vst.msk [vmem:[%s5464_s4 + $0x118] sm:$0x1] %vm1713_vm2, %v2384_v3 }
 0x32c   :  { %2533 = vst.msk [vmem:[%s5464_s4 + $0x128] sm:$0x1] %vm1713_vm2, %v2385_v7 }

</bundles_post_ra>
